<compile_context>
chip_gen: v5e
topology: v5e:2x2
jax: 0.10.0
libtpu: 0.0.40
codegen_flags: <defaults>
</compile_context>

<pallas_src>
import jax
import jax.numpy as jnp
from jax import lax
from jax.experimental import pallas as pl
from jax.experimental.pallas import tpu as pltpu

IMG_SIZE = 224                      # hardcoded in wrapper2D for weight='base'
PATCH = 4                           # patch_size
EMBED_DIM = 128                     # embed_dim for 'base'
LN_EPS = 1e-5                       # nn.LayerNorm default
HP = IMG_SIZE // PATCH              # 56 patches per side
PATCHES_PER_IMG = HP * HP           # 3136
TILE_M = PATCHES_PER_IMG // 2       # 1568 rows per grid step (divides B*3136)


def _patch_embed_ln_kernel(x0, x1, x2, x3, w_ref, b_ref, g_ref, beta_ref, o_ref):
    # x0..x3: (TILE_M, 4*C) bf16 slabs (one per kh), feature order (kw, c)
    # w_ref : (4, 4*C, 128) bf16      b/g/beta: (1, 128) f32
    # o_ref : (TILE_M, 128)
    acc = jnp.dot(x0[...], w_ref[0], preferred_element_type=jnp.float32)
    acc = acc + jnp.dot(x1[...], w_ref[1], preferred_element_type=jnp.float32)
    acc = acc + jnp.dot(x2[...], w_ref[2], preferred_element_type=jnp.float32)
    acc = acc + jnp.dot(x3[...], w_ref[3], preferred_element_type=jnp.float32)
    acc = acc + b_ref[...]
    # One-pass LayerNorm over the embedding dim (f32 math).
    mean = jnp.mean(acc, axis=-1, keepdims=True)
    mean_sq = jnp.mean(acc * acc, axis=-1, keepdims=True)
    var = mean_sq - mean * mean
    xn = (acc - mean) * lax.rsqrt(var + LN_EPS)
    o_ref[...] = (xn * g_ref[...] + beta_ref[...]).astype(o_ref.dtype)


def patch_embed_layernorm(x_slabs, w_stacked, b, gamma, beta, out_dtype):
    """x_slabs: 4 x (M, 4C) bf16, w_stacked: (4, 4C, 128) bf16 -> (M, 128)."""
    M, kwc = x_slabs[0].shape
    N = w_stacked.shape[-1]
    assert M % TILE_M == 0, (M, TILE_M)     # M = B*3136, always divisible by 1568
    slab_spec = pl.BlockSpec((TILE_M, kwc), lambda i: (i, 0))
    vec_spec = pl.BlockSpec((1, N), lambda i: (0, 0))
    return pl.pallas_call(
        _patch_embed_ln_kernel,
        out_shape=jax.ShapeDtypeStruct((M, N), out_dtype),
        grid_spec=pltpu.PrefetchScalarGridSpec(
            num_scalar_prefetch=0,
            grid=(M // TILE_M,),
            in_specs=[slab_spec, slab_spec, slab_spec, slab_spec,
                      pl.BlockSpec((PATCH, kwc, N), lambda i: (0, 0, 0)),
                      vec_spec, vec_spec, vec_spec],
            out_specs=pl.BlockSpec((TILE_M, N), lambda i: (i, 0)),
        ),
        compiler_params=pltpu.CompilerParams(
            dimension_semantics=("parallel",),
        ),
    )(*x_slabs, w_stacked, b, gamma, beta)


def prepare_params(raw):
    """One-time conversion from PyTorch layout to the kernel layout."""
    conv_w = raw["conv_w"]                              # (128, C, 4, 4)
    c_in = conv_w.shape[1]
    # (O, C, kh, kw) -> (kh, kw, C, O) -> (kh, kw*C, O); matches slab feature
    # order (kw, c) for each kh.
    w_stacked = jnp.transpose(conv_w, (2, 3, 1, 0)).reshape(
        PATCH, PATCH * c_in, EMBED_DIM)
    return {
        "w_stacked": w_stacked.astype(jnp.bfloat16),
        "conv_b": raw["conv_b"].reshape(1, EMBED_DIM).astype(jnp.float32),
        "ln_g": raw["ln_g"].reshape(1, EMBED_DIM).astype(jnp.float32),
        "ln_b": raw["ln_b"].reshape(1, EMBED_DIM).astype(jnp.float32),
    }


def wrapper2d_forward(x, params, out_dtype=jnp.float32):
    """wrapper2D.forward with output_raw=True: returns (B, (224/4)^2, 128).

    out_dtype=jnp.bfloat16 halves the dominant (output) HBM stream; default
    stays float32 to match the PyTorch module's output dtype.
    """
    B, C, H, W = x.shape
    x = jnp.transpose(x, (0, 2, 3, 1))                       # NCHW -> NHWC
    if (H, W) != (IMG_SIZE, IMG_SIZE):
        # TODO(synk): torchvision Resize applies antialiased bilinear when
        # downscaling; jax.image bilinear (no antialias) is the closest in-JAX
        # equivalent.  Run it in bf16 so the (B,224,224,C) intermediate is half-size.
        x = jax.image.resize(x.astype(jnp.bfloat16),
                             (B, IMG_SIZE, IMG_SIZE, C), method="bilinear")
    x = x.astype(jnp.bfloat16)
    # kh-decomposed im2col: 4 contiguous strided views, no 6-D transpose and no
    # (M, 16*C) patches buffer.  Slab kh holds x[b, 4*hp+kh, 4*wp+kw, c] with
    # row = (b, hp, wp) and feature order (kw, c); (224, C) is contiguous so the
    # reshape to (M, 4*C) is free and each pallas block DMA is one contiguous chunk.
    M = B * PATCHES_PER_IMG
    x_slabs = [x[:, kh::PATCH, :, :].reshape(M, PATCH * C) for kh in range(PATCH)]
    out = patch_embed_layernorm(
        x_slabs, params["w_stacked"], params["conv_b"],
        params["ln_g"], params["ln_b"], out_dtype)
    return out.reshape(B, PATCHES_PER_IMG, EMBED_DIM)


def init_params(key, in_channels):
    kw, kb = jax.random.split(key, 2)
    fan_in = in_channels * PATCH * PATCH
    return {
        # nn.Conv2d(Cin, 128, kernel=4, stride=4) weights, deterministic init.
        "conv_w": jax.random.normal(
            kw, (EMBED_DIM, in_channels, PATCH, PATCH), jnp.float32)
        * (1.0 / fan_in) ** 0.5,
        "conv_b": jax.random.normal(kb, (EMBED_DIM,), jnp.float32) * 0.01,
        # nn.LayerNorm(128) default init.
        "ln_g": jnp.ones((EMBED_DIM,), jnp.float32),
        "ln_b": jnp.zeros((EMBED_DIM,), jnp.float32),
    }


if __name__ == "__main__":
    key = jax.random.PRNGKey(0)
    kx, kp = jax.random.split(key)

    # Small input consistent with input_shape=(B, C, H, W); embedder resizes to 224.
    B, C, H, W = 2, 4, 16, 16
    x = jax.random.normal(kx, (B, C, H, W), jnp.float32)
    params = prepare_params(init_params(kp, C))

    fwd = jax.jit(wrapper2d_forward)
    out = fwd(x, params)
    jax.block_until_ready(out)

    assert out.shape == (B, PATCHES_PER_IMG, EMBED_DIM), out.shape
    assert out.dtype == jnp.float32
    assert bool(jnp.all(jnp.isfinite(out)))
    print("KERNEL_OK")
</pallas_src>

<mosaic_0001>
module attributes {stable_mosaic.version = 11 : i64} {
  func.func @_patch_embed_ln_kernel(%arg0: i32, %arg1: memref<1568x16xbf16, #tpu.memory_space<vmem>>, %arg2: memref<1568x16xbf16, #tpu.memory_space<vmem>>, %arg3: memref<1568x16xbf16, #tpu.memory_space<vmem>>, %arg4: memref<1568x16xbf16, #tpu.memory_space<vmem>>, %arg5: memref<4x16x128xbf16, #tpu.memory_space<vmem>>, %arg6: memref<1x128xf32, #tpu.memory_space<vmem>>, %arg7: memref<1x128xf32, #tpu.memory_space<vmem>>, %arg8: memref<1x128xf32, #tpu.memory_space<vmem>>, %arg9: memref<1568x128xf32, #tpu.memory_space<vmem>>) attributes {dimension_semantics = [#tpu.dimension_semantics<parallel>], iteration_bounds = array<i64: 4>, scalar_prefetch = 0 : i64, scratch_operands = 0 : i64, tpu.core_type = #tpu.core_type<tc>, window_params = [{transform_indices = @transform_0, window_bounds = array<i64: 1568, 16>}, {transform_indices = @transform_1, window_bounds = array<i64: 1568, 16>}, {transform_indices = @transform_2, window_bounds = array<i64: 1568, 16>}, {transform_indices = @transform_3, window_bounds = array<i64: 1568, 16>}, {pipeline_mode = #tpu.pipeline_mode<synchronous>, transform_indices = @transform_4, window_bounds = array<i64: 4, 16, 128>}, {pipeline_mode = #tpu.pipeline_mode<synchronous>, transform_indices = @transform_5, window_bounds = array<i64: 1, 128>}, {pipeline_mode = #tpu.pipeline_mode<synchronous>, transform_indices = @transform_6, window_bounds = array<i64: 1, 128>}, {pipeline_mode = #tpu.pipeline_mode<synchronous>, transform_indices = @transform_7, window_bounds = array<i64: 1, 128>}, {transform_indices = @transform_8, window_bounds = array<i64: 1568, 128>}]} {
    %c0 = arith.constant 0 : index
    %c0_0 = arith.constant 0 : index
    %0 = vector.load %arg1[%c0, %c0_0] : memref<1568x16xbf16, #tpu.memory_space<vmem>>, vector<1568x16xbf16>
    %c0_1 = arith.constant 0 : index
    %c0_2 = arith.constant 0 : index
    %c0_3 = arith.constant 0 : index
    %1 = vector.load %arg5[%c0_1, %c0_2, %c0_3] : memref<4x16x128xbf16, #tpu.memory_space<vmem>>, vector<1x16x128xbf16>
    %2 = vector.shape_cast %1 : vector<1x16x128xbf16> to vector<16x128xbf16>
    %cst = arith.constant dense<0.000000e+00> : vector<1568x128xf32>
    %3 = tpu.matmul %0, %2, %cst {dimension_numbers = #tpu.dot_dimension_numbers<[1], [0], [0], [1], [0, 0, 1, 1], [], []>} : vector<1568x16xbf16>, vector<16x128xbf16>, vector<1568x128xf32> -> vector<1568x128xf32>
    %c0_4 = arith.constant 0 : index
    %c0_5 = arith.constant 0 : index
    %4 = vector.load %arg2[%c0_4, %c0_5] : memref<1568x16xbf16, #tpu.memory_space<vmem>>, vector<1568x16xbf16>
    %c1 = arith.constant 1 : index
    %c0_6 = arith.constant 0 : index
    %c0_7 = arith.constant 0 : index
    %5 = vector.load %arg5[%c1, %c0_6, %c0_7] : memref<4x16x128xbf16, #tpu.memory_space<vmem>>, vector<1x16x128xbf16>
    %6 = vector.shape_cast %5 : vector<1x16x128xbf16> to vector<16x128xbf16>
    %cst_8 = arith.constant dense<0.000000e+00> : vector<1568x128xf32>
    %7 = tpu.matmul %4, %6, %cst_8 {dimension_numbers = #tpu.dot_dimension_numbers<[1], [0], [0], [1], [0, 0, 1, 1], [], []>} : vector<1568x16xbf16>, vector<16x128xbf16>, vector<1568x128xf32> -> vector<1568x128xf32>
    %8 = arith.addf %3, %7 : vector<1568x128xf32>
    %c0_9 = arith.constant 0 : index
    %c0_10 = arith.constant 0 : index
    %9 = vector.load %arg3[%c0_9, %c0_10] : memref<1568x16xbf16, #tpu.memory_space<vmem>>, vector<1568x16xbf16>
    %c2 = arith.constant 2 : index
    %c0_11 = arith.constant 0 : index
    %c0_12 = arith.constant 0 : index
    %10 = vector.load %arg5[%c2, %c0_11, %c0_12] : memref<4x16x128xbf16, #tpu.memory_space<vmem>>, vector<1x16x128xbf16>
    %11 = vector.shape_cast %10 : vector<1x16x128xbf16> to vector<16x128xbf16>
    %cst_13 = arith.constant dense<0.000000e+00> : vector<1568x128xf32>
    %12 = tpu.matmul %9, %11, %cst_13 {dimension_numbers = #tpu.dot_dimension_numbers<[1], [0], [0], [1], [0, 0, 1, 1], [], []>} : vector<1568x16xbf16>, vector<16x128xbf16>, vector<1568x128xf32> -> vector<1568x128xf32>
    %13 = arith.addf %8, %12 : vector<1568x128xf32>
    %c0_14 = arith.constant 0 : index
    %c0_15 = arith.constant 0 : index
    %14 = vector.load %arg4[%c0_14, %c0_15] : memref<1568x16xbf16, #tpu.memory_space<vmem>>, vector<1568x16xbf16>
    %c3 = arith.constant 3 : index
    %c0_16 = arith.constant 0 : index
    %c0_17 = arith.constant 0 : index
    %15 = vector.load %arg5[%c3, %c0_16, %c0_17] : memref<4x16x128xbf16, #tpu.memory_space<vmem>>, vector<1x16x128xbf16>
    %16 = vector.shape_cast %15 : vector<1x16x128xbf16> to vector<16x128xbf16>
    %cst_18 = arith.constant dense<0.000000e+00> : vector<1568x128xf32>
    %17 = tpu.matmul %14, %16, %cst_18 {dimension_numbers = #tpu.dot_dimension_numbers<[1], [0], [0], [1], [0, 0, 1, 1], [], []>} : vector<1568x16xbf16>, vector<16x128xbf16>, vector<1568x128xf32> -> vector<1568x128xf32>
    %18 = arith.addf %13, %17 : vector<1568x128xf32>
    %c0_19 = arith.constant 0 : index
    %c0_20 = arith.constant 0 : index
    %19 = vector.load %arg6[%c0_19, %c0_20] : memref<1x128xf32, #tpu.memory_space<vmem>>, vector<1x128xf32>
    %20 = vector.broadcast %19 : vector<1x128xf32> to vector<1568x128xf32>
    %21 = arith.addf %18, %20 : vector<1568x128xf32>
    %cst_21 = arith.constant dense<0.000000e+00> : vector<1568xf32>
    %22 = vector.multi_reduction <add>, %21, %cst_21 [1] : vector<1568x128xf32> to vector<1568xf32>
    %23 = vector.shape_cast %22 : vector<1568xf32> to vector<1568x1xf32>
    %cst_22 = arith.constant 1.280000e+02 : f32
    %24 = vector.broadcast %cst_22 : f32 to vector<1568x1xf32>
    %25 = arith.divf %23, %24 : vector<1568x1xf32>
    %26 = arith.mulf %21, %21 : vector<1568x128xf32>
    %cst_23 = arith.constant dense<0.000000e+00> : vector<1568xf32>
    %27 = vector.multi_reduction <add>, %26, %cst_23 [1] : vector<1568x128xf32> to vector<1568xf32>
    %28 = vector.shape_cast %27 : vector<1568xf32> to vector<1568x1xf32>
    %cst_24 = arith.constant 1.280000e+02 : f32
    %29 = vector.broadcast %cst_24 : f32 to vector<1568x1xf32>
    %30 = arith.divf %28, %29 : vector<1568x1xf32>
    %31 = arith.mulf %25, %25 : vector<1568x1xf32>
    %32 = arith.subf %30, %31 : vector<1568x1xf32>
    %33 = vector.broadcast %25 : vector<1568x1xf32> to vector<1568x128xf32>
    %34 = arith.subf %21, %33 : vector<1568x128xf32>
    %cst_25 = arith.constant 9.99999974E-6 : f32
    %35 = vector.broadcast %cst_25 : f32 to vector<1568x1xf32>
    %36 = arith.addf %32, %35 : vector<1568x1xf32>
    %37 = math.rsqrt %36 : vector<1568x1xf32>
    %38 = vector.broadcast %37 : vector<1568x1xf32> to vector<1568x128xf32>
    %39 = arith.mulf %34, %38 : vector<1568x128xf32>
    %c0_26 = arith.constant 0 : index
    %c0_27 = arith.constant 0 : index
    %40 = vector.load %arg7[%c0_26, %c0_27] : memref<1x128xf32, #tpu.memory_space<vmem>>, vector<1x128xf32>
    %41 = vector.broadcast %40 : vector<1x128xf32> to vector<1568x128xf32>
    %42 = arith.mulf %39, %41 : vector<1568x128xf32>
    %c0_28 = arith.constant 0 : index
    %c0_29 = arith.constant 0 : index
    %43 = vector.load %arg8[%c0_28, %c0_29] : memref<1x128xf32, #tpu.memory_space<vmem>>, vector<1x128xf32>
    %44 = vector.broadcast %43 : vector<1x128xf32> to vector<1568x128xf32>
    %45 = arith.addf %42, %44 : vector<1568x128xf32>
    %c0_30 = arith.constant 0 : index
    %c0_31 = arith.constant 0 : index
    %46 = vector.load %arg9[%c0_30, %c0_31] : memref<1568x128xf32, #tpu.memory_space<vmem>>, vector<1568x128xf32>
    tpu.vector_store %arg9[%c0_30, %c0_31], %45 {strides = array<i32>} : memref<1568x128xf32, #tpu.memory_space<vmem>>, vector<1568x128xf32>,
    return
  }
  func.func @transform_0(%arg0: i32) -> (i32, i32) {
    %c0_i32 = arith.constant 0 : i32
    %c0_i32_0 = arith.constant 0 : i32
    return %arg0, %c0_i32 : i32, i32
  }
  func.func @transform_1(%arg0: i32) -> (i32, i32) {
    %c0_i32 = arith.constant 0 : i32
    %c0_i32_0 = arith.constant 0 : i32
    return %arg0, %c0_i32 : i32, i32
  }
  func.func @transform_2(%arg0: i32) -> (i32, i32) {
    %c0_i32 = arith.constant 0 : i32
    %c0_i32_0 = arith.constant 0 : i32
    return %arg0, %c0_i32 : i32, i32
  }
  func.func @transform_3(%arg0: i32) -> (i32, i32) {
    %c0_i32 = arith.constant 0 : i32
    %c0_i32_0 = arith.constant 0 : i32
    return %arg0, %c0_i32 : i32, i32
  }
  func.func @transform_4(%arg0: i32) -> (i32, i32, i32) {
    %c0_i32 = arith.constant 0 : i32
    %c0_i32_0 = arith.constant 0 : i32
    %c0_i32_1 = arith.constant 0 : i32
    %c0_i32_2 = arith.constant 0 : i32
    return %c0_i32, %c0_i32_0, %c0_i32_1 : i32, i32, i32
  }
  func.func @transform_5(%arg0: i32) -> (i32, i32) {
    %c0_i32 = arith.constant 0 : i32
    %c0_i32_0 = arith.constant 0 : i32
    %c0_i32_1 = arith.constant 0 : i32
    return %c0_i32, %c0_i32_0 : i32, i32
  }
  func.func @transform_6(%arg0: i32) -> (i32, i32) {
    %c0_i32 = arith.constant 0 : i32
    %c0_i32_0 = arith.constant 0 : i32
    %c0_i32_1 = arith.constant 0 : i32
    return %c0_i32, %c0_i32_0 : i32, i32
  }
  func.func @transform_7(%arg0: i32) -> (i32, i32) {
    %c0_i32 = arith.constant 0 : i32
    %c0_i32_0 = arith.constant 0 : i32
    %c0_i32_1 = arith.constant 0 : i32
    return %c0_i32, %c0_i32_0 : i32, i32
  }
  func.func @transform_8(%arg0: i32) -> (i32, i32) {
    %c0_i32 = arith.constant 0 : i32
    %c0_i32_0 = arith.constant 0 : i32
    return %arg0, %c0_i32 : i32, i32
  }
}

</mosaic_0001>

<bundles_post_ra>
// kernel: wrapper2d_forward.1
= control target key start
LH: loop header
LB: loop body
LE: loop exit
PB: predicated region body
PF: predicated region fallthrough
CT: control target
= control target key end

     0   :  { %13 = vsyncpa [#allocation3], 0  ;;  %s20445_s0 = inlined_call_operand.vmem [shape: bf16[6272,16], index: 0, kind: input, shape index: {}]   ;;  %s20446_s1 = inlined_call_operand.vmem [shape: bf16[6272,16], index: 1, kind: input, shape index: {}]   ;;  %s20447_s2 = inlined_call_operand.vmem [shape: bf16[6272,16], index: 2, kind: input, shape index: {}]   ;;  %s20448_s3 = inlined_call_operand.vmem [shape: bf16[6272,16], index: 3, kind: input, shape index: {}]   ;;  %s20449_s4 = inlined_call_operand.vmem [shape: bf16[4,16,128], index: 4, kind: input, shape index: {}]   ;;  %s20450_s5 = inlined_call_operand.vmem [shape: f32[1,128], index: 5, kind: input, shape index: {}]   ;;  %s20451_s6 = inlined_call_operand.vmem [shape: f32[1,128], index: 6, kind: input, shape index: {}]   ;;  %s20452_s7 = inlined_call_operand.vmem [shape: f32[1,128], index: 7, kind: input, shape index: {}]   ;;  %s20453_s8 = inlined_call_operand.hbm [shape: f32[6272,128], index: 8, kind: output, shape index: {}]  }
   0x1   :  { %15 = vsyncpa [#allocation3 + $0x1], 0  ;;  %s14928_s27 = smov 0   ;;  %s14930_s28 = smov 0  }
   0x2   :  { %s14932_s29 = smov 0   ;;  %s14934_s30 = smov 0  }
   0x3 LB: > { %s14949_s9 = sadd.s32 4294967295, %s14878_s30   ;;  %s11947_s10 = sadd.s32 4294967294, %s14878_s30   ;;  %s14878_s30 = sphi %s14934_s30, %s20459_s30   ;;  %s14874_s29 = sphi %s14932_s29, %s20458_s29   ;;  %s14870_s28 = sphi %s14930_s28, %s20457_s28   ;;  %s14866_s27 = sphi %s14928_s27, %s20456_s27  }
   0x4   : > { %s14953_s11 = sadd.s32 1, %s14878_s30   ;;  %s216_s12 = sadd.s32 1, %s14874_s29 }
   0x5   : > { %s213_s13 = ssub.s32 %s14878_s30, %s14953_s11  ;;  %p226_p0 = scmp.ne.s32.totalorder %s14874_s29, %s14870_s28 }
   0x6   : > { %p214_p1 = scmp.eq.s32.totalorder %s213_s13, 0  ;;  %p227_p2 = scmp.eq.s32.totalorder %s14949_s9, 3 }
   0x7   : > { %p232_p3 = scmp.ne.s32.totalorder %s14870_s28, %s14866_s27  ;;  %p233_p4 = scmp.eq.s32.totalorder %s11947_s10, 3 }
   0x8   : > { %s14964_s14 = scalar_select %p214_p1, %s14874_s29, %s216_s12  }
   0x9   : > { %p14966_p5 = por %p227_p2, %p226_p0  ;;  %p14970_p6 = por %p233_p4, %p232_p3 }
   0xa   : > { %p11950_p7 = scmp.ge.s32.totalorder %s14878_s30, 1  ;;  %p299_p8 = scmp.lt.s32.totalorder %s14878_s30, 5 }
   0xc   : > { %p300_p9 = pnand %p11950_p7, %p299_p8 }
   0xd   : > { %s348_s23 = smul.u32 (!%p300_p9), 196, %s14949_s9  ;;  %s345_s12 = sand.u32 (!%p300_p9), 1, %s14870_s28  }
   0xe   : > { %303 = sbr.rel (%p300_p9) target bundleno = 1881 (0x759), region = 52  ;;  %s11834_s21 = scalar_lea.sflag (!%p300_p9), [#allocation3], %s345_s12 }
   0xf   : > { %p349_p10 = scmp.lt.s32.totalorder (!%p300_p9), %s348_s23, 783  ;;  %s15309_s20 = smul.u32 (!%p300_p9), 1568, %s345_s12 }
  0x11   : > { %s15334_s24 = scalar_lea.vmem (!%p300_p9), [#allocation2], %s15309_s20 }
  0x13   : > { %v14137_v0 = vld [vmem:[%s20449_s4 + $0x8] sm:$0xff]  ;;  %v14038_v1 = vld [vmem:[%s20449_s4] sm:$0xff]  ;;  %v14236_v2 = vld [vmem:[%s20449_s4 + $0x10] sm:$0xff]  ;;  %s20461_s23 = smov (!%p349_p10, %s348_s23), 783  ;;  %vm1267_vm0 = vcmask 130048  }
  0x14   : > { %v14335_v3 = vld [vmem:[%s20449_s4 + $0x18] sm:$0xff]  ;;  %1569 = vmatpush.bf16.msra.mxu0 %v14137_v0  ;;  %2858 = vmatpush.bf16.msra.mxu1 %v14038_v1  ;;  %s11951_s26 = sshll.u32 %s20461_s23, 2  ;;  %v15084_v46 = vld [vmem:[%s20450_s5] ss:$0 sm:$0xff] }
  0x15   : > { %4346 = vmatpush.bf16.msra.mxu2 %v14236_v2  ;;  %6030 = vmatpush.bf16.msra.mxu3 %v14335_v3  ;;  %s14992_s13 = scalar_lea.vmem %s20446_s1, %s11951_s26  ;;  %s14997_s19 = scalar_lea.vmem %s20445_s0, %s11951_s26 }
  0x16   : > { %v14039_v4 = vld [vmem:[%s14992_s13] sm:$0xff]  ;;  %s15004_s22 = scalar_lea.vmem %s20447_s2, %s11951_s26  ;;  %s15009_s25 = scalar_lea.vmem %s20448_s3, %s11951_s26  ;;  %v14040_v8 = vld [vmem:[%s14992_s13 + $0x8] sm:$0xff]  ;;  %v14041_v12 = vld [vmem:[%s14992_s13 + $0x10] sm:$0xff] }
  0x17   : > { %v13940_v5 = vld [vmem:[%s14997_s19] sm:$0xff]  ;;  %12353 = vmatmul.msk.bf16.vlgmr.msra.gmra.mxu0 %vm1267_vm0, %v14039_v4  ;;  %v13941_v9 = vld [vmem:[%s14997_s19 + $0x8] sm:$0xff]  ;;  %v13942_v13 = vld [vmem:[%s14997_s19 + $0x10] sm:$0xff] }
  0x18   : > { %v14138_v6 = vld [vmem:[%s15004_s22] sm:$0xff]  ;;  %12847 = vmatmul.msk.bf16.vlgmr.msra.gmra.mxu1 %vm1267_vm0, %v13940_v5  ;;  %v14139_v10 = vld [vmem:[%s15004_s22 + $0x8] sm:$0xff]  ;;  %v14140_v14 = vld [vmem:[%s15004_s22 + $0x10] sm:$0xff] }
  0x19   : > { %v14237_v7 = vld [vmem:[%s15009_s25] sm:$0xff]  ;;  %13343 = vmatmul.msk.bf16.vlgmr.msra.gmra.mxu2 %vm1267_vm0, %v14138_v6  ;;  %v14238_v11 = vld [vmem:[%s15009_s25 + $0x8] sm:$0xff]  ;;  %v14239_v15 = vld [vmem:[%s15009_s25 + $0x10] sm:$0xff] }
  0x1a   : > { %13839 = vmatmul.msk.bf16.vlgmr.msra.gmra.mxu3 %vm1267_vm0, %v14237_v7  ;;  %v14042_v16 = vld [vmem:[%s14992_s13 + $0x18] sm:$0xff]  ;;  %v14043_v20 = vld [vmem:[%s14992_s13 + $0x20] sm:$0xff]  ;;  %v14044_v24 = vld [vmem:[%s14992_s13 + $0x28] sm:$0xff] }
  0x1b   : > { %v13943_v17 = vld [vmem:[%s14997_s19 + $0x18] sm:$0xff]  ;;  %v13944_v21 = vld [vmem:[%s14997_s19 + $0x20] sm:$0xff]  ;;  %v13945_v25 = vld [vmem:[%s14997_s19 + $0x28] sm:$0xff] }
  0x1c   : > { %v14141_v18 = vld [vmem:[%s15004_s22 + $0x18] sm:$0xff]  ;;  %v14142_v22 = vld [vmem:[%s15004_s22 + $0x20] sm:$0xff]  ;;  %v14143_v26 = vld [vmem:[%s15004_s22 + $0x28] sm:$0xff] }
  0x1d   : > { %v14240_v19 = vld [vmem:[%s15009_s25 + $0x18] sm:$0xff]  ;;  %v14241_v23 = vld [vmem:[%s15009_s25 + $0x20] sm:$0xff]  ;;  %v14242_v27 = vld [vmem:[%s15009_s25 + $0x28] sm:$0xff] }
  0x1e   : > { %v14045_v28 = vld [vmem:[%s14992_s13 + $0x30] sm:$0xff]  ;;  %v14046_v32 = vld [vmem:[%s14992_s13 + $0x38] sm:$0xff]  ;;  %v14047_v36 = vld [vmem:[%s14992_s13 + $0x40] sm:$0xff] }
  0x1f   : > { %v13946_v29 = vld [vmem:[%s14997_s19 + $0x30] sm:$0xff]  ;;  %v13947_v33 = vld [vmem:[%s14997_s19 + $0x38] sm:$0xff]  ;;  %v13948_v37 = vld [vmem:[%s14997_s19 + $0x40] sm:$0xff] }
  0x20   : > { %v14144_v30 = vld [vmem:[%s15004_s22 + $0x30] sm:$0xff]  ;;  %v14145_v34 = vld [vmem:[%s15004_s22 + $0x38] sm:$0xff]  ;;  %v14146_v40 = vld [vmem:[%s15004_s22 + $0x40] sm:$0xff] }
  0x21   : > { %v14243_v31 = vld [vmem:[%s15009_s25 + $0x30] sm:$0xff]  ;;  %v14244_v35 = vld [vmem:[%s15009_s25 + $0x38] sm:$0xff]  ;;  %v14245_v41 = vld [vmem:[%s15009_s25 + $0x40] sm:$0xff] }
  0x22   : > { %v14048_v55 = vld [vmem:[%s14992_s13 + $0x48] sm:$0xff] }
  0x23   : > { %v13949_v56 = vld [vmem:[%s14997_s19 + $0x48] sm:$0xff] }
  0x24   : > { %v14147_v60 = vld [vmem:[%s15004_s22 + $0x48] sm:$0xff] }
  0x25   : > { %v14246_v61 = vld [vmem:[%s15009_s25 + $0x48] sm:$0xff] }
  0x27   : > { %12354 = vmatmul.msk.bf16.gmra.mxu0 %vm1267_vm0, %v14040_v8 }
  0x28   : > { %12848 = vmatmul.msk.bf16.gmra.mxu1 %vm1267_vm0, %v13941_v9 }
  0x29   : > { %13344 = vmatmul.msk.bf16.gmra.mxu2 %vm1267_vm0, %v14139_v10 }
  0x2a   : > { %13840 = vmatmul.msk.bf16.gmra.mxu3 %vm1267_vm0, %v14238_v11 }
  0x37   : > { %12355 = vmatmul.msk.bf16.gmra.mxu0 %vm1267_vm0, %v14041_v12 }
  0x38   : > { %12849 = vmatmul.msk.bf16.gmra.mxu1 %vm1267_vm0, %v13942_v13  ;;  %v14049_v13 = vld [vmem:[%s14992_s13 + $0x50] sm:$0xff] }
  0x39   : > { %13345 = vmatmul.msk.bf16.gmra.mxu2 %vm1267_vm0, %v14140_v14  ;;  %v13950_v14 = vld [vmem:[%s14997_s19 + $0x50] sm:$0xff] }
  0x3a   : > { %13841 = vmatmul.msk.bf16.gmra.mxu3 %vm1267_vm0, %v14239_v15 }
  0x47   : > { %12356 = vmatmul.msk.bf16.gmra.mxu0 %vm1267_vm0, %v14042_v16 }
  0x48   : > { %12850 = vmatmul.msk.bf16.gmra.mxu1 %vm1267_vm0, %v13943_v17 }
  0x49   : > { %13346 = vmatmul.msk.bf16.gmra.mxu2 %vm1267_vm0, %v14141_v18  ;;  %v14148_v18 = vld [vmem:[%s15004_s22 + $0x50] sm:$0xff] }
  0x4a   : > { %13842 = vmatmul.msk.bf16.gmra.mxu3 %vm1267_vm0, %v14240_v19  ;;  %v14247_v19 = vld [vmem:[%s15009_s25 + $0x50] sm:$0xff] }
  0x57   : > { %12357 = vmatmul.msk.bf16.gmra.mxu0 %vm1267_vm0, %v14043_v20 }
  0x58   : > { %12851 = vmatmul.msk.bf16.gmra.mxu1 %vm1267_vm0, %v13944_v21 }
  0x59   : > { %13347 = vmatmul.msk.bf16.gmra.mxu2 %vm1267_vm0, %v14142_v22 }
  0x5a   : > { %13843 = vmatmul.msk.bf16.gmra.mxu3 %vm1267_vm0, %v14241_v23 }
  0x67   : > { %12358 = vmatmul.msk.bf16.gmra.mxu0 %vm1267_vm0, %v14044_v24 }
  0x68   : > { %12852 = vmatmul.msk.bf16.gmra.mxu1 %vm1267_vm0, %v13945_v25 }
  0x69   : > { %13348 = vmatmul.msk.bf16.gmra.mxu2 %vm1267_vm0, %v14143_v26 }
  0x6a   : > { %13844 = vmatmul.msk.bf16.gmra.mxu3 %vm1267_vm0, %v14242_v27 }
  0x77   : > { %12359 = vmatmul.msk.bf16.gmra.mxu0 %vm1267_vm0, %v14045_v28 }
  0x78   : > { %12853 = vmatmul.msk.bf16.gmra.mxu1 %vm1267_vm0, %v13946_v29 }
  0x79   : > { %13349 = vmatmul.msk.bf16.gmra.mxu2 %vm1267_vm0, %v14144_v30 }
  0x7a   : > { %13845 = vmatmul.msk.bf16.gmra.mxu3 %vm1267_vm0, %v14243_v31 }
  0x87   : > { %12360 = vmatmul.msk.bf16.gmra.mxu0 %vm1267_vm0, %v14046_v32 }
  0x88   : > { %12854 = vmatmul.msk.bf16.gmra.mxu1 %vm1267_vm0, %v13947_v33 }
  0x89   : > { %13350 = vmatmul.msk.bf16.gmra.mxu2 %vm1267_vm0, %v14145_v34  ;;  %v14050_v34 = vld [vmem:[%s14992_s13 + $0x58] sm:$0xff] }
  0x8a   : > { %13846 = vmatmul.msk.bf16.gmra.mxu3 %vm1267_vm0, %v14244_v35  ;;  %v13951_v35 = vld [vmem:[%s14997_s19 + $0x58] sm:$0xff] }
  0x94   : > { %v1571_v38 = vpop.f32.mrf.mxu0 }
  0x95   : > { %v2860_v39 = vpop.f32.mrf.mxu1 }
  0x96   : > { %v2861_v42 = vadd.f32 %v2860_v39, %v1571_v38  ;;  %v14149_v39 = vld [vmem:[%s15004_s22 + $0x58] sm:$0xff] }
  0x97   : > { %12361 = vmatmul.msk.bf16.gmra.mxu0 %vm1267_vm0, %v14047_v36 }
  0x98   : > { %12855 = vmatmul.msk.bf16.gmra.mxu1 %vm1267_vm0, %v13948_v37 }
  0x99   : > { %13351 = vmatmul.msk.bf16.gmra.mxu2 %vm1267_vm0, %v14146_v40  ;;  %v14248_v40 = vld [vmem:[%s15009_s25 + $0x58] sm:$0xff] }
  0x9a   : > { %13847 = vmatmul.msk.bf16.gmra.mxu3 %vm1267_vm0, %v14245_v41 }
  0x9c   : > { %v4348_v43 = vpop.f32.mrf.mxu2  ;;  %v1573_v47 = vpop.f32.mrf.mxu0 }
  0x9d   : > { %v6032_v44 = vpop.f32.mrf.mxu3  ;;  %v4838_v45 = vadd.f32 %v4348_v43, %v2861_v42  ;;  %v2862_v48 = vpop.f32.mrf.mxu1 }
  0x9e   : > { %v2863_v51 = vadd.f32 %v2862_v48, %v1573_v47 }
  0x9f   : > { %v6522_v49 = vadd.f32 %v6032_v44, %v4838_v45 }
  0xa1   : > { %v15087_v50 = vadd.f32 %v15084_v46, %v6522_v49 }
  0xa3   : > { %6918 = vadd.xlane.f32.xlu0 %v15087_v50  ;;  %v7513_v52 = vmul.f32 %v15087_v50, %v15087_v50 }
  0xa4   : > { %v4350_v53 = vpop.f32.mrf.mxu2  ;;  %v1576_v58 = vpop.f32.mrf.mxu0 }
  0xa5   : > { %v6034_v54 = vpop.f32.mrf.mxu3  ;;  %v4839_v57 = vadd.f32 %v4350_v53, %v2863_v51  ;;  %7709 = vadd.xlane.f32.xlu1 %v7513_v52  ;;  %v2865_v59 = vpop.f32.mrf.mxu1 }
  0xa6   : > { %v2866_v0 = vadd.f32 %v2865_v59, %v1576_v58  ;;  %v14051_v59 = vld [vmem:[%s14992_s13 + $0x60] sm:$0xff] }
  0xa7   : > { %v6523_v62 = vadd.f32 %v6034_v54, %v4839_v57  ;;  %12362 = vmatmul.msk.bf16.gmra.mxu0 %vm1267_vm0, %v14048_v55 }
  0xa8   : > { %12856 = vmatmul.msk.bf16.gmra.mxu1 %vm1267_vm0, %v13949_v56 }
  0xa9   : > { %v15099_v63 = vadd.f32 %v15084_v46, %v6523_v62  ;;  %13352 = vmatmul.msk.bf16.gmra.mxu2 %vm1267_vm0, %v14147_v60  ;;  %v13952_v60 = vld [vmem:[%s14997_s19 + $0x60] sm:$0xff] }
  0xaa   : > { %13848 = vmatmul.msk.bf16.gmra.mxu3 %vm1267_vm0, %v14246_v61 }
  0xab   : > { %6920 = vadd.xlane.f32.xlu0 %v15099_v63  ;;  %v7514_v1 = vmul.f32 %v15099_v63, %v15099_v63 }
  0xac   : > { %v4353_v2 = vpop.f32.mrf.mxu2  ;;  %v1578_v5 = vpop.f32.mrf.mxu0 }
  0xad   : > { %v6037_v3 = vpop.f32.mrf.mxu3  ;;  %v4840_v4 = vadd.f32 %v4353_v2, %v2866_v0  ;;  %7711 = vadd.xlane.f32.xlu2 %v7514_v1  ;;  %v2867_v6 = vpop.f32.mrf.mxu1  ;;  %v14150_v1 = vld [vmem:[%s15004_s22 + $0x60] sm:$0xff] }
  0xae   : > { %v2868_v9 = vadd.f32 %v2867_v6, %v1578_v5  ;;  %v14249_v2 = vld [vmem:[%s15009_s25 + $0x60] sm:$0xff] }
  0xaf   : > { %v6524_v7 = vadd.f32 %v6037_v3, %v4840_v4 }
  0xb1   : > { %v15107_v8 = vadd.f32 %v15084_v46, %v6524_v7 }
  0xb3   : > { %6922 = vadd.xlane.f32.xlu1 %v15107_v8  ;;  %v7515_v10 = vmul.f32 %v15107_v8, %v15107_v8 }
  0xb4   : > { %v4355_v11 = vpop.f32.mrf.mxu2  ;;  %v1581_v16 = vpop.f32.mrf.mxu0 }
  0xb5   : > { %v6039_v12 = vpop.f32.mrf.mxu3  ;;  %v4841_v15 = vadd.f32 %v4355_v11, %v2868_v9  ;;  %7713 = vadd.xlane.f32.xlu0 %v7515_v10  ;;  %v2870_v17 = vpop.f32.mrf.mxu1 }
  0xb6   : > { %v2871_v22 = vadd.f32 %v2870_v17, %v1581_v16 }
  0xb7   : > { %v6525_v20 = vadd.f32 %v6039_v12, %v4841_v15  ;;  %12363 = vmatmul.msk.bf16.gmra.mxu0 %vm1267_vm0, %v14049_v13 }
  0xb8   : > { %12857 = vmatmul.msk.bf16.gmra.mxu1 %vm1267_vm0, %v13950_v14 }
  0xb9   : > { %v15119_v21 = vadd.f32 %v15084_v46, %v6525_v20  ;;  %13353 = vmatmul.msk.bf16.gmra.mxu2 %vm1267_vm0, %v14148_v18  ;;  %v13953_v20 = vld [vmem:[%s14997_s19 + $0x68] sm:$0xff] }
  0xba   : > { %13849 = vmatmul.msk.bf16.gmra.mxu3 %vm1267_vm0, %v14247_v19  ;;  %v14052_v19 = vld [vmem:[%s14992_s13 + $0x68] sm:$0xff] }
  0xbb   : > { %6924 = vadd.xlane.f32.xlu1 %v15119_v21  ;;  %v7516_v30 = vmul.f32 %v15119_v21, %v15119_v21 }
  0xbc   : > { %v4358_v23 = vpop.f32.mrf.mxu2  ;;  %v1583_v26 = vpop.f32.mrf.mxu0 }
  0xbd   : > { %v6042_v24 = vpop.f32.mrf.mxu3  ;;  %v4842_v25 = vadd.f32 %v4358_v23, %v2871_v22  ;;  %v2872_v27 = vpop.f32.mrf.mxu1 }
  0xbe   : > { %v2873_v31 = vadd.f32 %v2872_v27, %v1583_v26  ;;  %v14250_v26 = vld [vmem:[%s15009_s25 + $0x68] sm:$0xff] }
  0xbf   : > { %v6526_v28 = vadd.f32 %v6042_v24, %v4842_v25  ;;  %v14151_v25 = vld [vmem:[%s15004_s22 + $0x68] sm:$0xff] }
  0xc1   : > { %v15125_v29 = vadd.f32 %v15084_v46, %v6526_v28 }
  0xc3   : > { %6926 = vadd.xlane.f32.xlu2 %v15125_v29  ;;  %7715 = vadd.xlane.f32.xlu1 %v7516_v30  ;;  %v7517_v44 = vmul.f32 %v15125_v29, %v15125_v29 }
  0xc4   : > { %v4360_v32 = vpop.f32.mrf.mxu2  ;;  %v1586_v37 = vpop.f32.mrf.mxu0 }
  0xc5   : > { %v6044_v33 = vpop.f32.mrf.mxu3  ;;  %v4843_v36 = vadd.f32 %v4360_v32, %v2873_v31  ;;  %v2875_v38 = vpop.f32.mrf.mxu1 }
  0xc6   : > { %v2876_v43 = vadd.f32 %v2875_v38, %v1586_v37 }
  0xc7   : > { %v6527_v41 = vadd.f32 %v6044_v33, %v4843_v36  ;;  %12364 = vmatmul.msk.bf16.gmra.mxu0 %vm1267_vm0, %v14050_v34 }
  0xc8   : > { %12858 = vmatmul.msk.bf16.gmra.mxu1 %vm1267_vm0, %v13951_v35 }
  0xc9   : > { %v15137_v42 = vadd.f32 %v15084_v46, %v6527_v41  ;;  %13354 = vmatmul.msk.bf16.gmra.mxu2 %vm1267_vm0, %v14149_v39 }
  0xca   : > { %13850 = vmatmul.msk.bf16.gmra.mxu3 %vm1267_vm0, %v14248_v40 }
  0xcb   : > { %7717 = vadd.xlane.f32.xlu2 %v7517_v44  ;;  %v7518_v45 = vmul.f32 %v15137_v42, %v15137_v42  ;;  %v14053_v44 = vld [vmem:[%s14992_s13 + $0x70] sm:$0xff] }
  0xcc   : > { %v4363_v47 = vpop.f32.mrf.mxu2  ;;  %v1588_v51 = vpop.f32.mrf.mxu0 }
  0xcd   : > { %v6047_v48 = vpop.f32.mrf.mxu3  ;;  %v4844_v49 = vadd.f32 %v4363_v47, %v2876_v43  ;;  %7719 = vadd.xlane.f32.xlu0 %v7518_v45  ;;  %v2877_v52 = vpop.f32.mrf.mxu1  ;;  %v13954_v45 = vld [vmem:[%s14997_s19 + $0x70] sm:$0xff] }
  0xce   : > { %v2878_v55 = vadd.f32 %v2877_v52, %v1588_v51  ;;  %v14152_v51 = vld [vmem:[%s15004_s22 + $0x70] sm:$0xff] }
  0xcf   : > { %v6528_v53 = vadd.f32 %v6047_v48, %v4844_v49  ;;  %v14251_v52 = vld [vmem:[%s15009_s25 + $0x70] sm:$0xff] }
  0xd1   : > { %v15146_v54 = vadd.f32 %v15084_v46, %v6528_v53 }
  0xd3   : > { %6928 = vadd.xlane.f32.xlu2 %v15137_v42  ;;  %v7519_v56 = vmul.f32 %v15146_v54, %v15146_v54 }
  0xd4   : > { %v4365_v57 = vpop.f32.mrf.mxu2  ;;  %v1591_v62 = vpop.f32.mrf.mxu0 }
  0xd5   : > { %v6049_v58 = vpop.f32.mrf.mxu3  ;;  %v4845_v61 = vadd.f32 %v4365_v57, %v2878_v55  ;;  %6930 = vadd.xlane.f32.xlu0 %v15146_v54  ;;  %7721 = vadd.xlane.f32.xlu1 %v7519_v56  ;;  %v2880_v0 = vpop.f32.mrf.mxu1 }
  0xd6   : > { %v2881_v5 = vadd.f32 %v2880_v0, %v1591_v62 }
  0xd7   : > { %v6529_v3 = vadd.f32 %v6049_v58, %v4845_v61  ;;  %12365 = vmatmul.msk.bf16.gmra.mxu0 %vm1267_vm0, %v14051_v59  ;;  %v14880_v58 = vmov 128.0  }
  0xd8   : > { %12859 = vmatmul.msk.bf16.gmra.mxu1 %vm1267_vm0, %v13952_v60  ;;  %14383 = vrcp.f32 %v14880_v58 }
  0xd9   : > { %v15159_v4 = vadd.f32 %v15084_v46, %v6529_v3  ;;  %13355 = vmatmul.msk.bf16.gmra.mxu2 %vm1267_vm0, %v14150_v1 }
  0xda   : > { %13851 = vmatmul.msk.bf16.gmra.mxu3 %vm1267_vm0, %v14249_v2 }
  0xdb   : > { %v7520_v6 = vmul.f32 %v15159_v4, %v15159_v4 }
  0xdc   : > { %v4368_v7 = vpop.f32.mrf.mxu2  ;;  %v1593_v11 = vpop.f32.mrf.mxu0 }
  0xdd   : > { %v6052_v9 = vpop.f32.mrf.mxu3  ;;  %v4846_v10 = vadd.f32 %v4368_v7, %v2881_v5  ;;  %7723 = vadd.xlane.f32.xlu2 %v7520_v6  ;;  %6932 = vadd.xlane.f32.xlu1 %v15159_v4  ;;  %v2882_v12 = vpop.f32.mrf.mxu1 }
  0xde   : > { %v2883_v15 = vadd.f32 %v2882_v12, %v1593_v11  ;;  %v14384_v2 = vpop.eup %14383  ;;  %v13955_v11 = vld [vmem:[%s14997_s19 + $0x78] sm:$0xff] }
  0xdf   : > { %v6530_v13 = vadd.f32 %v6052_v9, %v4846_v10  ;;  %v14054_v10 = vld [vmem:[%s14992_s13 + $0x78] sm:$0xff]  ;;  %v7311_v12 = vmul.f32 128.0, %v14384_v2  ;;  %vm7315_vm1 = vweird.f32 %v14384_v2 }
  0xe1   : > { %v15167_v14 = vadd.f32 %v15084_v46, %v6530_v13 }
  0xe3   : > { %v7521_v16 = vmul.f32 %v15167_v14, %v15167_v14 }
  0xe4   : > { %v4370_v17 = vpop.f32.mrf.mxu2  ;;  %v1596_v23 = vpop.f32.mrf.mxu0 }
  0xe5   : > { %v6054_v18 = vpop.f32.mrf.mxu3  ;;  %v4847_v22 = vadd.f32 %v4370_v17, %v2883_v15  ;;  %6934 = vadd.xlane.f32.xlu2 %v15167_v14  ;;  %7725 = vadd.xlane.f32.xlu0 %v7521_v16  ;;  %v2885_v24 = vpop.f32.mrf.mxu1  ;;  %v14153_v17 = vld [vmem:[%s15004_s22 + $0x78] sm:$0xff] }
  0xe6   : > { %v2886_v30 = vadd.f32 %v2885_v24, %v1596_v23 }
  0xe7   : > { %v6531_v27 = vadd.f32 %v6054_v18, %v4847_v22  ;;  %12366 = vmatmul.msk.bf16.gmra.mxu0 %vm1267_vm0, %v14052_v19  ;;  %v14252_v18 = vld [vmem:[%s15009_s25 + $0x78] sm:$0xff] }
  0xe8   : > { %12860 = vmatmul.msk.bf16.gmra.mxu1 %vm1267_vm0, %v13953_v20  ;;  %v7312_v20 = vsub.f32 1.0, %v7311_v12 }
  0xe9   : > { %v15179_v28 = vadd.f32 %v15084_v46, %v6531_v27  ;;  %13356 = vmatmul.msk.bf16.gmra.mxu2 %vm1267_vm0, %v14151_v25 }
  0xea   : > { %13852 = vmatmul.msk.bf16.gmra.mxu3 %vm1267_vm0, %v14250_v26  ;;  %v7313_v27 = vmul.f32 %v14384_v2, %v7312_v20 }
  0xeb   : > { %v7522_v31 = vmul.f32 %v15179_v28, %v15179_v28 }
  0xec   : > { %v4373_v32 = vpop.f32.mrf.mxu2  ;;  %v1598_v35 = vpop.f32.mrf.mxu0 }
  0xed   : > { %v6057_v33 = vpop.f32.mrf.mxu3  ;;  %v4848_v34 = vadd.f32 %v4373_v32, %v2886_v30  ;;  %6936 = vadd.xlane.f32.xlu0 %v15179_v28  ;;  %7727 = vadd.xlane.f32.xlu1 %v7522_v31  ;;  %v2887_v36 = vpop.f32.mrf.mxu1 }
  0xee   : > { %v2888_v39 = vadd.f32 %v2887_v36, %v1598_v35 }
  0xef   : > { %v6532_v37 = vadd.f32 %v6057_v33, %v4848_v34  ;;  %v7314_v34 = vadd.f32 %v14384_v2, %v7313_v27 }
  0xf1   : > { %v15187_v38 = vadd.f32 %v15084_v46, %v6532_v37 }
  0xf3   : > { %v7523_v40 = vmul.f32 %v15187_v38, %v15187_v38 }
  0xf4   : > { %v4375_v41 = vpop.f32.mrf.mxu2  ;;  %v1601_v48 = vpop.f32.mrf.mxu0 }
  0xf5   : > { %v6059_v43 = vpop.f32.mrf.mxu3  ;;  %v4849_v47 = vadd.f32 %v4375_v41, %v2888_v39  ;;  %7729 = vadd.xlane.f32.xlu2 %v7523_v40  ;;  %6938 = vadd.xlane.f32.xlu1 %v15187_v38  ;;  %v2890_v49 = vpop.f32.mrf.mxu1  ;;  %v15231_v41 = vsel %vm7315_vm1, %v14384_v2, %v7314_v34  ;;  %v14155_v34 = vld [vmem:[%s15004_s22 + $0x88] sm:$0xff] }
  0xf6   : > { %v2891_v56 = vadd.f32 %v2890_v49, %v1601_v48  ;;  %v14154_v49 = vld [vmem:[%s15004_s22 + $0x80] sm:$0xff] }
  0xf7   : > { %v6533_v53 = vadd.f32 %v6059_v43, %v4849_v47  ;;  %12367 = vmatmul.msk.bf16.gmra.mxu0 %vm1267_vm0, %v14053_v44  ;;  %v14055_v43 = vld [vmem:[%s14992_s13 + $0x80] sm:$0xff] }
  0xf8   : > { %12861 = vmatmul.msk.bf16.gmra.mxu1 %vm1267_vm0, %v13954_v45  ;;  %v13956_v44 = vld [vmem:[%s14997_s19 + $0x80] sm:$0xff] }
  0xf9   : > { %v15199_v55 = vadd.f32 %v15084_v46, %v6533_v53  ;;  %13357 = vmatmul.msk.bf16.gmra.mxu2 %vm1267_vm0, %v14152_v51 }
  0xfa   : > { %13853 = vmatmul.msk.bf16.gmra.mxu3 %vm1267_vm0, %v14251_v52  ;;  %v14253_v52 = vld [vmem:[%s15009_s25 + $0x80] sm:$0xff] }
  0xfb   : > { %v7524_v57 = vmul.f32 %v15199_v55, %v15199_v55 }
  0xfc   : > { %v4378_v59 = vpop.f32.mrf.mxu2  ;;  %v1603_v62 = vpop.f32.mrf.mxu0 }
  0xfd   : > { %v6062_v60 = vpop.f32.mrf.mxu3  ;;  %v4850_v61 = vadd.f32 %v4378_v59, %v2891_v56  ;;  %6940 = vadd.xlane.f32.xlu2 %v15199_v55  ;;  %7731 = vadd.xlane.f32.xlu0 %v7524_v57  ;;  %v2892_v0 = vpop.f32.mrf.mxu1 }
  0xfe   : > { %v2893_v5 = vadd.f32 %v2892_v0, %v1603_v62 }
  0xff   : > { %v6534_v1 = vadd.f32 %v6062_v60, %v4850_v61 }
 0x101   : > { %v15207_v3 = vadd.f32 %v15084_v46, %v6534_v1 }
 0x103   : > { %v7525_v6 = vmul.f32 %v15207_v3, %v15207_v3 }
 0x104   : > { %v4380_v7 = vpop.f32.mrf.mxu2  ;;  %v1606_v15 = vpop.f32.mrf.mxu0 }
 0x105   : > { %v6064_v9 = vpop.f32.mrf.mxu3  ;;  %v4851_v13 = vadd.f32 %v4380_v7, %v2893_v5  ;;  %6942 = vadd.xlane.f32.xlu0 %v15207_v3  ;;  %7733 = vadd.xlane.f32.xlu1 %v7525_v6  ;;  %v2895_v16 = vpop.f32.mrf.mxu1 }
 0x106   : > { %v2896_v23 = vadd.f32 %v2895_v16, %v1606_v15 }
 0x107   : > { %v6535_v19 = vadd.f32 %v6064_v9, %v4851_v13  ;;  %12368 = vmatmul.msk.bf16.gmra.mxu0 %vm1267_vm0, %v14054_v10 }
 0x108   : > { %12862 = vmatmul.msk.bf16.gmra.mxu1 %vm1267_vm0, %v13955_v11 }
 0x109   : > { %v15219_v22 = vadd.f32 %v15084_v46, %v6535_v19  ;;  %13358 = vmatmul.msk.bf16.gmra.mxu2 %vm1267_vm0, %v14153_v17 }
 0x10a   : > { %13854 = vmatmul.msk.bf16.gmra.mxu3 %vm1267_vm0, %v14252_v18 }
 0x10b   : > { %v7526_v24 = vmul.f32 %v15219_v22, %v15219_v22 }
 0x10c   : > { %v4383_v25 = vpop.f32.mrf.mxu2  ;;  %v1608_v31 = vpop.f32.mrf.mxu0 }
 0x10d   : > { %v6067_v26 = vpop.f32.mrf.mxu3  ;;  %v4852_v30 = vadd.f32 %v4383_v25, %v2896_v23  ;;  %7735 = vadd.xlane.f32.xlu2 %v7526_v24  ;;  %6944 = vadd.xlane.f32.xlu1 %v15219_v22  ;;  %v2897_v32 = vpop.f32.mrf.mxu1  ;;  %v14056_v25 = vld [vmem:[%s14992_s13 + $0x88] sm:$0xff] }
 0x10e   : > { %v2898_v36 = vadd.f32 %v2897_v32, %v1608_v31 }
 0x10f   : > { %v6536_v33 = vadd.f32 %v6067_v26, %v4852_v30  ;;  %v13957_v26 = vld [vmem:[%s14997_s19 + $0x88] sm:$0xff] }
 0x111   : > { %v15227_v35 = vadd.f32 %v15084_v46, %v6536_v33 }
 0x113   : > { %v7527_v37 = vmul.f32 %v15227_v35, %v15227_v35 }
 0x114   : > { %v4385_v39 = vpop.f32.mrf.mxu2  ;;  %v1611_v47 = vpop.f32.mrf.mxu0 }
 0x115   : > { %v6069_v40 = vpop.f32.mrf.mxu3  ;;  %v4853_v45 = vadd.f32 %v4385_v39, %v2898_v36  ;;  %6946 = vadd.xlane.f32.xlu2 %v15227_v35  ;;  %7737 = vadd.xlane.f32.xlu0 %v7527_v37  ;;  %v2900_v48 = vpop.f32.mrf.mxu1  ;;  %v14254_v39 = vld [vmem:[%s15009_s25 + $0x88] sm:$0xff] }
 0x116   : > { %v6919_v51 = vpop.xlane.xlu0 %6918  ;;  %v2901_v59 = vadd.f32 %v2900_v48, %v1611_v47 }
 0x117   : > { %v6537_v53 = vadd.f32 %v6069_v40, %v4853_v45  ;;  %v15239_v56 = vmul.f32 %v15231_v41, %v6919_v51  ;;  %12369 = vmatmul.msk.bf16.gmra.mxu0 %vm1267_vm0, %v14055_v43 }
 0x118   : > { %v7710_v57 = vpop.xlane.xlu1 %7709  ;;  %12863 = vmatmul.msk.bf16.gmra.mxu1 %vm1267_vm0, %v13956_v44 }
 0x119   : > { %v15244_v58 = vadd.f32 %v15084_v46, %v6537_v53  ;;  %v8297_v60 = vmul.f32 %v15239_v56, %v15239_v56  ;;  %v8101_v61 = vmul.f32 %v7710_v57, %v15231_v41  ;;  %13359 = vmatmul.msk.bf16.gmra.mxu2 %vm1267_vm0, %v14154_v49 }
 0x11a   : > { %13855 = vmatmul.msk.bf16.gmra.mxu3 %vm1267_vm0, %v14253_v52 }
 0x11b   : > { %v8493_v62 = vsub.f32 %v8101_v61, %v8297_v60  ;;  %v7528_v0 = vmul.f32 %v15244_v58, %v15244_v58 }
 0x11c   : > { %v4388_v1 = vpop.f32.mrf.mxu2  ;;  %v1613_v7 = vpop.f32.mrf.mxu0 }
 0x11d   : > { %v6072_v2 = vpop.f32.mrf.mxu3  ;;  %v15253_v5 = vadd.f32 1e-05, %v8493_v62  ;;  %v4854_v6 = vadd.f32 %v4388_v1, %v2901_v59  ;;  %6948 = vadd.xlane.f32.xlu0 %v15244_v58  ;;  %7739 = vadd.xlane.f32.xlu1 %v7528_v0  ;;  %v2902_v9 = vpop.f32.mrf.mxu1 }
 0x11e   : > { %v6921_v10 = vpop.xlane.xlu0 %6920  ;;  %v2903_v18 = vadd.f32 %v2902_v9, %v1613_v7 }
 0x11f   : > { %14385 = vrsqrt.f32 %v15253_v5  ;;  %v6538_v11 = vadd.f32 %v6072_v2, %v4854_v6  ;;  %v15258_v12 = vmul.f32 %v15231_v41, %v6921_v10  ;;  %vm9087_vm3 = vweird.f32 %v15253_v5 }
 0x120   : > { %v7712_v13 = vpop.xlane.xlu2 %7711 }
 0x121   : > { %v15261_v15 = vadd.f32 %v15084_v46, %v6538_v11  ;;  %v8298_v16 = vmul.f32 %v15258_v12, %v15258_v12  ;;  %v8102_v17 = vmul.f32 %v7712_v13, %v15231_v41  ;;  %v8689_v11 = vsub.f32 %v15087_v50, %v15239_v56  ;;  %v15303_v13 = vld [vmem:[%s20451_s6] ss:$0 sm:$0xff] }
 0x122   : > { %v15314_v50 = vld [vmem:[%s20452_s7] ss:$0 sm:$0xff] }
 0x123   : > { %v8494_v19 = vsub.f32 %v8102_v17, %v8298_v16  ;;  %v7529_v20 = vmul.f32 %v15261_v15, %v15261_v15 }
 0x124   : > { %v4390_v23 = vpop.f32.mrf.mxu2  ;;  %v1616_v32 = vpop.f32.mrf.mxu0 }
 0x125   : > { %v6074_v24 = vpop.f32.mrf.mxu3  ;;  %v14386_v27 = vpop.eup %14385  ;;  %v15270_v30 = vadd.f32 1e-05, %v8494_v19  ;;  %v4855_v31 = vadd.f32 %v4390_v23, %v2903_v18  ;;  %7741 = vadd.xlane.f32.xlu2 %v7529_v20  ;;  %6950 = vadd.xlane.f32.xlu1 %v15261_v15 }
 0x126   : > { %v2905_v33 = vpop.f32.mrf.mxu1  ;;  %v9082_v36 = vmul.f32 %v14386_v27, %v15253_v5  ;;  %v6923_v37 = vpop.xlane.xlu1 %6922  ;;  %vm9088_vm2 = vweird.f32 %v14386_v27 }
 0x127   : > { %14387 = vrsqrt.f32 %v15270_v30  ;;  %v6539_v40 = vadd.f32 %v6074_v24, %v4855_v31  ;;  %v15278_v43 = vmul.f32 %v15231_v41, %v6923_v37  ;;  %12370 = vmatmul.msk.bf16.gmra.mxu0 %vm1267_vm0, %v14056_v25  ;;  %v2906_v48 = vadd.f32 %v2905_v33, %v1616_v32  ;;  %vm9089_vm4 = vmor %vm9087_vm3, %vm9088_vm2  ;;  %v14057_v32 = vld [vmem:[%s14992_s13 + $0x90] sm:$0xff] }
 0x128   : > { %v9083_v44 = vmul.f32 %v14386_v27, %v9082_v36  ;;  %v7714_v45 = vpop.xlane.xlu0 %7713  ;;  %12864 = vmatmul.msk.bf16.gmra.mxu1 %vm1267_vm0, %v13957_v26  ;;  %v13958_v33 = vld [vmem:[%s14997_s19 + $0x90] sm:$0xff]  ;;  %vm9097_vm6 = vweird.f32 %v15270_v30 }
 0x129   : > { %v15283_v47 = vadd.f32 %v15084_v46, %v6539_v40  ;;  %v8299_v49 = vmul.f32 %v15278_v43, %v15278_v43  ;;  %v8103_v51 = vmul.f32 %v7714_v45, %v15231_v41  ;;  %13360 = vmatmul.msk.bf16.gmra.mxu2 %vm1267_vm0, %v14155_v34 }
 0x12a   : > { %v9084_v52 = vmul.f32 0.5, %v9083_v44  ;;  %13856 = vmatmul.msk.bf16.gmra.mxu3 %vm1267_vm0, %v14254_v39  ;;  %v14156_v44 = vld [vmem:[%s15004_s22 + $0x90] sm:$0xff] }
 0x12b   : > { %v8495_v53 = vsub.f32 %v8103_v51, %v8299_v49  ;;  %v7530_v57 = vmul.f32 %v15283_v47, %v15283_v47 }
 0x12c   : > { %v9085_v59 = vsub.f32 1.5, %v9084_v52  ;;  %v4393_v60 = vpop.f32.mrf.mxu2  ;;  %v1618_v2 = vpop.f32.mrf.mxu0  ;;  %v14255_v52 = vld [vmem:[%s15009_s25 + $0x90] sm:$0xff] }
 0x12d   : > { %v6077_v61 = vpop.f32.mrf.mxu3  ;;  %v14388_v62 = vpop.eup %14387  ;;  %v15293_v0 = vadd.f32 1e-05, %v8495_v53  ;;  %v4856_v1 = vadd.f32 %v4393_v60, %v2906_v48  ;;  %6952 = vadd.xlane.f32.xlu2 %v15283_v47  ;;  %7743 = vadd.xlane.f32.xlu0 %v7530_v57  ;;  %v8690_v53 = vsub.f32 %v15099_v63, %v15258_v12 }
 0x12e   : > { %v2907_v6 = vpop.f32.mrf.mxu1  ;;  %v9086_v7 = vmul.f32 %v14386_v27, %v9085_v59  ;;  %v9092_v9 = vmul.f32 %v14388_v62, %v15270_v30  ;;  %v6925_v10 = vpop.xlane.xlu1 %6924  ;;  %vm9098_vm5 = vweird.f32 %v14388_v62 }
 0x12f   : > { %14389 = vrsqrt.f32 %v15293_v0  ;;  %v6540_v16 = vadd.f32 %v6077_v61, %v4856_v1  ;;  %v2908_v23 = vadd.f32 %v2907_v6, %v1618_v2  ;;  %v15323_v26 = vmul.f32 %v15231_v41, %v6925_v10  ;;  %vm9099_vm7 = vmor %vm9097_vm6, %vm9098_vm5 }
 0x130   : > { %v9090_v5 = vsel %vm9089_vm4, %v14386_v27, %v9086_v7  ;;  %v9093_v17 = vmul.f32 %v14388_v62, %v9092_v9  ;;  %vm9107_vm9 = vweird.f32 %v15293_v0 }
 0x131   : > { %v11041_v56 = vmul.f32 %v9090_v5, %v8689_v11  ;;  %v15317_v18 = vadd.f32 %v15084_v46, %v6540_v16  ;;  %v8300_v30 = vmul.f32 %v15323_v26, %v15323_v26 }
 0x132   : > { %v9094_v19 = vmul.f32 0.5, %v9093_v17 }
 0x133   : > { %v11241_v20 = vmul.f32 %v15303_v13, %v11041_v56  ;;  %v7531_v24 = vmul.f32 %v15317_v18, %v15317_v18 }
 0x134   : > { %v9095_v25 = vsub.f32 1.5, %v9094_v19  ;;  %v4395_v27 = vpop.f32.mrf.mxu2  ;;  %v1621_v39 = vpop.f32.mrf.mxu0 }
 0x135   : > { %v6079_v31 = vpop.f32.mrf.mxu3  ;;  %v14390_v34 = vpop.eup %14389  ;;  %v11441_v36 = vadd.f32 %v15314_v50, %v11241_v20  ;;  %v4857_v37 = vadd.f32 %v4395_v27, %v2908_v23  ;;  %6954 = vadd.xlane.f32.xlu0 %v15317_v18  ;;  %7745 = vadd.xlane.f32.xlu1 %v7531_v24 }
 0x136   : > { %v2910_v40 = vpop.f32.mrf.mxu1  ;;  %v9096_v45 = vmul.f32 %v14388_v62, %v9095_v25  ;;  %v9102_v48 = vmul.f32 %v14390_v34, %v15293_v0  ;;  %v6927_v49 = vpop.xlane.xlu2 %6926  ;;  %vm9108_vm8 = vweird.f32 %v14390_v34  ;;  %v8691_v25 = vsub.f32 %v15107_v8, %v15278_v43 }
 0x137   : > { %v7716_v51 = vpop.xlane.xlu1 %7715  ;;  %11637 = vst [vmem:[%s15334_s24] sm:$0xff] %v11441_v36  ;;  %v6541_v57 = vadd.f32 %v6079_v31, %v4857_v37  ;;  %12371 = vmatmul.msk.bf16.gmra.mxu0 %vm1267_vm0, %v14057_v32  ;;  %v2911_v6 = vadd.f32 %v2910_v40, %v1621_v39  ;;  %v15352_v7 = vmul.f32 %v15231_v41, %v6927_v49  ;;  %vm9109_vm10 = vmor %vm9107_vm9, %vm9108_vm8  ;;  %v14058_v49 = vld [vmem:[%s14992_s13 + $0x98] sm:$0xff] }
 0x138   : > { %v8104_v59 = vmul.f32 %v7716_v51, %v15231_v41  ;;  %v9100_v60 = vsel %vm9099_vm7, %v14388_v62, %v9096_v45  ;;  %v9103_v61 = vmul.f32 %v14390_v34, %v9102_v48  ;;  %12865 = vmatmul.msk.bf16.gmra.mxu1 %vm1267_vm0, %v13958_v33  ;;  %v13959_v51 = vld [vmem:[%s14997_s19 + $0x98] sm:$0xff] }
 0x139   : > { %v11042_v1 = vmul.f32 %v9100_v60, %v8690_v53  ;;  %v15346_v2 = vadd.f32 %v15084_v46, %v6541_v57  ;;  %13361 = vmatmul.msk.bf16.gmra.mxu2 %vm1267_vm0, %v14156_v44  ;;  %v8301_v27 = vmul.f32 %v15352_v7, %v15352_v7  ;;  %v14157_v60 = vld [vmem:[%s15004_s22 + $0x98] sm:$0xff] }
 0x13a   : > { %v9104_v63 = vmul.f32 0.5, %v9103_v61  ;;  %v8496_v12 = vsub.f32 %v8104_v59, %v8300_v30  ;;  %13857 = vmatmul.msk.bf16.gmra.mxu3 %vm1267_vm0, %v14255_v52 }
 0x13b   : > { %v11242_v62 = vmul.f32 %v15303_v13, %v11042_v1  ;;  %v7532_v9 = vmul.f32 %v15346_v2, %v15346_v2  ;;  %v14256_v1 = vld [vmem:[%s15009_s25 + $0x98] sm:$0xff] }
 0x13c   : > { %v9105_v10 = vsub.f32 1.5, %v9104_v63  ;;  %v15356_v11 = vadd.f32 1e-05, %v8496_v12  ;;  %v4398_v16 = vpop.f32.mrf.mxu2  ;;  %v1623_v19 = vpop.f32.mrf.mxu0 }
 0x13d   : > { %v6082_v5 = vpop.f32.mrf.mxu3  ;;  %v11442_v17 = vadd.f32 %v15314_v50, %v11242_v62  ;;  %v4858_v56 = vadd.f32 %v4398_v16, %v2911_v6  ;;  %7747 = vadd.xlane.f32.xlu2 %v7532_v9  ;;  %6956 = vadd.xlane.f32.xlu1 %v15346_v2 }
 0x13e   : > { %v2912_v20 = vpop.f32.mrf.mxu1  ;;  %v9106_v23 = vmul.f32 %v14390_v34, %v9105_v10  ;;  %14391 = vrsqrt.f32 %v15356_v11  ;;  %v7718_v24 = vpop.xlane.xlu2 %7717  ;;  %vm9117_vm12 = vweird.f32 %v15356_v11 }
 0x13f   : > { %11638 = vst [vmem:[%s15334_s24 + $0x8] sm:$0xff] %v11442_v17  ;;  %v6542_v31 = vadd.f32 %v6082_v5, %v4858_v56  ;;  %v8105_v32 = vmul.f32 %v7718_v24, %v15231_v41  ;;  %v2913_v45 = vadd.f32 %v2912_v20, %v1623_v19 }
 0x140   : > { %v9110_v33 = vsel %vm9109_vm10, %v14390_v34, %v9106_v23  ;;  %v7720_v36 = vpop.xlane.xlu0 %7719 }
 0x141   : > { %v11043_v0 = vmul.f32 %v9110_v33, %v8691_v25  ;;  %v15370_v37 = vadd.f32 %v15084_v46, %v6542_v31  ;;  %v8497_v39 = vsub.f32 %v8105_v32, %v8301_v27  ;;  %v8106_v12 = vmul.f32 %v7720_v36, %v15231_v41 }
 0x143   : > { %v11243_v40 = vmul.f32 %v15303_v13, %v11043_v0  ;;  %v15373_v8 = vadd.f32 1e-05, %v8497_v39  ;;  %v7533_v43 = vmul.f32 %v15370_v37, %v15370_v37 }
 0x144   : > { %v14392_v44 = vpop.eup %14391  ;;  %v4400_v48 = vpop.f32.mrf.mxu2 }
 0x145   : > { %v6084_v34 = vpop.f32.mrf.mxu3  ;;  %v11443_v52 = vadd.f32 %v15314_v50, %v11243_v40  ;;  %v9112_v53 = vmul.f32 %v14392_v44, %v15356_v11  ;;  %14393 = vrsqrt.f32 %v15373_v8  ;;  %6958 = vadd.xlane.f32.xlu2 %v15370_v37  ;;  %7749 = vadd.xlane.f32.xlu0 %v7533_v43  ;;  %v1626_v57 = vpop.f32.mrf.mxu0  ;;  %v4859_v61 = vadd.f32 %v4400_v48, %v2913_v45 }
 0x146   : > { %v2915_v59 = vpop.f32.mrf.mxu1  ;;  %v6929_v30 = vpop.xlane.xlu2 %6928  ;;  %vm9118_vm11 = vweird.f32 %v14392_v44  ;;  %vm9127_vm15 = vweird.f32 %v15373_v8 }
 0x147   : > { %11639 = vst [vmem:[%s15334_s24 + $0x10] sm:$0xff] %v11443_v52  ;;  %v9113_v6 = vmul.f32 %v14392_v44, %v9112_v53  ;;  %v15387_v63 = vmul.f32 %v15231_v41, %v6929_v30  ;;  %v6543_v62 = vadd.f32 %v6084_v34, %v4859_v61  ;;  %12372 = vmatmul.msk.bf16.gmra.mxu0 %vm1267_vm0, %v14058_v49  ;;  %vm9119_vm13 = vmor %vm9117_vm12, %vm9118_vm11 }
 0x148   : > { %v6931_v9 = vpop.xlane.xlu0 %6930  ;;  %v7722_v10 = vpop.xlane.xlu1 %7721  ;;  %12866 = vmatmul.msk.bf16.gmra.mxu1 %vm1267_vm0, %v13959_v51  ;;  %v2916_v5 = vadd.f32 %v2915_v59, %v1626_v57  ;;  %v8692_v34 = vsub.f32 %v15119_v21, %v15323_v26 }
 0x149   : > { %v9114_v16 = vmul.f32 0.5, %v9113_v6  ;;  %v8302_v17 = vmul.f32 %v15387_v63, %v15387_v63  ;;  %v15395_v56 = vmul.f32 %v15231_v41, %v6931_v9  ;;  %13362 = vmatmul.msk.bf16.gmra.mxu2 %vm1267_vm0, %v14157_v60  ;;  %v15399_v19 = vadd.f32 %v15084_v46, %v6543_v62 }
 0x14a   : > { %13858 = vmatmul.msk.bf16.gmra.mxu3 %vm1267_vm0, %v14256_v1  ;;  %v8107_v27 = vmul.f32 %v7722_v10, %v15231_v41 }
 0x14b   : > { %v14394_v20 = vpop.eup %14393  ;;  %v9115_v23 = vsub.f32 1.5, %v9114_v16  ;;  %v8498_v24 = vsub.f32 %v8106_v12, %v8302_v17  ;;  %v8303_v25 = vmul.f32 %v15395_v56, %v15395_v56  ;;  %v7534_v36 = vmul.f32 %v15399_v19, %v15399_v19  ;;  %v13960_v17 = vld [vmem:[%s14997_s19 + $0xa0] sm:$0xff] }
 0x14c   : > { %v9122_v31 = vmul.f32 %v14394_v20, %v15373_v8  ;;  %v4403_v32 = vpop.f32.mrf.mxu2  ;;  %vm9128_vm14 = vweird.f32 %v14394_v20  ;;  %v14158_v8 = vld [vmem:[%s15004_s22 + $0xa0] sm:$0xff] }
 0x14d   : > { %v6087_v33 = vpop.f32.mrf.mxu3  ;;  %v9116_v0 = vmul.f32 %v14392_v44, %v9115_v23  ;;  %v15409_v39 = vadd.f32 1e-05, %v8498_v24  ;;  %v8499_v40 = vsub.f32 %v8107_v27, %v8303_v25  ;;  %v4860_v43 = vadd.f32 %v4403_v32, %v2916_v5  ;;  %6960 = vadd.xlane.f32.xlu0 %v15399_v19  ;;  %v1628_v45 = vpop.f32.mrf.mxu0  ;;  %7751 = vadd.xlane.f32.xlu1 %v7534_v36  ;;  %v14059_v5 = vld [vmem:[%s14992_s13 + $0xa0] sm:$0xff]  ;;  %vm9129_vm1 = vmor %vm9127_vm15, %vm9128_vm14 }
 0x14e   : > { %v2917_v48 = vpop.f32.mrf.mxu1  ;;  %v9123_v11 = vmul.f32 %v14394_v20, %v9122_v31  ;;  %v8693_v24 = vsub.f32 %v15125_v29, %v15352_v7 }
 0x14f   : > { %v9120_v49 = vsel %vm9119_vm13, %v14392_v44, %v9116_v0  ;;  %14395 = vrsqrt.f32 %v15409_v39  ;;  %v15416_v51 = vadd.f32 1e-05, %v8499_v40  ;;  %v6544_v57 = vadd.f32 %v6087_v33, %v4860_v43  ;;  %v14257_v0 = vld [vmem:[%s15009_s25 + $0xa0] sm:$0xff] }
 0x150   : > { %v11044_v52 = vmul.f32 %v9120_v49, %v8692_v34  ;;  %v9124_v53 = vmul.f32 0.5, %v9123_v11  ;;  %v7724_v59 = vpop.xlane.xlu2 %7723  ;;  %v6933_v60 = vpop.xlane.xlu1 %6932  ;;  %v2918_v30 = vadd.f32 %v2917_v48, %v1628_v45  ;;  %vm9137_vm3 = vweird.f32 %v15409_v39 }
 0x151   : > { %14397 = vrsqrt.f32 %v15416_v51  ;;  %v15420_v21 = vmul.f32 %v15231_v41, %v6933_v60  ;;  %v15424_v44 = vadd.f32 %v15084_v46, %v6544_v57  ;;  %v8108_v1 = vmul.f32 %v7724_v59, %v15231_v41 }
 0x152   : > { %v11244_v26 = vmul.f32 %v15303_v13, %v11044_v52  ;;  %v9125_v61 = vsub.f32 1.5, %v9124_v53  ;;  %vm9147_vm6 = vweird.f32 %v15416_v51 }
 0x153   : > { %v8304_v6 = vmul.f32 %v15420_v21, %v15420_v21  ;;  %v7535_v16 = vmul.f32 %v15424_v44, %v15424_v44 }
 0x154   : > { %v11444_v12 = vadd.f32 %v15314_v50, %v11244_v26  ;;  %v9126_v62 = vmul.f32 %v14394_v20, %v9125_v61  ;;  %v4405_v9 = vpop.f32.mrf.mxu2 }
 0x155   : > { %v6089_v10 = vpop.f32.mrf.mxu3  ;;  %v15435_v23 = vpop.eup %14395  ;;  %v8500_v25 = vsub.f32 %v8108_v1, %v8304_v6  ;;  %v4861_v27 = vadd.f32 %v4405_v9, %v2918_v30  ;;  %7753 = vadd.xlane.f32.xlu2 %v7535_v16  ;;  %6962 = vadd.xlane.f32.xlu1 %v15424_v44 }
 0x156   : > { %v1631_v31 = vpop.f32.mrf.mxu0  ;;  %v2920_v32 = vpop.f32.mrf.mxu1  ;;  %11640 = vst [vmem:[%s15334_s24 + $0x18] sm:$0xff] %v11444_v12  ;;  %v9130_v33 = vsel %vm9129_vm1, %v14394_v20, %v9126_v62  ;;  %v9132_v36 = vmul.f32 %v15435_v23, %v15409_v39  ;;  %vm9138_vm2 = vweird.f32 %v15435_v23  ;;  %v8695_v39 = vsub.f32 %v15146_v54, %v15395_v56  ;;  %v15491_v54 = vld [vmem:[%s20450_s5] ss:$0 sm:$0xff] }
 0x157   : > { %v14398_v40 = vpop.eup %14397  ;;  %v11045_v43 = vmul.f32 %v9130_v33, %v8693_v24  ;;  %v15446_v45 = vadd.f32 1e-05, %v8500_v25  ;;  %v6545_v29 = vadd.f32 %v6089_v10, %v4861_v27  ;;  %12373 = vmatmul.msk.bf16.gmra.mxu0 %vm1267_vm0, %v14059_v5  ;;  %v2921_v52 = vadd.f32 %v2920_v32, %v1631_v31  ;;  %vm9139_vm5 = vmor %vm9137_vm3, %vm9138_vm2 }
 0x158   : > { %v9133_v7 = vmul.f32 %v15435_v23, %v9132_v36  ;;  %v9142_v48 = vmul.f32 %v14398_v40, %v15416_v51  ;;  %v6935_v34 = vpop.xlane.xlu2 %6934  ;;  %v7726_v11 = vpop.xlane.xlu0 %7725  ;;  %12867 = vmatmul.msk.bf16.gmra.mxu1 %vm1267_vm0, %v13960_v17  ;;  %vm9148_vm4 = vweird.f32 %v14398_v40  ;;  %v8694_v25 = vsub.f32 %v15137_v42, %v15387_v63 }
 0x159   : > { %v11245_v20 = vmul.f32 %v15303_v13, %v11045_v43  ;;  %14399 = vrsqrt.f32 %v15446_v45  ;;  %v15455_v49 = vadd.f32 %v15084_v46, %v6545_v29  ;;  %13363 = vmatmul.msk.bf16.gmra.mxu2 %vm1267_vm0, %v14158_v8  ;;  %v15459_v59 = vmul.f32 %v15231_v41, %v6935_v34  ;;  %vm9149_vm7 = vmor %vm9147_vm6, %vm9148_vm4 }
 0x15a   : > { %v9134_v53 = vmul.f32 0.5, %v9133_v7  ;;  %v9143_v57 = vmul.f32 %v14398_v40, %v9142_v48  ;;  %13859 = vmatmul.msk.bf16.gmra.mxu3 %vm1267_vm0, %v14257_v0  ;;  %v8109_v1 = vmul.f32 %v7726_v11, %v15231_v41  ;;  %vm9157_vm9 = vweird.f32 %v15446_v45 }
 0x15b   : > { %v11445_v60 = vadd.f32 %v15314_v50, %v11245_v20  ;;  %v7536_v26 = vmul.f32 %v15455_v49, %v15455_v49  ;;  %v8305_v30 = vmul.f32 %v15459_v59, %v15459_v59 }
 0x15c   : > { %v9135_v46 = vsub.f32 1.5, %v9134_v53  ;;  %v9144_v61 = vmul.f32 0.5, %v9143_v57  ;;  %v4408_v6 = vpop.f32.mrf.mxu2  ;;  %v14060_v53 = vld [vmem:[%s14992_s13 + $0xa8] sm:$0xff] }
 0x15d   : > { %v6092_v12 = vpop.f32.mrf.mxu3  ;;  %11641 = vst [vmem:[%s15334_s24 + $0x20] sm:$0xff] %v11445_v60  ;;  %v4862_v62 = vadd.f32 %v4408_v6, %v2921_v52  ;;  %7755 = vadd.xlane.f32.xlu0 %v7536_v26  ;;  %v8501_v17 = vsub.f32 %v8109_v1, %v8305_v30  ;;  %6964 = vadd.xlane.f32.xlu2 %v15455_v49  ;;  %v13961_v57 = vld [vmem:[%s14997_s19 + $0xa8] sm:$0xff] }
 0x15e   : > { %v1633_v9 = vpop.f32.mrf.mxu0  ;;  %v2922_v10 = vpop.f32.mrf.mxu1  ;;  %v9136_v16 = vmul.f32 %v15435_v23, %v9135_v46  ;;  %v9145_v5 = vsub.f32 1.5, %v9144_v61  ;;  %v14159_v1 = vld [vmem:[%s15004_s22 + $0xa8] sm:$0xff] }
 0x15f   : > { %v15473_v24 = vpop.eup %14399  ;;  %v6546_v27 = vadd.f32 %v6092_v12, %v4862_v62  ;;  %v15486_v42 = vadd.f32 1e-05, %v8501_v17  ;;  %v2923_v7 = vadd.f32 %v2922_v10, %v1633_v9  ;;  %v14258_v62 = vld [vmem:[%s15009_s25 + $0xa8] sm:$0xff] }
 0x160   : > { %v9140_v31 = vsel %vm9139_vm5, %v15435_v23, %v9136_v16  ;;  %v9146_v32 = vmul.f32 %v14398_v40, %v9145_v5  ;;  %v9152_v8 = vmul.f32 %v15473_v24, %v15446_v45  ;;  %v6937_v33 = vpop.xlane.xlu0 %6936  ;;  %v7728_v36 = vpop.xlane.xlu1 %7727  ;;  %vm9158_vm8 = vweird.f32 %v15473_v24 }
 0x161   : > { %v11046_v0 = vmul.f32 %v9140_v31, %v8694_v25  ;;  %v15494_v63 = vadd.f32 %v15491_v54, %v6546_v27  ;;  %v15497_v56 = vmul.f32 %v15231_v41, %v6937_v33  ;;  %14401 = vrsqrt.f32 %v15486_v42  ;;  %vm9159_vm10 = vmor %vm9157_vm9, %vm9158_vm8 }
 0x162   : > { %v9150_v51 = vsel %vm9149_vm7, %v14398_v40, %v9146_v32  ;;  %v9153_v23 = vmul.f32 %v15473_v24, %v9152_v8  ;;  %v8110_v11 = vmul.f32 %v7728_v36, %v15231_v41  ;;  %v8696_v16 = vsub.f32 %v15159_v4, %v15420_v21 }
 0x163   : > { %v11246_v43 = vmul.f32 %v15303_v13, %v11046_v0  ;;  %v11047_v29 = vmul.f32 %v9150_v51, %v8695_v39  ;;  %v8306_v34 = vmul.f32 %v15497_v56, %v15497_v56  ;;  %v7537_v40 = vmul.f32 %v15494_v63, %v15494_v63 }
 0x164   : > { %v9154_v48 = vmul.f32 0.5, %v9153_v23  ;;  %v4410_v20 = vpop.f32.mrf.mxu2  ;;  %vm9167_vm12 = vweird.f32 %v15486_v42 }
 0x165   : > { %v6094_v52 = vpop.f32.mrf.mxu3  ;;  %v11446_v60 = vadd.f32 %v15314_v50, %v11246_v43  ;;  %v11247_v26 = vmul.f32 %v15303_v13, %v11047_v29  ;;  %v4863_v46 = vadd.f32 %v4410_v20, %v2923_v7  ;;  %6966 = vadd.xlane.f32.xlu0 %v15494_v63  ;;  %v8502_v12 = vsub.f32 %v8110_v11, %v8306_v34 }
 0x166   : > { %v1636_v61 = vpop.f32.mrf.mxu0  ;;  %v2925_v30 = vpop.f32.mrf.mxu1  ;;  %v9155_v6 = vsub.f32 1.5, %v9154_v48  ;;  %7757 = vadd.xlane.f32.xlu1 %v7537_v40 }
 0x167   : > { %11642 = vst [vmem:[%s15334_s24 + $0x28] sm:$0xff] %v11446_v60  ;;  %v11447_v9 = vadd.f32 %v15314_v50, %v11247_v26  ;;  %v6547_v10 = vadd.f32 %v6094_v52, %v4863_v46  ;;  %v15521_v17 = vadd.f32 1e-05, %v8502_v12  ;;  %12374 = vmatmul.msk.bf16.gmra.mxu0 %vm1267_vm0, %v14060_v53  ;;  %v14402_v27 = vpop.eup %14401  ;;  %v2926_v4 = vadd.f32 %v2925_v30, %v1636_v61 }
 0x168   : > { %v9156_v5 = vmul.f32 %v15473_v24, %v9155_v6  ;;  %v7730_v25 = vpop.xlane.xlu2 %7729  ;;  %v6939_v39 = vpop.xlane.xlu1 %6938  ;;  %12868 = vmatmul.msk.bf16.gmra.mxu1 %vm1267_vm0, %v13961_v57  ;;  %v9162_v32 = vmul.f32 %v14402_v27, %v15486_v42  ;;  %vm9168_vm11 = vweird.f32 %v14402_v27  ;;  %v8697_v6 = vsub.f32 %v15167_v14, %v15459_v59 }
 0x169   : > { %11643 = vst [vmem:[%s15334_s24 + $0x30] sm:$0xff] %v11447_v9  ;;  %v15529_v31 = vadd.f32 %v15491_v54, %v6547_v10  ;;  %v15532_v21 = vmul.f32 %v15231_v41, %v6939_v39  ;;  %13364 = vmatmul.msk.bf16.gmra.mxu2 %vm1267_vm0, %v14159_v1  ;;  %14403 = vrsqrt.f32 %v15521_v17  ;;  %v8111_v33 = vmul.f32 %v7730_v25, %v15231_v41  ;;  %vm9169_vm13 = vmor %vm9167_vm12, %vm9168_vm11  ;;  %v14061_v39 = vld [vmem:[%s14992_s13 + $0xb0] sm:$0xff] }
 0x16a   : > { %v9160_v45 = vsel %vm9159_vm10, %v15473_v24, %v9156_v5  ;;  %13860 = vmatmul.msk.bf16.gmra.mxu3 %vm1267_vm0, %v14258_v62  ;;  %v9163_v0 = vmul.f32 %v14402_v27, %v9162_v32  ;;  %vm9177_vm15 = vweird.f32 %v15521_v17 }
 0x16b   : > { %v11048_v8 = vmul.f32 %v9160_v45, %v8696_v16  ;;  %v8307_v36 = vmul.f32 %v15532_v21, %v15532_v21  ;;  %v7538_v43 = vmul.f32 %v15529_v31, %v15529_v31 }
 0x16c   : > { %v4413_v51 = vpop.f32.mrf.mxu2  ;;  %v9164_v11 = vmul.f32 0.5, %v9163_v0 }
 0x16d   : > { %v6097_v23 = vpop.f32.mrf.mxu3  ;;  %v11248_v24 = vmul.f32 %v15303_v13, %v11048_v8  ;;  %v8503_v29 = vsub.f32 %v8111_v33, %v8307_v36  ;;  %v4864_v7 = vadd.f32 %v4413_v51, %v2926_v4  ;;  %7759 = vadd.xlane.f32.xlu2 %v7538_v43  ;;  %v13962_v4 = vld [vmem:[%s14997_s19 + $0xb0] sm:$0xff] }
 0x16e   : > { %v1638_v48 = vpop.f32.mrf.mxu0  ;;  %v2927_v34 = vpop.f32.mrf.mxu1  ;;  %6968 = vadd.xlane.f32.xlu1 %v15529_v31  ;;  %v9165_v57 = vsub.f32 1.5, %v9164_v11  ;;  %v14160_v33 = vld [vmem:[%s15004_s22 + $0xb0] sm:$0xff] }
 0x16f   : > { %v11448_v20 = vadd.f32 %v15314_v50, %v11248_v24  ;;  %v15547_v52 = vadd.f32 1e-05, %v8503_v29  ;;  %v6548_v40 = vadd.f32 %v6097_v23, %v4864_v7  ;;  %v15549_v53 = vpop.eup %14403  ;;  %v2928_v62 = vadd.f32 %v2927_v34, %v1638_v48  ;;  %v14259_v36 = vld [vmem:[%s15009_s25 + $0xb0] sm:$0xff] }
 0x170   : > { %v6941_v60 = vpop.xlane.xlu2 %6940  ;;  %v7732_v26 = vpop.xlane.xlu0 %7731  ;;  %v9172_v46 = vmul.f32 %v15549_v53, %v15521_v17  ;;  %v9166_v61 = vmul.f32 %v14402_v27, %v9165_v57  ;;  %vm9178_vm14 = vweird.f32 %v15549_v53  ;;  %v8698_v57 = vsub.f32 %v15179_v28, %v15497_v56 }
 0x171   : > { %11644 = vst [vmem:[%s15334_s24 + $0x38] sm:$0xff] %v11448_v20  ;;  %14405 = vrsqrt.f32 %v15547_v52  ;;  %v15557_v30 = vadd.f32 %v15491_v54, %v6548_v40  ;;  %v15560_v1 = vmul.f32 %v15231_v41, %v6941_v60  ;;  %v8112_v42 = vmul.f32 %v7732_v26, %v15231_v41  ;;  %vm9179_vm1 = vmor %vm9177_vm15, %vm9178_vm14 }
 0x172   : > { %v9173_v12 = vmul.f32 %v15549_v53, %v9172_v46  ;;  %v9170_v9 = vsel %vm9169_vm13, %v14402_v27, %v9166_v61  ;;  %vm9187_vm3 = vweird.f32 %v15547_v52 }
 0x173   : > { %v8308_v10 = vmul.f32 %v15560_v1, %v15560_v1  ;;  %v7539_v25 = vmul.f32 %v15557_v30, %v15557_v30  ;;  %v11049_v14 = vmul.f32 %v9170_v9, %v8697_v6 }
 0x174   : > { %v4415_v16 = vpop.f32.mrf.mxu2  ;;  %v9174_v59 = vmul.f32 0.5, %v9173_v12 }
 0x175   : > { %v6099_v5 = vpop.f32.mrf.mxu3  ;;  %v4865_v45 = vadd.f32 %v4415_v16, %v2928_v62  ;;  %v8504_v27 = vsub.f32 %v8112_v42, %v8308_v10  ;;  %6970 = vadd.xlane.f32.xlu2 %v15557_v30  ;;  %7761 = vadd.xlane.f32.xlu0 %v7539_v25  ;;  %v11249_v51 = vmul.f32 %v15303_v13, %v11049_v14 }
 0x176   : > { %v1641_v32 = vpop.f32.mrf.mxu0  ;;  %v2930_v8 = vpop.f32.mrf.mxu1  ;;  %v9175_v23 = vsub.f32 1.5, %v9174_v59 }
 0x177   : > { %v14406_v0 = vpop.eup %14405  ;;  %v6549_v43 = vadd.f32 %v6099_v5, %v4865_v45  ;;  %v15579_v29 = vadd.f32 1e-05, %v8504_v27  ;;  %v2931_v7 = vadd.f32 %v2930_v8, %v1641_v32  ;;  %12375 = vmatmul.msk.bf16.gmra.mxu0 %vm1267_vm0, %v14061_v39  ;;  %v11449_v11 = vadd.f32 %v15314_v50, %v11249_v51 }
 0x178   : > { %v9182_v24 = vmul.f32 %v14406_v0, %v15547_v52  ;;  %v6943_v48 = vpop.xlane.xlu0 %6942  ;;  %v7734_v34 = vpop.xlane.xlu1 %7733  ;;  %12869 = vmatmul.msk.bf16.gmra.mxu1 %vm1267_vm0, %v13962_v4  ;;  %v9176_v20 = vmul.f32 %v15549_v53, %v9175_v23  ;;  %vm9188_vm2 = vweird.f32 %v14406_v0  ;;  %v8699_v8 = vsub.f32 %v15187_v38, %v15532_v21 }
 0x179   : > { %v15586_v40 = vadd.f32 %v15491_v54, %v6549_v43  ;;  %v15589_v17 = vmul.f32 %v15231_v41, %v6943_v48  ;;  %13365 = vmatmul.msk.bf16.gmra.mxu2 %vm1267_vm0, %v14160_v33  ;;  %14407 = vrsqrt.f32 %v15579_v29  ;;  %11645 = vst [vmem:[%s15334_s24 + $0x40] sm:$0xff] %v11449_v11  ;;  %v8113_v61 = vmul.f32 %v7734_v34, %v15231_v41  ;;  %vm9189_vm4 = vmor %vm9187_vm3, %vm9188_vm2  ;;  %v14062_v48 = vld [vmem:[%s14992_s13 + $0xb8] sm:$0xff] }
 0x17a   : > { %v9183_v60 = vmul.f32 %v14406_v0, %v9182_v24  ;;  %13861 = vmatmul.msk.bf16.gmra.mxu3 %vm1267_vm0, %v14259_v36  ;;  %v9180_v26 = vsel %vm9179_vm1, %v15549_v53, %v9176_v20  ;;  %v13963_v34 = vld [vmem:[%s14997_s19 + $0xb8] sm:$0xff]  ;;  %vm9197_vm6 = vweird.f32 %v15579_v29 }
 0x17b   : > { %v8309_v46 = vmul.f32 %v15589_v17, %v15589_v17  ;;  %v7540_v6 = vmul.f32 %v15586_v40, %v15586_v40  ;;  %v11050_v28 = vmul.f32 %v9180_v26, %v8698_v57 }
 0x17c   : > { %v9184_v56 = vmul.f32 0.5, %v9183_v60  ;;  %v4418_v12 = vpop.f32.mrf.mxu2 }
 0x17d   : > { %v6102_v62 = vpop.f32.mrf.mxu3  ;;  %v8505_v9 = vsub.f32 %v8113_v61, %v8309_v46  ;;  %v4866_v10 = vadd.f32 %v4418_v12, %v2931_v7  ;;  %7763 = vadd.xlane.f32.xlu1 %v7540_v6  ;;  %v11250_v5 = vmul.f32 %v15303_v13, %v11050_v28  ;;  %6972 = vadd.xlane.f32.xlu0 %v15586_v40  ;;  %v14161_v61 = vld [vmem:[%s15004_s22 + $0xb8] sm:$0xff] }
 0x17e   : > { %v1643_v42 = vpop.f32.mrf.mxu0  ;;  %v2932_v16 = vpop.f32.mrf.mxu1  ;;  %v9185_v53 = vsub.f32 1.5, %v9184_v56  ;;  %v14260_v6 = vld [vmem:[%s15009_s25 + $0xb8] sm:$0xff] }
 0x17f   : > { %v15607_v25 = vadd.f32 1e-05, %v8505_v9  ;;  %v6550_v39 = vadd.f32 %v6102_v62, %v4866_v10  ;;  %v14408_v4 = vpop.eup %14407  ;;  %v11450_v14 = vadd.f32 %v15314_v50, %v11250_v5  ;;  %v2933_v43 = vadd.f32 %v2932_v16, %v1643_v42 }
 0x180   : > { %v9186_v59 = vmul.f32 %v14406_v0, %v9185_v53  ;;  %v7736_v45 = vpop.xlane.xlu2 %7735  ;;  %v6945_v32 = vpop.xlane.xlu1 %6944  ;;  %v9192_v33 = vmul.f32 %v14408_v4, %v15579_v29  ;;  %vm9198_vm5 = vweird.f32 %v14408_v4  ;;  %v8700_v29 = vsub.f32 %v15199_v55, %v15560_v1 }
 0x181   : > { %14409 = vrsqrt.f32 %v15607_v25  ;;  %11646 = vst [vmem:[%s15334_s24 + $0x48] sm:$0xff] %v11450_v14  ;;  %v15617_v36 = vadd.f32 %v15491_v54, %v6550_v39  ;;  %v15620_v51 = vmul.f32 %v15231_v41, %v6945_v32  ;;  %v8114_v38 = vmul.f32 %v7736_v45, %v15231_v41  ;;  %vm9199_vm7 = vmor %vm9197_vm6, %vm9198_vm5 }
 0x182   : > { %v9190_v27 = vsel %vm9189_vm4, %v14406_v0, %v9186_v59  ;;  %v9193_v23 = vmul.f32 %v14408_v4, %v9192_v33  ;;  %vm9207_vm9 = vweird.f32 %v15607_v25 }
 0x183   : > { %v11051_v52 = vmul.f32 %v9190_v27, %v8699_v8  ;;  %v8310_v21 = vmul.f32 %v15620_v51, %v15620_v51  ;;  %v7541_v0 = vmul.f32 %v15617_v36, %v15617_v36 }
 0x184   : > { %v4420_v24 = vpop.f32.mrf.mxu2  ;;  %v9194_v20 = vmul.f32 0.5, %v9193_v23 }
 0x185   : > { %v6104_v7 = vpop.f32.mrf.mxu3  ;;  %v11251_v11 = vmul.f32 %v15303_v13, %v11051_v52  ;;  %v4867_v57 = vadd.f32 %v4420_v24, %v2933_v43  ;;  %6974 = vadd.xlane.f32.xlu1 %v15617_v36  ;;  %v8506_v46 = vsub.f32 %v8114_v38, %v8310_v21  ;;  %7765 = vadd.xlane.f32.xlu2 %v7541_v0 }
 0x186   : > { %v1646_v60 = vpop.f32.mrf.mxu0  ;;  %v2935_v26 = vpop.f32.mrf.mxu1  ;;  %v9195_v12 = vsub.f32 1.5, %v9194_v20 }
 0x187   : > { %v14410_v28 = vpop.eup %14409  ;;  %v11451_v56 = vadd.f32 %v15314_v50, %v11251_v11  ;;  %v6551_v62 = vadd.f32 %v6104_v7, %v4867_v57  ;;  %v15636_v10 = vadd.f32 1e-05, %v8506_v46  ;;  %12376 = vmatmul.msk.bf16.gmra.mxu0 %vm1267_vm0, %v14062_v48  ;;  %v2936_v39 = vadd.f32 %v2935_v26, %v1646_v60 }
 0x188   : > { %v9202_v9 = vmul.f32 %v14410_v28, %v15607_v25  ;;  %v6947_v42 = vpop.xlane.xlu2 %6946  ;;  %v7738_v16 = vpop.xlane.xlu0 %7737  ;;  %12870 = vmatmul.msk.bf16.gmra.mxu1 %vm1267_vm0, %v13963_v34  ;;  %v9196_v5 = vmul.f32 %v14408_v4, %v9195_v12  ;;  %vm9208_vm8 = vweird.f32 %v14410_v28  ;;  %v8701_v60 = vsub.f32 %v15207_v3, %v15589_v17 }
 0x189   : > { %11647 = vst [vmem:[%s15334_s24 + $0x50] sm:$0xff] %v11451_v56  ;;  %v15642_v53 = vadd.f32 %v15491_v54, %v6551_v62  ;;  %v15645_v14 = vmul.f32 %v15231_v41, %v6947_v42  ;;  %14411 = vrsqrt.f32 %v15636_v10  ;;  %13366 = vmatmul.msk.bf16.gmra.mxu2 %vm1267_vm0, %v14161_v61  ;;  %v8115_v8 = vmul.f32 %v7738_v16, %v15231_v41  ;;  %vm9209_vm10 = vmor %vm9207_vm9, %vm9208_vm8  ;;  %v14063_v42 = vld [vmem:[%s14992_s13 + $0xc0] sm:$0xff] }
 0x18a   : > { %v9203_v59 = vmul.f32 %v14410_v28, %v9202_v9  ;;  %13862 = vmatmul.msk.bf16.gmra.mxu3 %vm1267_vm0, %v14260_v6  ;;  %v9200_v45 = vsel %vm9199_vm7, %v14408_v4, %v9196_v5  ;;  %v13964_v16 = vld [vmem:[%s14997_s19 + $0xc0] sm:$0xff]  ;;  %vm9217_vm12 = vweird.f32 %v15636_v10 }
 0x18b   : > { %v8311_v32 = vmul.f32 %v15645_v14, %v15645_v14  ;;  %v7542_v33 = vmul.f32 %v15642_v53, %v15642_v53  ;;  %v11052_v27 = vmul.f32 %v9200_v45, %v8700_v29 }
 0x18c   : > { %v9204_v55 = vmul.f32 0.5, %v9203_v59  ;;  %v4423_v1 = vpop.f32.mrf.mxu2 }
 0x18d   : > { %v6107_v52 = vpop.f32.mrf.mxu3  ;;  %v8507_v23 = vsub.f32 %v8115_v8, %v8311_v32  ;;  %v4868_v43 = vadd.f32 %v4423_v1, %v2936_v39  ;;  %7767 = vadd.xlane.f32.xlu0 %v7542_v33  ;;  %v11252_v24 = vmul.f32 %v15303_v13, %v11052_v27  ;;  %6976 = vadd.xlane.f32.xlu2 %v15642_v53  ;;  %v14162_v8 = vld [vmem:[%s15004_s22 + $0xc0] sm:$0xff] }
 0x18e   : > { %v1648_v38 = vpop.f32.mrf.mxu0  ;;  %v2937_v21 = vpop.f32.mrf.mxu1  ;;  %v9205_v4 = vsub.f32 1.5, %v9204_v55  ;;  %v14261_v33 = vld [vmem:[%s15009_s25 + $0xc0] sm:$0xff] }
 0x18f   : > { %v15660_v7 = vadd.f32 1e-05, %v8507_v23  ;;  %v6552_v0 = vadd.f32 %v6107_v52, %v4868_v43  ;;  %v14412_v48 = vpop.eup %14411  ;;  %v11452_v34 = vadd.f32 %v15314_v50, %v11252_v24  ;;  %v2938_v12 = vadd.f32 %v2937_v21, %v1648_v38 }
 0x190   : > { %v9206_v11 = vmul.f32 %v14410_v28, %v9205_v4  ;;  %v6949_v20 = vpop.xlane.xlu0 %6948  ;;  %v7740_v57 = vpop.xlane.xlu1 %7739  ;;  %v9212_v26 = vmul.f32 %v14412_v48, %v15636_v10  ;;  %vm9218_vm11 = vweird.f32 %v14412_v48  ;;  %v8702_v10 = vsub.f32 %v15219_v22, %v15620_v51 }
 0x191   : > { %14413 = vrsqrt.f32 %v15660_v7  ;;  %11648 = vst [vmem:[%s15334_s24 + $0x58] sm:$0xff] %v11452_v34  ;;  %v15670_v61 = vadd.f32 %v15491_v54, %v6552_v0  ;;  %v15673_v6 = vmul.f32 %v15231_v41, %v6949_v20  ;;  %v8116_v17 = vmul.f32 %v7740_v57, %v15231_v41  ;;  %vm9219_vm13 = vmor %vm9217_vm12, %vm9218_vm11 }
 0x192   : > { %v9210_v46 = vsel %vm9209_vm10, %v14410_v28, %v9206_v11  ;;  %v9213_v56 = vmul.f32 %v14412_v48, %v9212_v26  ;;  %vm9227_vm15 = vweird.f32 %v15660_v7 }
 0x193   : > { %v11053_v25 = vmul.f32 %v9210_v46, %v8701_v60  ;;  %v8312_v3 = vmul.f32 %v15673_v6, %v15673_v6  ;;  %v7543_v28 = vmul.f32 %v15670_v61, %v15670_v61 }
 0x194   : > { %v4425_v62 = vpop.f32.mrf.mxu2  ;;  %v9214_v39 = vmul.f32 0.5, %v9213_v56 }
 0x195   : > { %v6109_v9 = vpop.f32.mrf.mxu3  ;;  %v11253_v5 = vmul.f32 %v15303_v13, %v11053_v25  ;;  %v4869_v29 = vadd.f32 %v4425_v62, %v2938_v12  ;;  %6978 = vadd.xlane.f32.xlu0 %v15670_v61  ;;  %v8508_v32 = vsub.f32 %v8116_v17, %v8312_v3  ;;  %7769 = vadd.xlane.f32.xlu1 %v7543_v28 }
 0x196   : > { %v1651_v59 = vpop.f32.mrf.mxu0  ;;  %v2940_v45 = vpop.f32.mrf.mxu1  ;;  %v9215_v1 = vsub.f32 1.5, %v9214_v39 }
 0x197   : > { %v14414_v27 = vpop.eup %14413  ;;  %v11453_v55 = vadd.f32 %v15314_v50, %v11253_v5  ;;  %v6553_v52 = vadd.f32 %v6109_v9, %v4869_v29  ;;  %v15689_v23 = vadd.f32 1e-05, %v8508_v32  ;;  %12377 = vmatmul.msk.bf16.gmra.mxu0 %vm1267_vm0, %v14063_v42  ;;  %v2941_v50 = vadd.f32 %v2940_v45, %v1651_v59  ;;  %v15725_v42 = vld [vmem:[%s20452_s7] ss:$0 sm:$0xff] }
 0x198   : > { %v9222_v13 = vmul.f32 %v14414_v27, %v15660_v7  ;;  %v7742_v43 = vpop.xlane.xlu2 %7741  ;;  %v6951_v38 = vpop.xlane.xlu1 %6950  ;;  %12871 = vmatmul.msk.bf16.gmra.mxu1 %vm1267_vm0, %v13964_v16  ;;  %v9216_v21 = vmul.f32 %v14412_v48, %v9215_v1  ;;  %vm9228_vm14 = vweird.f32 %v14414_v27  ;;  %v8703_v59 = vsub.f32 %v15227_v35, %v15645_v14 }
 0x199   : > { %11649 = vst [vmem:[%s15334_s24 + $0x60] sm:$0xff] %v11453_v55  ;;  %v15695_v24 = vadd.f32 %v15491_v54, %v6553_v52  ;;  %v15698_v4 = vmul.f32 %v15231_v41, %v6951_v38  ;;  %14415 = vrsqrt.f32 %v15689_v23  ;;  %13367 = vmatmul.msk.bf16.gmra.mxu2 %vm1267_vm0, %v14162_v8  ;;  %v8117_v11 = vmul.f32 %v7742_v43, %v15231_v41  ;;  %vm9229_vm1 = vmor %vm9227_vm15, %vm9228_vm14  ;;  %v13965_v43 = vld [vmem:[%s14997_s19 + $0xc8] sm:$0xff] }
 0x19a   : > { %v9223_v0 = vmul.f32 %v14414_v27, %v9222_v13  ;;  %13863 = vmatmul.msk.bf16.gmra.mxu3 %vm1267_vm0, %v14261_v33  ;;  %v9220_v34 = vsel %vm9219_vm13, %v14412_v48, %v9216_v21  ;;  %v15714_v48 = vld [vmem:[%s20451_s6] ss:$0 sm:$0xff]  ;;  %v14064_v13 = vld [vmem:[%s14992_s13 + $0xc8] sm:$0xff]  ;;  %vm9237_vm3 = vweird.f32 %v15689_v23 }
 0x19b   : > { %v8313_v20 = vmul.f32 %v15698_v4, %v15698_v4  ;;  %v7544_v57 = vmul.f32 %v15695_v24, %v15695_v24  ;;  %v11054_v60 = vmul.f32 %v9220_v34, %v8702_v10 }
 0x19c   : > { %v9224_v22 = vmul.f32 0.5, %v9223_v0  ;;  %v4428_v51 = vpop.f32.mrf.mxu2 }
 0x19d   : > { %v8509_v26 = vsub.f32 %v8117_v11, %v8313_v20  ;;  %v4870_v46 = vadd.f32 %v4428_v51, %v2941_v50  ;;  %v6112_v25 = vpop.f32.mrf.mxu3  ;;  %7771 = vadd.xlane.f32.xlu2 %v7544_v57  ;;  %v11254_v12 = vmul.f32 %v15714_v48, %v11054_v60  ;;  %6980 = vadd.xlane.f32.xlu1 %v15695_v24  ;;  %v14163_v20 = vld [vmem:[%s15004_s22 + $0xc8] sm:$0xff] }
 0x19e   : > { %v1653_v56 = vpop.f32.mrf.mxu0  ;;  %v9225_v3 = vsub.f32 1.5, %v9224_v22  ;;  %v2942_v17 = vpop.f32.mrf.mxu1  ;;  %v14262_v57 = vld [vmem:[%s15009_s25 + $0xc8] sm:$0xff] }
 0x19f   : > { %v15718_v62 = vadd.f32 1e-05, %v8509_v26  ;;  %v6554_v9 = vadd.f32 %v6112_v25, %v4870_v46  ;;  %v15720_v28 = vpop.eup %14415  ;;  %v11454_v16 = vadd.f32 %v15725_v42, %v11254_v12  ;;  %v2943_v1 = vadd.f32 %v2942_v17, %v1653_v56 }
 0x1a0   : > { %v9226_v5 = vmul.f32 %v14414_v27, %v9225_v3  ;;  %v6953_v39 = vpop.xlane.xlu2 %6952  ;;  %v7744_v29 = vpop.xlane.xlu0 %7743  ;;  %v9232_v45 = vmul.f32 %v15720_v28, %v15689_v23  ;;  %vm9238_vm2 = vweird.f32 %v15720_v28  ;;  %v8704_v23 = vsub.f32 %v15244_v58, %v15673_v6 }
 0x1a1   : > { %14417 = vrsqrt.f32 %v15718_v62  ;;  %11650 = vst [vmem:[%s15334_s24 + $0x68] sm:$0xff] %v11454_v16  ;;  %v15736_v8 = vadd.f32 %v15491_v54, %v6554_v9  ;;  %v15739_v7 = vmul.f32 %v15231_v41, %v6953_v39  ;;  %v8118_v14 = vmul.f32 %v7744_v29, %v15231_v41  ;;  %vm9239_vm4 = vmor %vm9237_vm3, %vm9238_vm2 }
 0x1a2   : > { %v9230_v32 = vsel %vm9229_vm1, %v14414_v27, %v9226_v5  ;;  %v9233_v55 = vmul.f32 %v15720_v28, %v9232_v45  ;;  %vm9247_vm6 = vweird.f32 %v15718_v62 }
 0x1a3   : > { %v11055_v33 = vmul.f32 %v9230_v32, %v8703_v59  ;;  %v8314_v35 = vmul.f32 %v15739_v7, %v15739_v7  ;;  %v7545_v27 = vmul.f32 %v15736_v8, %v15736_v8 }
 0x1a4   : > { %v4430_v52 = vpop.f32.mrf.mxu2  ;;  %v9234_v21 = vmul.f32 0.5, %v9233_v55 }
 0x1a5   : > { %v11255_v38 = vmul.f32 %v15714_v48, %v11055_v33  ;;  %v4871_v50 = vadd.f32 %v4430_v52, %v2943_v1  ;;  %v6114_v10 = vpop.f32.mrf.mxu3  ;;  %6982 = vadd.xlane.f32.xlu2 %v15736_v8  ;;  %v8510_v34 = vsub.f32 %v8118_v14, %v8314_v35  ;;  %7773 = vadd.xlane.f32.xlu0 %v7545_v27 }
 0x1a6   : > { %v1656_v0 = vpop.f32.mrf.mxu0  ;;  %v2945_v11 = vpop.f32.mrf.mxu1  ;;  %v9235_v51 = vsub.f32 1.5, %v9234_v21 }
 0x1a7   : > { %v14418_v60 = vpop.eup %14417  ;;  %v11455_v22 = vadd.f32 %v15725_v42, %v11255_v38  ;;  %v6555_v26 = vadd.f32 %v6114_v10, %v4871_v50  ;;  %v15757_v25 = vadd.f32 1e-05, %v8510_v34  ;;  %12378 = vmatmul.msk.bf16.gmra.mxu0 %vm1267_vm0, %v14064_v13  ;;  %v2946_v9 = vadd.f32 %v2945_v11, %v1656_v0 }
 0x1a8   : > { %v9242_v46 = vmul.f32 %v14418_v60, %v15718_v62  ;;  %v6955_v56 = vpop.xlane.xlu0 %6954  ;;  %v7746_v12 = vpop.xlane.xlu1 %7745  ;;  %12872 = vmatmul.msk.bf16.gmra.mxu1 %vm1267_vm0, %v13965_v43  ;;  %v9236_v3 = vmul.f32 %v15720_v28, %v9235_v51  ;;  %vm9248_vm5 = vweird.f32 %v14418_v60  ;;  %v8705_v0 = vsub.f32 %v15261_v15, %v15698_v4 }
 0x1a9   : > { %11651 = vst [vmem:[%s15334_s24 + $0x70] sm:$0xff] %v11455_v22  ;;  %v15764_v17 = vadd.f32 %v15491_v54, %v6555_v26  ;;  %v15767_v16 = vmul.f32 %v15231_v41, %v6955_v56  ;;  %14419 = vrsqrt.f32 %v15757_v25  ;;  %13368 = vmatmul.msk.bf16.gmra.mxu2 %vm1267_vm0, %v14163_v20  ;;  %v8119_v59 = vmul.f32 %v7746_v12, %v15231_v41  ;;  %vm9249_vm7 = vmor %vm9247_vm6, %vm9248_vm5  ;;  %v13966_v56 = vld [vmem:[%s14997_s19 + $0xd0] sm:$0xff] }
 0x1aa   : > { %v9243_v5 = vmul.f32 %v14418_v60, %v9242_v46  ;;  %13864 = vmatmul.msk.bf16.gmra.mxu3 %vm1267_vm0, %v14262_v57  ;;  %v9240_v39 = vsel %vm9239_vm4, %v15720_v28, %v9236_v3  ;;  %v14065_v46 = vld [vmem:[%s14992_s13 + $0xd0] sm:$0xff]  ;;  %vm9257_vm9 = vweird.f32 %v15757_v25 }
 0x1ab   : > { %v8315_v29 = vmul.f32 %v15767_v16, %v15767_v16  ;;  %v7546_v58 = vmul.f32 %v15764_v17, %v15764_v17  ;;  %v11056_v6 = vmul.f32 %v9240_v39, %v8704_v23 }
 0x1ac   : > { %v9244_v45 = vmul.f32 0.5, %v9243_v5  ;;  %v4433_v32 = vpop.f32.mrf.mxu2 }
 0x1ad   : > { %v8511_v33 = vsub.f32 %v8119_v59, %v8315_v29  ;;  %v4872_v55 = vadd.f32 %v4433_v32, %v2946_v9  ;;  %v6117_v1 = vpop.f32.mrf.mxu3  ;;  %7775 = vadd.xlane.f32.xlu1 %v7546_v58  ;;  %v11256_v14 = vmul.f32 %v15714_v48, %v11056_v6  ;;  %6984 = vadd.xlane.f32.xlu0 %v15764_v17  ;;  %v14164_v59 = vld [vmem:[%s15004_s22 + $0xd0] sm:$0xff] }
 0x1ae   : > { %v1658_v35 = vpop.f32.mrf.mxu0  ;;  %v9245_v52 = vsub.f32 1.5, %v9244_v45  ;;  %v2947_v28 = vpop.f32.mrf.mxu1  ;;  %v14263_v58 = vld [vmem:[%s15009_s25 + $0xd0] sm:$0xff] }
 0x1af   : > { %v15784_v27 = vadd.f32 1e-05, %v8511_v33  ;;  %v6556_v13 = vadd.f32 %v6117_v1, %v4872_v55  ;;  %v14420_v43 = vpop.eup %14419  ;;  %v11456_v38 = vadd.f32 %v15725_v42, %v11256_v14  ;;  %v2948_v51 = vadd.f32 %v2947_v28, %v1658_v35 }
 0x1b0   : > { %v9246_v21 = vmul.f32 %v14418_v60, %v9245_v52  ;;  %v7748_v50 = vpop.xlane.xlu2 %7747  ;;  %v6957_v10 = vpop.xlane.xlu1 %6956  ;;  %v9252_v34 = vmul.f32 %v14420_v43, %v15757_v25  ;;  %vm9258_vm8 = vweird.f32 %v14420_v43  ;;  %v8706_v25 = vsub.f32 %v15283_v47, %v15739_v7 }
 0x1b1   : > { %14421 = vrsqrt.f32 %v15784_v27  ;;  %11652 = vst [vmem:[%s15334_s24 + $0x78] sm:$0xff] %v11456_v38  ;;  %v15794_v20 = vadd.f32 %v15491_v54, %v6556_v13  ;;  %v15797_v57 = vmul.f32 %v15231_v41, %v6957_v10  ;;  %v8120_v15 = vmul.f32 %v7748_v50, %v15231_v41  ;;  %vm9259_vm10 = vmor %vm9257_vm9, %vm9258_vm8 }
 0x1b2   : > { %v9250_v11 = vsel %vm9249_vm7, %v14418_v60, %v9246_v21  ;;  %v9253_v22 = vmul.f32 %v14420_v43, %v9252_v34  ;;  %vm9267_vm12 = vweird.f32 %v15784_v27 }
 0x1b3   : > { %v11057_v62 = vmul.f32 %v9250_v11, %v8705_v0  ;;  %v8316_v4 = vmul.f32 %v15797_v57, %v15797_v57  ;;  %v7547_v60 = vmul.f32 %v15794_v20, %v15794_v20 }
 0x1b4   : > { %v4435_v26 = vpop.f32.mrf.mxu2  ;;  %v9254_v3 = vmul.f32 0.5, %v9253_v22 }
 0x1b5   : > { %v11257_v12 = vmul.f32 %v15714_v48, %v11057_v62  ;;  %v4873_v9 = vadd.f32 %v4435_v26, %v2948_v51  ;;  %v6119_v23 = vpop.f32.mrf.mxu3  ;;  %6986 = vadd.xlane.f32.xlu1 %v15794_v20  ;;  %v8512_v39 = vsub.f32 %v8120_v15, %v8316_v4  ;;  %7777 = vadd.xlane.f32.xlu2 %v7547_v60 }
 0x1b6   : > { %v1661_v5 = vpop.f32.mrf.mxu0  ;;  %v2950_v29 = vpop.f32.mrf.mxu1  ;;  %v9255_v32 = vsub.f32 1.5, %v9254_v3 }
 0x1b7   : > { %v14422_v6 = vpop.eup %14421  ;;  %v11457_v45 = vadd.f32 %v15725_v42, %v11257_v12  ;;  %v6557_v33 = vadd.f32 %v6119_v23, %v4873_v9  ;;  %v15813_v1 = vadd.f32 1e-05, %v8512_v39  ;;  %12379 = vmatmul.msk.bf16.gmra.mxu0 %vm1267_vm0, %v14065_v46  ;;  %v2951_v13 = vadd.f32 %v2950_v29, %v1661_v5 }
 0x1b8   : > { %v9262_v55 = vmul.f32 %v14422_v6, %v15784_v27  ;;  %v6959_v35 = vpop.xlane.xlu2 %6958  ;;  %v7750_v14 = vpop.xlane.xlu0 %7749  ;;  %12873 = vmatmul.msk.bf16.gmra.mxu1 %vm1267_vm0, %v13966_v56  ;;  %v9256_v52 = vmul.f32 %v14420_v43, %v9255_v32  ;;  %vm9268_vm11 = vweird.f32 %v14422_v6  ;;  %v8707_v23 = vsub.f32 %v15317_v18, %v15767_v16 }
 0x1b9   : > { %11653 = vst [vmem:[%s15334_s24 + $0x80] sm:$0xff] %v11457_v45  ;;  %v15819_v28 = vadd.f32 %v15491_v54, %v6557_v33  ;;  %v15822_v38 = vmul.f32 %v15231_v41, %v6959_v35  ;;  %14423 = vrsqrt.f32 %v15813_v1  ;;  %13369 = vmatmul.msk.bf16.gmra.mxu2 %vm1267_vm0, %v14164_v59  ;;  %v8121_v0 = vmul.f32 %v7750_v14, %v15231_v41  ;;  %vm9269_vm13 = vmor %vm9267_vm12, %vm9268_vm11  ;;  %v13967_v35 = vld [vmem:[%s14997_s19 + $0xd8] sm:$0xff] }
 0x1ba   : > { %v9263_v21 = vmul.f32 %v14422_v6, %v9262_v55  ;;  %13865 = vmatmul.msk.bf16.gmra.mxu3 %vm1267_vm0, %v14263_v58  ;;  %v9260_v50 = vsel %vm9259_vm10, %v14420_v43, %v9256_v52  ;;  %v14066_v55 = vld [vmem:[%s14992_s13 + $0xd8] sm:$0xff]  ;;  %vm9277_vm15 = vweird.f32 %v15813_v1 }
 0x1bb   : > { %v8317_v10 = vmul.f32 %v15822_v38, %v15822_v38  ;;  %v7548_v34 = vmul.f32 %v15819_v28, %v15819_v28  ;;  %v11058_v11 = vmul.f32 %v9260_v50, %v8706_v25 }
 0x1bc   : > { %v9264_v47 = vmul.f32 0.5, %v9263_v21  ;;  %v4438_v7 = vpop.f32.mrf.mxu2 }
 0x1bd   : > { %v8513_v62 = vsub.f32 %v8121_v0, %v8317_v10  ;;  %v4874_v22 = vadd.f32 %v4438_v7, %v2951_v13  ;;  %v6122_v51 = vpop.f32.mrf.mxu3  ;;  %7779 = vadd.xlane.f32.xlu0 %v7548_v34  ;;  %v11258_v4 = vmul.f32 %v15714_v48, %v11058_v11  ;;  %6988 = vadd.xlane.f32.xlu2 %v15819_v28  ;;  %v14165_v0 = vld [vmem:[%s15004_s22 + $0xd8] sm:$0xff] }
 0x1be   : > { %v1663_v15 = vpop.f32.mrf.mxu0  ;;  %v9265_v26 = vsub.f32 1.5, %v9264_v47  ;;  %v2952_v43 = vpop.f32.mrf.mxu1  ;;  %v14264_v34 = vld [vmem:[%s15009_s25 + $0xd8] sm:$0xff] }
 0x1bf   : > { %v15837_v60 = vadd.f32 1e-05, %v8513_v62  ;;  %v6558_v46 = vadd.f32 %v6122_v51, %v4874_v22  ;;  %v14424_v56 = vpop.eup %14423  ;;  %v11458_v12 = vadd.f32 %v15725_v42, %v11258_v4  ;;  %v2953_v32 = vadd.f32 %v2952_v43, %v1663_v15 }
 0x1c0   : > { %v9266_v3 = vmul.f32 %v14422_v6, %v9265_v26  ;;  %v6961_v9 = vpop.xlane.xlu0 %6960  ;;  %v9272_v5 = vmul.f32 %v14424_v56, %v15813_v1  ;;  %v7752_v39 = vpop.xlane.xlu1 %7751  ;;  %vm9278_vm14 = vweird.f32 %v14424_v56 }
 0x1c1   : > { %14425 = vrsqrt.f32 %v15837_v60  ;;  %11654 = vst [vmem:[%s15334_s24 + $0x88] sm:$0xff] %v11458_v12  ;;  %v15847_v59 = vadd.f32 %v15491_v54, %v6558_v46  ;;  %v15850_v58 = vmul.f32 %v15231_v41, %v6961_v9  ;;  %v8122_v16 = vmul.f32 %v7752_v39, %v15231_v41  ;;  %vm9279_vm1 = vmor %vm9277_vm15, %vm9278_vm14 }
 0x1c2   : > { %v9270_v29 = vsel %vm9269_vm13, %v14422_v6, %v9266_v3  ;;  %v9273_v45 = vmul.f32 %v14424_v56, %v9272_v5  ;;  %v8708_v12 = vsub.f32 %v15346_v2, %v15797_v57  ;;  %vm9287_vm3 = vweird.f32 %v15837_v60 }
 0x1c3   : > { %v11059_v27 = vmul.f32 %v9270_v29, %v8707_v23  ;;  %v8318_v18 = vmul.f32 %v15850_v58, %v15850_v58  ;;  %v7549_v6 = vmul.f32 %v15847_v59, %v15847_v59 }
 0x1c4   : > { %v4440_v33 = vpop.f32.mrf.mxu2  ;;  %v9274_v52 = vmul.f32 0.5, %v9273_v45 }
 0x1c5   : > { %v11259_v14 = vmul.f32 %v15714_v48, %v11059_v27  ;;  %v4875_v13 = vadd.f32 %v4440_v33, %v2953_v32  ;;  %v6124_v25 = vpop.f32.mrf.mxu3  ;;  %6990 = vadd.xlane.f32.xlu0 %v15847_v59  ;;  %v8514_v50 = vsub.f32 %v8122_v16, %v8318_v18  ;;  %7781 = vadd.xlane.f32.xlu1 %v7549_v6 }
 0x1c6   : > { %v1666_v21 = vpop.f32.mrf.mxu0  ;;  %v2955_v10 = vpop.f32.mrf.mxu1  ;;  %v9275_v7 = vsub.f32 1.5, %v9274_v52  ;;  %v8709_v52 = vsub.f32 %v15370_v37, %v15822_v38 }
 0x1c7   : > { %v14426_v11 = vpop.eup %14425  ;;  %v11459_v47 = vadd.f32 %v15725_v42, %v11259_v14  ;;  %v6559_v62 = vadd.f32 %v6124_v25, %v4875_v13  ;;  %v15865_v51 = vadd.f32 1e-05, %v8514_v50  ;;  %12380 = vmatmul.msk.bf16.gmra.mxu0 %vm1267_vm0, %v14066_v55  ;;  %v2956_v26 = vadd.f32 %v2955_v10, %v1666_v21  ;;  %v15899_v21 = vld [vmem:[%s20450_s5] ss:$0 sm:$0xff] }
 0x1c8   : > { %v9282_v22 = vmul.f32 %v14426_v11, %v15837_v60  ;;  %12874 = vmatmul.msk.bf16.gmra.mxu1 %vm1267_vm0, %v13967_v35  ;;  %v9276_v15 = vmul.f32 %v14424_v56, %v9275_v7  ;;  %v7754_v43 = vpop.xlane.xlu2 %7753  ;;  %v6963_v46 = vpop.xlane.xlu1 %6962  ;;  %vm9288_vm2 = vweird.f32 %v14426_v11 }
 0x1c9   : > { %11655 = vst [vmem:[%s15334_s24 + $0x90] sm:$0xff] %v11459_v47  ;;  %v15872_v4 = vadd.f32 %v15491_v54, %v6559_v62  ;;  %14427 = vrsqrt.f32 %v15865_v51  ;;  %13370 = vmatmul.msk.bf16.gmra.mxu2 %vm1267_vm0, %v14165_v0  ;;  %v15880_v1 = vmul.f32 %v15231_v41, %v6963_v46  ;;  %v8123_v2 = vmul.f32 %v7754_v43, %v15231_v41  ;;  %vm9289_vm4 = vmor %vm9287_vm3, %vm9288_vm2 }
 0x1ca   : > { %v9283_v3 = vmul.f32 %v14426_v11, %v9282_v22  ;;  %13866 = vmatmul.msk.bf16.gmra.mxu3 %vm1267_vm0, %v14264_v34  ;;  %v9280_v9 = vsel %vm9279_vm1, %v14424_v56, %v9276_v15  ;;  %v13968_v15 = vld [vmem:[%s14997_s19 + $0xe0] sm:$0xff]  ;;  %vm9297_vm6 = vweird.f32 %v15865_v51 }
 0x1cb   : > { %v7550_v54 = vmul.f32 %v15872_v4, %v15872_v4  ;;  %v11060_v23 = vmul.f32 %v9280_v9, %v8708_v12  ;;  %v8319_v57 = vmul.f32 %v15880_v1, %v15880_v1 }
 0x1cc   : > { %v9284_v5 = vmul.f32 0.5, %v9283_v3  ;;  %v4443_v39 = vpop.f32.mrf.mxu2 }
 0x1cd   : > { %v4876_v29 = vadd.f32 %v4443_v39, %v2956_v26  ;;  %v6127_v27 = vpop.f32.mrf.mxu3  ;;  %7783 = vadd.xlane.f32.xlu2 %v7550_v54  ;;  %v11260_v56 = vmul.f32 %v15714_v48, %v11060_v23  ;;  %6992 = vadd.xlane.f32.xlu1 %v15872_v4  ;;  %v8515_v16 = vsub.f32 %v8123_v2, %v8319_v57  ;;  %v14166_v23 = vld [vmem:[%s15004_s22 + $0xe0] sm:$0xff] }
 0x1ce   : > { %v1668_v45 = vpop.f32.mrf.mxu0  ;;  %v9285_v32 = vsub.f32 1.5, %v9284_v5  ;;  %v2957_v18 = vpop.f32.mrf.mxu1  ;;  %v14265_v5 = vld [vmem:[%s15009_s25 + $0xe0] sm:$0xff] }
 0x1cf   : > { %v6560_v33 = vadd.f32 %v6127_v27, %v4876_v29  ;;  %v14428_v6 = vpop.eup %14427  ;;  %v11460_v55 = vadd.f32 %v15725_v42, %v11260_v56  ;;  %v15894_v25 = vadd.f32 1e-05, %v8515_v16  ;;  %v2958_v34 = vadd.f32 %v2957_v18, %v1668_v45 }
 0x1d0   : > { %v9286_v35 = vmul.f32 %v14426_v11, %v9285_v32  ;;  %v7756_v14 = vpop.xlane.xlu0 %7755  ;;  %v9292_v13 = vmul.f32 %v14428_v6, %v15865_v51  ;;  %v6965_v60 = vpop.xlane.xlu2 %6964  ;;  %vm9298_vm5 = vweird.f32 %v14428_v6  ;;  %v8710_v51 = vsub.f32 %v15399_v19, %v15850_v58 }
 0x1d1   : > { %v15902_v50 = vadd.f32 %v15899_v21, %v6560_v33  ;;  %11656 = vst [vmem:[%s15334_s24 + $0x98] sm:$0xff] %v11460_v55  ;;  %v15906_v37 = vmul.f32 %v15231_v41, %v6965_v60  ;;  %14429 = vrsqrt.f32 %v15894_v25  ;;  %v8124_v7 = vmul.f32 %v7756_v14, %v15231_v41  ;;  %vm9299_vm7 = vmor %vm9297_vm6, %vm9298_vm5 }
 0x1d2   : > { %v9290_v10 = vsel %vm9289_vm4, %v14426_v11, %v9286_v35  ;;  %v9293_v0 = vmul.f32 %v14428_v6, %v9292_v13  ;;  %v14067_v11 = vld [vmem:[%s14992_s13 + $0xe0] sm:$0xff]  ;;  %vm9307_vm9 = vweird.f32 %v15894_v25 }
 0x1d3   : > { %v11061_v38 = vmul.f32 %v9290_v10, %v8709_v52  ;;  %v8320_v47 = vmul.f32 %v15906_v37, %v15906_v37  ;;  %v7551_v22 = vmul.f32 %v15902_v50, %v15902_v50 }
 0x1d4   : > { %v4445_v62 = vpop.f32.mrf.mxu2  ;;  %v9294_v43 = vmul.f32 0.5, %v9293_v0 }
 0x1d5   : > { %v11261_v26 = vmul.f32 %v15714_v48, %v11061_v38  ;;  %v4877_v46 = vadd.f32 %v4445_v62, %v2958_v34  ;;  %v6129_v12 = vpop.f32.mrf.mxu3  ;;  %6994 = vadd.xlane.f32.xlu2 %v15902_v50  ;;  %v8516_v9 = vsub.f32 %v8124_v7, %v8320_v47  ;;  %7785 = vadd.xlane.f32.xlu0 %v7551_v22 }
 0x1d6   : > { %v1671_v3 = vpop.f32.mrf.mxu0  ;;  %v2960_v54 = vpop.f32.mrf.mxu1  ;;  %v9295_v2 = vsub.f32 1.5, %v9294_v43 }
 0x1d7   : > { %v11461_v39 = vadd.f32 %v15725_v42, %v11261_v26  ;;  %v6561_v57 = vadd.f32 %v6129_v12, %v4877_v46  ;;  %v15922_v29 = vadd.f32 1e-05, %v8516_v9  ;;  %12381 = vmatmul.msk.bf16.gmra.mxu0 %vm1267_vm0, %v14067_v11  ;;  %v14430_v45 = vpop.eup %14429  ;;  %v2961_v18 = vadd.f32 %v2960_v54, %v1671_v3 }
 0x1d8   : > { %v6967_v27 = vpop.xlane.xlu0 %6966  ;;  %12875 = vmatmul.msk.bf16.gmra.mxu1 %vm1267_vm0, %v13968_v15  ;;  %v9296_v56 = vmul.f32 %v14428_v6, %v9295_v2  ;;  %v9302_v55 = vmul.f32 %v14430_v45, %v15894_v25  ;;  %vm9308_vm8 = vweird.f32 %v14430_v45 }
 0x1d9   : > { %11657 = vst [vmem:[%s15334_s24 + $0xa0] sm:$0xff] %v11461_v39  ;;  %v15928_v32 = vadd.f32 %v15899_v21, %v6561_v57  ;;  %v15931_v16 = vmul.f32 %v15231_v41, %v6967_v27  ;;  %v7758_v33 = vpop.xlane.xlu1 %7757  ;;  %14431 = vrsqrt.f32 %v15922_v29  ;;  %13371 = vmatmul.msk.bf16.gmra.mxu2 %vm1267_vm0, %v14166_v23  ;;  %v8711_v23 = vsub.f32 %v15424_v44, %v15880_v1  ;;  %vm9309_vm10 = vmor %vm9307_vm9, %vm9308_vm8 }
 0x1da   : > { %13867 = vmatmul.msk.bf16.gmra.mxu3 %vm1267_vm0, %v14265_v5  ;;  %v9300_v35 = vsel %vm9299_vm7, %v14428_v6, %v9296_v56  ;;  %v8125_v52 = vmul.f32 %v7758_v33, %v15231_v41  ;;  %v9303_v60 = vmul.f32 %v14430_v45, %v9302_v55  ;;  %v13969_v33 = vld [vmem:[%s14997_s19 + $0xe8] sm:$0xff]  ;;  %vm9317_vm12 = vweird.f32 %v15922_v29 }
 0x1db   : > { %v8321_v14 = vmul.f32 %v15931_v16, %v15931_v16  ;;  %v11062_v13 = vmul.f32 %v9300_v35, %v8710_v51  ;;  %v7552_v19 = vmul.f32 %v15928_v32, %v15928_v32 }
 0x1dc   : > { %v4448_v10 = vpop.f32.mrf.mxu2  ;;  %v9304_v7 = vmul.f32 0.5, %v9303_v60 }
 0x1dd   : > { %v8517_v58 = vsub.f32 %v8125_v52, %v8321_v14  ;;  %v4878_v38 = vadd.f32 %v4448_v10, %v2961_v18  ;;  %v6132_v0 = vpop.f32.mrf.mxu3  ;;  %v11262_v47 = vmul.f32 %v15714_v48, %v11062_v13  ;;  %6996 = vadd.xlane.f32.xlu0 %v15928_v32  ;;  %7787 = vadd.xlane.f32.xlu1 %v7552_v19  ;;  %v14068_v18 = vld [vmem:[%s14992_s13 + $0xe8] sm:$0xff] }
 0x1de   : > { %v1673_v34 = vpop.f32.mrf.mxu0  ;;  %v2962_v6 = vpop.f32.mrf.mxu1  ;;  %v9305_v26 = vsub.f32 1.5, %v9304_v7  ;;  %v14167_v52 = vld [vmem:[%s15004_s22 + $0xe8] sm:$0xff] }
 0x1df   : > { %v15947_v62 = vadd.f32 1e-05, %v8517_v58  ;;  %v6562_v22 = vadd.f32 %v6132_v0, %v4878_v38  ;;  %v14432_v11 = vpop.eup %14431  ;;  %v11462_v15 = vadd.f32 %v15725_v42, %v11262_v47  ;;  %v2963_v39 = vadd.f32 %v2962_v6, %v1673_v34  ;;  %v14266_v13 = vld [vmem:[%s15009_s25 + $0xe8] sm:$0xff] }
 0x1e0   : > { %v9312_v43 = vmul.f32 %v14432_v11, %v15922_v29  ;;  %v7760_v46 = vpop.xlane.xlu2 %7759  ;;  %v9306_v3 = vmul.f32 %v14430_v45, %v9305_v26  ;;  %vm9318_vm11 = vweird.f32 %v14432_v11  ;;  %v8712_v29 = vsub.f32 %v15455_v49, %v15906_v37 }
 0x1e1   : > { %14433 = vrsqrt.f32 %v15947_v62  ;;  %v6969_v12 = vpop.xlane.xlu1 %6968  ;;  %11658 = vst [vmem:[%s15334_s24 + $0xa8] sm:$0xff] %v11462_v15  ;;  %v15955_v9 = vadd.f32 %v15899_v21, %v6562_v22  ;;  %v8126_v57 = vmul.f32 %v7760_v46, %v15231_v41  ;;  %vm9319_vm13 = vmor %vm9317_vm12, %vm9318_vm11  ;;  %vm9327_vm15 = vweird.f32 %v15947_v62 }
 0x1e2   : > { %v15958_v54 = vmul.f32 %v15231_v41, %v6969_v12  ;;  %v9313_v5 = vmul.f32 %v14432_v11, %v9312_v43  ;;  %v9310_v2 = vsel %vm9309_vm10, %v14430_v45, %v9306_v3 }
 0x1e3   : > { %v7553_v56 = vmul.f32 %v15955_v9, %v15955_v9  ;;  %v11063_v51 = vmul.f32 %v9310_v2, %v8711_v23 }
 0x1e4   : > { %v8322_v25 = vmul.f32 %v15958_v54, %v15958_v54  ;;  %v4450_v27 = vpop.f32.mrf.mxu2  ;;  %v9314_v55 = vmul.f32 0.5, %v9313_v5 }
 0x1e5   : > { %v4879_v44 = vadd.f32 %v4450_v27, %v2963_v39  ;;  %v6134_v1 = vpop.f32.mrf.mxu3  ;;  %7789 = vadd.xlane.f32.xlu2 %v7553_v56  ;;  %6998 = vadd.xlane.f32.xlu1 %v15955_v9  ;;  %v11263_v10 = vmul.f32 %v15714_v48, %v11063_v51 }
 0x1e6   : > { %v1676_v35 = vpop.f32.mrf.mxu0  ;;  %v8518_v14 = vsub.f32 %v8126_v57, %v8322_v25  ;;  %v2965_v45 = vpop.f32.mrf.mxu1  ;;  %v9315_v19 = vsub.f32 1.5, %v9314_v55 }
 0x1e7   : > { %v14434_v60 = vpop.eup %14433  ;;  %v6563_v58 = vadd.f32 %v6134_v1, %v4879_v44  ;;  %12382 = vmatmul.msk.bf16.gmra.mxu0 %vm1267_vm0, %v14068_v18  ;;  %v11463_v34 = vadd.f32 %v15725_v42, %v11263_v10  ;;  %v2966_v6 = vadd.f32 %v2965_v45, %v1676_v35  ;;  %v8713_v35 = vsub.f32 %v15494_v63, %v15931_v16 }
 0x1e8   : > { %v9322_v38 = vmul.f32 %v14434_v60, %v15947_v62  ;;  %v15975_v0 = vadd.f32 1e-05, %v8518_v14  ;;  %12876 = vmatmul.msk.bf16.gmra.mxu1 %vm1267_vm0, %v13969_v33  ;;  %v9316_v47 = vmul.f32 %v14432_v11, %v9315_v19  ;;  %v6971_v22 = vpop.xlane.xlu2 %6970  ;;  %v7762_v15 = vpop.xlane.xlu0 %7761  ;;  %vm9328_vm14 = vweird.f32 %v14434_v60 }
 0x1e9   : > { %v15981_v7 = vadd.f32 %v15899_v21, %v6563_v58  ;;  %v15987_v43 = vmul.f32 %v15231_v41, %v6971_v22  ;;  %13372 = vmatmul.msk.bf16.gmra.mxu2 %vm1267_vm0, %v14167_v52  ;;  %11659 = vst [vmem:[%s15334_s24 + $0xb0] sm:$0xff] %v11463_v34  ;;  %v8127_v37 = vmul.f32 %v7762_v15, %v15231_v41  ;;  %vm9329_vm1 = vmor %vm9327_vm15, %vm9328_vm14 }
 0x1ea   : > { %v9323_v26 = vmul.f32 %v14434_v60, %v9322_v38  ;;  %14435 = vrsqrt.f32 %v15975_v0  ;;  %13868 = vmatmul.msk.bf16.gmra.mxu3 %vm1267_vm0, %v14266_v13  ;;  %v9320_v46 = vsel %vm9319_vm13, %v14432_v11, %v9316_v47  ;;  %v13970_v47 = vld [vmem:[%s14997_s19 + $0xf0] sm:$0xff]  ;;  %vm9337_vm3 = vweird.f32 %v15975_v0 }
 0x1eb   : > { %v7554_v12 = vmul.f32 %v15981_v7, %v15981_v7  ;;  %v11064_v3 = vmul.f32 %v9320_v46, %v8712_v29  ;;  %v8323_v49 = vmul.f32 %v15987_v43, %v15987_v43 }
 0x1ec   : > { %v9324_v23 = vmul.f32 0.5, %v9323_v26  ;;  %v4453_v5 = vpop.f32.mrf.mxu2 }
 0x1ed   : > { %v4880_v39 = vadd.f32 %v4453_v5, %v2966_v6  ;;  %v6137_v2 = vpop.f32.mrf.mxu3  ;;  %7791 = vadd.xlane.f32.xlu0 %v7554_v12  ;;  %v11264_v25 = vmul.f32 %v15714_v48, %v11064_v3  ;;  %v8519_v11 = vsub.f32 %v8127_v37, %v8323_v49  ;;  %7000 = vadd.xlane.f32.xlu2 %v15981_v7  ;;  %v14168_v3 = vld [vmem:[%s15004_s22 + $0xf0] sm:$0xff] }
 0x1ee   : > { %v1678_v57 = vpop.f32.mrf.mxu0  ;;  %v9325_v27 = vsub.f32 1.5, %v9324_v23  ;;  %v2967_v56 = vpop.f32.mrf.mxu1  ;;  %v14267_v23 = vld [vmem:[%s15009_s25 + $0xf0] sm:$0xff] }
 0x1ef   : > { %v6564_v18 = vadd.f32 %v6137_v2, %v4880_v39  ;;  %v11464_v51 = vadd.f32 %v15725_v42, %v11264_v25  ;;  %v16001_v44 = vadd.f32 1e-05, %v8519_v11  ;;  %v2968_v58 = vadd.f32 %v2967_v56, %v1678_v57 }
 0x1f0   : > { %v14436_v33 = vpop.eup %14435  ;;  %v9326_v55 = vmul.f32 %v14434_v60, %v9325_v27  ;;  %v7764_v1 = vpop.xlane.xlu1 %7763 }
 0x1f1   : > { %v9332_v14 = vmul.f32 %v14436_v33, %v15975_v0  ;;  %v16007_v45 = vadd.f32 %v15899_v21, %v6564_v18  ;;  %v6973_v52 = vpop.xlane.xlu0 %6972  ;;  %11660 = vst [vmem:[%s15334_s24 + $0xb8] sm:$0xff] %v11464_v51  ;;  %14437 = vrsqrt.f32 %v16001_v44  ;;  %v8128_v38 = vmul.f32 %v7764_v1, %v15231_v41 }
 0x1f2   : > { %v9330_v13 = vsel %vm9329_vm1, %v14434_v60, %v9326_v55  ;;  %v16012_v62 = vmul.f32 %v15231_v41, %v6973_v52  ;;  %v14069_v60 = vld [vmem:[%s14992_s13 + $0xf0] sm:$0xff]  ;;  %vm9338_vm2 = vweird.f32 %v14436_v33  ;;  %v8714_v51 = vsub.f32 %v15529_v31, %v15958_v54 }
 0x1f3   : > { %v11065_v10 = vmul.f32 %v9330_v13, %v8713_v35  ;;  %v9333_v19 = vmul.f32 %v14436_v33, %v9332_v14  ;;  %v7555_v63 = vmul.f32 %v16007_v45, %v16007_v45  ;;  %vm9339_vm4 = vmor %vm9337_vm3, %vm9338_vm2  ;;  %vm9347_vm6 = vweird.f32 %v16001_v44 }
 0x1f4   : > { %v8324_v16 = vmul.f32 %v16012_v62, %v16012_v62  ;;  %v4455_v34 = vpop.f32.mrf.mxu2 }
 0x1f5   : > { %v11265_v6 = vmul.f32 %v15714_v48, %v11065_v10  ;;  %v9334_v22 = vmul.f32 0.5, %v9333_v19  ;;  %v4881_v15 = vadd.f32 %v4455_v34, %v2968_v58  ;;  %v6139_v29 = vpop.f32.mrf.mxu3  ;;  %7002 = vadd.xlane.f32.xlu0 %v16007_v45  ;;  %7793 = vadd.xlane.f32.xlu1 %v7555_v63 }
 0x1f6   : > { %v1681_v26 = vpop.f32.mrf.mxu0  ;;  %v8520_v46 = vsub.f32 %v8128_v38, %v8324_v16  ;;  %v2970_v12 = vpop.f32.mrf.mxu1 }
 0x1f7   : > { %v11465_v49 = vadd.f32 %v15725_v42, %v11265_v6  ;;  %v9335_v37 = vsub.f32 1.5, %v9334_v22  ;;  %v6565_v5 = vadd.f32 %v6139_v29, %v4881_v15  ;;  %v14438_v39 = vpop.eup %14437  ;;  %12383 = vmatmul.msk.bf16.gmra.mxu0 %vm1267_vm0, %v14069_v60  ;;  %v2971_v56 = vadd.f32 %v2970_v12, %v1681_v26 }
 0x1f8   : > { %v16027_v2 = vadd.f32 1e-05, %v8520_v46  ;;  %v6975_v57 = vpop.xlane.xlu1 %6974  ;;  %12877 = vmatmul.msk.bf16.gmra.mxu1 %vm1267_vm0, %v13970_v47  ;;  %v9342_v27 = vmul.f32 %v14438_v39, %v16001_v44  ;;  %v7766_v18 = vpop.xlane.xlu2 %7765  ;;  %vm9348_vm5 = vweird.f32 %v14438_v39  ;;  %v8715_v12 = vsub.f32 %v15557_v30, %v15987_v43 }
 0x1f9   : > { %11661 = vst [vmem:[%s15334_s24 + $0xc0] sm:$0xff] %v11465_v49  ;;  %v9336_v25 = vmul.f32 %v14436_v33, %v9335_v37  ;;  %v16034_v11 = vadd.f32 %v15899_v21, %v6565_v5  ;;  %v16041_v0 = vmul.f32 %v15231_v41, %v6975_v57  ;;  %13373 = vmatmul.msk.bf16.gmra.mxu2 %vm1267_vm0, %v14168_v3  ;;  %vm9349_vm7 = vmor %vm9347_vm6, %vm9348_vm5 }
 0x1fa   : > { %14439 = vrsqrt.f32 %v16027_v2  ;;  %13869 = vmatmul.msk.bf16.gmra.mxu3 %vm1267_vm0, %v14267_v23  ;;  %v9343_v1 = vmul.f32 %v14438_v39, %v9342_v27  ;;  %v8129_v52 = vmul.f32 %v7766_v18, %v15231_v41  ;;  %v13971_v27 = vld [vmem:[%s14997_s19 + $0xf8] sm:$0xff]  ;;  %vm9357_vm9 = vweird.f32 %v16027_v2 }
 0x1fb   : > { %v9340_v55 = vsel %vm9339_vm4, %v14436_v33, %v9336_v25  ;;  %v7556_v35 = vmul.f32 %v16034_v11, %v16034_v11  ;;  %v8325_v31 = vmul.f32 %v16041_v0, %v16041_v0  ;;  %v14070_v25 = vld [vmem:[%s14992_s13 + $0xf8] sm:$0xff] }
 0x1fc   : > { %v11066_v14 = vmul.f32 %v9340_v55, %v8714_v51  ;;  %v4458_v54 = vpop.f32.mrf.mxu2  ;;  %v9344_v13 = vmul.f32 0.5, %v9343_v1 }
 0x1fd   : > { %v4882_v10 = vadd.f32 %v4458_v54, %v2971_v56  ;;  %v6142_v19 = vpop.f32.mrf.mxu3  ;;  %7795 = vadd.xlane.f32.xlu2 %v7556_v35  ;;  %7004 = vadd.xlane.f32.xlu1 %v16034_v11  ;;  %v8521_v63 = vsub.f32 %v8129_v52, %v8325_v31  ;;  %v14268_v52 = vld [vmem:[%s15009_s25 + $0xf8] sm:$0xff] }
 0x1fe   : > { %v1683_v58 = vpop.f32.mrf.mxu0  ;;  %v11266_v33 = vmul.f32 %v15714_v48, %v11066_v14  ;;  %v2972_v16 = vpop.f32.mrf.mxu1  ;;  %v9345_v38 = vsub.f32 1.5, %v9344_v13  ;;  %v14169_v14 = vld [vmem:[%s15004_s22 + $0xf8] sm:$0xff] }
 0x1ff   : > { %v6566_v34 = vadd.f32 %v6142_v19, %v4882_v10  ;;  %v16053_v6 = vadd.f32 1e-05, %v8521_v63  ;;  %v2973_v49 = vadd.f32 %v2972_v16, %v1683_v58  ;;  %v8716_v19 = vsub.f32 %v15586_v40, %v16012_v62 }
 0x200   : > { %v14440_v60 = vpop.eup %14439  ;;  %v11466_v47 = vadd.f32 %v15725_v42, %v11266_v33  ;;  %v7768_v22 = vpop.xlane.xlu0 %7767  ;;  %v9346_v15 = vmul.f32 %v14438_v39, %v9345_v38 }
 0x201   : > { %v9352_v29 = vmul.f32 %v14440_v60, %v16027_v2  ;;  %v16058_v26 = vadd.f32 %v15899_v21, %v6566_v34  ;;  %v6977_v46 = vpop.xlane.xlu2 %6976  ;;  %14441 = vrsqrt.f32 %v16053_v6  ;;  %v8130_v30 = vmul.f32 %v7768_v22, %v15231_v41 }
 0x202   : > { %11662 = vst [vmem:[%s15334_s24 + $0xc8] sm:$0xff] %v11466_v47  ;;  %v16065_v3 = vmul.f32 %v15231_v41, %v6977_v46  ;;  %v9350_v23 = vsel %vm9349_vm7, %v14438_v39, %v9346_v15  ;;  %vm9358_vm8 = vweird.f32 %v14440_v60  ;;  %vm9367_vm12 = vweird.f32 %v16053_v6 }
 0x203   : > { %v9353_v44 = vmul.f32 %v14440_v60, %v9352_v29  ;;  %v7557_v37 = vmul.f32 %v16058_v26, %v16058_v26  ;;  %v11067_v5 = vmul.f32 %v9350_v23, %v8715_v12  ;;  %vm9359_vm10 = vmor %vm9357_vm9, %vm9358_vm8 }
 0x204   : > { %v8326_v57 = vmul.f32 %v16065_v3, %v16065_v3  ;;  %v4460_v43 = vpop.f32.mrf.mxu2 }
 0x205   : > { %v9354_v56 = vmul.f32 0.5, %v9353_v44  ;;  %v4883_v18 = vadd.f32 %v4460_v43, %v2973_v49  ;;  %v6144_v51 = vpop.f32.mrf.mxu3  ;;  %7006 = vadd.xlane.f32.xlu2 %v16058_v26  ;;  %7797 = vadd.xlane.f32.xlu0 %v7557_v37  ;;  %v11267_v55 = vmul.f32 %v15714_v48, %v11067_v5  ;;  %v16115_v43 = vld [vmem:[%s20452_s7] ss:$0 sm:$0xff] }
 0x206   : > { %v1686_v39 = vpop.f32.mrf.mxu0  ;;  %v8522_v1 = vsub.f32 %v8130_v30, %v8326_v57  ;;  %v2975_v35 = vpop.f32.mrf.mxu1 }
 0x207   : > { %v9355_v31 = vsub.f32 1.5, %v9354_v56  ;;  %v6567_v54 = vadd.f32 %v6144_v51, %v4883_v18  ;;  %v14442_v13 = vpop.eup %14441  ;;  %v11467_v10 = vadd.f32 %v15725_v42, %v11267_v55  ;;  %12384 = vmatmul.msk.bf16.gmra.mxu0 %vm1267_vm0, %v14070_v25  ;;  %v2976_v40 = vadd.f32 %v2975_v35, %v1686_v39 }
 0x208   : > { %v16081_v58 = vadd.f32 1e-05, %v8522_v1  ;;  %v6979_v33 = vpop.xlane.xlu0 %6978  ;;  %12878 = vmatmul.msk.bf16.gmra.mxu1 %vm1267_vm0, %v13971_v27  ;;  %v9362_v63 = vmul.f32 %v14442_v13, %v16053_v6  ;;  %v7770_v38 = vpop.xlane.xlu1 %7769  ;;  %vm9368_vm11 = vweird.f32 %v14442_v13  ;;  %v8717_v1 = vsub.f32 %v15617_v36, %v16041_v0 }
 0x209   : > { %v9356_v48 = vmul.f32 %v14440_v60, %v9355_v31  ;;  %v16088_v16 = vadd.f32 %v15899_v21, %v6567_v54  ;;  %11663 = vst [vmem:[%s15334_s24 + $0xd0] sm:$0xff] %v11467_v10  ;;  %v16094_v42 = vmul.f32 %v15231_v41, %v6979_v33  ;;  %13374 = vmatmul.msk.bf16.gmra.mxu2 %vm1267_vm0, %v14169_v14  ;;  %vm9369_vm13 = vmor %vm9367_vm12, %vm9368_vm11  ;;  %v13972_v33 = vld [vmem:[%s14997_s19 + $0x100] sm:$0xff] }
 0x20a   : > { %14443 = vrsqrt.f32 %v16081_v58  ;;  %13870 = vmatmul.msk.bf16.gmra.mxu3 %vm1267_vm0, %v14268_v52  ;;  %v9363_v2 = vmul.f32 %v14442_v13, %v9362_v63  ;;  %v8131_v15 = vmul.f32 %v7770_v38, %v15231_v41  ;;  %vm9377_vm15 = vweird.f32 %v16081_v58 }
 0x20b   : > { %v9360_v62 = vsel %vm9359_vm10, %v14440_v60, %v9356_v48  ;;  %v7558_v34 = vmul.f32 %v16088_v16, %v16088_v16  ;;  %v8327_v22 = vmul.f32 %v16094_v42, %v16094_v42  ;;  %v16107_v60 = vld [vmem:[%s20451_s6] ss:$0 sm:$0xff] }
 0x20c   : > { %v11068_v47 = vmul.f32 %v9360_v62, %v8716_v19  ;;  %v9364_v29 = vmul.f32 0.5, %v9363_v2  ;;  %v4463_v46 = vpop.f32.mrf.mxu2  ;;  %v14071_v19 = vld [vmem:[%s14992_s13 + $0x100] sm:$0xff] }
 0x20d   : > { %v6147_v12 = vpop.f32.mrf.mxu3  ;;  %7008 = vadd.xlane.f32.xlu0 %v16088_v16  ;;  %7799 = vadd.xlane.f32.xlu1 %v7558_v34  ;;  %v8523_v44 = vsub.f32 %v8131_v15, %v8327_v22  ;;  %v4884_v49 = vadd.f32 %v4463_v46, %v2976_v40  ;;  %v14269_v22 = vld [vmem:[%s15009_s25 + $0x100] sm:$0xff] }
 0x20e   : > { %v11268_v23 = vmul.f32 %v16107_v60, %v11068_v47  ;;  %v1688_v37 = vpop.f32.mrf.mxu0  ;;  %v2977_v5 = vpop.f32.mrf.mxu1  ;;  %v9365_v57 = vsub.f32 1.5, %v9364_v29  ;;  %v14170_v47 = vld [vmem:[%s15004_s22 + $0x100] sm:$0xff] }
 0x20f   : > { %v16118_v27 = vadd.f32 1e-05, %v8523_v44  ;;  %v6568_v56 = vadd.f32 %v6147_v12, %v4884_v49  ;;  %v2978_v31 = vadd.f32 %v2977_v5, %v1688_v37  ;;  %v8718_v12 = vsub.f32 %v15642_v53, %v16065_v3 }
 0x210   : > { %v16110_v30 = vpop.eup %14443  ;;  %v11468_v25 = vadd.f32 %v16115_v43, %v11268_v23  ;;  %v7772_v18 = vpop.xlane.xlu2 %7771  ;;  %v9366_v51 = vmul.f32 %v14442_v13, %v9365_v57 }
 0x211   : > { %v9372_v39 = vmul.f32 %v16110_v30, %v16081_v58  ;;  %v6981_v55 = vpop.xlane.xlu1 %6980  ;;  %14445 = vrsqrt.f32 %v16118_v27  ;;  %v16128_v35 = vadd.f32 %v15899_v21, %v6568_v56  ;;  %v8132_v10 = vmul.f32 %v7772_v18, %v15231_v41 }
 0x212   : > { %11664 = vst [vmem:[%s15334_s24 + $0xd8] sm:$0xff] %v11468_v25  ;;  %v16131_v14 = vmul.f32 %v15231_v41, %v6981_v55  ;;  %v9370_v6 = vsel %vm9369_vm13, %v14442_v13, %v9366_v51  ;;  %vm9378_vm14 = vweird.f32 %v16110_v30  ;;  %vm9387_vm3 = vweird.f32 %v16118_v27 }
 0x213   : > { %v9373_v52 = vmul.f32 %v16110_v30, %v9372_v39  ;;  %v11069_v54 = vmul.f32 %v9370_v6, %v8717_v1  ;;  %v7559_v0 = vmul.f32 %v16128_v35, %v16128_v35  ;;  %vm9379_vm1 = vmor %vm9377_vm15, %vm9378_vm14 }
 0x214   : > { %v8328_v36 = vmul.f32 %v16131_v14, %v16131_v14  ;;  %v4465_v63 = vpop.f32.mrf.mxu2 }
 0x215   : > { %v9374_v48 = vmul.f32 0.5, %v9373_v52  ;;  %v6149_v38 = vpop.f32.mrf.mxu3  ;;  %7010 = vadd.xlane.f32.xlu1 %v16128_v35  ;;  %v11269_v13 = vmul.f32 %v16107_v60, %v11069_v54  ;;  %v4885_v62 = vadd.f32 %v4465_v63, %v2978_v31  ;;  %7801 = vadd.xlane.f32.xlu2 %v7559_v0 }
 0x216   : > { %v8524_v40 = vsub.f32 %v8132_v10, %v8328_v36  ;;  %v1691_v2 = vpop.f32.mrf.mxu0  ;;  %v2980_v34 = vpop.f32.mrf.mxu1 }
 0x217   : > { %v9375_v15 = vsub.f32 1.5, %v9374_v48  ;;  %v14446_v29 = vpop.eup %14445  ;;  %v11469_v46 = vadd.f32 %v16115_v43, %v11269_v13  ;;  %v6569_v44 = vadd.f32 %v6149_v38, %v4885_v62  ;;  %12385 = vmatmul.msk.bf16.gmra.mxu0 %vm1267_vm0, %v14071_v19  ;;  %v2981_v3 = vadd.f32 %v2980_v34, %v1691_v2 }
 0x218   : > { %v16149_v23 = vadd.f32 1e-05, %v8524_v40  ;;  %v6983_v49 = vpop.xlane.xlu2 %6982  ;;  %12879 = vmatmul.msk.bf16.gmra.mxu1 %vm1267_vm0, %v13972_v33  ;;  %v9382_v5 = vmul.f32 %v14446_v29, %v16118_v27  ;;  %v7774_v25 = vpop.xlane.xlu0 %7773  ;;  %vm9388_vm2 = vweird.f32 %v14446_v29  ;;  %v8719_v2 = vsub.f32 %v15670_v61, %v16094_v42  ;;  %v14072_v42 = vld [vmem:[%s14992_s13 + $0x108] sm:$0xff] }
 0x219   : > { %v9376_v37 = vmul.f32 %v16110_v30, %v9375_v15  ;;  %v16157_v57 = vmul.f32 %v15231_v41, %v6983_v49  ;;  %11665 = vst [vmem:[%s15334_s24 + $0xe0] sm:$0xff] %v11469_v46  ;;  %v16164_v53 = vadd.f32 %v15899_v21, %v6569_v44  ;;  %13375 = vmatmul.msk.bf16.gmra.mxu2 %vm1267_vm0, %v14170_v47  ;;  %vm9389_vm4 = vmor %vm9387_vm3, %vm9388_vm2  ;;  %v13973_v49 = vld [vmem:[%s14997_s19 + $0x108] sm:$0xff] }
 0x21a   : > { %14447 = vrsqrt.f32 %v16149_v23  ;;  %13871 = vmatmul.msk.bf16.gmra.mxu3 %vm1267_vm0, %v14269_v22  ;;  %v9383_v56 = vmul.f32 %v14446_v29, %v9382_v5  ;;  %v8133_v51 = vmul.f32 %v7774_v25, %v15231_v41  ;;  %vm9397_vm6 = vweird.f32 %v16149_v23 }
 0x21b   : > { %v9380_v58 = vsel %vm9379_vm1, %v16110_v30, %v9376_v37  ;;  %v8329_v18 = vmul.f32 %v16157_v57, %v16157_v57  ;;  %v7560_v55 = vmul.f32 %v16164_v53, %v16164_v53 }
 0x21c   : > { %v11070_v39 = vmul.f32 %v9380_v58, %v8718_v12  ;;  %v9384_v1 = vmul.f32 0.5, %v9383_v56  ;;  %v4468_v52 = vpop.f32.mrf.mxu2 }
 0x21d   : > { %v8525_v6 = vsub.f32 %v8133_v51, %v8329_v18  ;;  %v6152_v31 = vpop.f32.mrf.mxu3  ;;  %v4886_v10 = vadd.f32 %v4468_v52, %v2981_v3  ;;  %7012 = vadd.xlane.f32.xlu2 %v16164_v53  ;;  %7803 = vadd.xlane.f32.xlu0 %v7560_v55  ;;  %v14171_v51 = vld [vmem:[%s15004_s22 + $0x108] sm:$0xff]  ;;  %v8720_v52 = vsub.f32 %v15695_v24, %v16131_v14 }
 0x21e   : > { %v11270_v54 = vmul.f32 %v16107_v60, %v11070_v39  ;;  %v1693_v30 = vpop.f32.mrf.mxu0  ;;  %v2982_v36 = vpop.f32.mrf.mxu1  ;;  %v9385_v0 = vsub.f32 1.5, %v9384_v1  ;;  %v14270_v39 = vld [vmem:[%s15009_s25 + $0x108] sm:$0xff] }
 0x21f   : > { %v16176_v19 = vadd.f32 1e-05, %v8525_v6  ;;  %v6570_v63 = vadd.f32 %v6152_v31, %v4886_v10  ;;  %v2983_v15 = vadd.f32 %v2982_v36, %v1693_v30 }
 0x220   : > { %v14448_v33 = vpop.eup %14447  ;;  %v11470_v48 = vadd.f32 %v16115_v43, %v11270_v54  ;;  %v7776_v38 = vpop.xlane.xlu1 %7775  ;;  %v9386_v13 = vmul.f32 %v14446_v29, %v9385_v0 }
 0x221   : > { %v9392_v40 = vmul.f32 %v14448_v33, %v16149_v23  ;;  %14449 = vrsqrt.f32 %v16176_v19  ;;  %v6985_v62 = vpop.xlane.xlu0 %6984  ;;  %v16186_v34 = vadd.f32 %v15899_v21, %v6570_v63  ;;  %v8134_v44 = vmul.f32 %v7776_v38, %v15231_v41 }
 0x222   : > { %11666 = vst [vmem:[%s15334_s24 + $0xe8] sm:$0xff] %v11470_v48  ;;  %v16189_v47 = vmul.f32 %v15231_v41, %v6985_v62  ;;  %v9390_v22 = vsel %vm9389_vm4, %v14446_v29, %v9386_v13  ;;  %vm9398_vm5 = vweird.f32 %v14448_v33  ;;  %vm9407_vm9 = vweird.f32 %v16176_v19 }
 0x223   : > { %v9393_v27 = vmul.f32 %v14448_v33, %v9392_v40  ;;  %v11071_v46 = vmul.f32 %v9390_v22, %v8719_v2  ;;  %v7561_v61 = vmul.f32 %v16186_v34, %v16186_v34  ;;  %vm9399_vm7 = vmor %vm9397_vm6, %vm9398_vm5 }
 0x224   : > { %v8330_v12 = vmul.f32 %v16189_v47, %v16189_v47  ;;  %v4470_v5 = vpop.f32.mrf.mxu2 }
 0x225   : > { %v9394_v37 = vmul.f32 0.5, %v9393_v27  ;;  %v6154_v25 = vpop.f32.mrf.mxu3  ;;  %v11271_v29 = vmul.f32 %v16107_v60, %v11071_v46  ;;  %v4887_v58 = vadd.f32 %v4470_v5, %v2983_v15  ;;  %7014 = vadd.xlane.f32.xlu0 %v16186_v34  ;;  %7805 = vadd.xlane.f32.xlu1 %v7561_v61 }
 0x226   : > { %v8526_v3 = vsub.f32 %v8134_v44, %v8330_v12  ;;  %v1696_v56 = vpop.f32.mrf.mxu0  ;;  %v2985_v18 = vpop.f32.mrf.mxu1 }
 0x227   : > { %v14450_v55 = vpop.eup %14449  ;;  %v9395_v1 = vsub.f32 1.5, %v9394_v37  ;;  %v11471_v6 = vadd.f32 %v16115_v43, %v11271_v29  ;;  %12386 = vmatmul.msk.bf16.gmra.mxu0 %vm1267_vm0, %v14072_v42  ;;  %v6571_v36 = vadd.f32 %v6154_v25, %v4887_v58  ;;  %v2986_v14 = vadd.f32 %v2985_v18, %v1696_v56 }
 0x228   : > { %v9402_v31 = vmul.f32 %v14450_v55, %v16176_v19  ;;  %v16206_v54 = vadd.f32 1e-05, %v8526_v3  ;;  %v6987_v10 = vpop.xlane.xlu1 %6986  ;;  %12880 = vmatmul.msk.bf16.gmra.mxu1 %vm1267_vm0, %v13973_v49  ;;  %v7778_v0 = vpop.xlane.xlu2 %7777  ;;  %vm9408_vm8 = vweird.f32 %v14450_v55  ;;  %v8721_v3 = vsub.f32 %v15736_v8, %v16157_v57 }
 0x229   : > { %v9396_v30 = vmul.f32 %v14448_v33, %v9395_v1  ;;  %v16212_v48 = vmul.f32 %v15231_v41, %v6987_v10  ;;  %11667 = vst [vmem:[%s15334_s24 + $0xf0] sm:$0xff] %v11471_v6  ;;  %13376 = vmatmul.msk.bf16.gmra.mxu2 %vm1267_vm0, %v14171_v51  ;;  %v16219_v38 = vadd.f32 %v15899_v21, %v6571_v36  ;;  %vm9409_vm10 = vmor %vm9407_vm9, %vm9408_vm8 }
 0x22a   : > { %v9403_v24 = vmul.f32 %v14450_v55, %v9402_v31  ;;  %14451 = vrsqrt.f32 %v16206_v54  ;;  %13872 = vmatmul.msk.bf16.gmra.mxu3 %vm1267_vm0, %v14270_v39  ;;  %v8135_v23 = vmul.f32 %v7778_v0, %v15231_v41  ;;  %v13974_v31 = vld [vmem:[%s14997_s19 + $0x110] sm:$0xff]  ;;  %vm9417_vm12 = vweird.f32 %v16206_v54 }
 0x22b   : > { %v9400_v63 = vsel %vm9399_vm7, %v14448_v33, %v9396_v30  ;;  %v8331_v13 = vmul.f32 %v16212_v48, %v16212_v48  ;;  %v7562_v15 = vmul.f32 %v16219_v38, %v16219_v38 }
 0x22c   : > { %v11072_v40 = vmul.f32 %v9400_v63, %v8720_v52  ;;  %v9404_v62 = vmul.f32 0.5, %v9403_v24  ;;  %v4473_v22 = vpop.f32.mrf.mxu2 }
 0x22d   : > { %v8527_v2 = vsub.f32 %v8135_v23, %v8331_v13  ;;  %v6157_v27 = vpop.f32.mrf.mxu3  ;;  %v4888_v33 = vadd.f32 %v4473_v22, %v2986_v14  ;;  %7016 = vadd.xlane.f32.xlu1 %v16219_v38  ;;  %7807 = vadd.xlane.f32.xlu2 %v7562_v15  ;;  %v14172_v13 = vld [vmem:[%s15004_s22 + $0x110] sm:$0xff] }
 0x22e   : > { %v11272_v46 = vmul.f32 %v16107_v60, %v11072_v40  ;;  %v9405_v12 = vsub.f32 1.5, %v9404_v62  ;;  %v1698_v44 = vpop.f32.mrf.mxu0  ;;  %v2987_v61 = vpop.f32.mrf.mxu1  ;;  %v14271_v40 = vld [vmem:[%s15009_s25 + $0x110] sm:$0xff] }
 0x22f   : > { %v16228_v42 = vadd.f32 1e-05, %v8527_v2  ;;  %v6572_v25 = vadd.f32 %v6157_v27, %v4888_v33  ;;  %v2988_v6 = vadd.f32 %v2987_v61, %v1698_v44  ;;  %v8722_v33 = vsub.f32 %v15764_v17, %v16189_v47 }
 0x230   : > { %v14452_v49 = vpop.eup %14451  ;;  %v11472_v37 = vadd.f32 %v16115_v43, %v11272_v46  ;;  %v9406_v5 = vmul.f32 %v14450_v55, %v9405_v12  ;;  %v7780_v29 = vpop.xlane.xlu0 %7779 }
 0x231   : > { %v9412_v58 = vmul.f32 %v14452_v49, %v16206_v54  ;;  %14453 = vrsqrt.f32 %v16228_v42  ;;  %v6989_v56 = vpop.xlane.xlu2 %6988  ;;  %v16238_v51 = vadd.f32 %v15899_v21, %v6572_v25  ;;  %v8136_v57 = vmul.f32 %v7780_v29, %v15231_v41 }
 0x232   : > { %11668 = vst [vmem:[%s15334_s24 + $0xf8] sm:$0xff] %v11472_v37  ;;  %v9410_v18 = vsel %vm9409_vm10, %v14450_v55, %v9406_v5  ;;  %v16241_v19 = vmul.f32 %v15231_v41, %v6989_v56  ;;  %v14073_v55 = vld [vmem:[%s14992_s13 + $0x110] sm:$0xff]  ;;  %vm9418_vm11 = vweird.f32 %v14452_v49  ;;  %vm9427_vm15 = vweird.f32 %v16228_v42 }
 0x233   : > { %v11073_v39 = vmul.f32 %v9410_v18, %v8721_v3  ;;  %v9413_v1 = vmul.f32 %v14452_v49, %v9412_v58  ;;  %v7563_v52 = vmul.f32 %v16238_v51, %v16238_v51  ;;  %vm9419_vm13 = vmor %vm9417_vm12, %vm9418_vm11 }
 0x234   : > { %v8332_v8 = vmul.f32 %v16241_v19, %v16241_v19  ;;  %v4475_v36 = vpop.f32.mrf.mxu2 }
 0x235   : > { %v11273_v10 = vmul.f32 %v16107_v60, %v11073_v39  ;;  %v9414_v30 = vmul.f32 0.5, %v9413_v1  ;;  %v6159_v0 = vpop.f32.mrf.mxu3  ;;  %v4889_v14 = vadd.f32 %v4475_v36, %v2988_v6  ;;  %7809 = vadd.xlane.f32.xlu0 %v7563_v52  ;;  %7018 = vadd.xlane.f32.xlu2 %v16238_v51 }
 0x236   : > { %v8528_v24 = vsub.f32 %v8136_v57, %v8332_v8  ;;  %v1701_v63 = vpop.f32.mrf.mxu0  ;;  %v2990_v23 = vpop.f32.mrf.mxu1 }
 0x237   : > { %v14454_v62 = vpop.eup %14453  ;;  %v11473_v2 = vadd.f32 %v16115_v43, %v11273_v10  ;;  %v9415_v22 = vsub.f32 1.5, %v9414_v30  ;;  %v6573_v46 = vadd.f32 %v6159_v0, %v4889_v14  ;;  %12387 = vmatmul.msk.bf16.gmra.mxu0 %vm1267_vm0, %v14073_v55  ;;  %v2991_v29 = vadd.f32 %v2990_v23, %v1701_v63 }
 0x238   : > { %v9422_v27 = vmul.f32 %v14454_v62, %v16228_v42  ;;  %v16256_v15 = vadd.f32 1e-05, %v8528_v24  ;;  %v6991_v12 = vpop.xlane.xlu0 %6990  ;;  %12881 = vmatmul.msk.bf16.gmra.mxu1 %vm1267_vm0, %v13974_v31  ;;  %v7782_v37 = vpop.xlane.xlu1 %7781  ;;  %vm9428_vm14 = vweird.f32 %v14454_v62  ;;  %v8723_v0 = vsub.f32 %v15794_v20, %v16212_v48  ;;  %v16295_v42 = vld [vmem:[%s20450_s5] ss:$0 sm:$0xff] }
 0x239   : > { %11669 = vst [vmem:[%s15334_s24 + $0x100] sm:$0xff] %v11473_v2  ;;  %v9416_v44 = vmul.f32 %v14452_v49, %v9415_v22  ;;  %v16265_v61 = vmul.f32 %v15231_v41, %v6991_v12  ;;  %v16269_v25 = vadd.f32 %v15899_v21, %v6573_v46  ;;  %13377 = vmatmul.msk.bf16.gmra.mxu2 %vm1267_vm0, %v14172_v13  ;;  %vm9429_vm1 = vmor %vm9427_vm15, %vm9428_vm14  ;;  %v13975_v46 = vld [vmem:[%s14997_s19 + $0x118] sm:$0xff] }
 0x23a   : > { %v9423_v5 = vmul.f32 %v14454_v62, %v9422_v27  ;;  %14455 = vrsqrt.f32 %v16256_v15  ;;  %13873 = vmatmul.msk.bf16.gmra.mxu3 %vm1267_vm0, %v14271_v40  ;;  %v8137_v54 = vmul.f32 %v7782_v37, %v15231_v41  ;;  %v14074_v27 = vld [vmem:[%s14992_s13 + $0x118] sm:$0xff]  ;;  %vm9437_vm3 = vweird.f32 %v16256_v15 }
 0x23b   : > { %v9420_v17 = vsel %vm9419_vm13, %v14452_v49, %v9416_v44  ;;  %v8333_v47 = vmul.f32 %v16265_v61, %v16265_v61  ;;  %v7564_v56 = vmul.f32 %v16269_v25, %v16269_v25 }
 0x23c   : > { %v11074_v3 = vmul.f32 %v9420_v17, %v8722_v33  ;;  %v9424_v58 = vmul.f32 0.5, %v9423_v5  ;;  %v4478_v39 = vpop.f32.mrf.mxu2 }
 0x23d   : > { %v8529_v18 = vsub.f32 %v8137_v54, %v8333_v47  ;;  %v6162_v21 = vpop.f32.mrf.mxu3  ;;  %v4890_v8 = vadd.f32 %v4478_v39, %v2991_v29  ;;  %7020 = vadd.xlane.f32.xlu0 %v16269_v25  ;;  %7811 = vadd.xlane.f32.xlu1 %v7564_v56  ;;  %v14173_v54 = vld [vmem:[%s15004_s22 + $0x118] sm:$0xff] }
 0x23e   : > { %v11274_v1 = vmul.f32 %v16107_v60, %v11074_v3  ;;  %v9425_v6 = vsub.f32 1.5, %v9424_v58  ;;  %v1703_v49 = vpop.f32.mrf.mxu0  ;;  %v2992_v57 = vpop.f32.mrf.mxu1  ;;  %v14272_v3 = vld [vmem:[%s15009_s25 + $0x118] sm:$0xff] }
 0x23f   : > { %v16280_v52 = vadd.f32 1e-05, %v8529_v18  ;;  %v6574_v30 = vadd.f32 %v6162_v21, %v4890_v8  ;;  %v2993_v40 = vadd.f32 %v2992_v57, %v1703_v49  ;;  %v8724_v8 = vsub.f32 %v15819_v28, %v16241_v19 }
 0x240   : > { %v16282_v55 = vpop.eup %14455  ;;  %v11474_v31 = vadd.f32 %v16115_v43, %v11274_v1  ;;  %v9426_v10 = vmul.f32 %v14454_v62, %v9425_v6  ;;  %v7784_v36 = vpop.xlane.xlu2 %7783 }
 0x241   : > { %v9432_v24 = vmul.f32 %v16282_v55, %v16256_v15  ;;  %14457 = vrsqrt.f32 %v16280_v52  ;;  %v6993_v14 = vpop.xlane.xlu1 %6992  ;;  %v16298_v23 = vadd.f32 %v16295_v42, %v6574_v30  ;;  %v8138_v2 = vmul.f32 %v7784_v36, %v15231_v41 }
 0x242   : > { %11670 = vst [vmem:[%s15334_s24 + $0x108] sm:$0xff] %v11474_v31  ;;  %v9430_v63 = vsel %vm9429_vm1, %v14454_v62, %v9426_v10  ;;  %v16301_v20 = vmul.f32 %v15231_v41, %v6993_v14  ;;  %vm9438_vm2 = vweird.f32 %v16282_v55  ;;  %vm9447_vm6 = vweird.f32 %v16280_v52 }
 0x243   : > { %v11075_v48 = vmul.f32 %v9430_v63, %v8723_v0  ;;  %v9433_v13 = vmul.f32 %v16282_v55, %v9432_v24  ;;  %v7565_v22 = vmul.f32 %v16298_v23, %v16298_v23  ;;  %vm9439_vm4 = vmor %vm9437_vm3, %vm9438_vm2 }
 0x244   : > { %v8334_v62 = vmul.f32 %v16301_v20, %v16301_v20  ;;  %v4480_v44 = vpop.f32.mrf.mxu2 }
 0x245   : > { %v11275_v12 = vmul.f32 %v16107_v60, %v11075_v48  ;;  %v9434_v33 = vmul.f32 0.5, %v9433_v13  ;;  %v6164_v37 = vpop.f32.mrf.mxu3  ;;  %v4891_v29 = vadd.f32 %v4480_v44, %v2993_v40  ;;  %7813 = vadd.xlane.f32.xlu2 %v7565_v22  ;;  %7022 = vadd.xlane.f32.xlu1 %v16298_v23 }
 0x246   : > { %v8530_v5 = vsub.f32 %v8138_v2, %v8334_v62  ;;  %v1706_v17 = vpop.f32.mrf.mxu0  ;;  %v2995_v47 = vpop.f32.mrf.mxu1 }
 0x247   : > { %v14458_v58 = vpop.eup %14457  ;;  %v11475_v56 = vadd.f32 %v16115_v43, %v11275_v12  ;;  %v9435_v18 = vsub.f32 1.5, %v9434_v33  ;;  %v6575_v1 = vadd.f32 %v6164_v37, %v4891_v29  ;;  %12388 = vmatmul.msk.bf16.gmra.mxu0 %vm1267_vm0, %v14074_v27  ;;  %v2996_v36 = vadd.f32 %v2995_v47, %v1706_v17 }
 0x248   : > { %v9442_v39 = vmul.f32 %v14458_v58, %v16280_v52  ;;  %v16318_v21 = vadd.f32 1e-05, %v8530_v5  ;;  %v6995_v6 = vpop.xlane.xlu2 %6994  ;;  %12882 = vmatmul.msk.bf16.gmra.mxu1 %vm1267_vm0, %v13975_v46  ;;  %v7786_v31 = vpop.xlane.xlu0 %7785  ;;  %vm9448_vm5 = vweird.f32 %v14458_v58  ;;  %v8725_v37 = vsub.f32 %v15847_v59, %v16265_v61 }
 0x249   : > { %11671 = vst [vmem:[%s15334_s24 + $0x110] sm:$0xff] %v11475_v56  ;;  %v9436_v49 = vmul.f32 %v16282_v55, %v9435_v18  ;;  %v16328_v57 = vmul.f32 %v15231_v41, %v6995_v6  ;;  %v16332_v30 = vadd.f32 %v16295_v42, %v6575_v1  ;;  %13378 = vmatmul.msk.bf16.gmra.mxu2 %vm1267_vm0, %v14173_v54  ;;  %vm9449_vm7 = vmor %vm9447_vm6, %vm9448_vm5  ;;  %v13976_v1 = vld [vmem:[%s14997_s19 + $0x120] sm:$0xff] }
 0x24a   : > { %v9443_v10 = vmul.f32 %v14458_v58, %v9442_v39  ;;  %14459 = vrsqrt.f32 %v16318_v21  ;;  %13874 = vmatmul.msk.bf16.gmra.mxu3 %vm1267_vm0, %v14272_v3  ;;  %v8139_v15 = vmul.f32 %v7786_v31, %v15231_v41  ;;  %vm9457_vm9 = vweird.f32 %v16318_v21 }
 0x24b   : > { %v9440_v28 = vsel %vm9439_vm4, %v16282_v55, %v9436_v49  ;;  %v8335_v19 = vmul.f32 %v16328_v57, %v16328_v57  ;;  %v7566_v14 = vmul.f32 %v16332_v30, %v16332_v30 }
 0x24c   : > { %v11076_v0 = vmul.f32 %v9440_v28, %v8724_v8  ;;  %v9444_v24 = vmul.f32 0.5, %v9443_v10  ;;  %v4483_v48 = vpop.f32.mrf.mxu2 }
 0x24d   : > { %v8531_v63 = vsub.f32 %v8139_v15, %v8335_v19  ;;  %v6167_v13 = vpop.f32.mrf.mxu3  ;;  %v4892_v62 = vadd.f32 %v4483_v48, %v2996_v36  ;;  %7024 = vadd.xlane.f32.xlu2 %v16332_v30  ;;  %7815 = vadd.xlane.f32.xlu0 %v7566_v14  ;;  %v14174_v15 = vld [vmem:[%s15004_s22 + $0x120] sm:$0xff] }
 0x24e   : > { %v11276_v40 = vmul.f32 %v16107_v60, %v11076_v0  ;;  %v9445_v2 = vsub.f32 1.5, %v9444_v24  ;;  %v1708_v55 = vpop.f32.mrf.mxu0  ;;  %v2997_v22 = vpop.f32.mrf.mxu1  ;;  %v14273_v0 = vld [vmem:[%s15009_s25 + $0x120] sm:$0xff] }
 0x24f   : > { %v16344_v27 = vadd.f32 1e-05, %v8531_v63  ;;  %v6576_v44 = vadd.f32 %v6167_v13, %v4892_v62  ;;  %v2998_v59 = vadd.f32 %v2997_v22, %v1708_v55 }
 0x250   : > { %v14460_v46 = vpop.eup %14459  ;;  %v11476_v12 = vadd.f32 %v16115_v43, %v11276_v40  ;;  %v9446_v33 = vmul.f32 %v14458_v58, %v9445_v2  ;;  %v6997_v29 = vpop.xlane.xlu0 %6996  ;;  %v8726_v2 = vsub.f32 %v15872_v4, %v16301_v20 }
 0x251   : > { %v9452_v5 = vmul.f32 %v14460_v46, %v16318_v21  ;;  %14461 = vrsqrt.f32 %v16344_v27  ;;  %v7788_v17 = vpop.xlane.xlu1 %7787  ;;  %v16354_v54 = vadd.f32 %v16295_v42, %v6576_v44  ;;  %v16357_v52 = vmul.f32 %v15231_v41, %v6997_v29 }
 0x252   : > { %11672 = vst [vmem:[%s15334_s24 + $0x118] sm:$0xff] %v11476_v12  ;;  %v9450_v47 = vsel %vm9449_vm7, %v14458_v58, %v9446_v33  ;;  %v8140_v18 = vmul.f32 %v7788_v17, %v15231_v41  ;;  %v14075_v58 = vld [vmem:[%s14992_s13 + $0x120] sm:$0xff]  ;;  %vm9458_vm8 = vweird.f32 %v14460_v46  ;;  %vm9467_vm12 = vweird.f32 %v16344_v27 }
 0x253   : > { %v11077_v3 = vmul.f32 %v9450_v47, %v8725_v37  ;;  %v9453_v56 = vmul.f32 %v14460_v46, %v9452_v5  ;;  %v8336_v61 = vmul.f32 %v16357_v52, %v16357_v52  ;;  %v7567_v39 = vmul.f32 %v16354_v54, %v16354_v54  ;;  %vm9459_vm10 = vmor %vm9457_vm9, %vm9458_vm8 }
 0x254   : > { %v4485_v49 = vpop.f32.mrf.mxu2 }
 0x255   : > { %v11277_v6 = vmul.f32 %v16107_v60, %v11077_v3  ;;  %v9454_v8 = vmul.f32 0.5, %v9453_v56  ;;  %v6169_v31 = vpop.f32.mrf.mxu3  ;;  %v8532_v10 = vsub.f32 %v8140_v18, %v8336_v61  ;;  %v4893_v36 = vadd.f32 %v4485_v49, %v2998_v59  ;;  %7026 = vadd.xlane.f32.xlu0 %v16354_v54  ;;  %7817 = vadd.xlane.f32.xlu1 %v7567_v39 }
 0x256   : > { %v1711_v28 = vpop.f32.mrf.mxu0  ;;  %v3000_v19 = vpop.f32.mrf.mxu1 }
 0x257   : > { %v14462_v24 = vpop.eup %14461  ;;  %v11477_v14 = vadd.f32 %v16115_v43, %v11277_v6  ;;  %v9455_v63 = vsub.f32 1.5, %v9454_v8  ;;  %v16372_v13 = vadd.f32 1e-05, %v8532_v10  ;;  %v6577_v40 = vadd.f32 %v6169_v31, %v4893_v36  ;;  %12389 = vmatmul.msk.bf16.gmra.mxu0 %vm1267_vm0, %v14075_v58 }
 0x258   : > { %v9462_v48 = vmul.f32 %v14462_v24, %v16344_v27  ;;  %12883 = vmatmul.msk.bf16.gmra.mxu1 %vm1267_vm0, %v13976_v1  ;;  %v7790_v55 = vpop.xlane.xlu2 %7789  ;;  %v3001_v44 = vadd.f32 %v3000_v19, %v1711_v28  ;;  %vm9468_vm11 = vweird.f32 %v14462_v24  ;;  %v8727_v31 = vsub.f32 %v15902_v50, %v16328_v57 }
 0x259   : > { %11673 = vst [vmem:[%s15334_s24 + $0x120] sm:$0xff] %v11477_v14  ;;  %v9456_v62 = vmul.f32 %v14460_v46, %v9455_v63  ;;  %v6999_v22 = vpop.xlane.xlu1 %6998  ;;  %14463 = vrsqrt.f32 %v16372_v13  ;;  %v16382_v33 = vadd.f32 %v16295_v42, %v6577_v40  ;;  %13379 = vmatmul.msk.bf16.gmra.mxu2 %vm1267_vm0, %v14174_v15  ;;  %v8141_v29 = vmul.f32 %v7790_v55, %v15231_v41  ;;  %vm9469_vm13 = vmor %vm9467_vm12, %vm9468_vm11  ;;  %v13977_v40 = vld [vmem:[%s14997_s19 + $0x128] sm:$0xff] }
 0x25a   : > { %v9463_v12 = vmul.f32 %v14462_v24, %v9462_v48  ;;  %13875 = vmatmul.msk.bf16.gmra.mxu3 %vm1267_vm0, %v14273_v0  ;;  %v16387_v4 = vmul.f32 %v15231_v41, %v6999_v22  ;;  %v14076_v48 = vld [vmem:[%s14992_s13 + $0x128] sm:$0xff]  ;;  %vm9477_vm15 = vweird.f32 %v16372_v13 }
 0x25b   : > { %v9460_v37 = vsel %vm9459_vm10, %v14460_v46, %v9456_v62  ;;  %v7568_v5 = vmul.f32 %v16382_v33, %v16382_v33 }
 0x25c   : > { %v11078_v20 = vmul.f32 %v9460_v37, %v8726_v2  ;;  %v9464_v21 = vmul.f32 0.5, %v9463_v12  ;;  %v8337_v17 = vmul.f32 %v16387_v4, %v16387_v4  ;;  %v4488_v47 = vpop.f32.mrf.mxu2 }
 0x25d   : > { %v6172_v3 = vpop.f32.mrf.mxu3  ;;  %v4894_v46 = vadd.f32 %v4488_v47, %v3001_v44  ;;  %7819 = vadd.xlane.f32.xlu2 %v7568_v5  ;;  %7028 = vadd.xlane.f32.xlu1 %v16382_v33  ;;  %v14274_v5 = vld [vmem:[%s15009_s25 + $0x128] sm:$0xff] }
 0x25e   : > { %v11278_v56 = vmul.f32 %v16107_v60, %v11078_v20  ;;  %v9465_v59 = vsub.f32 1.5, %v9464_v21  ;;  %v1713_v61 = vpop.f32.mrf.mxu0  ;;  %v3002_v18 = vpop.f32.mrf.mxu1  ;;  %v8533_v39 = vsub.f32 %v8141_v29, %v8337_v17  ;;  %v14175_v21 = vld [vmem:[%s15004_s22 + $0x128] sm:$0xff] }
 0x25f   : > { %v14464_v58 = vpop.eup %14463  ;;  %v6578_v8 = vadd.f32 %v6172_v3, %v4894_v46  ;;  %v3003_v50 = vadd.f32 %v3002_v18, %v1713_v61 }
 0x260   : > { %v11478_v1 = vadd.f32 %v16115_v43, %v11278_v56  ;;  %v9466_v6 = vmul.f32 %v14462_v24, %v9465_v59  ;;  %v7792_v49 = vpop.xlane.xlu0 %7791  ;;  %v9472_v10 = vmul.f32 %v14464_v58, %v16372_v13  ;;  %v16401_v36 = vadd.f32 1e-05, %v8533_v39  ;;  %v7001_v28 = vpop.xlane.xlu2 %7000 }
 0x261   : > { %v16405_v15 = vadd.f32 %v16295_v42, %v6578_v8  ;;  %v16408_v27 = vmul.f32 %v15231_v41, %v7001_v28  ;;  %v8142_v63 = vmul.f32 %v7792_v49, %v15231_v41  ;;  %vm9478_vm14 = vweird.f32 %v14464_v58 }
 0x262   : > { %11674 = vst [vmem:[%s15334_s24 + $0x128] sm:$0xff] %v11478_v1  ;;  %v9470_v19 = vsel %vm9469_vm13, %v14462_v24, %v9466_v6  ;;  %v9473_v14 = vmul.f32 %v14464_v58, %v9472_v10  ;;  %14465 = vrsqrt.f32 %v16401_v36  ;;  %v8728_v39 = vsub.f32 %v15928_v32, %v16357_v52  ;;  %vm9479_vm1 = vmor %vm9477_vm15, %vm9478_vm14 }
 0x263   : > { %v11079_v0 = vmul.f32 %v9470_v19, %v8727_v31  ;;  %v8338_v57 = vmul.f32 %v16408_v27, %v16408_v27  ;;  %v7569_v24 = vmul.f32 %v16405_v15, %v16405_v15  ;;  %vm9487_vm3 = vweird.f32 %v16401_v36 }
 0x264   : > { %v9474_v62 = vmul.f32 0.5, %v9473_v14  ;;  %v4490_v55 = vpop.f32.mrf.mxu2 }
 0x265   : > { %v11279_v2 = vmul.f32 %v16107_v60, %v11079_v0  ;;  %v6174_v22 = vpop.f32.mrf.mxu3  ;;  %v8534_v12 = vsub.f32 %v8142_v63, %v8338_v57  ;;  %v4895_v44 = vadd.f32 %v4490_v55, %v3003_v50  ;;  %7030 = vadd.xlane.f32.xlu2 %v16405_v15  ;;  %7821 = vadd.xlane.f32.xlu0 %v7569_v24 }
 0x266   : > { %v1716_v37 = vpop.f32.mrf.mxu0  ;;  %v3005_v20 = vpop.f32.mrf.mxu1  ;;  %v9475_v17 = vsub.f32 1.5, %v9474_v62 }
 0x267   : > { %v11479_v29 = vadd.f32 %v16115_v43, %v11279_v2  ;;  %v16423_v47 = vadd.f32 1e-05, %v8534_v12  ;;  %v6579_v3 = vadd.f32 %v6174_v22, %v4895_v44  ;;  %12390 = vmatmul.msk.bf16.gmra.mxu0 %vm1267_vm0, %v14076_v48  ;;  %v3006_v6 = vadd.f32 %v3005_v20, %v1716_v37 }
 0x268   : > { %v7003_v56 = vpop.xlane.xlu0 %7002  ;;  %v7794_v59 = vpop.xlane.xlu1 %7793  ;;  %12884 = vmatmul.msk.bf16.gmra.mxu1 %vm1267_vm0, %v13977_v40  ;;  %v9476_v61 = vmul.f32 %v14464_v58, %v9475_v17 }
 0x269   : > { %v14466_v46 = vpop.eup %14465  ;;  %11675 = vst [vmem:[%s15334_s24 + $0x130] sm:$0xff] %v11479_v29  ;;  %v16430_v18 = vmul.f32 %v15231_v41, %v7003_v56  ;;  %14467 = vrsqrt.f32 %v16423_v47  ;;  %13380 = vmatmul.msk.bf16.gmra.mxu2 %vm1267_vm0, %v14175_v21  ;;  %v16439_v49 = vadd.f32 %v16295_v42, %v6579_v3  ;;  %v8143_v31 = vmul.f32 %v7794_v59, %v15231_v41  ;;  %v14077_v59 = vld [vmem:[%s14992_s13 + $0x130] sm:$0xff] }
 0x26a   : > { %v9482_v1 = vmul.f32 %v14466_v46, %v16401_v36  ;;  %13876 = vmatmul.msk.bf16.gmra.mxu3 %vm1267_vm0, %v14274_v5  ;;  %v9480_v8 = vsel %vm9479_vm1, %v14464_v58, %v9476_v61  ;;  %vm9488_vm2 = vweird.f32 %v14466_v46  ;;  %v8729_v21 = vsub.f32 %v15955_v9, %v16387_v4  ;;  %v13978_v61 = vld [vmem:[%s14997_s19 + $0x130] sm:$0xff] }
 0x26b   : > { %v8339_v13 = vmul.f32 %v16430_v18, %v16430_v18  ;;  %v11080_v32 = vmul.f32 %v9480_v8, %v8728_v39  ;;  %v7570_v0 = vmul.f32 %v16439_v49, %v16439_v49  ;;  %vm9489_vm4 = vmor %vm9487_vm3, %vm9488_vm2  ;;  %vm9497_vm6 = vweird.f32 %v16423_v47 }
 0x26c   : > { %v9483_v52 = vmul.f32 %v14466_v46, %v9482_v1  ;;  %v4493_v28 = vpop.f32.mrf.mxu2 }
 0x26d   : > { %v8535_v10 = vsub.f32 %v8143_v31, %v8339_v13  ;;  %v6177_v19 = vpop.f32.mrf.mxu3  ;;  %v11280_v14 = vmul.f32 %v16107_v60, %v11080_v32  ;;  %v4896_v58 = vadd.f32 %v4493_v28, %v3006_v6  ;;  %7032 = vadd.xlane.f32.xlu0 %v16439_v49  ;;  %7823 = vadd.xlane.f32.xlu1 %v7570_v0  ;;  %v14176_v31 = vld [vmem:[%s15004_s22 + $0x130] sm:$0xff] }
 0x26e   : > { %v9484_v50 = vmul.f32 0.5, %v9483_v52  ;;  %v1718_v57 = vpop.f32.mrf.mxu0  ;;  %v3007_v63 = vpop.f32.mrf.mxu1  ;;  %v14275_v32 = vld [vmem:[%s15009_s25 + $0x130] sm:$0xff] }
 0x26f   : > { %v16448_v24 = vadd.f32 1e-05, %v8535_v10  ;;  %v16450_v48 = vpop.eup %14467  ;;  %v11480_v40 = vadd.f32 %v16115_v43, %v11280_v14  ;;  %v6580_v62 = vadd.f32 %v6177_v19, %v4896_v58  ;;  %v3008_v29 = vadd.f32 %v3007_v63, %v1718_v57 }
 0x270   : > { %v9485_v2 = vsub.f32 1.5, %v9484_v50  ;;  %v7796_v55 = vpop.xlane.xlu2 %7795  ;;  %v7005_v22 = vpop.xlane.xlu1 %7004  ;;  %v9492_v12 = vmul.f32 %v16450_v48, %v16423_v47  ;;  %vm9498_vm5 = vweird.f32 %v16450_v48  ;;  %v8730_v19 = vsub.f32 %v15981_v7, %v16408_v27 }
 0x271   : > { %14469 = vrsqrt.f32 %v16448_v24  ;;  %11676 = vst [vmem:[%s15334_s24 + $0x138] sm:$0xff] %v11480_v40  ;;  %v16459_v37 = vadd.f32 %v16295_v42, %v6580_v62  ;;  %v16462_v20 = vmul.f32 %v15231_v41, %v7005_v22  ;;  %v8144_v3 = vmul.f32 %v7796_v55, %v15231_v41  ;;  %vm9499_vm7 = vmor %vm9497_vm6, %vm9498_vm5 }
 0x272   : > { %v9486_v44 = vmul.f32 %v14466_v46, %v9485_v2  ;;  %v9493_v5 = vmul.f32 %v16450_v48, %v9492_v12  ;;  %vm9507_vm9 = vweird.f32 %v16448_v24 }
 0x273   : > { %v8340_v36 = vmul.f32 %v16462_v20, %v16462_v20  ;;  %v7571_v56 = vmul.f32 %v16459_v37, %v16459_v37 }
 0x274   : > { %v9490_v17 = vsel %vm9489_vm4, %v14466_v46, %v9486_v44  ;;  %v9494_v1 = vmul.f32 0.5, %v9493_v5  ;;  %v4495_v9 = vpop.f32.mrf.mxu2 }
 0x275   : > { %v11081_v39 = vmul.f32 %v9490_v17, %v8729_v21  ;;  %v6179_v4 = vpop.f32.mrf.mxu3  ;;  %v8536_v6 = vsub.f32 %v8144_v3, %v8340_v36  ;;  %v4897_v8 = vadd.f32 %v4495_v9, %v3008_v29  ;;  %7825 = vadd.xlane.f32.xlu2 %v7571_v56  ;;  %7034 = vadd.xlane.f32.xlu1 %v16459_v37  ;;  %v16508_v29 = vld [vmem:[%s20451_s6] ss:$0 sm:$0xff] }
 0x276   : > { %v1721_v13 = vpop.f32.mrf.mxu0  ;;  %v3010_v46 = vpop.f32.mrf.mxu1  ;;  %v9495_v28 = vsub.f32 1.5, %v9494_v1 }
 0x277   : > { %v14470_v52 = vpop.eup %14469  ;;  %v11281_v10 = vmul.f32 %v16107_v60, %v11081_v39  ;;  %v16482_v14 = vadd.f32 1e-05, %v8536_v6  ;;  %v6581_v50 = vadd.f32 %v6179_v4, %v4897_v8  ;;  %12391 = vmatmul.msk.bf16.gmra.mxu0 %vm1267_vm0, %v14077_v59  ;;  %v3011_v2 = vadd.f32 %v3010_v46, %v1721_v13  ;;  %v16519_v39 = vld [vmem:[%s20452_s7] ss:$0 sm:$0xff] }
 0x278   : > { %v9502_v0 = vmul.f32 %v14470_v52, %v16448_v24  ;;  %v7007_v58 = vpop.xlane.xlu2 %7006  ;;  %v7798_v57 = vpop.xlane.xlu0 %7797  ;;  %12885 = vmatmul.msk.bf16.gmra.mxu1 %vm1267_vm0, %v13978_v61  ;;  %v9496_v63 = vmul.f32 %v16450_v48, %v9495_v28  ;;  %vm9508_vm8 = vweird.f32 %v14470_v52  ;;  %v8731_v13 = vsub.f32 %v16007_v45, %v16430_v18 }
 0x279   : > { %v11481_v60 = vadd.f32 %v16115_v43, %v11281_v10  ;;  %v16490_v7 = vmul.f32 %v15231_v41, %v7007_v58  ;;  %14471 = vrsqrt.f32 %v16482_v14  ;;  %v16494_v40 = vadd.f32 %v16295_v42, %v6581_v50  ;;  %13381 = vmatmul.msk.bf16.gmra.mxu2 %vm1267_vm0, %v14176_v31  ;;  %vm9509_vm10 = vmor %vm9507_vm9, %vm9508_vm8  ;;  %v13979_v50 = vld [vmem:[%s14997_s19 + $0x138] sm:$0xff] }
 0x27a   : > { %v9503_v27 = vmul.f32 %v14470_v52, %v9502_v0  ;;  %13877 = vmatmul.msk.bf16.gmra.mxu3 %vm1267_vm0, %v14275_v32  ;;  %v9500_v43 = vsel %vm9499_vm7, %v16450_v48, %v9496_v63  ;;  %v8145_v62 = vmul.f32 %v7798_v57, %v15231_v41  ;;  %v14078_v0 = vld [vmem:[%s14992_s13 + $0x138] sm:$0xff]  ;;  %vm9517_vm12 = vweird.f32 %v16482_v14 }
 0x27b   : > { %11677 = vst [vmem:[%s15334_s24 + $0x140] sm:$0xff] %v11481_v60  ;;  %v8341_v47 = vmul.f32 %v16490_v7, %v16490_v7  ;;  %v11082_v55 = vmul.f32 %v9500_v43, %v8730_v19  ;;  %v7572_v12 = vmul.f32 %v16494_v40, %v16494_v40 }
 0x27c   : > { %v9504_v22 = vmul.f32 0.5, %v9503_v27  ;;  %v4498_v21 = vpop.f32.mrf.mxu2 }
 0x27d   : > { %v8537_v44 = vsub.f32 %v8145_v62, %v8341_v47  ;;  %v6182_v5 = vpop.f32.mrf.mxu3  ;;  %v11282_v48 = vmul.f32 %v16508_v29, %v11082_v55  ;;  %v4898_v3 = vadd.f32 %v4498_v21, %v3011_v2  ;;  %7036 = vadd.xlane.f32.xlu2 %v16494_v40  ;;  %7827 = vadd.xlane.f32.xlu0 %v7572_v12  ;;  %v14177_v62 = vld [vmem:[%s15004_s22 + $0x138] sm:$0xff] }
 0x27e   : > { %v9505_v17 = vsub.f32 1.5, %v9504_v22  ;;  %v1723_v36 = vpop.f32.mrf.mxu0  ;;  %v3012_v56 = vpop.f32.mrf.mxu1  ;;  %v14276_v55 = vld [vmem:[%s15009_s25 + $0x138] sm:$0xff] }
 0x27f   : > { %v16512_v59 = vadd.f32 1e-05, %v8537_v44  ;;  %v16514_v61 = vpop.eup %14471  ;;  %v11482_v1 = vadd.f32 %v16519_v39, %v11282_v48  ;;  %v6582_v4 = vadd.f32 %v6182_v5, %v4898_v3  ;;  %v3013_v19 = vadd.f32 %v3012_v56, %v1723_v36 }
 0x280   : > { %v9506_v9 = vmul.f32 %v14470_v52, %v9505_v17  ;;  %v7009_v6 = vpop.xlane.xlu0 %7008  ;;  %v7800_v8 = vpop.xlane.xlu1 %7799  ;;  %v9512_v46 = vmul.f32 %v16514_v61, %v16482_v14  ;;  %vm9518_vm11 = vweird.f32 %v16514_v61  ;;  %v8732_v3 = vsub.f32 %v16034_v11, %v16462_v20 }
 0x281   : > { %14473 = vrsqrt.f32 %v16512_v59  ;;  %11678 = vst [vmem:[%s15334_s24 + $0x148] sm:$0xff] %v11482_v1  ;;  %v16531_v32 = vadd.f32 %v16295_v42, %v6582_v4  ;;  %v16534_v24 = vmul.f32 %v15231_v41, %v7009_v6  ;;  %v8146_v18 = vmul.f32 %v7800_v8, %v15231_v41  ;;  %vm9519_vm13 = vmor %vm9517_vm12, %vm9518_vm11 }
 0x282   : > { %v9510_v31 = vsel %vm9509_vm10, %v14470_v52, %v9506_v9  ;;  %v9513_v28 = vmul.f32 %v16514_v61, %v9512_v46  ;;  %vm9527_vm15 = vweird.f32 %v16512_v59 }
 0x283   : > { %v11083_v10 = vmul.f32 %v9510_v31, %v8731_v13  ;;  %v8342_v45 = vmul.f32 %v16534_v24, %v16534_v24  ;;  %v7573_v52 = vmul.f32 %v16531_v32, %v16531_v32 }
 0x284   : > { %v9514_v57 = vmul.f32 0.5, %v9513_v28  ;;  %v4500_v60 = vpop.f32.mrf.mxu2 }
 0x285   : > { %v11283_v58 = vmul.f32 %v16508_v29, %v11083_v10  ;;  %v6184_v63 = vpop.f32.mrf.mxu3  ;;  %v8538_v27 = vsub.f32 %v8146_v18, %v8342_v45  ;;  %v4899_v2 = vadd.f32 %v4500_v60, %v3013_v19  ;;  %7038 = vadd.xlane.f32.xlu0 %v16531_v32  ;;  %7829 = vadd.xlane.f32.xlu1 %v7573_v52 }
 0x286   : > { %v1726_v43 = vpop.f32.mrf.mxu0  ;;  %v3015_v47 = vpop.f32.mrf.mxu1  ;;  %v9515_v44 = vsub.f32 1.5, %v9514_v57 }
 0x287   : > { %v14474_v22 = vpop.eup %14473  ;;  %v11483_v12 = vadd.f32 %v16519_v39, %v11283_v58  ;;  %v16551_v5 = vadd.f32 1e-05, %v8538_v27  ;;  %v6583_v48 = vadd.f32 %v6184_v63, %v4899_v2  ;;  %12392 = vmatmul.msk.bf16.gmra.mxu0 %vm1267_vm0, %v14078_v0  ;;  %v3016_v6 = vadd.f32 %v3015_v47, %v1726_v43 }
 0x288   : > { %v9522_v21 = vmul.f32 %v14474_v22, %v16512_v59  ;;  %v7011_v17 = vpop.xlane.xlu1 %7010  ;;  %12886 = vmatmul.msk.bf16.gmra.mxu1 %vm1267_vm0, %v13979_v50  ;;  %v9516_v36 = vmul.f32 %v16514_v61, %v9515_v44  ;;  %v7802_v56 = vpop.xlane.xlu2 %7801  ;;  %vm9528_vm14 = vweird.f32 %v14474_v22  ;;  %v8733_v63 = vsub.f32 %v16058_v26, %v16490_v7 }
 0x289   : > { %11679 = vst [vmem:[%s15334_s24 + $0x150] sm:$0xff] %v11483_v12  ;;  %v16561_v1 = vmul.f32 %v15231_v41, %v7011_v17  ;;  %14475 = vrsqrt.f32 %v16551_v5  ;;  %v16565_v4 = vadd.f32 %v16295_v42, %v6583_v48  ;;  %13382 = vmatmul.msk.bf16.gmra.mxu2 %vm1267_vm0, %v14177_v62  ;;  %v8147_v20 = vmul.f32 %v7802_v56, %v15231_v41  ;;  %vm9529_vm1 = vmor %vm9527_vm15, %vm9528_vm14  ;;  %v13980_v48 = vld [vmem:[%s14997_s19 + $0x140] sm:$0xff] }
 0x28a   : > { %v9523_v9 = vmul.f32 %v14474_v22, %v9522_v21  ;;  %13878 = vmatmul.msk.bf16.gmra.mxu3 %vm1267_vm0, %v14276_v55  ;;  %v9520_v11 = vsel %vm9519_vm13, %v16514_v61, %v9516_v36  ;;  %vm9537_vm3 = vweird.f32 %v16551_v5 }
 0x28b   : > { %v8343_v14 = vmul.f32 %v16561_v1, %v16561_v1  ;;  %v11084_v8 = vmul.f32 %v9520_v11, %v8732_v3  ;;  %v7574_v46 = vmul.f32 %v16565_v4, %v16565_v4 }
 0x28c   : > { %v9524_v13 = vmul.f32 0.5, %v9523_v9  ;;  %v4503_v10 = vpop.f32.mrf.mxu2 }
 0x28d   : > { %v8539_v31 = vsub.f32 %v8147_v20, %v8343_v14  ;;  %v6187_v28 = vpop.f32.mrf.mxu3  ;;  %v11284_v19 = vmul.f32 %v16508_v29, %v11084_v8  ;;  %v4900_v18 = vadd.f32 %v4503_v10, %v3016_v6  ;;  %7831 = vadd.xlane.f32.xlu2 %v7574_v46  ;;  %7040 = vadd.xlane.f32.xlu1 %v16565_v4  ;;  %v14178_v14 = vld [vmem:[%s15004_s22 + $0x140] sm:$0xff] }
 0x28e   : > { %v9525_v45 = vsub.f32 1.5, %v9524_v13  ;;  %v1728_v61 = vpop.f32.mrf.mxu0  ;;  %v3017_v52 = vpop.f32.mrf.mxu1  ;;  %v14277_v8 = vld [vmem:[%s15009_s25 + $0x140] sm:$0xff] }
 0x28f   : > { %v16577_v0 = vadd.f32 1e-05, %v8539_v31  ;;  %v14476_v50 = vpop.eup %14475  ;;  %v11484_v58 = vadd.f32 %v16519_v39, %v11284_v19  ;;  %v6584_v60 = vadd.f32 %v6187_v28, %v4900_v18  ;;  %v3018_v26 = vadd.f32 %v3017_v52, %v1728_v61 }
 0x290   : > { %v9526_v57 = vmul.f32 %v14474_v22, %v9525_v45  ;;  %v9532_v27 = vmul.f32 %v14476_v50, %v16551_v5  ;;  %v7013_v2 = vpop.xlane.xlu2 %7012  ;;  %v7804_v43 = vpop.xlane.xlu0 %7803  ;;  %vm9538_vm2 = vweird.f32 %v14476_v50  ;;  %v8734_v45 = vsub.f32 %v16088_v16, %v16534_v24 }
 0x291   : > { %14477 = vrsqrt.f32 %v16577_v0  ;;  %11680 = vst [vmem:[%s15334_s24 + $0x158] sm:$0xff] %v11484_v58  ;;  %v16587_v62 = vadd.f32 %v16295_v42, %v6584_v60  ;;  %v16590_v59 = vmul.f32 %v15231_v41, %v7013_v2  ;;  %v8148_v44 = vmul.f32 %v7804_v43, %v15231_v41  ;;  %vm9539_vm4 = vmor %vm9537_vm3, %vm9538_vm2 }
 0x292   : > { %v9530_v47 = vsel %vm9529_vm1, %v14474_v22, %v9526_v57  ;;  %v9533_v12 = vmul.f32 %v14476_v50, %v9532_v27  ;;  %v14079_v22 = vld [vmem:[%s14992_s13 + $0x140] sm:$0xff]  ;;  %vm9547_vm6 = vweird.f32 %v16577_v0 }
 0x293   : > { %v11085_v55 = vmul.f32 %v9530_v47, %v8733_v63  ;;  %v8344_v7 = vmul.f32 %v16590_v59, %v16590_v59  ;;  %v7575_v21 = vmul.f32 %v16587_v62, %v16587_v62 }
 0x294   : > { %v9534_v3 = vmul.f32 0.5, %v9533_v12  ;;  %v4505_v36 = vpop.f32.mrf.mxu2 }
 0x295   : > { %v11285_v17 = vmul.f32 %v16508_v29, %v11085_v55  ;;  %v6189_v56 = vpop.f32.mrf.mxu3  ;;  %v8540_v9 = vsub.f32 %v8148_v44, %v8344_v7  ;;  %v4901_v6 = vadd.f32 %v4505_v36, %v3018_v26  ;;  %7042 = vadd.xlane.f32.xlu2 %v16587_v62  ;;  %7833 = vadd.xlane.f32.xlu0 %v7575_v21 }
 0x296   : > { %v1731_v11 = vpop.f32.mrf.mxu0  ;;  %v3020_v20 = vpop.f32.mrf.mxu1  ;;  %v9535_v31 = vsub.f32 1.5, %v9534_v3  ;;  %v8735_v36 = vsub.f32 %v16128_v35, %v16561_v1 }
 0x297   : > { %v14478_v13 = vpop.eup %14477  ;;  %v11485_v46 = vadd.f32 %v16519_v39, %v11285_v17  ;;  %v16605_v28 = vadd.f32 1e-05, %v8540_v9  ;;  %v6585_v19 = vadd.f32 %v6189_v56, %v4901_v6  ;;  %12393 = vmatmul.msk.bf16.gmra.mxu0 %vm1267_vm0, %v14079_v22  ;;  %v3021_v60 = vadd.f32 %v3020_v20, %v1731_v11 }
 0x298   : > { %v9542_v10 = vmul.f32 %v14478_v13, %v16577_v0  ;;  %12887 = vmatmul.msk.bf16.gmra.mxu1 %vm1267_vm0, %v13980_v48  ;;  %v9536_v18 = vmul.f32 %v14476_v50, %v9535_v31  ;;  %v7015_v61 = vpop.xlane.xlu0 %7014  ;;  %v7806_v52 = vpop.xlane.xlu1 %7805  ;;  %vm9548_vm5 = vweird.f32 %v14478_v13 }
 0x299   : > { %11681 = vst [vmem:[%s15334_s24 + $0x160] sm:$0xff] %v11485_v46  ;;  %14479 = vrsqrt.f32 %v16605_v28  ;;  %v16615_v57 = vadd.f32 %v16295_v42, %v6585_v19  ;;  %13383 = vmatmul.msk.bf16.gmra.mxu2 %vm1267_vm0, %v14178_v14  ;;  %v16620_v16 = vmul.f32 %v15231_v41, %v7015_v61  ;;  %v8149_v43 = vmul.f32 %v7806_v52, %v15231_v41  ;;  %vm9549_vm7 = vmor %vm9547_vm6, %vm9548_vm5  ;;  %v13981_v19 = vld [vmem:[%s14997_s19 + $0x148] sm:$0xff] }
 0x29a   : > { %v9543_v58 = vmul.f32 %v14478_v13, %v9542_v10  ;;  %13879 = vmatmul.msk.bf16.gmra.mxu3 %vm1267_vm0, %v14277_v8  ;;  %v9540_v63 = vsel %vm9539_vm4, %v14476_v50, %v9536_v18  ;;  %v14080_v10 = vld [vmem:[%s14992_s13 + $0x148] sm:$0xff]  ;;  %vm9557_vm9 = vweird.f32 %v16605_v28 }
 0x29b   : > { %v11086_v24 = vmul.f32 %v9540_v63, %v8734_v45  ;;  %v7576_v27 = vmul.f32 %v16615_v57, %v16615_v57  ;;  %v8345_v2 = vmul.f32 %v16620_v16, %v16620_v16 }
 0x29c   : > { %v9544_v5 = vmul.f32 0.5, %v9543_v58  ;;  %v4508_v47 = vpop.f32.mrf.mxu2 }
 0x29d   : > { %v6192_v55 = vpop.f32.mrf.mxu3  ;;  %v11286_v12 = vmul.f32 %v16508_v29, %v11086_v24  ;;  %v4902_v50 = vadd.f32 %v4508_v47, %v3021_v60  ;;  %7044 = vadd.xlane.f32.xlu0 %v16615_v57  ;;  %7835 = vadd.xlane.f32.xlu1 %v7576_v27  ;;  %v8541_v21 = vsub.f32 %v8149_v43, %v8345_v2  ;;  %v14278_v27 = vld [vmem:[%s15009_s25 + $0x148] sm:$0xff] }
 0x29e   : > { %v9545_v26 = vsub.f32 1.5, %v9544_v5  ;;  %v1733_v7 = vpop.f32.mrf.mxu0  ;;  %v3022_v44 = vpop.f32.mrf.mxu1  ;;  %v14179_v5 = vld [vmem:[%s15004_s22 + $0x148] sm:$0xff] }
 0x29f   : > { %v14480_v22 = vpop.eup %14479  ;;  %v11486_v48 = vadd.f32 %v16519_v39, %v11286_v12  ;;  %v6586_v3 = vadd.f32 %v6192_v55, %v4902_v50  ;;  %v16634_v9 = vadd.f32 1e-05, %v8541_v21  ;;  %v3023_v35 = vadd.f32 %v3022_v44, %v1733_v7 }
 0x2a0   : > { %v9546_v17 = vmul.f32 %v14478_v13, %v9545_v26  ;;  %v9552_v56 = vmul.f32 %v14480_v22, %v16605_v28  ;;  %v7017_v6 = vpop.xlane.xlu1 %7016  ;;  %v7808_v14 = vpop.xlane.xlu2 %7807  ;;  %vm9558_vm8 = vweird.f32 %v14480_v22  ;;  %v8736_v7 = vsub.f32 %v16164_v53, %v16590_v59 }
 0x2a1   : > { %11682 = vst [vmem:[%s15334_s24 + $0x168] sm:$0xff] %v11486_v48  ;;  %v16638_v20 = vadd.f32 %v16295_v42, %v6586_v3  ;;  %v16641_v0 = vmul.f32 %v15231_v41, %v7017_v6  ;;  %14481 = vrsqrt.f32 %v16634_v9  ;;  %v8150_v1 = vmul.f32 %v7808_v14, %v15231_v41  ;;  %vm9559_vm10 = vmor %vm9557_vm9, %vm9558_vm8 }
 0x2a2   : > { %v9550_v11 = vsel %vm9549_vm7, %v14478_v13, %v9546_v17  ;;  %v9553_v46 = vmul.f32 %v14480_v22, %v9552_v56  ;;  %vm9567_vm12 = vweird.f32 %v16634_v9 }
 0x2a3   : > { %v11087_v8 = vmul.f32 %v9550_v11, %v8735_v36  ;;  %v8346_v31 = vmul.f32 %v16641_v0, %v16641_v0  ;;  %v7577_v13 = vmul.f32 %v16638_v20, %v16638_v20 }
 0x2a4   : > { %v9554_v18 = vmul.f32 0.5, %v9553_v46  ;;  %v4510_v61 = vpop.f32.mrf.mxu2 }
 0x2a5   : > { %v11287_v45 = vmul.f32 %v16508_v29, %v11087_v8  ;;  %v6194_v52 = vpop.f32.mrf.mxu3  ;;  %v8542_v58 = vsub.f32 %v8150_v1, %v8346_v31  ;;  %v4903_v60 = vadd.f32 %v4510_v61, %v3023_v35  ;;  %7837 = vadd.xlane.f32.xlu2 %v7577_v13  ;;  %7046 = vadd.xlane.f32.xlu1 %v16638_v20 }
 0x2a6   : > { %v1736_v63 = vpop.f32.mrf.mxu0  ;;  %v3025_v24 = vpop.f32.mrf.mxu1  ;;  %v9555_v43 = vsub.f32 1.5, %v9554_v18 }
 0x2a7   : > { %v11487_v2 = vadd.f32 %v16519_v39, %v11287_v45  ;;  %v16656_v47 = vadd.f32 1e-05, %v8542_v58  ;;  %v6587_v55 = vadd.f32 %v6194_v52, %v4903_v60  ;;  %12394 = vmatmul.msk.bf16.gmra.mxu0 %vm1267_vm0, %v14080_v10  ;;  %v14482_v12 = vpop.eup %14481  ;;  %v3026_v21 = vadd.f32 %v3025_v24, %v1736_v63  ;;  %v16693_v60 = vld [vmem:[%s20450_s5] ss:$0 sm:$0xff] }
 0x2a8   : > { %12888 = vmatmul.msk.bf16.gmra.mxu1 %vm1267_vm0, %v13981_v19  ;;  %v9556_v26 = vmul.f32 %v14480_v22, %v9555_v43  ;;  %v7810_v50 = vpop.xlane.xlu0 %7809  ;;  %v9562_v44 = vmul.f32 %v14482_v12, %v16634_v9  ;;  %v7019_v48 = vpop.xlane.xlu2 %7018  ;;  %vm9568_vm11 = vweird.f32 %v14482_v12 }
 0x2a9   : > { %11683 = vst [vmem:[%s15334_s24 + $0x170] sm:$0xff] %v11487_v2  ;;  %14483 = vrsqrt.f32 %v16656_v47  ;;  %13384 = vmatmul.msk.bf16.gmra.mxu2 %vm1267_vm0, %v14179_v5  ;;  %v16669_v3 = vadd.f32 %v16295_v42, %v6587_v55  ;;  %v16672_v28 = vmul.f32 %v15231_v41, %v7019_v48  ;;  %v8151_v56 = vmul.f32 %v7810_v50, %v15231_v41  ;;  %vm9569_vm13 = vmor %vm9567_vm12, %vm9568_vm11  ;;  %v14081_v50 = vld [vmem:[%s14992_s13 + $0x150] sm:$0xff] }
 0x2aa   : > { %13880 = vmatmul.msk.bf16.gmra.mxu3 %vm1267_vm0, %v14278_v27  ;;  %v9560_v17 = vsel %vm9559_vm10, %v14480_v22, %v9556_v26  ;;  %v9563_v53 = vmul.f32 %v14482_v12, %v9562_v44  ;;  %v8737_v5 = vsub.f32 %v16186_v34, %v16620_v16  ;;  %vm9577_vm15 = vweird.f32 %v16656_v47 }
 0x2ab   : > { %v11088_v36 = vmul.f32 %v9560_v17, %v8736_v7  ;;  %v8347_v59 = vmul.f32 %v16672_v28, %v16672_v28  ;;  %v7578_v14 = vmul.f32 %v16669_v3, %v16669_v3  ;;  %v13982_v7 = vld [vmem:[%s14997_s19 + $0x150] sm:$0xff] }
 0x2ac   : > { %v4513_v6 = vpop.f32.mrf.mxu2  ;;  %v9564_v8 = vmul.f32 0.5, %v9563_v53  ;;  %v14180_v53 = vld [vmem:[%s15004_s22 + $0x150] sm:$0xff] }
 0x2ad   : > { %v6197_v11 = vpop.f32.mrf.mxu3  ;;  %v11288_v22 = vmul.f32 %v16508_v29, %v11088_v36  ;;  %v4904_v42 = vadd.f32 %v4513_v6, %v3026_v21  ;;  %7048 = vadd.xlane.f32.xlu2 %v16669_v3  ;;  %v8543_v1 = vsub.f32 %v8151_v56, %v8347_v59  ;;  %7839 = vadd.xlane.f32.xlu0 %v7578_v14  ;;  %v14279_v59 = vld [vmem:[%s15009_s25 + $0x150] sm:$0xff] }
 0x2ae   : > { %v1738_v46 = vpop.f32.mrf.mxu0  ;;  %v3027_v35 = vpop.f32.mrf.mxu1  ;;  %v9565_v10 = vsub.f32 1.5, %v9564_v8 }
 0x2af   : > { %v16681_v31 = vpop.eup %14483  ;;  %v11488_v13 = vadd.f32 %v16519_v39, %v11288_v22  ;;  %v6588_v19 = vadd.f32 %v6197_v11, %v4904_v42  ;;  %v16686_v18 = vadd.f32 1e-05, %v8543_v1  ;;  %v3028_v9 = vadd.f32 %v3027_v35, %v1738_v46 }
 0x2b0   : > { %v9572_v45 = vmul.f32 %v16681_v31, %v16656_v47  ;;  %v7021_v61 = vpop.xlane.xlu0 %7020  ;;  %v7812_v52 = vpop.xlane.xlu1 %7811  ;;  %v9566_v58 = vmul.f32 %v14482_v12, %v9565_v10  ;;  %vm9578_vm14 = vweird.f32 %v16681_v31  ;;  %v8738_v1 = vsub.f32 %v16219_v38, %v16641_v0 }
 0x2b1   : > { %11684 = vst [vmem:[%s15334_s24 + $0x178] sm:$0xff] %v11488_v13  ;;  %v16696_v63 = vadd.f32 %v16693_v60, %v6588_v19  ;;  %v16699_v24 = vmul.f32 %v15231_v41, %v7021_v61  ;;  %14485 = vrsqrt.f32 %v16686_v18  ;;  %v8152_v55 = vmul.f32 %v7812_v52, %v15231_v41  ;;  %vm9579_vm1 = vmor %vm9577_vm15, %vm9578_vm14 }
 0x2b2   : > { %v9573_v27 = vmul.f32 %v16681_v31, %v9572_v45  ;;  %v9570_v2 = vsel %vm9569_vm13, %v14482_v12, %v9566_v58  ;;  %vm9587_vm3 = vweird.f32 %v16686_v18 }
 0x2b3   : > { %v8348_v43 = vmul.f32 %v16699_v24, %v16699_v24  ;;  %v7579_v26 = vmul.f32 %v16696_v63, %v16696_v63  ;;  %v11089_v34 = vmul.f32 %v9570_v2, %v8737_v5 }
 0x2b4   : > { %v9574_v16 = vmul.f32 0.5, %v9573_v27  ;;  %v4515_v44 = vpop.f32.mrf.mxu2 }
 0x2b5   : > { %v6199_v21 = vpop.f32.mrf.mxu3  ;;  %v8544_v48 = vsub.f32 %v8152_v55, %v8348_v43  ;;  %v4905_v17 = vadd.f32 %v4515_v44, %v3028_v9  ;;  %7841 = vadd.xlane.f32.xlu1 %v7579_v26  ;;  %v11289_v56 = vmul.f32 %v16508_v29, %v11089_v34  ;;  %7050 = vadd.xlane.f32.xlu0 %v16696_v63 }
 0x2b6   : > { %v1741_v36 = vpop.f32.mrf.mxu0  ;;  %v3030_v12 = vpop.f32.mrf.mxu1  ;;  %v9575_v6 = vsub.f32 1.5, %v9574_v16 }
 0x2b7   : > { %v16717_v11 = vadd.f32 1e-05, %v8544_v48  ;;  %v6589_v14 = vadd.f32 %v6199_v21, %v4905_v17  ;;  %12395 = vmatmul.msk.bf16.gmra.mxu0 %vm1267_vm0, %v14081_v50  ;;  %v14486_v22 = vpop.eup %14485  ;;  %v11489_v8 = vadd.f32 %v16519_v39, %v11289_v56  ;;  %v3031_v10 = vadd.f32 %v3030_v12, %v1741_v36 }
 0x2b8   : > { %12889 = vmatmul.msk.bf16.gmra.mxu1 %vm1267_vm0, %v13982_v7  ;;  %v9576_v42 = vmul.f32 %v16681_v31, %v9575_v6  ;;  %v7814_v46 = vpop.xlane.xlu2 %7813  ;;  %v7023_v35 = vpop.xlane.xlu1 %7022  ;;  %v9582_v13 = vmul.f32 %v14486_v22, %v16686_v18  ;;  %vm9588_vm2 = vweird.f32 %v14486_v22 }
 0x2b9   : > { %14487 = vrsqrt.f32 %v16717_v11  ;;  %13385 = vmatmul.msk.bf16.gmra.mxu2 %vm1267_vm0, %v14180_v53  ;;  %11685 = vst [vmem:[%s15334_s24 + $0x180] sm:$0xff] %v11489_v8  ;;  %v16733_v47 = vadd.f32 %v16693_v60, %v6589_v14  ;;  %v16736_v45 = vmul.f32 %v15231_v41, %v7023_v35  ;;  %v8153_v61 = vmul.f32 %v7814_v46, %v15231_v41  ;;  %vm9589_vm4 = vmor %vm9587_vm3, %vm9588_vm2  ;;  %v14082_v46 = vld [vmem:[%s14992_s13 + $0x158] sm:$0xff] }
 0x2ba   : > { %13881 = vmatmul.msk.bf16.gmra.mxu3 %vm1267_vm0, %v14279_v59  ;;  %v9580_v19 = vsel %vm9579_vm1, %v16681_v31, %v9576_v42  ;;  %v9583_v0 = vmul.f32 %v14486_v22, %v9582_v13  ;;  %v8739_v59 = vsub.f32 %v16238_v51, %v16672_v28  ;;  %v13983_v35 = vld [vmem:[%s14997_s19 + $0x158] sm:$0xff]  ;;  %vm9597_vm6 = vweird.f32 %v16717_v11 }
 0x2bb   : > { %v11090_v38 = vmul.f32 %v9580_v19, %v8738_v1  ;;  %v8349_v52 = vmul.f32 %v16736_v45, %v16736_v45  ;;  %v7580_v27 = vmul.f32 %v16733_v47, %v16733_v47 }
 0x2bc   : > { %v4518_v58 = vpop.f32.mrf.mxu2  ;;  %v9584_v9 = vmul.f32 0.5, %v9583_v0  ;;  %v14181_v0 = vld [vmem:[%s15004_s22 + $0x158] sm:$0xff] }
 0x2bd   : > { %v6202_v5 = vpop.f32.mrf.mxu3  ;;  %v11290_v31 = vmul.f32 %v16508_v29, %v11090_v38  ;;  %v4906_v2 = vadd.f32 %v4518_v58, %v3031_v10  ;;  %7052 = vadd.xlane.f32.xlu1 %v16733_v47  ;;  %v8545_v26 = vsub.f32 %v8153_v61, %v8349_v52  ;;  %7843 = vadd.xlane.f32.xlu2 %v7580_v27  ;;  %v14280_v61 = vld [vmem:[%s15009_s25 + $0x158] sm:$0xff] }
 0x2be   : > { %v1743_v43 = vpop.f32.mrf.mxu0  ;;  %v3032_v55 = vpop.f32.mrf.mxu1  ;;  %v9585_v34 = vsub.f32 1.5, %v9584_v9 }
 0x2bf   : > { %v14488_v50 = vpop.eup %14487  ;;  %v11490_v7 = vadd.f32 %v16519_v39, %v11290_v31  ;;  %v6590_v16 = vadd.f32 %v6202_v5, %v4906_v2  ;;  %v16747_v21 = vadd.f32 1e-05, %v8545_v26  ;;  %v3033_v6 = vadd.f32 %v3032_v55, %v1743_v43 }
 0x2c0   : > { %v9592_v44 = vmul.f32 %v14488_v50, %v16717_v11  ;;  %v7025_v48 = vpop.xlane.xlu2 %7024  ;;  %v7816_v17 = vpop.xlane.xlu0 %7815  ;;  %v9586_v36 = vmul.f32 %v14486_v22, %v9585_v34  ;;  %vm9598_vm5 = vweird.f32 %v14488_v50  ;;  %v8740_v26 = vsub.f32 %v16269_v25, %v16699_v24 }
 0x2c1   : > { %11686 = vst [vmem:[%s15334_s24 + $0x188] sm:$0xff] %v11490_v7  ;;  %v16752_v12 = vadd.f32 %v16693_v60, %v6590_v16  ;;  %v16755_v53 = vmul.f32 %v15231_v41, %v7025_v48  ;;  %14489 = vrsqrt.f32 %v16747_v21  ;;  %v8154_v8 = vmul.f32 %v7816_v17, %v15231_v41  ;;  %vm9599_vm7 = vmor %vm9597_vm6, %vm9598_vm5 }
 0x2c2   : > { %v9593_v56 = vmul.f32 %v14488_v50, %v9592_v44  ;;  %v9590_v14 = vsel %vm9589_vm4, %v14486_v22, %v9586_v36  ;;  %vm9607_vm9 = vweird.f32 %v16747_v21 }
 0x2c3   : > { %v8350_v18 = vmul.f32 %v16755_v53, %v16755_v53  ;;  %v7581_v42 = vmul.f32 %v16752_v12, %v16752_v12  ;;  %v11091_v1 = vmul.f32 %v9590_v14, %v8739_v59 }
 0x2c4   : > { %v9594_v51 = vmul.f32 0.5, %v9593_v56  ;;  %v4520_v28 = vpop.f32.mrf.mxu2 }
 0x2c5   : > { %v6204_v13 = vpop.f32.mrf.mxu3  ;;  %v8546_v10 = vsub.f32 %v8154_v8, %v8350_v18  ;;  %v4907_v19 = vadd.f32 %v4520_v28, %v3033_v6  ;;  %7845 = vadd.xlane.f32.xlu0 %v7581_v42  ;;  %v11291_v52 = vmul.f32 %v16508_v29, %v11091_v1  ;;  %7054 = vadd.xlane.f32.xlu2 %v16752_v12 }
 0x2c6   : > { %v1746_v38 = vpop.f32.mrf.mxu0  ;;  %v3035_v22 = vpop.f32.mrf.mxu1  ;;  %v9595_v58 = vsub.f32 1.5, %v9594_v51 }
 0x2c7   : > { %v16771_v5 = vadd.f32 1e-05, %v8546_v10  ;;  %v6591_v27 = vadd.f32 %v6204_v13, %v4907_v19  ;;  %12396 = vmatmul.msk.bf16.gmra.mxu0 %vm1267_vm0, %v14082_v46  ;;  %v14490_v31 = vpop.eup %14489  ;;  %v11491_v9 = vadd.f32 %v16519_v39, %v11291_v52  ;;  %v3036_v34 = vadd.f32 %v3035_v22, %v1746_v38 }
 0x2c8   : > { %12890 = vmatmul.msk.bf16.gmra.mxu1 %vm1267_vm0, %v13983_v35  ;;  %v9596_v2 = vmul.f32 %v14488_v50, %v9595_v58  ;;  %v7027_v43 = vpop.xlane.xlu0 %7026  ;;  %v7818_v55 = vpop.xlane.xlu1 %7817  ;;  %v9602_v7 = vmul.f32 %v14490_v31, %v16747_v21  ;;  %vm9608_vm8 = vweird.f32 %v14490_v31 }
 0x2c9   : > { %14491 = vrsqrt.f32 %v16771_v5  ;;  %13386 = vmatmul.msk.bf16.gmra.mxu2 %vm1267_vm0, %v14181_v0  ;;  %11687 = vst [vmem:[%s15334_s24 + $0x190] sm:$0xff] %v11491_v9  ;;  %v16785_v44 = vadd.f32 %v16693_v60, %v6591_v27  ;;  %v16788_v11 = vmul.f32 %v15231_v41, %v7027_v43  ;;  %v8155_v17 = vmul.f32 %v7818_v55, %v15231_v41  ;;  %vm9609_vm10 = vmor %vm9607_vm9, %vm9608_vm8  ;;  %v14083_v43 = vld [vmem:[%s14992_s13 + $0x160] sm:$0xff] }
 0x2ca   : > { %13882 = vmatmul.msk.bf16.gmra.mxu3 %vm1267_vm0, %v14280_v61  ;;  %v9600_v16 = vsel %vm9599_vm7, %v14488_v50, %v9596_v2  ;;  %v9603_v25 = vmul.f32 %v14490_v31, %v9602_v7  ;;  %v8741_v61 = vsub.f32 %v16298_v23, %v16736_v45  ;;  %v13984_v55 = vld [vmem:[%s14997_s19 + $0x160] sm:$0xff]  ;;  %vm9617_vm12 = vweird.f32 %v16771_v5 }
 0x2cb   : > { %v11092_v48 = vmul.f32 %v9600_v16, %v8740_v26  ;;  %v8351_v24 = vmul.f32 %v16788_v11, %v16788_v11  ;;  %v7582_v56 = vmul.f32 %v16785_v44, %v16785_v44 }
 0x2cc   : > { %v4523_v36 = vpop.f32.mrf.mxu2  ;;  %v9604_v6 = vmul.f32 0.5, %v9603_v25  ;;  %v14182_v25 = vld [vmem:[%s15004_s22 + $0x160] sm:$0xff] }
 0x2cd   : > { %v6207_v59 = vpop.f32.mrf.mxu3  ;;  %v11292_v50 = vmul.f32 %v16508_v29, %v11092_v48  ;;  %v4908_v14 = vadd.f32 %v4523_v36, %v3036_v34  ;;  %7056 = vadd.xlane.f32.xlu0 %v16785_v44  ;;  %v8547_v42 = vsub.f32 %v8155_v17, %v8351_v24  ;;  %7847 = vadd.xlane.f32.xlu1 %v7582_v56  ;;  %v14281_v24 = vld [vmem:[%s15009_s25 + $0x160] sm:$0xff] }
 0x2ce   : > { %v1748_v18 = vpop.f32.mrf.mxu0  ;;  %v3037_v8 = vpop.f32.mrf.mxu1  ;;  %v9605_v1 = vsub.f32 1.5, %v9604_v6 }
 0x2cf   : > { %v14492_v46 = vpop.eup %14491  ;;  %v11492_v35 = vadd.f32 %v16519_v39, %v11292_v50  ;;  %v6592_v51 = vadd.f32 %v6207_v59, %v4908_v14  ;;  %v16799_v13 = vadd.f32 1e-05, %v8547_v42  ;;  %v3038_v58 = vadd.f32 %v3037_v8, %v1748_v18 }
 0x2d0   : > { %v9612_v28 = vmul.f32 %v14492_v46, %v16771_v5  ;;  %v7820_v10 = vpop.xlane.xlu2 %7819  ;;  %v7029_v19 = vpop.xlane.xlu1 %7028  ;;  %v9606_v38 = vmul.f32 %v14490_v31, %v9605_v1  ;;  %vm9618_vm11 = vweird.f32 %v14492_v46  ;;  %v8742_v42 = vsub.f32 %v16332_v30, %v16755_v53 }
 0x2d1   : > { %11688 = vst [vmem:[%s15334_s24 + $0x198] sm:$0xff] %v11492_v35  ;;  %v16804_v22 = vadd.f32 %v16693_v60, %v6592_v51  ;;  %v16807_v0 = vmul.f32 %v15231_v41, %v7029_v19  ;;  %14493 = vrsqrt.f32 %v16799_v13  ;;  %v8156_v9 = vmul.f32 %v7820_v10, %v15231_v41  ;;  %vm9619_vm13 = vmor %vm9617_vm12, %vm9618_vm11 }
 0x2d2   : > { %v9613_v52 = vmul.f32 %v14492_v46, %v9612_v28  ;;  %v9610_v27 = vsel %vm9609_vm10, %v14490_v31, %v9606_v38  ;;  %vm9627_vm15 = vweird.f32 %v16799_v13 }
 0x2d3   : > { %v8352_v21 = vmul.f32 %v16807_v0, %v16807_v0  ;;  %v7583_v2 = vmul.f32 %v16804_v22, %v16804_v22  ;;  %v11093_v26 = vmul.f32 %v9610_v27, %v8741_v61 }
 0x2d4   : > { %v9614_v23 = vmul.f32 0.5, %v9613_v52  ;;  %v4525_v45 = vpop.f32.mrf.mxu2 }
 0x2d5   : > { %v6209_v7 = vpop.f32.mrf.mxu3  ;;  %v8548_v34 = vsub.f32 %v8156_v9, %v8352_v21  ;;  %v4909_v16 = vadd.f32 %v4525_v45, %v3038_v58  ;;  %7849 = vadd.xlane.f32.xlu2 %v7583_v2  ;;  %v11293_v17 = vmul.f32 %v16508_v29, %v11093_v26  ;;  %7058 = vadd.xlane.f32.xlu1 %v16804_v22 }
 0x2d6   : > { %v1751_v48 = vpop.f32.mrf.mxu0  ;;  %v3040_v31 = vpop.f32.mrf.mxu1  ;;  %v9615_v36 = vsub.f32 1.5, %v9614_v23 }
 0x2d7   : > { %v16823_v59 = vadd.f32 1e-05, %v8548_v34  ;;  %v6593_v56 = vadd.f32 %v6209_v7, %v4909_v16  ;;  %12397 = vmatmul.msk.bf16.gmra.mxu0 %vm1267_vm0, %v14083_v43  ;;  %v14494_v50 = vpop.eup %14493  ;;  %v11493_v6 = vadd.f32 %v16519_v39, %v11293_v17  ;;  %v3041_v1 = vadd.f32 %v3040_v31, %v1751_v48 }
 0x2d8   : > { %12891 = vmatmul.msk.bf16.gmra.mxu1 %vm1267_vm0, %v13984_v55  ;;  %v9616_v14 = vmul.f32 %v14492_v46, %v9615_v36  ;;  %v7031_v18 = vpop.xlane.xlu2 %7030  ;;  %v7822_v8 = vpop.xlane.xlu0 %7821  ;;  %v9622_v35 = vmul.f32 %v14494_v50, %v16799_v13  ;;  %vm9628_vm14 = vweird.f32 %v14494_v50 }
 0x2d9   : > { %14495 = vrsqrt.f32 %v16823_v59  ;;  %13387 = vmatmul.msk.bf16.gmra.mxu2 %vm1267_vm0, %v14182_v25  ;;  %11689 = vst [vmem:[%s15334_s24 + $0x1a0] sm:$0xff] %v11493_v6  ;;  %v16837_v28 = vadd.f32 %v16693_v60, %v6593_v56  ;;  %v16840_v5 = vmul.f32 %v15231_v41, %v7031_v18  ;;  %v8157_v19 = vmul.f32 %v7822_v8, %v15231_v41  ;;  %vm9629_vm1 = vmor %vm9627_vm15, %vm9628_vm14  ;;  %v14084_v18 = vld [vmem:[%s14992_s13 + $0x168] sm:$0xff] }
 0x2da   : > { %13883 = vmatmul.msk.bf16.gmra.mxu3 %vm1267_vm0, %v14281_v24  ;;  %v9620_v51 = vsel %vm9619_vm13, %v14492_v46, %v9616_v14  ;;  %v9623_v30 = vmul.f32 %v14494_v50, %v9622_v35  ;;  %v8743_v24 = vsub.f32 %v16354_v54, %v16788_v11  ;;  %v13985_v8 = vld [vmem:[%s14997_s19 + $0x168] sm:$0xff]  ;;  %vm9637_vm3 = vweird.f32 %v16823_v59 }
 0x2db   : > { %v11094_v10 = vmul.f32 %v9620_v51, %v8742_v42  ;;  %v8353_v53 = vmul.f32 %v16840_v5, %v16840_v5  ;;  %v7584_v52 = vmul.f32 %v16837_v28, %v16837_v28 }
 0x2dc   : > { %v4528_v38 = vpop.f32.mrf.mxu2  ;;  %v9624_v58 = vmul.f32 0.5, %v9623_v30  ;;  %v14183_v30 = vld [vmem:[%s15004_s22 + $0x168] sm:$0xff] }
 0x2dd   : > { %v6212_v61 = vpop.f32.mrf.mxu3  ;;  %v11294_v46 = vmul.f32 %v16508_v29, %v11094_v10  ;;  %v4910_v27 = vadd.f32 %v4528_v38, %v3041_v1  ;;  %7060 = vadd.xlane.f32.xlu2 %v16837_v28  ;;  %v8549_v2 = vsub.f32 %v8157_v19, %v8353_v53  ;;  %7851 = vadd.xlane.f32.xlu0 %v7584_v52  ;;  %v14282_v53 = vld [vmem:[%s15009_s25 + $0x168] sm:$0xff] }
 0x2de   : > { %v1753_v9 = vpop.f32.mrf.mxu0  ;;  %v3042_v21 = vpop.f32.mrf.mxu1  ;;  %v9625_v26 = vsub.f32 1.5, %v9624_v58 }
 0x2df   : > { %v14496_v43 = vpop.eup %14495  ;;  %v11494_v55 = vadd.f32 %v16519_v39, %v11294_v46  ;;  %v6594_v23 = vadd.f32 %v6212_v61, %v4910_v27  ;;  %v16851_v7 = vadd.f32 1e-05, %v8549_v2  ;;  %v3043_v36 = vadd.f32 %v3042_v21, %v1753_v9 }
 0x2e0   : > { %v9632_v45 = vmul.f32 %v14496_v43, %v16823_v59  ;;  %v7033_v34 = vpop.xlane.xlu0 %7032  ;;  %v9626_v16 = vmul.f32 %v14494_v50, %v9625_v26  ;;  %v7824_v25 = vpop.xlane.xlu1 %7823  ;;  %vm9638_vm2 = vweird.f32 %v14496_v43 }
 0x2e1   : > { %11690 = vst [vmem:[%s15334_s24 + $0x1a8] sm:$0xff] %v11494_v55  ;;  %v16856_v48 = vadd.f32 %v16693_v60, %v6594_v23  ;;  %v16859_v31 = vmul.f32 %v15231_v41, %v7033_v34  ;;  %14497 = vrsqrt.f32 %v16851_v7  ;;  %v8158_v6 = vmul.f32 %v7824_v25, %v15231_v41  ;;  %vm9639_vm4 = vmor %vm9637_vm3, %vm9638_vm2 }
 0x2e2   : > { %v9633_v17 = vmul.f32 %v14496_v43, %v9632_v45  ;;  %v9630_v56 = vsel %vm9629_vm1, %v14494_v50, %v9626_v16  ;;  %vm9647_vm6 = vweird.f32 %v16851_v7 }
 0x2e3   : > { %v8354_v13 = vmul.f32 %v16859_v31, %v16859_v31  ;;  %v7585_v14 = vmul.f32 %v16856_v48, %v16856_v48  ;;  %v11095_v42 = vmul.f32 %v9630_v56, %v8743_v24 }
 0x2e4   : > { %v9634_v54 = vmul.f32 0.5, %v9633_v17  ;;  %v4530_v11 = vpop.f32.mrf.mxu2 }
 0x2e5   : > { %v6214_v35 = vpop.f32.mrf.mxu3  ;;  %v8550_v1 = vsub.f32 %v8158_v6, %v8354_v13  ;;  %v4911_v51 = vadd.f32 %v4530_v11, %v3043_v36  ;;  %7853 = vadd.xlane.f32.xlu1 %v7585_v14  ;;  %v11295_v19 = vmul.f32 %v16508_v29, %v11095_v42  ;;  %7062 = vadd.xlane.f32.xlu0 %v16856_v48 }
 0x2e6   : > { %v1756_v10 = vpop.f32.mrf.mxu0  ;;  %v3045_v50 = vpop.f32.mrf.mxu1  ;;  %v9635_v38 = vsub.f32 1.5, %v9634_v54  ;;  %v8744_v29 = vsub.f32 %v16382_v33, %v16807_v0 }
 0x2e7   : > { %v16875_v61 = vadd.f32 1e-05, %v8550_v1  ;;  %v6595_v52 = vadd.f32 %v6214_v35, %v4911_v51  ;;  %12398 = vmatmul.msk.bf16.gmra.mxu0 %vm1267_vm0, %v14084_v18  ;;  %v14498_v46 = vpop.eup %14497  ;;  %v11495_v58 = vadd.f32 %v16519_v39, %v11295_v19  ;;  %v3046_v2 = vadd.f32 %v3045_v50, %v1756_v10  ;;  %v16911_v18 = vld [vmem:[%s20452_s7] ss:$0 sm:$0xff] }
 0x2e8   : > { %12892 = vmatmul.msk.bf16.gmra.mxu1 %vm1267_vm0, %v13985_v8  ;;  %v9636_v27 = vmul.f32 %v14496_v43, %v9635_v38  ;;  %v7826_v9 = vpop.xlane.xlu2 %7825  ;;  %v9642_v21 = vmul.f32 %v14498_v46, %v16851_v7  ;;  %v7035_v55 = vpop.xlane.xlu1 %7034  ;;  %vm9648_vm5 = vweird.f32 %v14498_v46 }
 0x2e9   : > { %14499 = vrsqrt.f32 %v16875_v61  ;;  %13388 = vmatmul.msk.bf16.gmra.mxu2 %vm1267_vm0, %v14183_v30  ;;  %11691 = vst [vmem:[%s15334_s24 + $0x1b0] sm:$0xff] %v11495_v58  ;;  %v16889_v26 = vadd.f32 %v16693_v60, %v6595_v52  ;;  %v16892_v59 = vmul.f32 %v15231_v41, %v7035_v55  ;;  %v8159_v23 = vmul.f32 %v7826_v9, %v15231_v41  ;;  %vm9649_vm7 = vmor %vm9647_vm6, %vm9648_vm5  ;;  %v14085_v9 = vld [vmem:[%s14992_s13 + $0x170] sm:$0xff] }
 0x2ea   : > { %13884 = vmatmul.msk.bf16.gmra.mxu3 %vm1267_vm0, %v14282_v53  ;;  %v9640_v39 = vsel %vm9639_vm4, %v14496_v43, %v9636_v27  ;;  %v9643_v0 = vmul.f32 %v14498_v46, %v9642_v21  ;;  %v16902_v43 = vld [vmem:[%s20451_s6] ss:$0 sm:$0xff]  ;;  %v8745_v53 = vsub.f32 %v16405_v15, %v16840_v5  ;;  %vm9657_vm9 = vweird.f32 %v16875_v61 }
 0x2eb   : > { %v11096_v33 = vmul.f32 %v9640_v39, %v8744_v29  ;;  %v8355_v45 = vmul.f32 %v16892_v59, %v16892_v59  ;;  %v7586_v25 = vmul.f32 %v16889_v26, %v16889_v26  ;;  %v13986_v29 = vld [vmem:[%s14997_s19 + $0x170] sm:$0xff] }
 0x2ec   : > { %v4533_v34 = vpop.f32.mrf.mxu2  ;;  %v9644_v17 = vmul.f32 0.5, %v9643_v0  ;;  %v14184_v0 = vld [vmem:[%s15004_s22 + $0x170] sm:$0xff] }
 0x2ed   : > { %v6217_v16 = vpop.f32.mrf.mxu3  ;;  %v11296_v24 = vmul.f32 %v16902_v43, %v11096_v33  ;;  %v4912_v36 = vadd.f32 %v4533_v34, %v3046_v2  ;;  %7064 = vadd.xlane.f32.xlu1 %v16889_v26  ;;  %v8551_v6 = vsub.f32 %v8159_v23, %v8355_v45  ;;  %7855 = vadd.xlane.f32.xlu2 %v7586_v25  ;;  %v14283_v23 = vld [vmem:[%s15009_s25 + $0x170] sm:$0xff] }
 0x2ee   : > { %v1758_v56 = vpop.f32.mrf.mxu0  ;;  %v3047_v13 = vpop.f32.mrf.mxu1  ;;  %v9645_v42 = vsub.f32 1.5, %v9644_v17 }
 0x2ef   : > { %v16906_v14 = vpop.eup %14499  ;;  %v11496_v8 = vadd.f32 %v16911_v18, %v11296_v24  ;;  %v6596_v54 = vadd.f32 %v6217_v16, %v4912_v36  ;;  %v16916_v35 = vadd.f32 1e-05, %v8551_v6  ;;  %v3048_v38 = vadd.f32 %v3047_v13, %v1758_v56 }
 0x2f0   : > { %v9652_v11 = vmul.f32 %v16906_v14, %v16875_v61  ;;  %v7037_v1 = vpop.xlane.xlu2 %7036  ;;  %v7828_v51 = vpop.xlane.xlu0 %7827  ;;  %v9646_v10 = vmul.f32 %v14498_v46, %v9645_v42  ;;  %vm9658_vm8 = vweird.f32 %v16906_v14  ;;  %v8746_v6 = vsub.f32 %v16439_v49, %v16859_v31 }
 0x2f1   : > { %11692 = vst [vmem:[%s15334_s24 + $0x1b8] sm:$0xff] %v11496_v8  ;;  %v16921_v50 = vadd.f32 %v16693_v60, %v6596_v54  ;;  %v16924_v30 = vmul.f32 %v15231_v41, %v7037_v1  ;;  %14501 = vrsqrt.f32 %v16916_v35  ;;  %v8160_v58 = vmul.f32 %v7828_v51, %v15231_v41  ;;  %vm9659_vm10 = vmor %vm9657_vm9, %vm9658_vm8 }
 0x2f2   : > { %v9653_v19 = vmul.f32 %v16906_v14, %v9652_v11  ;;  %v9650_v52 = vsel %vm9649_vm7, %v14498_v46, %v9646_v10  ;;  %vm9667_vm12 = vweird.f32 %v16916_v35 }
 0x2f3   : > { %v8356_v7 = vmul.f32 %v16924_v30, %v16924_v30  ;;  %v7587_v27 = vmul.f32 %v16921_v50, %v16921_v50  ;;  %v11097_v15 = vmul.f32 %v9650_v52, %v8745_v53 }
 0x2f4   : > { %v9654_v5 = vmul.f32 0.5, %v9653_v19  ;;  %v4535_v21 = vpop.f32.mrf.mxu2 }
 0x2f5   : > { %v6219_v2 = vpop.f32.mrf.mxu3  ;;  %v8552_v55 = vsub.f32 %v8160_v58, %v8356_v7  ;;  %v4913_v39 = vadd.f32 %v4535_v21, %v3048_v38  ;;  %7857 = vadd.xlane.f32.xlu0 %v7587_v27  ;;  %v11297_v45 = vmul.f32 %v16902_v43, %v11097_v15  ;;  %7066 = vadd.xlane.f32.xlu2 %v16921_v50 }
 0x2f6   : > { %v1761_v33 = vpop.f32.mrf.mxu0  ;;  %v3050_v46 = vpop.f32.mrf.mxu1  ;;  %v9655_v34 = vsub.f32 1.5, %v9654_v5 }
 0x2f7   : > { %v16942_v16 = vadd.f32 1e-05, %v8552_v55  ;;  %v6597_v25 = vadd.f32 %v6219_v2, %v4913_v39  ;;  %12399 = vmatmul.msk.bf16.gmra.mxu0 %vm1267_vm0, %v14085_v9  ;;  %v14502_v24 = vpop.eup %14501  ;;  %v11497_v17 = vadd.f32 %v16911_v18, %v11297_v45  ;;  %v3051_v42 = vadd.f32 %v3050_v46, %v1761_v33 }
 0x2f8   : > { %12893 = vmatmul.msk.bf16.gmra.mxu1 %vm1267_vm0, %v13986_v29  ;;  %v9656_v36 = vmul.f32 %v16906_v14, %v9655_v34  ;;  %v7039_v56 = vpop.xlane.xlu0 %7038  ;;  %v7830_v13 = vpop.xlane.xlu1 %7829  ;;  %v9662_v8 = vmul.f32 %v14502_v24, %v16916_v35  ;;  %vm9668_vm11 = vweird.f32 %v14502_v24 }
 0x2f9   : > { %14503 = vrsqrt.f32 %v16942_v16  ;;  %13389 = vmatmul.msk.bf16.gmra.mxu2 %vm1267_vm0, %v14184_v0  ;;  %11693 = vst [vmem:[%s15334_s24 + $0x1c0] sm:$0xff] %v11497_v17  ;;  %v16958_v61 = vadd.f32 %v16693_v60, %v6597_v25  ;;  %v16961_v11 = vmul.f32 %v15231_v41, %v7039_v56  ;;  %v8161_v51 = vmul.f32 %v7830_v13, %v15231_v41  ;;  %vm9669_vm13 = vmor %vm9667_vm12, %vm9668_vm11  ;;  %v14086_v56 = vld [vmem:[%s14992_s13 + $0x178] sm:$0xff] }
 0x2fa   : > { %13885 = vmatmul.msk.bf16.gmra.mxu3 %vm1267_vm0, %v14283_v23  ;;  %v9660_v54 = vsel %vm9659_vm10, %v16906_v14, %v9656_v36  ;;  %v9663_v31 = vmul.f32 %v14502_v24, %v9662_v8  ;;  %v8747_v23 = vsub.f32 %v16459_v37, %v16892_v59  ;;  %v13987_v13 = vld [vmem:[%s14997_s19 + $0x178] sm:$0xff]  ;;  %vm9677_vm15 = vweird.f32 %v16942_v16 }
 0x2fb   : > { %v11098_v49 = vmul.f32 %v9660_v54, %v8746_v6  ;;  %v8357_v1 = vmul.f32 %v16961_v11, %v16961_v11  ;;  %v7588_v19 = vmul.f32 %v16958_v61, %v16958_v61 }
 0x2fc   : > { %v4538_v10 = vpop.f32.mrf.mxu2  ;;  %v9664_v38 = vmul.f32 0.5, %v9663_v31  ;;  %v14185_v31 = vld [vmem:[%s15004_s22 + $0x178] sm:$0xff] }
 0x2fd   : > { %v6222_v53 = vpop.f32.mrf.mxu3  ;;  %v11298_v14 = vmul.f32 %v16902_v43, %v11098_v49  ;;  %v4914_v52 = vadd.f32 %v4538_v10, %v3051_v42  ;;  %7068 = vadd.xlane.f32.xlu0 %v16958_v61  ;;  %v8553_v27 = vsub.f32 %v8161_v51, %v8357_v1  ;;  %7859 = vadd.xlane.f32.xlu1 %v7588_v19  ;;  %v14284_v1 = vld [vmem:[%s15009_s25 + $0x178] sm:$0xff] }
 0x2fe   : > { %v1763_v7 = vpop.f32.mrf.mxu0  ;;  %v3052_v58 = vpop.f32.mrf.mxu1  ;;  %v9665_v15 = vsub.f32 1.5, %v9664_v38 }
 0x2ff   : > { %v14504_v9 = vpop.eup %14503  ;;  %v11498_v29 = vadd.f32 %v16911_v18, %v11298_v14  ;;  %v6598_v5 = vadd.f32 %v6222_v53, %v4914_v52  ;;  %v16972_v2 = vadd.f32 1e-05, %v8553_v27  ;;  %v3053_v34 = vadd.f32 %v3052_v58, %v1763_v7 }
 0x300   : > { %v9672_v21 = vmul.f32 %v14504_v9, %v16942_v16  ;;  %v7832_v55 = vpop.xlane.xlu2 %7831  ;;  %v7041_v39 = vpop.xlane.xlu1 %7040  ;;  %v9666_v33 = vmul.f32 %v14502_v24, %v9665_v15  ;;  %vm9678_vm14 = vweird.f32 %v14504_v9  ;;  %v8748_v27 = vsub.f32 %v16494_v40, %v16924_v30 }
 0x301   : > { %11694 = vst [vmem:[%s15334_s24 + $0x1c8] sm:$0xff] %v11498_v29  ;;  %v16977_v46 = vadd.f32 %v16693_v60, %v6598_v5  ;;  %v16980_v0 = vmul.f32 %v15231_v41, %v7041_v39  ;;  %14505 = vrsqrt.f32 %v16972_v2  ;;  %v8162_v17 = vmul.f32 %v7832_v55, %v15231_v41  ;;  %vm9679_vm1 = vmor %vm9677_vm15, %vm9678_vm14 }
 0x302   : > { %v9673_v45 = vmul.f32 %v14504_v9, %v9672_v21  ;;  %v9670_v25 = vsel %vm9669_vm13, %v14502_v24, %v9666_v33  ;;  %vm9687_vm3 = vweird.f32 %v16972_v2 }
 0x303   : > { %v8358_v35 = vmul.f32 %v16980_v0, %v16980_v0  ;;  %v7589_v36 = vmul.f32 %v16977_v46, %v16977_v46  ;;  %v11099_v6 = vmul.f32 %v9670_v25, %v8747_v23 }
 0x304   : > { %v9674_v37 = vmul.f32 0.5, %v9673_v45  ;;  %v4540_v59 = vpop.f32.mrf.mxu2 }
 0x305   : > { %v6224_v8 = vpop.f32.mrf.mxu3  ;;  %v8554_v42 = vsub.f32 %v8162_v17, %v8358_v35  ;;  %v4915_v54 = vadd.f32 %v4540_v59, %v3053_v34  ;;  %7861 = vadd.xlane.f32.xlu2 %v7589_v36  ;;  %v11299_v51 = vmul.f32 %v16902_v43, %v11099_v6  ;;  %7070 = vadd.xlane.f32.xlu1 %v16977_v46 }
 0x306   : > { %v1766_v49 = vpop.f32.mrf.mxu0  ;;  %v3055_v24 = vpop.f32.mrf.mxu1  ;;  %v9675_v10 = vsub.f32 1.5, %v9674_v37 }
 0x307   : > { %v16996_v53 = vadd.f32 1e-05, %v8554_v42  ;;  %v6599_v19 = vadd.f32 %v6224_v8, %v4915_v54  ;;  %12400 = vmatmul.msk.bf16.gmra.mxu0 %vm1267_vm0, %v14086_v56  ;;  %v14506_v14 = vpop.eup %14505  ;;  %v11499_v38 = vadd.f32 %v16911_v18, %v11299_v51  ;;  %v3056_v15 = vadd.f32 %v3055_v24, %v1766_v49 }
 0x308   : > { %12894 = vmatmul.msk.bf16.gmra.mxu1 %vm1267_vm0, %v13987_v13  ;;  %v9676_v52 = vmul.f32 %v14504_v9, %v9675_v10  ;;  %v7043_v7 = vpop.xlane.xlu2 %7042  ;;  %v7834_v58 = vpop.xlane.xlu0 %7833  ;;  %v9682_v29 = vmul.f32 %v14506_v14, %v16972_v2  ;;  %vm9688_vm2 = vweird.f32 %v14506_v14 }
 0x309   : > { %14507 = vrsqrt.f32 %v16996_v53  ;;  %13390 = vmatmul.msk.bf16.gmra.mxu2 %vm1267_vm0, %v14185_v31  ;;  %11695 = vst [vmem:[%s15334_s24 + $0x1d0] sm:$0xff] %v11499_v38  ;;  %v17010_v21 = vadd.f32 %v16693_v60, %v6599_v19  ;;  %v17013_v16 = vmul.f32 %v15231_v41, %v7043_v7  ;;  %v8163_v39 = vmul.f32 %v7834_v58, %v15231_v41  ;;  %vm9689_vm4 = vmor %vm9687_vm3, %vm9688_vm2  ;;  %v14087_v7 = vld [vmem:[%s14992_s13 + $0x180] sm:$0xff] }
 0x30a   : > { %13886 = vmatmul.msk.bf16.gmra.mxu3 %vm1267_vm0, %v14284_v1  ;;  %v9680_v5 = vsel %vm9679_vm1, %v14504_v9, %v9676_v52  ;;  %v9683_v40 = vmul.f32 %v14506_v14, %v9682_v29  ;;  %v8749_v1 = vsub.f32 %v16531_v32, %v16961_v11  ;;  %v13988_v58 = vld [vmem:[%s14997_s19 + $0x180] sm:$0xff]  ;;  %vm9697_vm6 = vweird.f32 %v16996_v53 }
 0x30b   : > { %v11100_v55 = vmul.f32 %v9680_v5, %v8748_v27  ;;  %v8359_v30 = vmul.f32 %v17013_v16, %v17013_v16  ;;  %v7590_v45 = vmul.f32 %v17010_v21, %v17010_v21 }
 0x30c   : > { %v4543_v33 = vpop.f32.mrf.mxu2  ;;  %v9684_v34 = vmul.f32 0.5, %v9683_v40  ;;  %v14186_v40 = vld [vmem:[%s15004_s22 + $0x180] sm:$0xff] }
 0x30d   : > { %v6227_v23 = vpop.f32.mrf.mxu3  ;;  %v11300_v9 = vmul.f32 %v16902_v43, %v11100_v55  ;;  %v4916_v25 = vadd.f32 %v4543_v33, %v3056_v15  ;;  %7072 = vadd.xlane.f32.xlu2 %v17010_v21  ;;  %v8555_v36 = vsub.f32 %v8163_v39, %v8359_v30  ;;  %7863 = vadd.xlane.f32.xlu0 %v7590_v45  ;;  %v14285_v30 = vld [vmem:[%s15009_s25 + $0x180] sm:$0xff] }
 0x30e   : > { %v1768_v17 = vpop.f32.mrf.mxu0  ;;  %v3057_v35 = vpop.f32.mrf.mxu1  ;;  %v9685_v6 = vsub.f32 1.5, %v9684_v34 }
 0x30f   : > { %v14508_v56 = vpop.eup %14507  ;;  %v11500_v13 = vadd.f32 %v16911_v18, %v11300_v9  ;;  %v6600_v37 = vadd.f32 %v6227_v23, %v4916_v25  ;;  %v17024_v8 = vadd.f32 1e-05, %v8555_v36  ;;  %v3058_v10 = vadd.f32 %v3057_v35, %v1768_v17 }
 0x310   : > { %v9692_v59 = vmul.f32 %v14508_v56, %v16996_v53  ;;  %v7045_v42 = vpop.xlane.xlu0 %7044  ;;  %v7836_v54 = vpop.xlane.xlu1 %7835  ;;  %v9686_v49 = vmul.f32 %v14506_v14, %v9685_v6  ;;  %vm9698_vm5 = vweird.f32 %v14508_v56  ;;  %v8750_v36 = vsub.f32 %v16565_v4, %v16980_v0 }
 0x311   : > { %11696 = vst [vmem:[%s15334_s24 + $0x1d8] sm:$0xff] %v11500_v13  ;;  %v17029_v24 = vadd.f32 %v16693_v60, %v6600_v37  ;;  %v17032_v31 = vmul.f32 %v15231_v41, %v7045_v42  ;;  %14509 = vrsqrt.f32 %v17024_v8  ;;  %v8164_v38 = vmul.f32 %v7836_v54, %v15231_v41  ;;  %vm9699_vm7 = vmor %vm9697_vm6, %vm9698_vm5 }
 0x312   : > { %v9693_v51 = vmul.f32 %v14508_v56, %v9692_v59  ;;  %v9690_v19 = vsel %vm9689_vm4, %v14506_v14, %v9686_v49  ;;  %vm9707_vm9 = vweird.f32 %v17024_v8 }
 0x313   : > { %v8360_v2 = vmul.f32 %v17032_v31, %v17032_v31  ;;  %v7591_v52 = vmul.f32 %v17029_v24, %v17029_v24  ;;  %v11101_v27 = vmul.f32 %v9690_v19, %v8749_v1 }
 0x314   : > { %v9694_v32 = vmul.f32 0.5, %v9693_v51  ;;  %v4545_v11 = vpop.f32.mrf.mxu2 }
 0x315   : > { %v6229_v29 = vpop.f32.mrf.mxu3  ;;  %v8556_v15 = vsub.f32 %v8164_v38, %v8360_v2  ;;  %v4917_v5 = vadd.f32 %v4545_v11, %v3058_v10  ;;  %7865 = vadd.xlane.f32.xlu1 %v7591_v52  ;;  %v11301_v39 = vmul.f32 %v16902_v43, %v11101_v27  ;;  %7074 = vadd.xlane.f32.xlu0 %v17029_v24 }
 0x316   : > { %v1771_v55 = vpop.f32.mrf.mxu0  ;;  %v3060_v14 = vpop.f32.mrf.mxu1  ;;  %v9695_v33 = vsub.f32 1.5, %v9694_v32 }
 0x317   : > { %v17048_v23 = vadd.f32 1e-05, %v8556_v15  ;;  %v6601_v45 = vadd.f32 %v6229_v29, %v4917_v5  ;;  %12401 = vmatmul.msk.bf16.gmra.mxu0 %vm1267_vm0, %v14087_v7  ;;  %v14510_v9 = vpop.eup %14509  ;;  %v11501_v34 = vadd.f32 %v16911_v18, %v11301_v39  ;;  %v3061_v6 = vadd.f32 %v3060_v14, %v1771_v55  ;;  %v17086_v5 = vld [vmem:[%s20450_s5] ss:$0 sm:$0xff] }
 0x318   : > { %12895 = vmatmul.msk.bf16.gmra.mxu1 %vm1267_vm0, %v13988_v58  ;;  %v9696_v25 = vmul.f32 %v14508_v56, %v9695_v33  ;;  %v7838_v17 = vpop.xlane.xlu2 %7837  ;;  %v7047_v35 = vpop.xlane.xlu1 %7046  ;;  %v9702_v13 = vmul.f32 %v14510_v9, %v17024_v8  ;;  %vm9708_vm8 = vweird.f32 %v14510_v9 }
 0x319   : > { %14511 = vrsqrt.f32 %v17048_v23  ;;  %13391 = vmatmul.msk.bf16.gmra.mxu2 %vm1267_vm0, %v14186_v40  ;;  %11697 = vst [vmem:[%s15334_s24 + $0x1e0] sm:$0xff] %v11501_v34  ;;  %v17062_v59 = vadd.f32 %v16693_v60, %v6601_v45  ;;  %v17065_v53 = vmul.f32 %v15231_v41, %v7047_v35  ;;  %v8165_v0 = vmul.f32 %v7838_v17, %v15231_v41  ;;  %vm9709_vm10 = vmor %vm9707_vm9, %vm9708_vm8  ;;  %v14088_v17 = vld [vmem:[%s14992_s13 + $0x188] sm:$0xff] }
 0x31a   : > { %13887 = vmatmul.msk.bf16.gmra.mxu3 %vm1267_vm0, %v14285_v30  ;;  %v9700_v37 = vsel %vm9699_vm7, %v14508_v56, %v9696_v25  ;;  %v9703_v4 = vmul.f32 %v14510_v9, %v9702_v13  ;;  %v8751_v30 = vsub.f32 %v16587_v62, %v17013_v16  ;;  %v13989_v35 = vld [vmem:[%s14997_s19 + $0x188] sm:$0xff]  ;;  %vm9717_vm12 = vweird.f32 %v17048_v23 }
 0x31b   : > { %v11102_v42 = vmul.f32 %v9700_v37, %v8750_v36  ;;  %v8361_v54 = vmul.f32 %v17065_v53, %v17065_v53  ;;  %v7592_v51 = vmul.f32 %v17062_v59, %v17062_v59 }
 0x31c   : > { %v4548_v49 = vpop.f32.mrf.mxu2  ;;  %v9704_v60 = vmul.f32 0.5, %v9703_v4  ;;  %v14187_v4 = vld [vmem:[%s15004_s22 + $0x188] sm:$0xff] }
 0x31d   : > { %v6232_v1 = vpop.f32.mrf.mxu3  ;;  %v11302_v56 = vmul.f32 %v16902_v43, %v11102_v42  ;;  %v4918_v10 = vadd.f32 %v4548_v49, %v3061_v6  ;;  %7076 = vadd.xlane.f32.xlu1 %v17062_v59  ;;  %v8557_v38 = vsub.f32 %v8165_v0, %v8361_v54  ;;  %7867 = vadd.xlane.f32.xlu2 %v7592_v51  ;;  %v14286_v0 = vld [vmem:[%s15009_s25 + $0x188] sm:$0xff] }
 0x31e   : > { %v1773_v19 = vpop.f32.mrf.mxu0  ;;  %v3062_v2 = vpop.f32.mrf.mxu1  ;;  %v9705_v58 = vsub.f32 1.5, %v9704_v60 }
 0x31f   : > { %v17074_v52 = vpop.eup %14511  ;;  %v11502_v7 = vadd.f32 %v16911_v18, %v11302_v56  ;;  %v6602_v27 = vadd.f32 %v6232_v1, %v4918_v10  ;;  %v17079_v11 = vadd.f32 1e-05, %v8557_v38  ;;  %v3063_v8 = vadd.f32 %v3062_v2, %v1773_v19 }
 0x320   : > { %v9712_v32 = vmul.f32 %v17074_v52, %v17048_v23  ;;  %v7049_v29 = vpop.xlane.xlu2 %7048  ;;  %v9706_v15 = vmul.f32 %v14510_v9, %v9705_v58  ;;  %v7840_v40 = vpop.xlane.xlu0 %7839  ;;  %vm9718_vm11 = vweird.f32 %v17074_v52  ;;  %v8752_v2 = vsub.f32 %v16615_v57, %v17032_v31 }
 0x321   : > { %11698 = vst [vmem:[%s15334_s24 + $0x1e8] sm:$0xff] %v11502_v7  ;;  %v17089_v55 = vadd.f32 %v17086_v5, %v6602_v27  ;;  %v17092_v14 = vmul.f32 %v15231_v41, %v7049_v29  ;;  %14513 = vrsqrt.f32 %v17079_v11  ;;  %v8166_v34 = vmul.f32 %v7840_v40, %v15231_v41  ;;  %vm9719_vm13 = vmor %vm9717_vm12, %vm9718_vm11 }
 0x322   : > { %v9713_v39 = vmul.f32 %v17074_v52, %v9712_v32  ;;  %v9710_v33 = vsel %vm9709_vm10, %v14510_v9, %v9706_v15  ;;  %vm9727_vm15 = vweird.f32 %v17079_v11 }
 0x323   : > { %v8362_v45 = vmul.f32 %v17092_v14, %v17092_v14  ;;  %v7593_v25 = vmul.f32 %v17089_v55, %v17089_v55  ;;  %v11103_v62 = vmul.f32 %v9710_v33, %v8751_v30 }
 0x324   : > { %v9714_v16 = vmul.f32 0.5, %v9713_v39  ;;  %v4550_v36 = vpop.f32.mrf.mxu2 }
 0x325   : > { %v6234_v13 = vpop.f32.mrf.mxu3  ;;  %v8558_v6 = vsub.f32 %v8166_v34, %v8362_v45  ;;  %v4919_v37 = vadd.f32 %v4550_v36, %v3063_v8  ;;  %7869 = vadd.xlane.f32.xlu0 %v7593_v25  ;;  %v11303_v54 = vmul.f32 %v16902_v43, %v11103_v62  ;;  %7078 = vadd.xlane.f32.xlu2 %v17089_v55 }
 0x326   : > { %v1776_v42 = vpop.f32.mrf.mxu0  ;;  %v3065_v9 = vpop.f32.mrf.mxu1  ;;  %v9715_v49 = vsub.f32 1.5, %v9714_v16 }
 0x327   : > { %v17110_v1 = vadd.f32 1e-05, %v8558_v6  ;;  %v6603_v51 = vadd.f32 %v6234_v13, %v4919_v37  ;;  %12402 = vmatmul.msk.bf16.gmra.mxu0 %vm1267_vm0, %v14088_v17  ;;  %v14514_v56 = vpop.eup %14513  ;;  %v11503_v60 = vadd.f32 %v16911_v18, %v11303_v54  ;;  %v3066_v7 = vadd.f32 %v3065_v9, %v1776_v42 }
 0x328   : > { %12896 = vmatmul.msk.bf16.gmra.mxu1 %vm1267_vm0, %v13989_v35  ;;  %v9716_v10 = vmul.f32 %v17074_v52, %v9715_v49  ;;  %v7842_v19 = vpop.xlane.xlu1 %7841  ;;  %v9722_v38 = vmul.f32 %v14514_v56, %v17079_v11  ;;  %v7051_v58 = vpop.xlane.xlu0 %7050  ;;  %vm9728_vm14 = vweird.f32 %v14514_v56 }
 0x329   : > { %14515 = vrsqrt.f32 %v17110_v1  ;;  %13392 = vmatmul.msk.bf16.gmra.mxu2 %vm1267_vm0, %v14187_v4  ;;  %11699 = vst [vmem:[%s15334_s24 + $0x1f0] sm:$0xff] %v11503_v60  ;;  %v17126_v23 = vadd.f32 %v17086_v5, %v6603_v51  ;;  %v17129_v32 = vmul.f32 %v15231_v41, %v7051_v58  ;;  %v8167_v15 = vmul.f32 %v7842_v19, %v15231_v41  ;;  %vm9729_vm1 = vmor %vm9727_vm15, %vm9728_vm14  ;;  %v14089_v19 = vld [vmem:[%s14992_s13 + $0x190] sm:$0xff] }
 0x32a   : > { %13888 = vmatmul.msk.bf16.gmra.mxu3 %vm1267_vm0, %v14286_v0  ;;  %v9720_v27 = vsel %vm9719_vm13, %v17074_v52, %v9716_v10  ;;  %v9723_v31 = vmul.f32 %v14514_v56, %v9722_v38  ;;  %v8753_v0 = vsub.f32 %v16638_v20, %v17065_v53  ;;  %vm9737_vm3 = vweird.f32 %v17110_v1 }
 0x32b   : > { %v11104_v57 = vmul.f32 %v9720_v27, %v8752_v2  ;;  %v8363_v29 = vmul.f32 %v17129_v32, %v17129_v32  ;;  %v7594_v39 = vmul.f32 %v17126_v23, %v17126_v23  ;;  %v13990_v2 = vld [vmem:[%s14997_s19 + $0x190] sm:$0xff] }
 0x32c   : > { %v4553_v40 = vpop.f32.mrf.mxu2  ;;  %v9724_v8 = vmul.f32 0.5, %v9723_v31  ;;  %v14188_v31 = vld [vmem:[%s15004_s22 + $0x190] sm:$0xff] }
 0x32d   : > { %v6237_v30 = vpop.f32.mrf.mxu3  ;;  %v11304_v52 = vmul.f32 %v16902_v43, %v11104_v57  ;;  %v4920_v33 = vadd.f32 %v4553_v40, %v3066_v7  ;;  %7080 = vadd.xlane.f32.xlu0 %v17126_v23  ;;  %v8559_v25 = vsub.f32 %v8167_v15, %v8363_v29  ;;  %7871 = vadd.xlane.f32.xlu1 %v7594_v39  ;;  %v14287_v29 = vld [vmem:[%s15009_s25 + $0x190] sm:$0xff] }
 0x32e   : > { %v1778_v45 = vpop.f32.mrf.mxu0  ;;  %v3067_v34 = vpop.f32.mrf.mxu1  ;;  %v9725_v62 = vsub.f32 1.5, %v9724_v8 }
 0x32f   : > { %v14516_v17 = vpop.eup %14515  ;;  %v11504_v35 = vadd.f32 %v16911_v18, %v11304_v52  ;;  %v6604_v16 = vadd.f32 %v6237_v30, %v4920_v33  ;;  %v17140_v13 = vadd.f32 1e-05, %v8559_v25  ;;  %v3068_v49 = vadd.f32 %v3067_v34, %v1778_v45 }
 0x330   : > { %v9732_v36 = vmul.f32 %v14516_v17, %v17110_v1  ;;  %v7053_v6 = vpop.xlane.xlu1 %7052  ;;  %v9726_v37 = vmul.f32 %v14514_v56, %v9725_v62  ;;  %v7844_v9 = vpop.xlane.xlu2 %7843  ;;  %vm9738_vm2 = vweird.f32 %v14516_v17  ;;  %v8754_v34 = vsub.f32 %v16669_v3, %v17092_v14 }
 0x331   : > { %11700 = vst [vmem:[%s15334_s24 + $0x1f8] sm:$0xff] %v11504_v35  ;;  %v17145_v42 = vadd.f32 %v17086_v5, %v6604_v16  ;;  %v17148_v4 = vmul.f32 %v15231_v41, %v7053_v6  ;;  %14517 = vrsqrt.f32 %v17140_v13  ;;  %v8168_v11 = vmul.f32 %v7844_v9, %v15231_v41  ;;  %vm9739_vm4 = vmor %vm9737_vm3, %vm9738_vm2 }
 0x332   : > { %v9733_v54 = vmul.f32 %v14516_v17, %v9732_v36  ;;  %v9730_v51 = vsel %vm9729_vm1, %v14514_v56, %v9726_v37  ;;  %vm9747_vm6 = vweird.f32 %v17140_v13 }
 0x333   : > { %v8364_v60 = vmul.f32 %v17148_v4, %v17148_v4  ;;  %v7595_v10 = vmul.f32 %v17145_v42, %v17145_v42  ;;  %v11105_v38 = vmul.f32 %v9730_v51, %v8753_v0 }
 0x334   : > { %v9734_v20 = vmul.f32 0.5, %v9733_v54  ;;  %v4555_v53 = vpop.f32.mrf.mxu2 }
 0x335   : > { %v6239_v7 = vpop.f32.mrf.mxu3  ;;  %v8560_v58 = vsub.f32 %v8168_v11, %v8364_v60  ;;  %v4921_v27 = vadd.f32 %v4555_v53, %v3068_v49  ;;  %7873 = vadd.xlane.f32.xlu2 %v7595_v10  ;;  %v11305_v15 = vmul.f32 %v16902_v43, %v11105_v38  ;;  %7082 = vadd.xlane.f32.xlu1 %v17145_v42 }
 0x336   : > { %v1781_v57 = vpop.f32.mrf.mxu0  ;;  %v3070_v56 = vpop.f32.mrf.mxu1  ;;  %v9735_v40 = vsub.f32 1.5, %v9734_v20 }
 0x337   : > { %v17164_v30 = vadd.f32 1e-05, %v8560_v58  ;;  %v6605_v39 = vadd.f32 %v6239_v7, %v4921_v27  ;;  %12403 = vmatmul.msk.bf16.gmra.mxu0 %vm1267_vm0, %v14089_v19  ;;  %v14518_v52 = vpop.eup %14517  ;;  %v11505_v8 = vadd.f32 %v16911_v18, %v11305_v15  ;;  %v3071_v35 = vadd.f32 %v3070_v56, %v1781_v57 }
 0x338   : > { %12897 = vmatmul.msk.bf16.gmra.mxu1 %vm1267_vm0, %v13990_v2  ;;  %v9736_v33 = vmul.f32 %v14516_v17, %v9735_v40  ;;  %v7846_v45 = vpop.xlane.xlu0 %7845  ;;  %v9742_v25 = vmul.f32 %v14518_v52, %v17140_v13  ;;  %v7055_v62 = vpop.xlane.xlu2 %7054  ;;  %vm9748_vm5 = vweird.f32 %v14518_v52 }
 0x339   : > { %14519 = vrsqrt.f32 %v17164_v30  ;;  %13393 = vmatmul.msk.bf16.gmra.mxu2 %vm1267_vm0, %v14188_v31  ;;  %11701 = vst [vmem:[%s15334_s24 + $0x200] sm:$0xff] %v11505_v8  ;;  %v17178_v36 = vadd.f32 %v17086_v5, %v6605_v39  ;;  %v17181_v1 = vmul.f32 %v15231_v41, %v7055_v62  ;;  %v8169_v37 = vmul.f32 %v7846_v45, %v15231_v41  ;;  %vm9749_vm7 = vmor %vm9747_vm6, %vm9748_vm5  ;;  %v14090_v45 = vld [vmem:[%s14992_s13 + $0x198] sm:$0xff] }
 0x33a   : > { %13889 = vmatmul.msk.bf16.gmra.mxu3 %vm1267_vm0, %v14287_v29  ;;  %v9740_v16 = vsel %vm9739_vm4, %v14516_v17, %v9736_v33  ;;  %v9743_v14 = vmul.f32 %v14518_v52, %v9742_v25  ;;  %v8755_v29 = vsub.f32 %v16696_v63, %v17129_v32  ;;  %vm9757_vm9 = vweird.f32 %v17164_v30 }
 0x33b   : > { %v11106_v3 = vmul.f32 %v9740_v16, %v8754_v34  ;;  %v8365_v6 = vmul.f32 %v17181_v1, %v17181_v1  ;;  %v7596_v54 = vmul.f32 %v17178_v36, %v17178_v36  ;;  %v13991_v34 = vld [vmem:[%s14997_s19 + $0x198] sm:$0xff] }
 0x33c   : > { %v4558_v9 = vpop.f32.mrf.mxu2  ;;  %v9744_v49 = vmul.f32 0.5, %v9743_v14  ;;  %v14189_v14 = vld [vmem:[%s15004_s22 + $0x198] sm:$0xff] }
 0x33d   : > { %v6242_v0 = vpop.f32.mrf.mxu3  ;;  %v11306_v17 = vmul.f32 %v16902_v43, %v11106_v3  ;;  %v4922_v51 = vadd.f32 %v4558_v9, %v3071_v35  ;;  %7084 = vadd.xlane.f32.xlu2 %v17178_v36  ;;  %v8561_v10 = vsub.f32 %v8169_v37, %v8365_v6  ;;  %7875 = vadd.xlane.f32.xlu0 %v7596_v54  ;;  %v14288_v6 = vld [vmem:[%s15009_s25 + $0x198] sm:$0xff] }
 0x33e   : > { %v1783_v11 = vpop.f32.mrf.mxu0  ;;  %v3072_v60 = vpop.f32.mrf.mxu1  ;;  %v9745_v38 = vsub.f32 1.5, %v9744_v49 }
 0x33f   : > { %v14520_v19 = vpop.eup %14519  ;;  %v11506_v2 = vadd.f32 %v16911_v18, %v11306_v17  ;;  %v6606_v20 = vadd.f32 %v6242_v0, %v4922_v51  ;;  %v17192_v7 = vadd.f32 1e-05, %v8561_v10  ;;  %v3073_v40 = vadd.f32 %v3072_v60, %v1783_v11 }
 0x340   : > { %v9752_v53 = vmul.f32 %v14520_v19, %v17164_v30  ;;  %v7057_v58 = vpop.xlane.xlu0 %7056  ;;  %v9746_v27 = vmul.f32 %v14518_v52, %v9745_v38  ;;  %v7848_v31 = vpop.xlane.xlu1 %7847  ;;  %vm9758_vm8 = vweird.f32 %v14520_v19  ;;  %v8756_v60 = vsub.f32 %v16733_v47, %v17148_v4 }
 0x341   : > { %11702 = vst [vmem:[%s15334_s24 + $0x208] sm:$0xff] %v11506_v2  ;;  %v17197_v57 = vadd.f32 %v17086_v5, %v6606_v20  ;;  %v17200_v56 = vmul.f32 %v15231_v41, %v7057_v58  ;;  %14521 = vrsqrt.f32 %v17192_v7  ;;  %v8170_v8 = vmul.f32 %v7848_v31, %v15231_v41  ;;  %vm9759_vm10 = vmor %vm9757_vm9, %vm9758_vm8 }
 0x342   : > { %v9753_v15 = vmul.f32 %v14520_v19, %v9752_v53  ;;  %v9750_v39 = vsel %vm9749_vm7, %v14518_v52, %v9746_v27  ;;  %vm9767_vm12 = vweird.f32 %v17192_v7 }
 0x343   : > { %v8366_v13 = vmul.f32 %v17200_v56, %v17200_v56  ;;  %v7597_v33 = vmul.f32 %v17197_v57, %v17197_v57  ;;  %v11107_v25 = vmul.f32 %v9750_v39, %v8755_v29 }
 0x344   : > { %v9754_v63 = vmul.f32 0.5, %v9753_v15  ;;  %v4560_v32 = vpop.f32.mrf.mxu2 }
 0x345   : > { %v6244_v35 = vpop.f32.mrf.mxu3  ;;  %v8562_v62 = vsub.f32 %v8170_v8, %v8366_v13  ;;  %v4923_v16 = vadd.f32 %v4560_v32, %v3073_v40  ;;  %7877 = vadd.xlane.f32.xlu1 %v7597_v33  ;;  %v11307_v37 = vmul.f32 %v16902_v43, %v11107_v25  ;;  %7086 = vadd.xlane.f32.xlu0 %v17197_v57 }
 0x346   : > { %v1786_v3 = vpop.f32.mrf.mxu0  ;;  %v3075_v52 = vpop.f32.mrf.mxu1  ;;  %v9755_v9 = vsub.f32 1.5, %v9754_v63 }
 0x347   : > { %v17216_v0 = vadd.f32 1e-05, %v8562_v62  ;;  %v6607_v54 = vadd.f32 %v6244_v35, %v4923_v16  ;;  %12404 = vmatmul.msk.bf16.gmra.mxu0 %vm1267_vm0, %v14090_v45  ;;  %v14522_v17 = vpop.eup %14521  ;;  %v11507_v49 = vadd.f32 %v16911_v18, %v11307_v37  ;;  %v3076_v2 = vadd.f32 %v3075_v52, %v1786_v3 }
 0x348   : > { %12898 = vmatmul.msk.bf16.gmra.mxu1 %vm1267_vm0, %v13991_v34  ;;  %v9756_v51 = vmul.f32 %v14520_v19, %v9755_v9  ;;  %v7850_v11 = vpop.xlane.xlu2 %7849  ;;  %v9762_v10 = vmul.f32 %v14522_v17, %v17192_v7  ;;  %v7059_v38 = vpop.xlane.xlu1 %7058  ;;  %vm9768_vm11 = vweird.f32 %v14522_v17 }
 0x349   : > { %14523 = vrsqrt.f32 %v17216_v0  ;;  %13394 = vmatmul.msk.bf16.gmra.mxu2 %vm1267_vm0, %v14189_v14  ;;  %11703 = vst [vmem:[%s15334_s24 + $0x210] sm:$0xff] %v11507_v49  ;;  %v17230_v53 = vadd.f32 %v17086_v5, %v6607_v54  ;;  %v17233_v30 = vmul.f32 %v15231_v41, %v7059_v38  ;;  %v8171_v58 = vmul.f32 %v7850_v11, %v15231_v41  ;;  %vm9769_vm13 = vmor %vm9767_vm12, %vm9768_vm11  ;;  %v14091_v11 = vld [vmem:[%s14992_s13 + $0x1a0] sm:$0xff] }
 0x34a   : > { %13890 = vmatmul.msk.bf16.gmra.mxu3 %vm1267_vm0, %v14288_v6  ;;  %v9760_v20 = vsel %vm9759_vm10, %v14520_v19, %v9756_v51  ;;  %v9763_v4 = vmul.f32 %v14522_v17, %v9762_v10  ;;  %v8757_v6 = vsub.f32 %v16752_v12, %v17181_v1  ;;  %vm9777_vm15 = vweird.f32 %v17216_v0 }
 0x34b   : > { %v11108_v47 = vmul.f32 %v9760_v20, %v8756_v60  ;;  %v8367_v27 = vmul.f32 %v17233_v30, %v17233_v30  ;;  %v7598_v15 = vmul.f32 %v17230_v53, %v17230_v53  ;;  %v13992_v60 = vld [vmem:[%s14997_s19 + $0x1a0] sm:$0xff] }
 0x34c   : > { %v4563_v31 = vpop.f32.mrf.mxu2  ;;  %v9764_v40 = vmul.f32 0.5, %v9763_v4  ;;  %v14190_v4 = vld [vmem:[%s15004_s22 + $0x1a0] sm:$0xff] }
 0x34d   : > { %v6247_v29 = vpop.f32.mrf.mxu3  ;;  %v11308_v19 = vmul.f32 %v16902_v43, %v11108_v47  ;;  %v4924_v39 = vadd.f32 %v4563_v31, %v3076_v2  ;;  %7088 = vadd.xlane.f32.xlu1 %v17230_v53  ;;  %v8563_v33 = vsub.f32 %v8171_v58, %v8367_v27  ;;  %7879 = vadd.xlane.f32.xlu2 %v7598_v15  ;;  %v14289_v58 = vld [vmem:[%s15009_s25 + $0x1a0] sm:$0xff] }
 0x34e   : > { %v1788_v13 = vpop.f32.mrf.mxu0  ;;  %v3077_v8 = vpop.f32.mrf.mxu1  ;;  %v9765_v25 = vsub.f32 1.5, %v9764_v40 }
 0x34f   : > { %v14524_v45 = vpop.eup %14523  ;;  %v11508_v34 = vadd.f32 %v16911_v18, %v11308_v19  ;;  %v6608_v63 = vadd.f32 %v6247_v29, %v4924_v39  ;;  %v17244_v35 = vadd.f32 1e-05, %v8563_v33  ;;  %v3078_v9 = vadd.f32 %v3077_v8, %v1788_v13 }
 0x350   : > { %v9772_v32 = vmul.f32 %v14524_v45, %v17216_v0  ;;  %v7061_v62 = vpop.xlane.xlu2 %7060  ;;  %v9766_v16 = vmul.f32 %v14522_v17, %v9765_v25  ;;  %v7852_v14 = vpop.xlane.xlu0 %7851  ;;  %vm9778_vm14 = vweird.f32 %v14524_v45 }
 0x351   : > { %11704 = vst [vmem:[%s15334_s24 + $0x218] sm:$0xff] %v11508_v34  ;;  %v17249_v3 = vadd.f32 %v17086_v5, %v6608_v63  ;;  %v17252_v52 = vmul.f32 %v15231_v41, %v7061_v62  ;;  %14525 = vrsqrt.f32 %v17244_v35  ;;  %v8172_v49 = vmul.f32 %v7852_v14, %v15231_v41  ;;  %vm9779_vm1 = vmor %vm9777_vm15, %vm9778_vm14 }
 0x352   : > { %v9773_v37 = vmul.f32 %v14524_v45, %v9772_v32  ;;  %v9770_v54 = vsel %vm9769_vm13, %v14522_v17, %v9766_v16  ;;  %vm9787_vm3 = vweird.f32 %v17244_v35 }
 0x353   : > { %v8368_v7 = vmul.f32 %v17252_v52, %v17252_v52  ;;  %v7599_v51 = vmul.f32 %v17249_v3, %v17249_v3  ;;  %v11109_v10 = vmul.f32 %v9770_v54, %v8757_v6 }
 0x354   : > { %v9774_v12 = vmul.f32 0.5, %v9773_v37  ;;  %v4565_v1 = vpop.f32.mrf.mxu2 }
 0x355   : > { %v6249_v2 = vpop.f32.mrf.mxu3  ;;  %v8564_v38 = vsub.f32 %v8172_v49, %v8368_v7  ;;  %v4925_v20 = vadd.f32 %v4565_v1, %v3078_v9  ;;  %7881 = vadd.xlane.f32.xlu0 %v7599_v51  ;;  %v11309_v27 = vmul.f32 %v16902_v43, %v11109_v10  ;;  %7090 = vadd.xlane.f32.xlu2 %v17249_v3 }
 0x356   : > { %v1791_v47 = vpop.f32.mrf.mxu0  ;;  %v3080_v17 = vpop.f32.mrf.mxu1  ;;  %v9775_v31 = vsub.f32 1.5, %v9774_v12  ;;  %v8758_v43 = vsub.f32 %v16785_v44, %v17200_v56 }
 0x357   : > { %v17268_v29 = vadd.f32 1e-05, %v8564_v38  ;;  %v6609_v15 = vadd.f32 %v6249_v2, %v4925_v20  ;;  %12405 = vmatmul.msk.bf16.gmra.mxu0 %vm1267_vm0, %v14091_v11  ;;  %v14526_v19 = vpop.eup %14525  ;;  %v11509_v40 = vadd.f32 %v16911_v18, %v11309_v27  ;;  %v3081_v33 = vadd.f32 %v3080_v17, %v1791_v47  ;;  %v17304_v11 = vld [vmem:[%s20452_s7] ss:$0 sm:$0xff] }
 0x358   : > { %12899 = vmatmul.msk.bf16.gmra.mxu1 %vm1267_vm0, %v13992_v60  ;;  %v9776_v39 = vmul.f32 %v14524_v45, %v9775_v31  ;;  %v7854_v13 = vpop.xlane.xlu1 %7853  ;;  %v9782_v8 = vmul.f32 %v14526_v19, %v17244_v35  ;;  %v7063_v34 = vpop.xlane.xlu0 %7062  ;;  %vm9788_vm2 = vweird.f32 %v14526_v19 }
 0x359   : > { %14527 = vrsqrt.f32 %v17268_v29  ;;  %13395 = vmatmul.msk.bf16.gmra.mxu2 %vm1267_vm0, %v14190_v4  ;;  %11705 = vst [vmem:[%s15334_s24 + $0x220] sm:$0xff] %v11509_v40  ;;  %v17282_v25 = vadd.f32 %v17086_v5, %v6609_v15  ;;  %v17285_v0 = vmul.f32 %v15231_v41, %v7063_v34  ;;  %v8173_v32 = vmul.f32 %v7854_v13, %v15231_v41  ;;  %vm9789_vm4 = vmor %vm9787_vm3, %vm9788_vm2  ;;  %v14092_v13 = vld [vmem:[%s14992_s13 + $0x1a8] sm:$0xff] }
 0x35a   : > { %13891 = vmatmul.msk.bf16.gmra.mxu3 %vm1267_vm0, %v14289_v58  ;;  %v9780_v18 = vsel %vm9779_vm1, %v14524_v45, %v9776_v39  ;;  %v9783_v56 = vmul.f32 %v14526_v19, %v9782_v8  ;;  %v17295_v45 = vld [vmem:[%s20451_s6] ss:$0 sm:$0xff]  ;;  %v8759_v58 = vsub.f32 %v16804_v22, %v17233_v30  ;;  %vm9797_vm6 = vweird.f32 %v17268_v29 }
 0x35b   : > { %v11110_v44 = vmul.f32 %v9780_v18, %v8758_v43  ;;  %v8369_v63 = vmul.f32 %v17285_v0, %v17285_v0  ;;  %v7600_v14 = vmul.f32 %v17282_v25, %v17282_v25  ;;  %v13993_v43 = vld [vmem:[%s14997_s19 + $0x1a8] sm:$0xff] }
 0x35c   : > { %v4568_v62 = vpop.f32.mrf.mxu2  ;;  %v9784_v37 = vmul.f32 0.5, %v9783_v56  ;;  %v14191_v56 = vld [vmem:[%s15004_s22 + $0x1a8] sm:$0xff] }
 0x35d   : > { %v6252_v16 = vpop.f32.mrf.mxu3  ;;  %v11310_v6 = vmul.f32 %v17295_v45, %v11110_v44  ;;  %v4926_v9 = vadd.f32 %v4568_v62, %v3081_v33  ;;  %7092 = vadd.xlane.f32.xlu0 %v17282_v25  ;;  %v8565_v49 = vsub.f32 %v8173_v32, %v8369_v63  ;;  %7883 = vadd.xlane.f32.xlu1 %v7600_v14  ;;  %v14290_v63 = vld [vmem:[%s15009_s25 + $0x1a8] sm:$0xff] }
 0x35e   : > { %v1793_v54 = vpop.f32.mrf.mxu0  ;;  %v3082_v7 = vpop.f32.mrf.mxu1  ;;  %v9785_v10 = vsub.f32 1.5, %v9784_v37 }
 0x35f   : > { %v17299_v51 = vpop.eup %14527  ;;  %v11510_v60 = vadd.f32 %v17304_v11, %v11310_v6  ;;  %v6610_v12 = vadd.f32 %v6252_v16, %v4926_v9  ;;  %v17309_v2 = vadd.f32 1e-05, %v8565_v49  ;;  %v3083_v31 = vadd.f32 %v3082_v7, %v1793_v54 }
 0x360   : > { %v9792_v1 = vmul.f32 %v17299_v51, %v17268_v29  ;;  %v7065_v38 = vpop.xlane.xlu1 %7064  ;;  %v9786_v20 = vmul.f32 %v14526_v19, %v9785_v10  ;;  %v7856_v17 = vpop.xlane.xlu2 %7855  ;;  %vm9798_vm5 = vweird.f32 %v17299_v51  ;;  %v8760_v7 = vsub.f32 %v16837_v28, %v17252_v52 }
 0x361   : > { %11706 = vst [vmem:[%s15334_s24 + $0x228] sm:$0xff] %v11510_v60  ;;  %v17314_v47 = vadd.f32 %v17086_v5, %v6610_v12  ;;  %v17317_v4 = vmul.f32 %v15231_v41, %v7065_v38  ;;  %14529 = vrsqrt.f32 %v17309_v2  ;;  %v8174_v35 = vmul.f32 %v7856_v17, %v15231_v41  ;;  %vm9799_vm7 = vmor %vm9797_vm6, %vm9798_vm5 }
 0x362   : > { %v9793_v27 = vmul.f32 %v17299_v51, %v9792_v1  ;;  %v9790_v15 = vsel %vm9789_vm4, %v14526_v19, %v9786_v20  ;;  %vm9807_vm9 = vweird.f32 %v17309_v2 }
 0x363   : > { %v8370_v40 = vmul.f32 %v17317_v4, %v17317_v4  ;;  %v7601_v39 = vmul.f32 %v17314_v47, %v17314_v47  ;;  %v11111_v22 = vmul.f32 %v9790_v15, %v8759_v58 }
 0x364   : > { %v9794_v30 = vmul.f32 0.5, %v9793_v27  ;;  %v4570_v8 = vpop.f32.mrf.mxu2 }
 0x365   : > { %v6254_v33 = vpop.f32.mrf.mxu3  ;;  %v8566_v34 = vsub.f32 %v8174_v35, %v8370_v40  ;;  %v4927_v18 = vadd.f32 %v4570_v8, %v3083_v31  ;;  %7885 = vadd.xlane.f32.xlu2 %v7601_v39  ;;  %v11311_v32 = vmul.f32 %v17295_v45, %v11111_v22  ;;  %7094 = vadd.xlane.f32.xlu1 %v17314_v47 }
 0x366   : > { %v1796_v44 = vpop.f32.mrf.mxu0  ;;  %v3085_v19 = vpop.f32.mrf.mxu1  ;;  %v9795_v62 = vsub.f32 1.5, %v9794_v30 }
 0x367   : > { %v17335_v16 = vadd.f32 1e-05, %v8566_v34  ;;  %v6611_v14 = vadd.f32 %v6254_v33, %v4927_v18  ;;  %12406 = vmatmul.msk.bf16.gmra.mxu0 %vm1267_vm0, %v14092_v13  ;;  %v14530_v6 = vpop.eup %14529  ;;  %v11511_v37 = vadd.f32 %v17304_v11, %v11311_v32  ;;  %v3086_v60 = vadd.f32 %v3085_v19, %v1796_v44 }
 0x368   : > { %12900 = vmatmul.msk.bf16.gmra.mxu1 %vm1267_vm0, %v13993_v43  ;;  %v9796_v9 = vmul.f32 %v17299_v51, %v9795_v62  ;;  %v7858_v54 = vpop.xlane.xlu0 %7857  ;;  %v9802_v49 = vmul.f32 %v14530_v6, %v17309_v2  ;;  %v7067_v10 = vpop.xlane.xlu2 %7066  ;;  %vm9808_vm8 = vweird.f32 %v14530_v6 }
 0x369   : > { %14531 = vrsqrt.f32 %v17335_v16  ;;  %13396 = vmatmul.msk.bf16.gmra.mxu2 %vm1267_vm0, %v14191_v56  ;;  %11707 = vst [vmem:[%s15334_s24 + $0x230] sm:$0xff] %v11511_v37  ;;  %v17351_v29 = vadd.f32 %v17086_v5, %v6611_v14  ;;  %v17354_v1 = vmul.f32 %v15231_v41, %v7067_v10  ;;  %v8175_v20 = vmul.f32 %v7858_v54, %v15231_v41  ;;  %vm9809_vm10 = vmor %vm9807_vm9, %vm9808_vm8  ;;  %v14093_v54 = vld [vmem:[%s14992_s13 + $0x1b0] sm:$0xff] }
 0x36a   : > { %13892 = vmatmul.msk.bf16.gmra.mxu3 %vm1267_vm0, %v14290_v63  ;;  %v9800_v12 = vsel %vm9799_vm7, %v17299_v51, %v9796_v9  ;;  %v9803_v52 = vmul.f32 %v14530_v6, %v9802_v49  ;;  %v8761_v63 = vsub.f32 %v16856_v48, %v17285_v0  ;;  %vm9817_vm12 = vweird.f32 %v17335_v16 }
 0x36b   : > { %v11112_v28 = vmul.f32 %v9800_v12, %v8760_v7  ;;  %v8371_v38 = vmul.f32 %v17354_v1, %v17354_v1  ;;  %v7602_v27 = vmul.f32 %v17351_v29, %v17351_v29  ;;  %v13994_v7 = vld [vmem:[%s14997_s19 + $0x1b0] sm:$0xff] }
 0x36c   : > { %v4573_v17 = vpop.f32.mrf.mxu2  ;;  %v9804_v31 = vmul.f32 0.5, %v9803_v52  ;;  %v14192_v52 = vld [vmem:[%s15004_s22 + $0x1b0] sm:$0xff] }
 0x36d   : > { %v6257_v58 = vpop.f32.mrf.mxu3  ;;  %v11312_v51 = vmul.f32 %v17295_v45, %v11112_v28  ;;  %v4928_v15 = vadd.f32 %v4573_v17, %v3086_v60  ;;  %7096 = vadd.xlane.f32.xlu2 %v17351_v29  ;;  %v8567_v39 = vsub.f32 %v8175_v20, %v8371_v38  ;;  %7887 = vadd.xlane.f32.xlu0 %v7602_v27  ;;  %v14291_v38 = vld [vmem:[%s15009_s25 + $0x1b0] sm:$0xff] }
 0x36e   : > { %v1798_v35 = vpop.f32.mrf.mxu0  ;;  %v3087_v40 = vpop.f32.mrf.mxu1  ;;  %v9805_v22 = vsub.f32 1.5, %v9804_v31 }
 0x36f   : > { %v14532_v13 = vpop.eup %14531  ;;  %v11512_v43 = vadd.f32 %v17304_v11, %v11312_v51  ;;  %v6612_v30 = vadd.f32 %v6257_v58, %v4928_v15  ;;  %v17365_v33 = vadd.f32 1e-05, %v8567_v39  ;;  %v3088_v62 = vadd.f32 %v3087_v40, %v1798_v35 }
 0x370   : > { %v9812_v8 = vmul.f32 %v14532_v13, %v17335_v16  ;;  %v7069_v34 = vpop.xlane.xlu0 %7068  ;;  %v9806_v18 = vmul.f32 %v14530_v6, %v9805_v22  ;;  %v7860_v56 = vpop.xlane.xlu1 %7859  ;;  %vm9818_vm11 = vweird.f32 %v14532_v13  ;;  %v8762_v40 = vsub.f32 %v16889_v26, %v17317_v4 }
 0x371   : > { %11708 = vst [vmem:[%s15334_s24 + $0x238] sm:$0xff] %v11512_v43  ;;  %v17370_v44 = vadd.f32 %v17086_v5, %v6612_v30  ;;  %v17373_v19 = vmul.f32 %v15231_v41, %v7069_v34  ;;  %14533 = vrsqrt.f32 %v17365_v33  ;;  %v8176_v37 = vmul.f32 %v7860_v56, %v15231_v41  ;;  %vm9819_vm13 = vmor %vm9817_vm12, %vm9818_vm11 }
 0x372   : > { %v9813_v32 = vmul.f32 %v14532_v13, %v9812_v8  ;;  %v9810_v14 = vsel %vm9809_vm10, %v14530_v6, %v9806_v18  ;;  %vm9827_vm15 = vweird.f32 %v17365_v33 }
 0x373   : > { %v8372_v2 = vmul.f32 %v17373_v19, %v17373_v19  ;;  %v7603_v9 = vmul.f32 %v17370_v44, %v17370_v44  ;;  %v11113_v49 = vmul.f32 %v9810_v14, %v8761_v63 }
 0x374   : > { %v9814_v48 = vmul.f32 0.5, %v9813_v32  ;;  %v4575_v0 = vpop.f32.mrf.mxu2 }
 0x375   : > { %v6259_v60 = vpop.f32.mrf.mxu3  ;;  %v8568_v10 = vsub.f32 %v8176_v37, %v8372_v2  ;;  %v4929_v12 = vadd.f32 %v4575_v0, %v3088_v62  ;;  %7889 = vadd.xlane.f32.xlu1 %v7603_v9  ;;  %v11313_v20 = vmul.f32 %v17295_v45, %v11113_v49  ;;  %7098 = vadd.xlane.f32.xlu0 %v17370_v44 }
 0x376   : > { %v1801_v28 = vpop.f32.mrf.mxu0  ;;  %v3090_v6 = vpop.f32.mrf.mxu1  ;;  %v9815_v17 = vsub.f32 1.5, %v9814_v48 }
 0x377   : > { %v17389_v58 = vadd.f32 1e-05, %v8568_v10  ;;  %v6613_v27 = vadd.f32 %v6259_v60, %v4929_v12  ;;  %12407 = vmatmul.msk.bf16.gmra.mxu0 %vm1267_vm0, %v14093_v54  ;;  %v14534_v51 = vpop.eup %14533  ;;  %v11513_v31 = vadd.f32 %v17304_v11, %v11313_v20  ;;  %v3091_v43 = vadd.f32 %v3090_v6, %v1801_v28 }
 0x378   : > { %12901 = vmatmul.msk.bf16.gmra.mxu1 %vm1267_vm0, %v13994_v7  ;;  %v9816_v15 = vmul.f32 %v14532_v13, %v9815_v17  ;;  %v7862_v35 = vpop.xlane.xlu2 %7861  ;;  %v9822_v39 = vmul.f32 %v14534_v51, %v17365_v33  ;;  %v7071_v22 = vpop.xlane.xlu1 %7070  ;;  %vm9828_vm14 = vweird.f32 %v14534_v51 }
 0x379   : > { %14535 = vrsqrt.f32 %v17389_v58  ;;  %13397 = vmatmul.msk.bf16.gmra.mxu2 %vm1267_vm0, %v14192_v52  ;;  %11709 = vst [vmem:[%s15334_s24 + $0x240] sm:$0xff] %v11513_v31  ;;  %v17403_v8 = vadd.f32 %v17086_v5, %v6613_v27  ;;  %v17406_v16 = vmul.f32 %v15231_v41, %v7071_v22  ;;  %v8177_v34 = vmul.f32 %v7862_v35, %v15231_v41  ;;  %vm9829_vm1 = vmor %vm9827_vm15, %vm9828_vm14  ;;  %v14094_v35 = vld [vmem:[%s14992_s13 + $0x1b8] sm:$0xff] }
 0x37a   : > { %13893 = vmatmul.msk.bf16.gmra.mxu3 %vm1267_vm0, %v14291_v38  ;;  %v9820_v30 = vsel %vm9819_vm13, %v14532_v13, %v9816_v15  ;;  %v9823_v4 = vmul.f32 %v14534_v51, %v9822_v39  ;;  %v8763_v38 = vsub.f32 %v16921_v50, %v17354_v1  ;;  %vm9837_vm3 = vweird.f32 %v17389_v58 }
 0x37b   : > { %v11114_v26 = vmul.f32 %v9820_v30, %v8762_v40  ;;  %v8373_v18 = vmul.f32 %v17406_v16, %v17406_v16  ;;  %v7604_v32 = vmul.f32 %v17403_v8, %v17403_v8  ;;  %v13995_v40 = vld [vmem:[%s14997_s19 + $0x1b8] sm:$0xff] }
 0x37c   : > { %v4578_v56 = vpop.f32.mrf.mxu2  ;;  %v9824_v62 = vmul.f32 0.5, %v9823_v4  ;;  %v14193_v4 = vld [vmem:[%s15004_s22 + $0x1b8] sm:$0xff] }
 0x37d   : > { %v6262_v63 = vpop.f32.mrf.mxu3  ;;  %v11314_v13 = vmul.f32 %v17295_v45, %v11114_v26  ;;  %v4930_v14 = vadd.f32 %v4578_v56, %v3091_v43  ;;  %7100 = vadd.xlane.f32.xlu1 %v17403_v8  ;;  %v8569_v9 = vsub.f32 %v8177_v34, %v8373_v18  ;;  %7891 = vadd.xlane.f32.xlu2 %v7604_v32  ;;  %v14292_v34 = vld [vmem:[%s15009_s25 + $0x1b8] sm:$0xff] }
 0x37e   : > { %v1803_v2 = vpop.f32.mrf.mxu0  ;;  %v3092_v37 = vpop.f32.mrf.mxu1  ;;  %v9825_v49 = vsub.f32 1.5, %v9824_v62 }
 0x37f   : > { %v14536_v54 = vpop.eup %14535  ;;  %v11514_v7 = vadd.f32 %v17304_v11, %v11314_v13  ;;  %v6614_v48 = vadd.f32 %v6262_v63, %v4930_v14  ;;  %v17417_v60 = vadd.f32 1e-05, %v8569_v9  ;;  %v3093_v17 = vadd.f32 %v3092_v37, %v1803_v2 }
 0x380   : > { %v9832_v0 = vmul.f32 %v14536_v54, %v17389_v58  ;;  %v7073_v10 = vpop.xlane.xlu2 %7072  ;;  %v9826_v12 = vmul.f32 %v14534_v51, %v9825_v49  ;;  %v7864_v52 = vpop.xlane.xlu0 %7863  ;;  %vm9838_vm2 = vweird.f32 %v14536_v54  ;;  %v8764_v37 = vsub.f32 %v16958_v61, %v17373_v19 }
 0x381   : > { %11710 = vst [vmem:[%s15334_s24 + $0x248] sm:$0xff] %v11514_v7  ;;  %v17422_v28 = vadd.f32 %v17086_v5, %v6614_v48  ;;  %v17425_v6 = vmul.f32 %v15231_v41, %v7073_v10  ;;  %14537 = vrsqrt.f32 %v17417_v60  ;;  %v8178_v31 = vmul.f32 %v7864_v52, %v15231_v41  ;;  %vm9839_vm4 = vmor %vm9837_vm3, %vm9838_vm2 }
 0x382   : > { %v9833_v20 = vmul.f32 %v14536_v54, %v9832_v0  ;;  %v9830_v27 = vsel %vm9829_vm1, %v14534_v51, %v9826_v12  ;;  %vm9847_vm6 = vweird.f32 %v17417_v60 }
 0x383   : > { %v8374_v33 = vmul.f32 %v17425_v6, %v17425_v6  ;;  %v7605_v15 = vmul.f32 %v17422_v28, %v17422_v28  ;;  %v11115_v39 = vmul.f32 %v9830_v27, %v8763_v38 }
 0x384   : > { %v9834_v50 = vmul.f32 0.5, %v9833_v20  ;;  %v4580_v1 = vpop.f32.mrf.mxu2 }
 0x385   : > { %v6264_v43 = vpop.f32.mrf.mxu3  ;;  %v8570_v22 = vsub.f32 %v8178_v31, %v8374_v33  ;;  %v4931_v30 = vadd.f32 %v4580_v1, %v3093_v17  ;;  %7893 = vadd.xlane.f32.xlu0 %v7605_v15  ;;  %v11315_v18 = vmul.f32 %v17295_v45, %v11115_v39  ;;  %7102 = vadd.xlane.f32.xlu2 %v17422_v28 }
 0x386   : > { %v1806_v26 = vpop.f32.mrf.mxu0  ;;  %v3095_v51 = vpop.f32.mrf.mxu1  ;;  %v9835_v56 = vsub.f32 1.5, %v9834_v50 }
 0x387   : > { %v17441_v63 = vadd.f32 1e-05, %v8570_v22  ;;  %v6615_v32 = vadd.f32 %v6264_v43, %v4931_v30  ;;  %12408 = vmatmul.msk.bf16.gmra.mxu0 %vm1267_vm0, %v14094_v35  ;;  %v14538_v13 = vpop.eup %14537  ;;  %v11515_v62 = vadd.f32 %v17304_v11, %v11315_v18  ;;  %v3096_v7 = vadd.f32 %v3095_v51, %v1806_v26  ;;  %v17479_v30 = vld [vmem:[%s20450_s5] ss:$0 sm:$0xff] }
 0x388   : > { %12902 = vmatmul.msk.bf16.gmra.mxu1 %vm1267_vm0, %v13995_v40  ;;  %v9836_v14 = vmul.f32 %v14536_v54, %v9835_v56  ;;  %v7866_v2 = vpop.xlane.xlu1 %7865  ;;  %v9842_v9 = vmul.f32 %v14538_v13, %v17417_v60  ;;  %v7075_v49 = vpop.xlane.xlu0 %7074  ;;  %vm9848_vm5 = vweird.f32 %v14538_v13 }
 0x389   : > { %14539 = vrsqrt.f32 %v17441_v63  ;;  %13398 = vmatmul.msk.bf16.gmra.mxu2 %vm1267_vm0, %v14193_v4  ;;  %11711 = vst [vmem:[%s15334_s24 + $0x250] sm:$0xff] %v11515_v62  ;;  %v17455_v0 = vadd.f32 %v17086_v5, %v6615_v32  ;;  %v17458_v58 = vmul.f32 %v15231_v41, %v7075_v49  ;;  %v8179_v12 = vmul.f32 %v7866_v2, %v15231_v41  ;;  %vm9849_vm7 = vmor %vm9847_vm6, %vm9848_vm5  ;;  %v14095_v2 = vld [vmem:[%s14992_s13 + $0x1c0] sm:$0xff] }
 0x38a   : > { %13894 = vmatmul.msk.bf16.gmra.mxu3 %vm1267_vm0, %v14292_v34  ;;  %v9840_v48 = vsel %vm9839_vm4, %v14536_v54, %v9836_v14  ;;  %v9843_v19 = vmul.f32 %v14538_v13, %v9842_v9  ;;  %v8765_v34 = vsub.f32 %v16977_v46, %v17406_v16  ;;  %vm9857_vm9 = vweird.f32 %v17441_v63 }
 0x38b   : > { %v11116_v61 = vmul.f32 %v9840_v48, %v8764_v37  ;;  %v8375_v10 = vmul.f32 %v17458_v58, %v17458_v58  ;;  %v7606_v20 = vmul.f32 %v17455_v0, %v17455_v0  ;;  %v13996_v37 = vld [vmem:[%s14997_s19 + $0x1c0] sm:$0xff] }
 0x38c   : > { %v4583_v52 = vpop.f32.mrf.mxu2  ;;  %v9844_v5 = vmul.f32 0.5, %v9843_v19  ;;  %v14194_v19 = vld [vmem:[%s15004_s22 + $0x1c0] sm:$0xff] }
 0x38d   : > { %v6267_v38 = vpop.f32.mrf.mxu3  ;;  %v11316_v54 = vmul.f32 %v17295_v45, %v11116_v61  ;;  %v4932_v17 = vadd.f32 %v4583_v52, %v3096_v7  ;;  %7104 = vadd.xlane.f32.xlu0 %v17455_v0  ;;  %v8571_v31 = vsub.f32 %v8179_v12, %v8375_v10  ;;  %7895 = vadd.xlane.f32.xlu1 %v7606_v20  ;;  %v14293_v10 = vld [vmem:[%s15009_s25 + $0x1c0] sm:$0xff] }
 0x38e   : > { %v1808_v27 = vpop.f32.mrf.mxu0  ;;  %v3097_v33 = vpop.f32.mrf.mxu1  ;;  %v9845_v40 = vsub.f32 1.5, %v9844_v5 }
 0x38f   : > { %v17467_v15 = vpop.eup %14539  ;;  %v11516_v35 = vadd.f32 %v17304_v11, %v11316_v54  ;;  %v6616_v39 = vadd.f32 %v6267_v38, %v4932_v17  ;;  %v17472_v1 = vadd.f32 1e-05, %v8571_v31  ;;  %v3098_v60 = vadd.f32 %v3097_v33, %v1808_v27 }
 0x390   : > { %v9852_v50 = vmul.f32 %v17467_v15, %v17441_v63  ;;  %v7077_v43 = vpop.xlane.xlu1 %7076  ;;  %v9846_v22 = vmul.f32 %v14538_v13, %v9845_v40  ;;  %v7868_v51 = vpop.xlane.xlu2 %7867  ;;  %vm9858_vm8 = vweird.f32 %v17467_v15  ;;  %v8766_v33 = vsub.f32 %v17010_v21, %v17425_v6 }
 0x391   : > { %11712 = vst [vmem:[%s15334_s24 + $0x258] sm:$0xff] %v11516_v35  ;;  %v17482_v26 = vadd.f32 %v17479_v30, %v6616_v39  ;;  %v17485_v4 = vmul.f32 %v15231_v41, %v7077_v43  ;;  %14541 = vrsqrt.f32 %v17472_v1  ;;  %v8180_v32 = vmul.f32 %v7868_v51, %v15231_v41  ;;  %vm9859_vm10 = vmor %vm9857_vm9, %vm9858_vm8 }
 0x392   : > { %v9853_v18 = vmul.f32 %v17467_v15, %v9852_v50  ;;  %v9850_v56 = vsel %vm9849_vm7, %v14538_v13, %v9846_v22  ;;  %vm9867_vm12 = vweird.f32 %v17472_v1 }
 0x393   : > { %v8376_v62 = vmul.f32 %v17485_v4, %v17485_v4  ;;  %v7607_v14 = vmul.f32 %v17482_v26, %v17482_v26  ;;  %v11117_v46 = vmul.f32 %v9850_v56, %v8765_v34 }
 0x394   : > { %v9854_v16 = vmul.f32 0.5, %v9853_v18  ;;  %v4585_v9 = vpop.f32.mrf.mxu2 }
 0x395   : > { %v6269_v7 = vpop.f32.mrf.mxu3  ;;  %v8572_v49 = vsub.f32 %v8180_v32, %v8376_v62  ;;  %v4933_v48 = vadd.f32 %v4585_v9, %v3098_v60  ;;  %7897 = vadd.xlane.f32.xlu2 %v7607_v14  ;;  %v11317_v12 = vmul.f32 %v17295_v45, %v11117_v46  ;;  %7106 = vadd.xlane.f32.xlu1 %v17482_v26 }
 0x396   : > { %v1811_v61 = vpop.f32.mrf.mxu0  ;;  %v3100_v13 = vpop.f32.mrf.mxu1  ;;  %v9855_v52 = vsub.f32 1.5, %v9854_v16 }
 0x397   : > { %v17503_v38 = vadd.f32 1e-05, %v8572_v49  ;;  %v6617_v20 = vadd.f32 %v6269_v7, %v4933_v48  ;;  %12409 = vmatmul.msk.bf16.gmra.mxu0 %vm1267_vm0, %v14095_v2  ;;  %v14542_v54 = vpop.eup %14541  ;;  %v11517_v5 = vadd.f32 %v17304_v11, %v11317_v12  ;;  %v3101_v35 = vadd.f32 %v3100_v13, %v1811_v61 }
 0x398   : > { %12903 = vmatmul.msk.bf16.gmra.mxu1 %vm1267_vm0, %v13996_v37  ;;  %v9856_v17 = vmul.f32 %v17467_v15, %v9855_v52  ;;  %v7870_v27 = vpop.xlane.xlu0 %7869  ;;  %v9862_v31 = vmul.f32 %v14542_v54, %v17472_v1  ;;  %v7079_v40 = vpop.xlane.xlu2 %7078  ;;  %vm9868_vm11 = vweird.f32 %v14542_v54 }
 0x399   : > { %14543 = vrsqrt.f32 %v17503_v38  ;;  %13399 = vmatmul.msk.bf16.gmra.mxu2 %vm1267_vm0, %v14194_v19  ;;  %11713 = vst [vmem:[%s15334_s24 + $0x260] sm:$0xff] %v11517_v5  ;;  %v17519_v63 = vadd.f32 %v17479_v30, %v6617_v20  ;;  %v17522_v50 = vmul.f32 %v15231_v41, %v7079_v40  ;;  %v8181_v22 = vmul.f32 %v7870_v27, %v15231_v41  ;;  %vm9869_vm13 = vmor %vm9867_vm12, %vm9868_vm11  ;;  %v14096_v27 = vld [vmem:[%s14992_s13 + $0x1c8] sm:$0xff] }
 0x39a   : > { %13895 = vmatmul.msk.bf16.gmra.mxu3 %vm1267_vm0, %v14293_v10  ;;  %v9860_v39 = vsel %vm9859_vm10, %v17467_v15, %v9856_v17  ;;  %v9863_v6 = vmul.f32 %v14542_v54, %v9862_v31  ;;  %v8767_v10 = vsub.f32 %v17029_v24, %v17458_v58  ;;  %vm9877_vm15 = vweird.f32 %v17503_v38 }
 0x39b   : > { %v11118_v21 = vmul.f32 %v9860_v39, %v8766_v33  ;;  %v8377_v43 = vmul.f32 %v17522_v50, %v17522_v50  ;;  %v7608_v18 = vmul.f32 %v17519_v63, %v17519_v63  ;;  %v13997_v33 = vld [vmem:[%s14997_s19 + $0x1c8] sm:$0xff] }
 0x39c   : > { %v4588_v51 = vpop.f32.mrf.mxu2  ;;  %v9864_v60 = vmul.f32 0.5, %v9863_v6  ;;  %v14195_v6 = vld [vmem:[%s15004_s22 + $0x1c8] sm:$0xff] }
 0x39d   : > { %v6272_v34 = vpop.f32.mrf.mxu3  ;;  %v11318_v15 = vmul.f32 %v17295_v45, %v11118_v21  ;;  %v4934_v56 = vadd.f32 %v4588_v51, %v3101_v35  ;;  %7108 = vadd.xlane.f32.xlu2 %v17519_v63  ;;  %v8573_v14 = vsub.f32 %v8181_v22, %v8377_v43  ;;  %7899 = vadd.xlane.f32.xlu0 %v7608_v18  ;;  %v14294_v43 = vld [vmem:[%s15009_s25 + $0x1c8] sm:$0xff] }
 0x39e   : > { %v1813_v32 = vpop.f32.mrf.mxu0  ;;  %v3102_v62 = vpop.f32.mrf.mxu1  ;;  %v9865_v46 = vsub.f32 1.5, %v9864_v60 }
 0x39f   : > { %v14544_v2 = vpop.eup %14543  ;;  %v11518_v37 = vadd.f32 %v17304_v11, %v11318_v15  ;;  %v6618_v16 = vadd.f32 %v6272_v34, %v4934_v56  ;;  %v17533_v7 = vadd.f32 1e-05, %v8573_v14  ;;  %v3103_v52 = vadd.f32 %v3102_v62, %v1813_v32 }
 0x3a0   : > { %v9872_v9 = vmul.f32 %v14544_v2, %v17503_v38  ;;  %v7081_v49 = vpop.xlane.xlu0 %7080  ;;  %v9866_v48 = vmul.f32 %v14542_v54, %v9865_v46  ;;  %v7872_v19 = vpop.xlane.xlu1 %7871  ;;  %vm9878_vm14 = vweird.f32 %v14544_v2  ;;  %v8768_v62 = vsub.f32 %v17062_v59, %v17485_v4 }
 0x3a1   : > { %11714 = vst [vmem:[%s15334_s24 + $0x268] sm:$0xff] %v11518_v37  ;;  %v17538_v61 = vadd.f32 %v17479_v30, %v6618_v16  ;;  %v17541_v13 = vmul.f32 %v15231_v41, %v7081_v49  ;;  %14545 = vrsqrt.f32 %v17533_v7  ;;  %v8182_v5 = vmul.f32 %v7872_v19, %v15231_v41  ;;  %vm9879_vm1 = vmor %vm9877_vm15, %vm9878_vm14 }
 0x3a2   : > { %v9873_v12 = vmul.f32 %v14544_v2, %v9872_v9  ;;  %v9870_v20 = vsel %vm9869_vm13, %v14542_v54, %v9866_v48  ;;  %vm9887_vm3 = vweird.f32 %v17533_v7 }
 0x3a3   : > { %v8378_v1 = vmul.f32 %v17541_v13, %v17541_v13  ;;  %v7609_v17 = vmul.f32 %v17538_v61, %v17538_v61  ;;  %v11119_v31 = vmul.f32 %v9870_v20, %v8767_v10 }
 0x3a4   : > { %v9874_v24 = vmul.f32 0.5, %v9873_v12  ;;  %v4590_v58 = vpop.f32.mrf.mxu2 }
 0x3a5   : > { %v6274_v35 = vpop.f32.mrf.mxu3  ;;  %v8574_v40 = vsub.f32 %v8182_v5, %v8378_v1  ;;  %v4935_v39 = vadd.f32 %v4590_v58, %v3103_v52  ;;  %7901 = vadd.xlane.f32.xlu1 %v7609_v17  ;;  %v11319_v22 = vmul.f32 %v17295_v45, %v11119_v31  ;;  %7110 = vadd.xlane.f32.xlu0 %v17538_v61 }
 0x3a6   : > { %v1816_v21 = vpop.f32.mrf.mxu0  ;;  %v3105_v54 = vpop.f32.mrf.mxu1  ;;  %v9875_v51 = vsub.f32 1.5, %v9874_v24 }
 0x3a7   : > { %v17557_v34 = vadd.f32 1e-05, %v8574_v40  ;;  %v6619_v18 = vadd.f32 %v6274_v35, %v4935_v39  ;;  %12410 = vmatmul.msk.bf16.gmra.mxu0 %vm1267_vm0, %v14096_v27  ;;  %v14546_v15 = vpop.eup %14545  ;;  %v11519_v60 = vadd.f32 %v17304_v11, %v11319_v22  ;;  %v3106_v37 = vadd.f32 %v3105_v54, %v1816_v21 }
 0x3a8   : > { %12904 = vmatmul.msk.bf16.gmra.mxu1 %vm1267_vm0, %v13997_v33  ;;  %v9876_v56 = vmul.f32 %v14544_v2, %v9875_v51  ;;  %v7874_v32 = vpop.xlane.xlu2 %7873  ;;  %v9882_v14 = vmul.f32 %v14546_v15, %v17533_v7  ;;  %v7083_v46 = vpop.xlane.xlu1 %7082  ;;  %vm9888_vm2 = vweird.f32 %v14546_v15 }
 0x3a9   : > { %14547 = vrsqrt.f32 %v17557_v34  ;;  %13400 = vmatmul.msk.bf16.gmra.mxu2 %vm1267_vm0, %v14195_v6  ;;  %11715 = vst [vmem:[%s15334_s24 + $0x270] sm:$0xff] %v11519_v60  ;;  %v17571_v9 = vadd.f32 %v17479_v30, %v6619_v18  ;;  %v17574_v38 = vmul.f32 %v15231_v41, %v7083_v46  ;;  %v8183_v49 = vmul.f32 %v7874_v32, %v15231_v41  ;;  %vm9889_vm4 = vmor %vm9887_vm3, %vm9888_vm2  ;;  %v14097_v32 = vld [vmem:[%s14992_s13 + $0x1d0] sm:$0xff] }
 0x3aa   : > { %13896 = vmatmul.msk.bf16.gmra.mxu3 %vm1267_vm0, %v14294_v43  ;;  %v9880_v16 = vsel %vm9879_vm1, %v14544_v2, %v9876_v56  ;;  %v9883_v4 = vmul.f32 %v14546_v15, %v9882_v14  ;;  %v8769_v43 = vsub.f32 %v17089_v55, %v17522_v50  ;;  %vm9897_vm6 = vweird.f32 %v17557_v34 }
 0x3ab   : > { %v11120_v59 = vmul.f32 %v9880_v16, %v8768_v62  ;;  %v8379_v48 = vmul.f32 %v17574_v38, %v17574_v38  ;;  %v7610_v12 = vmul.f32 %v17571_v9, %v17571_v9  ;;  %v13998_v62 = vld [vmem:[%s14997_s19 + $0x1d0] sm:$0xff] }
 0x3ac   : > { %v4593_v19 = vpop.f32.mrf.mxu2  ;;  %v9884_v52 = vmul.f32 0.5, %v9883_v4  ;;  %v14196_v4 = vld [vmem:[%s15004_s22 + $0x1d0] sm:$0xff] }
 0x3ad   : > { %v6277_v10 = vpop.f32.mrf.mxu3  ;;  %v11320_v2 = vmul.f32 %v17295_v45, %v11120_v59  ;;  %v4936_v20 = vadd.f32 %v4593_v19, %v3106_v37  ;;  %7112 = vadd.xlane.f32.xlu1 %v17571_v9  ;;  %v8575_v17 = vsub.f32 %v8183_v49, %v8379_v48  ;;  %7903 = vadd.xlane.f32.xlu2 %v7610_v12  ;;  %v14295_v49 = vld [vmem:[%s15009_s25 + $0x1d0] sm:$0xff] }
 0x3ae   : > { %v1818_v1 = vpop.f32.mrf.mxu0  ;;  %v3107_v5 = vpop.f32.mrf.mxu1  ;;  %v9885_v31 = vsub.f32 1.5, %v9884_v52 }
 0x3af   : > { %v14548_v27 = vpop.eup %14547  ;;  %v11520_v33 = vadd.f32 %v17304_v11, %v11320_v2  ;;  %v6620_v24 = vadd.f32 %v6277_v10, %v4936_v20  ;;  %v17585_v35 = vadd.f32 1e-05, %v8575_v17  ;;  %v3108_v51 = vadd.f32 %v3107_v5, %v1818_v1 }
 0x3b0   : > { %v9892_v58 = vmul.f32 %v14548_v27, %v17557_v34  ;;  %v7085_v40 = vpop.xlane.xlu2 %7084  ;;  %v9886_v39 = vmul.f32 %v14546_v15, %v9885_v31  ;;  %v7876_v6 = vpop.xlane.xlu0 %7875  ;;  %vm9898_vm5 = vweird.f32 %v14548_v27  ;;  %v8770_v5 = vsub.f32 %v17126_v23, %v17541_v13 }
 0x3b1   : > { %11716 = vst [vmem:[%s15334_s24 + $0x278] sm:$0xff] %v11520_v33  ;;  %v17590_v21 = vadd.f32 %v17479_v30, %v6620_v24  ;;  %v17593_v54 = vmul.f32 %v15231_v41, %v7085_v40  ;;  %14549 = vrsqrt.f32 %v17585_v35  ;;  %v8184_v60 = vmul.f32 %v7876_v6, %v15231_v41  ;;  %vm9899_vm7 = vmor %vm9897_vm6, %vm9898_vm5 }
 0x3b2   : > { %v9893_v22 = vmul.f32 %v14548_v27, %v9892_v58  ;;  %v9890_v18 = vsel %vm9889_vm4, %v14546_v15, %v9886_v39  ;;  %vm9907_vm9 = vweird.f32 %v17585_v35 }
 0x3b3   : > { %v8380_v7 = vmul.f32 %v17593_v54, %v17593_v54  ;;  %v7611_v56 = vmul.f32 %v17590_v21, %v17590_v21  ;;  %v11121_v14 = vmul.f32 %v9890_v18, %v8769_v43 }
 0x3b4   : > { %v9894_v55 = vmul.f32 0.5, %v9893_v22  ;;  %v4595_v50 = vpop.f32.mrf.mxu2 }
 0x3b5   : > { %v6279_v37 = vpop.f32.mrf.mxu3  ;;  %v8576_v46 = vsub.f32 %v8184_v60, %v8380_v7  ;;  %v4937_v16 = vadd.f32 %v4595_v50, %v3108_v51  ;;  %7905 = vadd.xlane.f32.xlu0 %v7611_v56  ;;  %v11321_v48 = vmul.f32 %v17295_v45, %v11121_v14  ;;  %7114 = vadd.xlane.f32.xlu2 %v17590_v21 }
 0x3b6   : > { %v1821_v59 = vpop.f32.mrf.mxu0  ;;  %v3110_v15 = vpop.f32.mrf.mxu1  ;;  %v9895_v19 = vsub.f32 1.5, %v9894_v55 }
 0x3b7   : > { %v17609_v10 = vadd.f32 1e-05, %v8576_v46  ;;  %v6621_v12 = vadd.f32 %v6279_v37, %v4937_v16  ;;  %12411 = vmatmul.msk.bf16.gmra.mxu0 %vm1267_vm0, %v14097_v32  ;;  %v14550_v2 = vpop.eup %14549  ;;  %v11521_v52 = vadd.f32 %v17304_v11, %v11321_v48  ;;  %v3111_v33 = vadd.f32 %v3110_v15, %v1821_v59 }
 0x3b8   : > { %12905 = vmatmul.msk.bf16.gmra.mxu1 %vm1267_vm0, %v13998_v62  ;;  %v9896_v20 = vmul.f32 %v14548_v27, %v9895_v19  ;;  %v7878_v1 = vpop.xlane.xlu1 %7877  ;;  %v9902_v17 = vmul.f32 %v14550_v2, %v17585_v35  ;;  %v7087_v31 = vpop.xlane.xlu0 %7086  ;;  %vm9908_vm8 = vweird.f32 %v14550_v2 }
 0x3b9   : > { %14551 = vrsqrt.f32 %v17609_v10  ;;  %13401 = vmatmul.msk.bf16.gmra.mxu2 %vm1267_vm0, %v14196_v4  ;;  %11717 = vst [vmem:[%s15334_s24 + $0x280] sm:$0xff] %v11521_v52  ;;  %v17623_v58 = vadd.f32 %v17479_v30, %v6621_v12  ;;  %v17626_v34 = vmul.f32 %v15231_v41, %v7087_v31  ;;  %v8185_v39 = vmul.f32 %v7878_v1, %v15231_v41  ;;  %vm9909_vm10 = vmor %vm9907_vm9, %vm9908_vm8  ;;  %v14098_v1 = vld [vmem:[%s14992_s13 + $0x1d8] sm:$0xff] }
 0x3ba   : > { %13897 = vmatmul.msk.bf16.gmra.mxu3 %vm1267_vm0, %v14295_v49  ;;  %v9900_v24 = vsel %vm9899_vm7, %v14548_v27, %v9896_v20  ;;  %v9903_v13 = vmul.f32 %v14550_v2, %v9902_v17  ;;  %v8771_v49 = vsub.f32 %v17145_v42, %v17574_v38  ;;  %vm9917_vm12 = vweird.f32 %v17609_v10 }
 0x3bb   : > { %v11122_v23 = vmul.f32 %v9900_v24, %v8770_v5  ;;  %v8381_v40 = vmul.f32 %v17626_v34, %v17626_v34  ;;  %v7612_v22 = vmul.f32 %v17623_v58, %v17623_v58  ;;  %v13999_v5 = vld [vmem:[%s14997_s19 + $0x1d8] sm:$0xff] }
 0x3bc   : > { %v4598_v6 = vpop.f32.mrf.mxu2  ;;  %v9904_v51 = vmul.f32 0.5, %v9903_v13  ;;  %v14197_v13 = vld [vmem:[%s15004_s22 + $0x1d8] sm:$0xff] }
 0x3bd   : > { %v6282_v43 = vpop.f32.mrf.mxu3  ;;  %v11322_v27 = vmul.f32 %v17295_v45, %v11122_v23  ;;  %v4938_v18 = vadd.f32 %v4598_v6, %v3111_v33  ;;  %7116 = vadd.xlane.f32.xlu0 %v17623_v58  ;;  %v8577_v56 = vsub.f32 %v8185_v39, %v8381_v40  ;;  %7907 = vadd.xlane.f32.xlu1 %v7612_v22  ;;  %v14296_v40 = vld [vmem:[%s15009_s25 + $0x1d8] sm:$0xff] }
 0x3be   : > { %v1823_v7 = vpop.f32.mrf.mxu0  ;;  %v3112_v60 = vpop.f32.mrf.mxu1  ;;  %v9905_v14 = vsub.f32 1.5, %v9904_v51 }
 0x3bf   : > { %v14552_v32 = vpop.eup %14551  ;;  %v11522_v62 = vadd.f32 %v17304_v11, %v11322_v27  ;;  %v6622_v55 = vadd.f32 %v6282_v43, %v4938_v18  ;;  %v17637_v37 = vadd.f32 1e-05, %v8577_v56  ;;  %v3113_v19 = vadd.f32 %v3112_v60, %v1823_v7 }
 0x3c0   : > { %v9912_v50 = vmul.f32 %v14552_v32, %v17609_v10  ;;  %v7089_v46 = vpop.xlane.xlu1 %7088  ;;  %v9906_v16 = vmul.f32 %v14550_v2, %v9905_v14  ;;  %v7880_v15 = vpop.xlane.xlu2 %7879  ;;  %vm9918_vm11 = vweird.f32 %v14552_v32 }
 0x3c1   : > { %11718 = vst [vmem:[%s15334_s24 + $0x288] sm:$0xff] %v11522_v62  ;;  %v17642_v59 = vadd.f32 %v17479_v30, %v6622_v55  ;;  %v17645_v4 = vmul.f32 %v15231_v41, %v7089_v46  ;;  %14553 = vrsqrt.f32 %v17637_v37  ;;  %v8186_v35 = vmul.f32 %v7880_v15, %v15231_v41  ;;  %vm9919_vm13 = vmor %vm9917_vm12, %vm9918_vm11 }
 0x3c2   : > { %v9913_v48 = vmul.f32 %v14552_v32, %v9912_v50  ;;  %v9910_v12 = vsel %vm9909_vm10, %v14550_v2, %v9906_v16  ;;  %vm9927_vm15 = vweird.f32 %v17637_v37 }
 0x3c3   : > { %v8382_v52 = vmul.f32 %v17645_v4, %v17645_v4  ;;  %v7613_v20 = vmul.f32 %v17642_v59, %v17642_v59  ;;  %v11123_v17 = vmul.f32 %v9910_v12, %v8771_v49 }
 0x3c4   : > { %v9914_v42 = vmul.f32 0.5, %v9913_v48  ;;  %v4600_v38 = vpop.f32.mrf.mxu2 }
 0x3c5   : > { %v6284_v33 = vpop.f32.mrf.mxu3  ;;  %v8578_v31 = vsub.f32 %v8186_v35, %v8382_v52  ;;  %v4939_v24 = vadd.f32 %v4600_v38, %v3113_v19  ;;  %7909 = vadd.xlane.f32.xlu2 %v7613_v20  ;;  %v11323_v39 = vmul.f32 %v17295_v45, %v11123_v17  ;;  %7118 = vadd.xlane.f32.xlu1 %v17642_v59 }
 0x3c6   : > { %v1826_v23 = vpop.f32.mrf.mxu0  ;;  %v3115_v2 = vpop.f32.mrf.mxu1  ;;  %v9915_v6 = vsub.f32 1.5, %v9914_v42  ;;  %v8772_v45 = vsub.f32 %v17178_v36, %v17593_v54 }
 0x3c7   : > { %v17661_v43 = vadd.f32 1e-05, %v8578_v31  ;;  %v6623_v22 = vadd.f32 %v6284_v33, %v4939_v24  ;;  %12412 = vmatmul.msk.bf16.gmra.mxu0 %vm1267_vm0, %v14098_v1  ;;  %v14554_v27 = vpop.eup %14553  ;;  %v11523_v51 = vadd.f32 %v17304_v11, %v11323_v39  ;;  %v3116_v56 = vadd.f32 %v3115_v2, %v1826_v23  ;;  %v17697_v1 = vld [vmem:[%s20452_s7] ss:$0 sm:$0xff] }
 0x3c8   : > { %12906 = vmatmul.msk.bf16.gmra.mxu1 %vm1267_vm0, %v13999_v5  ;;  %v9916_v18 = vmul.f32 %v14552_v32, %v9915_v6  ;;  %v7882_v7 = vpop.xlane.xlu0 %7881  ;;  %v9922_v60 = vmul.f32 %v14554_v27, %v17637_v37  ;;  %v7091_v62 = vpop.xlane.xlu2 %7090  ;;  %vm9928_vm14 = vweird.f32 %v14554_v27 }
 0x3c9   : > { %14555 = vrsqrt.f32 %v17661_v43  ;;  %13402 = vmatmul.msk.bf16.gmra.mxu2 %vm1267_vm0, %v14197_v13  ;;  %11719 = vst [vmem:[%s15334_s24 + $0x290] sm:$0xff] %v11523_v51  ;;  %v17675_v14 = vadd.f32 %v17479_v30, %v6623_v22  ;;  %v17678_v10 = vmul.f32 %v15231_v41, %v7091_v62  ;;  %v8187_v50 = vmul.f32 %v7882_v7, %v15231_v41  ;;  %vm9929_vm1 = vmor %vm9927_vm15, %vm9928_vm14  ;;  %v14099_v7 = vld [vmem:[%s14992_s13 + $0x1e0] sm:$0xff] }
 0x3ca   : > { %13898 = vmatmul.msk.bf16.gmra.mxu3 %vm1267_vm0, %v14296_v40  ;;  %v9920_v11 = vsel %vm9919_vm13, %v14552_v32, %v9916_v18  ;;  %v9923_v54 = vmul.f32 %v14554_v27, %v9922_v60  ;;  %v17688_v32 = vld [vmem:[%s20451_s6] ss:$0 sm:$0xff]  ;;  %v8773_v40 = vsub.f32 %v17197_v57, %v17626_v34  ;;  %vm9937_vm3 = vweird.f32 %v17661_v43 }
 0x3cb   : > { %v11124_v36 = vmul.f32 %v9920_v11, %v8772_v45  ;;  %v8383_v55 = vmul.f32 %v17678_v10, %v17678_v10  ;;  %v7614_v15 = vmul.f32 %v17675_v14, %v17675_v14  ;;  %v14000_v45 = vld [vmem:[%s14997_s19 + $0x1e0] sm:$0xff] }
 0x3cc   : > { %v4603_v46 = vpop.f32.mrf.mxu2  ;;  %v9924_v48 = vmul.f32 0.5, %v9923_v54  ;;  %v14198_v54 = vld [vmem:[%s15004_s22 + $0x1e0] sm:$0xff] }
 0x3cd   : > { %v6287_v16 = vpop.f32.mrf.mxu3  ;;  %v11324_v49 = vmul.f32 %v17688_v32, %v11124_v36  ;;  %v4940_v19 = vadd.f32 %v4603_v46, %v3116_v56  ;;  %7120 = vadd.xlane.f32.xlu2 %v17675_v14  ;;  %v8579_v52 = vsub.f32 %v8187_v50, %v8383_v55  ;;  %7911 = vadd.xlane.f32.xlu0 %v7614_v15  ;;  %v14297_v55 = vld [vmem:[%s15009_s25 + $0x1e0] sm:$0xff] }
 0x3ce   : > { %v1828_v12 = vpop.f32.mrf.mxu0  ;;  %v3117_v35 = vpop.f32.mrf.mxu1  ;;  %v9925_v17 = vsub.f32 1.5, %v9924_v48 }
 0x3cf   : > { %v17692_v20 = vpop.eup %14555  ;;  %v11524_v5 = vadd.f32 %v17697_v1, %v11324_v49  ;;  %v6624_v42 = vadd.f32 %v6287_v16, %v4940_v19  ;;  %v17702_v33 = vadd.f32 1e-05, %v8579_v52  ;;  %v3118_v6 = vadd.f32 %v3117_v35, %v1828_v12 }
 0x3d0   : > { %v9932_v38 = vmul.f32 %v17692_v20, %v17661_v43  ;;  %v7093_v31 = vpop.xlane.xlu0 %7092  ;;  %v9926_v24 = vmul.f32 %v14554_v27, %v9925_v17  ;;  %v7884_v13 = vpop.xlane.xlu1 %7883  ;;  %vm9938_vm2 = vweird.f32 %v17692_v20  ;;  %v8774_v35 = vsub.f32 %v17230_v53, %v17645_v4 }
 0x3d1   : > { %11720 = vst [vmem:[%s15334_s24 + $0x298] sm:$0xff] %v11524_v5  ;;  %v17707_v23 = vadd.f32 %v17479_v30, %v6624_v42  ;;  %v17710_v2 = vmul.f32 %v15231_v41, %v7093_v31  ;;  %14557 = vrsqrt.f32 %v17702_v33  ;;  %v8188_v51 = vmul.f32 %v7884_v13, %v15231_v41  ;;  %vm9939_vm4 = vmor %vm9937_vm3, %vm9938_vm2 }
 0x3d2   : > { %v9933_v39 = vmul.f32 %v17692_v20, %v9932_v38  ;;  %v9930_v22 = vsel %vm9929_vm1, %v14554_v27, %v9926_v24  ;;  %vm9947_vm6 = vweird.f32 %v17702_v33 }
 0x3d3   : > { %v8384_v37 = vmul.f32 %v17710_v2, %v17710_v2  ;;  %v7615_v18 = vmul.f32 %v17707_v23, %v17707_v23  ;;  %v11125_v57 = vmul.f32 %v9930_v22, %v8773_v40 }
 0x3d4   : > { %v9934_v34 = vmul.f32 0.5, %v9933_v39  ;;  %v4605_v60 = vpop.f32.mrf.mxu2 }
 0x3d5   : > { %v6289_v56 = vpop.f32.mrf.mxu3  ;;  %v8580_v62 = vsub.f32 %v8188_v51, %v8384_v37  ;;  %v4941_v11 = vadd.f32 %v4605_v60, %v3118_v6  ;;  %7913 = vadd.xlane.f32.xlu1 %v7615_v18  ;;  %v11325_v50 = vmul.f32 %v17688_v32, %v11125_v57  ;;  %7122 = vadd.xlane.f32.xlu0 %v17707_v23 }
 0x3d6   : > { %v1831_v36 = vpop.f32.mrf.mxu0  ;;  %v3120_v27 = vpop.f32.mrf.mxu1  ;;  %v9935_v46 = vsub.f32 1.5, %v9934_v34 }
 0x3d7   : > { %v17728_v16 = vadd.f32 1e-05, %v8580_v62  ;;  %v6625_v15 = vadd.f32 %v6289_v56, %v4941_v11  ;;  %12413 = vmatmul.msk.bf16.gmra.mxu0 %vm1267_vm0, %v14099_v7  ;;  %v14558_v49 = vpop.eup %14557  ;;  %v11525_v48 = vadd.f32 %v17697_v1, %v11325_v50  ;;  %v3121_v5 = vadd.f32 %v3120_v27, %v1831_v36 }
 0x3d8   : > { %12907 = vmatmul.msk.bf16.gmra.mxu1 %vm1267_vm0, %v14000_v45  ;;  %v9936_v19 = vmul.f32 %v17692_v20, %v9935_v46  ;;  %v7886_v12 = vpop.xlane.xlu2 %7885  ;;  %v9942_v52 = vmul.f32 %v14558_v49, %v17702_v33  ;;  %v7095_v17 = vpop.xlane.xlu1 %7094  ;;  %vm9948_vm5 = vweird.f32 %v14558_v49 }
 0x3d9   : > { %14559 = vrsqrt.f32 %v17728_v16  ;;  %13403 = vmatmul.msk.bf16.gmra.mxu2 %vm1267_vm0, %v14198_v54  ;;  %11721 = vst [vmem:[%s15334_s24 + $0x2a0] sm:$0xff] %v11525_v48  ;;  %v17744_v43 = vadd.f32 %v17479_v30, %v6625_v15  ;;  %v17747_v38 = vmul.f32 %v15231_v41, %v7095_v17  ;;  %v8189_v31 = vmul.f32 %v7886_v12, %v15231_v41  ;;  %vm9949_vm7 = vmor %vm9947_vm6, %vm9948_vm5  ;;  %v14100_v12 = vld [vmem:[%s14992_s13 + $0x1e8] sm:$0xff] }
 0x3da   : > { %13899 = vmatmul.msk.bf16.gmra.mxu3 %vm1267_vm0, %v14297_v55  ;;  %v9940_v42 = vsel %vm9939_vm4, %v17692_v20, %v9936_v19  ;;  %v9943_v4 = vmul.f32 %v14558_v49, %v9942_v52  ;;  %v8775_v55 = vsub.f32 %v17249_v3, %v17678_v10  ;;  %vm9957_vm9 = vweird.f32 %v17728_v16 }
 0x3db   : > { %v11126_v53 = vmul.f32 %v9940_v42, %v8774_v35  ;;  %v8385_v24 = vmul.f32 %v17747_v38, %v17747_v38  ;;  %v7616_v39 = vmul.f32 %v17744_v43, %v17744_v43  ;;  %v14001_v35 = vld [vmem:[%s14997_s19 + $0x1e8] sm:$0xff] }
 0x3dc   : > { %v4608_v13 = vpop.f32.mrf.mxu2  ;;  %v9944_v6 = vmul.f32 0.5, %v9943_v4  ;;  %v14199_v4 = vld [vmem:[%s15004_s22 + $0x1e8] sm:$0xff] }
 0x3dd   : > { %v6292_v40 = vpop.f32.mrf.mxu3  ;;  %v11326_v20 = vmul.f32 %v17688_v32, %v11126_v53  ;;  %v4942_v22 = vadd.f32 %v4608_v13, %v3121_v5  ;;  %7124 = vadd.xlane.f32.xlu1 %v17744_v43  ;;  %v8581_v18 = vsub.f32 %v8189_v31, %v8385_v24  ;;  %7915 = vadd.xlane.f32.xlu2 %v7616_v39  ;;  %v14298_v31 = vld [vmem:[%s15009_s25 + $0x1e8] sm:$0xff] }
 0x3de   : > { %v1833_v37 = vpop.f32.mrf.mxu0  ;;  %v3122_v51 = vpop.f32.mrf.mxu1  ;;  %v9945_v57 = vsub.f32 1.5, %v9944_v6 }
 0x3df   : > { %v14560_v7 = vpop.eup %14559  ;;  %v11526_v45 = vadd.f32 %v17697_v1, %v11326_v20  ;;  %v6626_v34 = vadd.f32 %v6292_v40, %v4942_v22  ;;  %v17758_v56 = vadd.f32 1e-05, %v8581_v18  ;;  %v3123_v46 = vadd.f32 %v3122_v51, %v1833_v37 }
 0x3e0   : > { %v9952_v60 = vmul.f32 %v14560_v7, %v17728_v16  ;;  %v7097_v62 = vpop.xlane.xlu2 %7096  ;;  %v9946_v11 = vmul.f32 %v14558_v49, %v9945_v57  ;;  %v7888_v54 = vpop.xlane.xlu0 %7887  ;;  %vm9958_vm8 = vweird.f32 %v14560_v7  ;;  %v8776_v51 = vsub.f32 %v17282_v25, %v17710_v2 }
 0x3e1   : > { %11722 = vst [vmem:[%s15334_s24 + $0x2a8] sm:$0xff] %v11526_v45  ;;  %v17763_v36 = vadd.f32 %v17479_v30, %v6626_v34  ;;  %v17766_v27 = vmul.f32 %v15231_v41, %v7097_v62  ;;  %14561 = vrsqrt.f32 %v17758_v56  ;;  %v8190_v48 = vmul.f32 %v7888_v54, %v15231_v41  ;;  %vm9959_vm10 = vmor %vm9957_vm9, %vm9958_vm8 }
 0x3e2   : > { %v9953_v50 = vmul.f32 %v14560_v7, %v9952_v60  ;;  %v9950_v15 = vsel %vm9949_vm7, %v14558_v49, %v9946_v11  ;;  %vm9967_vm12 = vweird.f32 %v17758_v56 }
 0x3e3   : > { %v8386_v33 = vmul.f32 %v17766_v27, %v17766_v27  ;;  %v7617_v19 = vmul.f32 %v17763_v36, %v17763_v36  ;;  %v11127_v52 = vmul.f32 %v9950_v15, %v8775_v55 }
 0x3e4   : > { %v9954_v3 = vmul.f32 0.5, %v9953_v50  ;;  %v4610_v10 = vpop.f32.mrf.mxu2 }
 0x3e5   : > { %v6294_v5 = vpop.f32.mrf.mxu3  ;;  %v8582_v17 = vsub.f32 %v8190_v48, %v8386_v33  ;;  %v4943_v42 = vadd.f32 %v4610_v10, %v3123_v46  ;;  %7917 = vadd.xlane.f32.xlu0 %v7617_v19  ;;  %v11327_v24 = vmul.f32 %v17688_v32, %v11127_v52  ;;  %7126 = vadd.xlane.f32.xlu2 %v17763_v36 }
 0x3e6   : > { %v1836_v53 = vpop.f32.mrf.mxu0  ;;  %v3125_v49 = vpop.f32.mrf.mxu1  ;;  %v9955_v13 = vsub.f32 1.5, %v9954_v3 }
 0x3e7   : > { %v17782_v40 = vadd.f32 1e-05, %v8582_v17  ;;  %v6627_v39 = vadd.f32 %v6294_v5, %v4943_v42  ;;  %12414 = vmatmul.msk.bf16.gmra.mxu0 %vm1267_vm0, %v14100_v12  ;;  %v14562_v20 = vpop.eup %14561  ;;  %v11527_v6 = vadd.f32 %v17697_v1, %v11327_v24  ;;  %v3126_v45 = vadd.f32 %v3125_v49, %v1836_v53 }
 0x3e8   : > { %12908 = vmatmul.msk.bf16.gmra.mxu1 %vm1267_vm0, %v14001_v35  ;;  %v9956_v22 = vmul.f32 %v14560_v7, %v9955_v13  ;;  %v7890_v37 = vpop.xlane.xlu1 %7889  ;;  %v9962_v18 = vmul.f32 %v14562_v20, %v17758_v56  ;;  %v7099_v57 = vpop.xlane.xlu0 %7098  ;;  %vm9968_vm11 = vweird.f32 %v14562_v20 }
 0x3e9   : > { %14563 = vrsqrt.f32 %v17782_v40  ;;  %13404 = vmatmul.msk.bf16.gmra.mxu2 %vm1267_vm0, %v14199_v4  ;;  %11723 = vst [vmem:[%s15334_s24 + $0x2b0] sm:$0xff] %v11527_v6  ;;  %v17796_v60 = vadd.f32 %v17479_v30, %v6627_v39  ;;  %v17799_v16 = vmul.f32 %v15231_v41, %v7099_v57  ;;  %v8191_v11 = vmul.f32 %v7890_v37, %v15231_v41  ;;  %vm9969_vm13 = vmor %vm9967_vm12, %vm9968_vm11  ;;  %v14101_v37 = vld [vmem:[%s14992_s13 + $0x1f0] sm:$0xff] }
 0x3ea   : > { %13900 = vmatmul.msk.bf16.gmra.mxu3 %vm1267_vm0, %v14298_v31  ;;  %v9960_v34 = vsel %vm9959_vm10, %v14560_v7, %v9956_v22  ;;  %v9963_v2 = vmul.f32 %v14562_v20, %v9962_v18  ;;  %v8777_v31 = vsub.f32 %v17314_v47, %v17747_v38  ;;  %vm9977_vm15 = vweird.f32 %v17782_v40 }
 0x3eb   : > { %v11128_v25 = vmul.f32 %v9960_v34, %v8776_v51  ;;  %v8387_v62 = vmul.f32 %v17799_v16, %v17799_v16  ;;  %v7618_v50 = vmul.f32 %v17796_v60, %v17796_v60  ;;  %v14002_v51 = vld [vmem:[%s14997_s19 + $0x1f0] sm:$0xff] }
 0x3ec   : > { %v4613_v54 = vpop.f32.mrf.mxu2  ;;  %v9964_v46 = vmul.f32 0.5, %v9963_v2  ;;  %v14200_v2 = vld [vmem:[%s15004_s22 + $0x1f0] sm:$0xff] }
 0x3ed   : > { %v6297_v55 = vpop.f32.mrf.mxu3  ;;  %v11328_v7 = vmul.f32 %v17688_v32, %v11128_v25  ;;  %v4944_v15 = vadd.f32 %v4613_v54, %v3126_v45  ;;  %7128 = vadd.xlane.f32.xlu0 %v17796_v60  ;;  %v8583_v19 = vsub.f32 %v8191_v11, %v8387_v62  ;;  %7919 = vadd.xlane.f32.xlu1 %v7618_v50  ;;  %v14299_v62 = vld [vmem:[%s15009_s25 + $0x1f0] sm:$0xff] }
 0x3ee   : > { %v1838_v33 = vpop.f32.mrf.mxu0  ;;  %v3127_v48 = vpop.f32.mrf.mxu1  ;;  %v9965_v52 = vsub.f32 1.5, %v9964_v46 }
 0x3ef   : > { %v14564_v12 = vpop.eup %14563  ;;  %v11528_v35 = vadd.f32 %v17697_v1, %v11328_v7  ;;  %v6628_v3 = vadd.f32 %v6297_v55, %v4944_v15  ;;  %v17810_v5 = vadd.f32 1e-05, %v8583_v19  ;;  %v3128_v13 = vadd.f32 %v3127_v48, %v1838_v33 }
 0x3f0   : > { %v9972_v10 = vmul.f32 %v14564_v12, %v17782_v40  ;;  %v7101_v17 = vpop.xlane.xlu1 %7100  ;;  %v9966_v42 = vmul.f32 %v14562_v20, %v9965_v52  ;;  %v7892_v49 = vpop.xlane.xlu2 %7891  ;;  %vm9978_vm14 = vweird.f32 %v14564_v12  ;;  %v8778_v48 = vsub.f32 %v17351_v29, %v17766_v27 }
 0x3f1   : > { %11724 = vst [vmem:[%s15334_s24 + $0x2b8] sm:$0xff] %v11528_v35  ;;  %v17815_v53 = vadd.f32 %v17479_v30, %v6628_v3  ;;  %v17818_v4 = vmul.f32 %v15231_v41, %v7101_v17  ;;  %14565 = vrsqrt.f32 %v17810_v5  ;;  %v8192_v56 = vmul.f32 %v7892_v49, %v15231_v41  ;;  %vm9979_vm1 = vmor %vm9977_vm15, %vm9978_vm14 }
 0x3f2   : > { %v9973_v24 = vmul.f32 %v14564_v12, %v9972_v10  ;;  %v9970_v39 = vsel %vm9969_vm13, %v14562_v20, %v9966_v42  ;;  %vm9987_vm3 = vweird.f32 %v17810_v5 }
 0x3f3   : > { %v8388_v6 = vmul.f32 %v17818_v4, %v17818_v4  ;;  %v7619_v22 = vmul.f32 %v17815_v53, %v17815_v53  ;;  %v11129_v18 = vmul.f32 %v9970_v39, %v8777_v31 }
 0x3f4   : > { %v9974_v47 = vmul.f32 0.5, %v9973_v24  ;;  %v4615_v38 = vpop.f32.mrf.mxu2 }
 0x3f5   : > { %v6299_v45 = vpop.f32.mrf.mxu3  ;;  %v8584_v57 = vsub.f32 %v8192_v56, %v8388_v6  ;;  %v4945_v34 = vadd.f32 %v4615_v38, %v3128_v13  ;;  %7921 = vadd.xlane.f32.xlu2 %v7619_v22  ;;  %v11329_v11 = vmul.f32 %v17688_v32, %v11129_v18  ;;  %7130 = vadd.xlane.f32.xlu1 %v17815_v53 }
 0x3f6   : > { %v1841_v25 = vpop.f32.mrf.mxu0  ;;  %v3130_v20 = vpop.f32.mrf.mxu1  ;;  %v9975_v54 = vsub.f32 1.5, %v9974_v47 }
 0x3f7   : > { %v17834_v55 = vadd.f32 1e-05, %v8584_v57  ;;  %v6629_v50 = vadd.f32 %v6299_v45, %v4945_v34  ;;  %12415 = vmatmul.msk.bf16.gmra.mxu0 %vm1267_vm0, %v14101_v37  ;;  %v14566_v7 = vpop.eup %14565  ;;  %v11529_v46 = vadd.f32 %v17697_v1, %v11329_v11  ;;  %v3131_v35 = vadd.f32 %v3130_v20, %v1841_v25  ;;  %v17872_v34 = vld [vmem:[%s20450_s5] ss:$0 sm:$0xff] }
 0x3f8   : > { %12909 = vmatmul.msk.bf16.gmra.mxu1 %vm1267_vm0, %v14002_v51  ;;  %v9976_v15 = vmul.f32 %v14564_v12, %v9975_v54  ;;  %v7894_v33 = vpop.xlane.xlu0 %7893  ;;  %v9982_v19 = vmul.f32 %v14566_v7, %v17810_v5  ;;  %v7103_v52 = vpop.xlane.xlu2 %7102  ;;  %vm9988_vm2 = vweird.f32 %v14566_v7 }
 0x3f9   : > { %14567 = vrsqrt.f32 %v17834_v55  ;;  %13405 = vmatmul.msk.bf16.gmra.mxu2 %vm1267_vm0, %v14200_v2  ;;  %11725 = vst [vmem:[%s15334_s24 + $0x2c0] sm:$0xff] %v11529_v46  ;;  %v17848_v10 = vadd.f32 %v17479_v30, %v6629_v50  ;;  %v17851_v40 = vmul.f32 %v15231_v41, %v7103_v52  ;;  %v8193_v42 = vmul.f32 %v7894_v33, %v15231_v41  ;;  %vm9989_vm4 = vmor %vm9987_vm3, %vm9988_vm2  ;;  %v14102_v33 = vld [vmem:[%s14992_s13 + $0x1f8] sm:$0xff] }
 0x3fa   : > { %13901 = vmatmul.msk.bf16.gmra.mxu3 %vm1267_vm0, %v14299_v62  ;;  %v9980_v3 = vsel %vm9979_vm1, %v14564_v12, %v9976_v15  ;;  %v9983_v27 = vmul.f32 %v14566_v7, %v9982_v19  ;;  %v8779_v62 = vsub.f32 %v17370_v44, %v17799_v16  ;;  %vm9997_vm6 = vweird.f32 %v17834_v55 }
 0x3fb   : > { %v11130_v29 = vmul.f32 %v9980_v3, %v8778_v48  ;;  %v8389_v17 = vmul.f32 %v17851_v40, %v17851_v40  ;;  %v7620_v24 = vmul.f32 %v17848_v10, %v17848_v10  ;;  %v14003_v48 = vld [vmem:[%s14997_s19 + $0x1f8] sm:$0xff] }
 0x3fc   : > { %v4618_v49 = vpop.f32.mrf.mxu2  ;;  %v9984_v30 = vmul.f32 0.5, %v9983_v27  ;;  %v14201_v27 = vld [vmem:[%s15004_s22 + $0x1f8] sm:$0xff] }
 0x3fd   : > { %v6302_v31 = vpop.f32.mrf.mxu3  ;;  %v11330_v12 = vmul.f32 %v17688_v32, %v11130_v29  ;;  %v4946_v13 = vadd.f32 %v4618_v49, %v3131_v35  ;;  %7132 = vadd.xlane.f32.xlu2 %v17848_v10  ;;  %v8585_v6 = vsub.f32 %v8193_v42, %v8389_v17  ;;  %7923 = vadd.xlane.f32.xlu0 %v7620_v24  ;;  %v14300_v17 = vld [vmem:[%s15009_s25 + $0x1f8] sm:$0xff] }
 0x3fe   : > { %v1843_v39 = vpop.f32.mrf.mxu0  ;;  %v3132_v56 = vpop.f32.mrf.mxu1  ;;  %v9985_v51 = vsub.f32 1.5, %v9984_v30 }
 0x3ff   : > { %v17860_v22 = vpop.eup %14567  ;;  %v11530_v37 = vadd.f32 %v17697_v1, %v11330_v12  ;;  %v6630_v18 = vadd.f32 %v6302_v31, %v4946_v13  ;;  %v17865_v38 = vadd.f32 1e-05, %v8585_v6  ;;  %v3133_v5 = vadd.f32 %v3132_v56, %v1843_v39 }
 0x400   : > { %v9992_v47 = vmul.f32 %v17860_v22, %v17834_v55  ;;  %v7105_v45 = vpop.xlane.xlu0 %7104  ;;  %v9986_v57 = vmul.f32 %v14566_v7, %v9985_v51  ;;  %v7896_v2 = vpop.xlane.xlu1 %7895  ;;  %vm9998_vm5 = vweird.f32 %v17860_v22  ;;  %v8780_v56 = vsub.f32 %v17403_v8, %v17818_v4 }
 0x401   : > { %11726 = vst [vmem:[%s15334_s24 + $0x2c8] sm:$0xff] %v11530_v37  ;;  %v17875_v25 = vadd.f32 %v17872_v34, %v6630_v18  ;;  %v17878_v20 = vmul.f32 %v15231_v41, %v7105_v45  ;;  %14569 = vrsqrt.f32 %v17865_v38  ;;  %v8194_v46 = vmul.f32 %v7896_v2, %v15231_v41  ;;  %vm9999_vm7 = vmor %vm9997_vm6, %vm9998_vm5 }
 0x402   : > { %v9993_v11 = vmul.f32 %v17860_v22, %v9992_v47  ;;  %v9990_v54 = vsel %vm9989_vm4, %v14566_v7, %v9986_v57  ;;  %vm10007_vm9 = vweird.f32 %v17865_v38 }
 0x403   : > { %v8390_v50 = vmul.f32 %v17878_v20, %v17878_v20  ;;  %v7621_v15 = vmul.f32 %v17875_v25, %v17875_v25  ;;  %v11131_v44 = vmul.f32 %v9990_v54, %v8779_v62 }
 0x404   : > { %v9994_v16 = vmul.f32 0.5, %v9993_v11  ;;  %v4620_v19 = vpop.f32.mrf.mxu2 }
 0x405   : > { %v6304_v35 = vpop.f32.mrf.mxu3  ;;  %v8586_v52 = vsub.f32 %v8194_v46, %v8390_v50  ;;  %v4947_v3 = vadd.f32 %v4620_v19, %v3133_v5  ;;  %7925 = vadd.xlane.f32.xlu1 %v7621_v15  ;;  %v11331_v42 = vmul.f32 %v17688_v32, %v11131_v44  ;;  %7134 = vadd.xlane.f32.xlu0 %v17875_v25 }
 0x406   : > { %v1846_v29 = vpop.f32.mrf.mxu0  ;;  %v3135_v7 = vpop.f32.mrf.mxu1  ;;  %v9995_v49 = vsub.f32 1.5, %v9994_v16 }
 0x407   : > { %v17896_v31 = vadd.f32 1e-05, %v8586_v52  ;;  %v6631_v24 = vadd.f32 %v6304_v35, %v4947_v3  ;;  %12416 = vmatmul.msk.bf16.gmra.mxu0 %vm1267_vm0, %v14102_v33  ;;  %v14570_v12 = vpop.eup %14569  ;;  %v11531_v30 = vadd.f32 %v17697_v1, %v11331_v42  ;;  %v3136_v37 = vadd.f32 %v3135_v7, %v1846_v29 }
 0x408   : > { %12910 = vmatmul.msk.bf16.gmra.mxu1 %vm1267_vm0, %v14003_v48  ;;  %v9996_v13 = vmul.f32 %v17860_v22, %v9995_v49  ;;  %v7898_v39 = vpop.xlane.xlu2 %7897  ;;  %v10002_v6 = vmul.f32 %v14570_v12, %v17865_v38  ;;  %v7107_v51 = vpop.xlane.xlu1 %7106  ;;  %vm10008_vm8 = vweird.f32 %v14570_v12 }
 0x409   : > { %14571 = vrsqrt.f32 %v17896_v31  ;;  %13406 = vmatmul.msk.bf16.gmra.mxu2 %vm1267_vm0, %v14201_v27  ;;  %11727 = vst [vmem:[%s15334_s24 + $0x2d0] sm:$0xff] %v11531_v30  ;;  %v17912_v55 = vadd.f32 %v17872_v34, %v6631_v24  ;;  %v17915_v47 = vmul.f32 %v15231_v41, %v7107_v51  ;;  %v8195_v45 = vmul.f32 %v7898_v39, %v15231_v41  ;;  %vm10009_vm10 = vmor %vm10007_vm9, %vm10008_vm8  ;;  %v14103_v39 = vld [vmem:[%s14992_s13 + $0x200] sm:$0xff] }
 0x40a   : > { %13902 = vmatmul.msk.bf16.gmra.mxu3 %vm1267_vm0, %v14300_v17  ;;  %v10000_v18 = vsel %vm9999_vm7, %v17860_v22, %v9996_v13  ;;  %v10003_v4 = vmul.f32 %v14570_v12, %v10002_v6  ;;  %v8781_v17 = vsub.f32 %v17422_v28, %v17851_v40  ;;  %vm10017_vm12 = vweird.f32 %v17896_v31 }
 0x40b   : > { %v11132_v8 = vmul.f32 %v10000_v18, %v8780_v56  ;;  %v8391_v57 = vmul.f32 %v17915_v47, %v17915_v47  ;;  %v7622_v11 = vmul.f32 %v17912_v55, %v17912_v55  ;;  %v14004_v56 = vld [vmem:[%s14997_s19 + $0x200] sm:$0xff] }
 0x40c   : > { %v4623_v2 = vpop.f32.mrf.mxu2  ;;  %v10004_v5 = vmul.f32 0.5, %v10003_v4  ;;  %v14202_v4 = vld [vmem:[%s15004_s22 + $0x200] sm:$0xff] }
 0x40d   : > { %v6307_v62 = vpop.f32.mrf.mxu3  ;;  %v11332_v22 = vmul.f32 %v17688_v32, %v11132_v8  ;;  %v4948_v54 = vadd.f32 %v4623_v2, %v3136_v37  ;;  %7136 = vadd.xlane.f32.xlu1 %v17912_v55  ;;  %v8587_v15 = vsub.f32 %v8195_v45, %v8391_v57  ;;  %7927 = vadd.xlane.f32.xlu2 %v7622_v11  ;;  %v14301_v45 = vld [vmem:[%s15009_s25 + $0x200] sm:$0xff] }
 0x40e   : > { %v1848_v50 = vpop.f32.mrf.mxu0  ;;  %v3137_v46 = vpop.f32.mrf.mxu1  ;;  %v10005_v44 = vsub.f32 1.5, %v10004_v5 }
 0x40f   : > { %v14572_v33 = vpop.eup %14571  ;;  %v11532_v48 = vadd.f32 %v17697_v1, %v11332_v22  ;;  %v6632_v16 = vadd.f32 %v6307_v62, %v4948_v54  ;;  %v17926_v35 = vadd.f32 1e-05, %v8587_v15  ;;  %v3138_v49 = vadd.f32 %v3137_v46, %v1848_v50 }
 0x410   : > { %v10012_v19 = vmul.f32 %v14572_v33, %v17896_v31  ;;  %v7109_v52 = vpop.xlane.xlu2 %7108  ;;  %v10006_v3 = vmul.f32 %v14570_v12, %v10005_v44  ;;  %v7900_v27 = vpop.xlane.xlu0 %7899  ;;  %vm10018_vm11 = vweird.f32 %v14572_v33  ;;  %v8782_v46 = vsub.f32 %v17455_v0, %v17878_v20 }
 0x411   : > { %11728 = vst [vmem:[%s15334_s24 + $0x2d8] sm:$0xff] %v11532_v48  ;;  %v17931_v29 = vadd.f32 %v17872_v34, %v6632_v16  ;;  %v17934_v7 = vmul.f32 %v15231_v41, %v7109_v52  ;;  %14573 = vrsqrt.f32 %v17926_v35  ;;  %v8196_v30 = vmul.f32 %v7900_v27, %v15231_v41  ;;  %vm10019_vm13 = vmor %vm10017_vm12, %vm10018_vm11 }
 0x412   : > { %v10013_v42 = vmul.f32 %v14572_v33, %v10012_v19  ;;  %v10010_v24 = vsel %vm10009_vm10, %v14570_v12, %v10006_v3  ;;  %vm10027_vm15 = vweird.f32 %v17926_v35 }
 0x413   : > { %v8392_v38 = vmul.f32 %v17934_v7, %v17934_v7  ;;  %v7623_v13 = vmul.f32 %v17931_v29, %v17931_v29  ;;  %v11133_v6 = vmul.f32 %v10010_v24, %v8781_v17 }
 0x414   : > { %v10014_v28 = vmul.f32 0.5, %v10013_v42  ;;  %v4625_v40 = vpop.f32.mrf.mxu2 }
 0x415   : > { %v6309_v37 = vpop.f32.mrf.mxu3  ;;  %v8588_v51 = vsub.f32 %v8196_v30, %v8392_v38  ;;  %v4949_v18 = vadd.f32 %v4625_v40, %v3138_v49  ;;  %7929 = vadd.xlane.f32.xlu0 %v7623_v13  ;;  %v11333_v57 = vmul.f32 %v17688_v32, %v11133_v6  ;;  %7138 = vadd.xlane.f32.xlu2 %v17931_v29 }
 0x416   : > { %v1851_v8 = vpop.f32.mrf.mxu0  ;;  %v3140_v12 = vpop.f32.mrf.mxu1  ;;  %v10015_v2 = vsub.f32 1.5, %v10014_v28 }
 0x417   : > { %v17950_v62 = vadd.f32 1e-05, %v8588_v51  ;;  %v6633_v11 = vadd.f32 %v6309_v37, %v4949_v18  ;;  %12417 = vmatmul.msk.bf16.gmra.mxu0 %vm1267_vm0, %v14103_v39  ;;  %v14574_v22 = vpop.eup %14573  ;;  %v11533_v5 = vadd.f32 %v17697_v1, %v11333_v57  ;;  %v3141_v48 = vadd.f32 %v3140_v12, %v1851_v8 }
 0x418   : > { %12911 = vmatmul.msk.bf16.gmra.mxu1 %vm1267_vm0, %v14004_v56  ;;  %v10016_v54 = vmul.f32 %v14572_v33, %v10015_v2  ;;  %v7902_v50 = vpop.xlane.xlu1 %7901  ;;  %v10022_v15 = vmul.f32 %v14574_v22, %v17926_v35  ;;  %v7111_v44 = vpop.xlane.xlu0 %7110  ;;  %vm10028_vm14 = vweird.f32 %v14574_v22 }
 0x419   : > { %14575 = vrsqrt.f32 %v17950_v62  ;;  %13407 = vmatmul.msk.bf16.gmra.mxu2 %vm1267_vm0, %v14202_v4  ;;  %11729 = vst [vmem:[%s15334_s24 + $0x2e0] sm:$0xff] %v11533_v5  ;;  %v17964_v19 = vadd.f32 %v17872_v34, %v6633_v11  ;;  %v17967_v31 = vmul.f32 %v15231_v41, %v7111_v44  ;;  %v8197_v3 = vmul.f32 %v7902_v50, %v15231_v41  ;;  %vm10029_vm1 = vmor %vm10027_vm15, %vm10028_vm14  ;;  %v14104_v50 = vld [vmem:[%s14992_s13 + $0x208] sm:$0xff] }
 0x41a   : > { %13903 = vmatmul.msk.bf16.gmra.mxu3 %vm1267_vm0, %v14301_v45  ;;  %v10020_v16 = vsel %vm10019_vm13, %v14572_v33, %v10016_v54  ;;  %v10023_v20 = vmul.f32 %v14574_v22, %v10022_v15  ;;  %v8783_v45 = vsub.f32 %v17482_v26, %v17915_v47  ;;  %vm10037_vm3 = vweird.f32 %v17950_v62 }
 0x41b   : > { %v11134_v0 = vmul.f32 %v10020_v16, %v8782_v46  ;;  %v8393_v52 = vmul.f32 %v17967_v31, %v17967_v31  ;;  %v7624_v42 = vmul.f32 %v17964_v19, %v17964_v19  ;;  %v14005_v46 = vld [vmem:[%s14997_s19 + $0x208] sm:$0xff] }
 0x41c   : > { %v4628_v27 = vpop.f32.mrf.mxu2  ;;  %v10024_v49 = vmul.f32 0.5, %v10023_v20  ;;  %v14203_v20 = vld [vmem:[%s15004_s22 + $0x208] sm:$0xff] }
 0x41d   : > { %v6312_v17 = vpop.f32.mrf.mxu3  ;;  %v11334_v33 = vmul.f32 %v17688_v32, %v11134_v0  ;;  %v4950_v24 = vadd.f32 %v4628_v27, %v3141_v48  ;;  %7140 = vadd.xlane.f32.xlu0 %v17964_v19  ;;  %v8589_v13 = vsub.f32 %v8197_v3, %v8393_v52  ;;  %7931 = vadd.xlane.f32.xlu1 %v7624_v42  ;;  %v14302_v52 = vld [vmem:[%s15009_s25 + $0x208] sm:$0xff] }
 0x41e   : > { %v1853_v38 = vpop.f32.mrf.mxu0  ;;  %v3142_v30 = vpop.f32.mrf.mxu1  ;;  %v10025_v6 = vsub.f32 1.5, %v10024_v49 }
 0x41f   : > { %v14576_v39 = vpop.eup %14575  ;;  %v11534_v56 = vadd.f32 %v17697_v1, %v11334_v33  ;;  %v6634_v28 = vadd.f32 %v6312_v17, %v4950_v24  ;;  %v17978_v37 = vadd.f32 1e-05, %v8589_v13  ;;  %v3143_v2 = vadd.f32 %v3142_v30, %v1853_v38 }
 0x420   : > { %v10032_v40 = vmul.f32 %v14576_v39, %v17950_v62  ;;  %v7113_v51 = vpop.xlane.xlu1 %7112  ;;  %v10026_v18 = vmul.f32 %v14574_v22, %v10025_v6  ;;  %v7904_v12 = vpop.xlane.xlu2 %7903  ;;  %vm10038_vm2 = vweird.f32 %v14576_v39  ;;  %v8784_v30 = vsub.f32 %v17519_v63, %v17934_v7 }
 0x421   : > { %11730 = vst [vmem:[%s15334_s24 + $0x2e8] sm:$0xff] %v11534_v56  ;;  %v17983_v8 = vadd.f32 %v17872_v34, %v6634_v28  ;;  %v17986_v4 = vmul.f32 %v15231_v41, %v7113_v51  ;;  %14577 = vrsqrt.f32 %v17978_v37  ;;  %v8198_v35 = vmul.f32 %v7904_v12, %v15231_v41  ;;  %vm10039_vm4 = vmor %vm10037_vm3, %vm10038_vm2 }
 0x422   : > { %v10033_v57 = vmul.f32 %v14576_v39, %v10032_v40  ;;  %v10030_v11 = vsel %vm10029_vm1, %v14574_v22, %v10026_v18  ;;  %vm10047_vm6 = vweird.f32 %v17978_v37 }
 0x423   : > { %v8394_v5 = vmul.f32 %v17986_v4, %v17986_v4  ;;  %v7625_v54 = vmul.f32 %v17983_v8, %v17983_v8  ;;  %v11135_v15 = vmul.f32 %v10030_v11, %v8783_v45 }
 0x424   : > { %v10034_v26 = vmul.f32 0.5, %v10033_v57  ;;  %v4630_v47 = vpop.f32.mrf.mxu2 }
 0x425   : > { %v6314_v48 = vpop.f32.mrf.mxu3  ;;  %v8590_v44 = vsub.f32 %v8198_v35, %v8394_v5  ;;  %v4951_v16 = vadd.f32 %v4630_v47, %v3143_v2  ;;  %7933 = vadd.xlane.f32.xlu2 %v7625_v54  ;;  %v11335_v3 = vmul.f32 %v17688_v32, %v11135_v15  ;;  %7142 = vadd.xlane.f32.xlu1 %v17983_v8 }
 0x426   : > { %v1856_v0 = vpop.f32.mrf.mxu0  ;;  %v3145_v22 = vpop.f32.mrf.mxu1  ;;  %v10035_v27 = vsub.f32 1.5, %v10034_v26 }
 0x427   : > { %v18002_v17 = vadd.f32 1e-05, %v8590_v44  ;;  %v6635_v42 = vadd.f32 %v6314_v48, %v4951_v16  ;;  %12418 = vmatmul.msk.bf16.gmra.mxu0 %vm1267_vm0, %v14104_v50  ;;  %v14578_v33 = vpop.eup %14577  ;;  %v11535_v49 = vadd.f32 %v17697_v1, %v11335_v3  ;;  %v3146_v56 = vadd.f32 %v3145_v22, %v1856_v0 }
 0x428   : > { %12912 = vmatmul.msk.bf16.gmra.mxu1 %vm1267_vm0, %v14005_v46  ;;  %v10036_v24 = vmul.f32 %v14576_v39, %v10035_v27  ;;  %v7906_v38 = vpop.xlane.xlu0 %7905  ;;  %v10042_v13 = vmul.f32 %v14578_v33, %v17978_v37  ;;  %v7115_v6 = vpop.xlane.xlu2 %7114  ;;  %vm10048_vm5 = vweird.f32 %v14578_v33 }
 0x429   : > { %14579 = vrsqrt.f32 %v18002_v17  ;;  %13408 = vmatmul.msk.bf16.gmra.mxu2 %vm1267_vm0, %v14203_v20  ;;  %11731 = vst [vmem:[%s15334_s24 + $0x2f0] sm:$0xff] %v11535_v49  ;;  %v18016_v40 = vadd.f32 %v17872_v34, %v6635_v42  ;;  %v18019_v62 = vmul.f32 %v15231_v41, %v7115_v6  ;;  %v8199_v18 = vmul.f32 %v7906_v38, %v15231_v41  ;;  %vm10049_vm7 = vmor %vm10047_vm6, %vm10048_vm5  ;;  %v14105_v38 = vld [vmem:[%s14992_s13 + $0x210] sm:$0xff] }
 0x42a   : > { %13904 = vmatmul.msk.bf16.gmra.mxu3 %vm1267_vm0, %v14302_v52  ;;  %v10040_v28 = vsel %vm10039_vm4, %v14576_v39, %v10036_v24  ;;  %v10043_v7 = vmul.f32 %v14578_v33, %v10042_v13  ;;  %v8785_v52 = vsub.f32 %v17538_v61, %v17967_v31  ;;  %vm10057_vm9 = vweird.f32 %v18002_v17 }
 0x42b   : > { %v11136_v63 = vmul.f32 %v10040_v28, %v8784_v30  ;;  %v8395_v51 = vmul.f32 %v18019_v62, %v18019_v62  ;;  %v7626_v57 = vmul.f32 %v18016_v40, %v18016_v40  ;;  %v14006_v30 = vld [vmem:[%s14997_s19 + $0x210] sm:$0xff] }
 0x42c   : > { %v4633_v12 = vpop.f32.mrf.mxu2  ;;  %v10044_v2 = vmul.f32 0.5, %v10043_v7  ;;  %v14204_v7 = vld [vmem:[%s15004_s22 + $0x210] sm:$0xff] }
 0x42d   : > { %v6317_v45 = vpop.f32.mrf.mxu3  ;;  %v11336_v39 = vmul.f32 %v17688_v32, %v11136_v63  ;;  %v4952_v11 = vadd.f32 %v4633_v12, %v3146_v56  ;;  %7144 = vadd.xlane.f32.xlu2 %v18016_v40  ;;  %v8591_v54 = vsub.f32 %v8199_v18, %v8395_v51  ;;  %7935 = vadd.xlane.f32.xlu0 %v7626_v57  ;;  %v14303_v51 = vld [vmem:[%s15009_s25 + $0x210] sm:$0xff] }
 0x42e   : > { %v1858_v35 = vpop.f32.mrf.mxu0  ;;  %v3147_v5 = vpop.f32.mrf.mxu1  ;;  %v10045_v15 = vsub.f32 1.5, %v10044_v2 }
 0x42f   : > { %v14580_v50 = vpop.eup %14579  ;;  %v11536_v46 = vadd.f32 %v17697_v1, %v11336_v39  ;;  %v6636_v26 = vadd.f32 %v6317_v45, %v4952_v11  ;;  %v18030_v48 = vadd.f32 1e-05, %v8591_v54  ;;  %v3148_v27 = vadd.f32 %v3147_v5, %v1858_v35 }
 0x430   : > { %v10052_v47 = vmul.f32 %v14580_v50, %v18002_v17  ;;  %v7117_v44 = vpop.xlane.xlu0 %7116  ;;  %v10046_v16 = vmul.f32 %v14578_v33, %v10045_v15  ;;  %v7908_v20 = vpop.xlane.xlu1 %7907  ;;  %vm10058_vm8 = vweird.f32 %v14580_v50 }
 0x431   : > { %11732 = vst [vmem:[%s15334_s24 + $0x2f8] sm:$0xff] %v11536_v46  ;;  %v18035_v0 = vadd.f32 %v17872_v34, %v6636_v26  ;;  %v18038_v22 = vmul.f32 %v15231_v41, %v7117_v44  ;;  %14581 = vrsqrt.f32 %v18030_v48  ;;  %v8200_v49 = vmul.f32 %v7908_v20, %v15231_v41  ;;  %vm10059_vm10 = vmor %vm10057_vm9, %vm10058_vm8 }
 0x432   : > { %v10053_v3 = vmul.f32 %v14580_v50, %v10052_v47  ;;  %v10050_v42 = vsel %vm10049_vm7, %v14578_v33, %v10046_v16  ;;  %vm10067_vm12 = vweird.f32 %v18030_v48 }
 0x433   : > { %v8396_v37 = vmul.f32 %v18038_v22, %v18038_v22  ;;  %v7627_v24 = vmul.f32 %v18035_v0, %v18035_v0  ;;  %v11137_v13 = vmul.f32 %v10050_v42, %v8785_v52 }
 0x434   : > { %v10054_v61 = vmul.f32 0.5, %v10053_v3  ;;  %v4635_v31 = vpop.f32.mrf.mxu2 }
 0x435   : > { %v6319_v56 = vpop.f32.mrf.mxu3  ;;  %v8592_v6 = vsub.f32 %v8200_v49, %v8396_v37  ;;  %v4953_v28 = vadd.f32 %v4635_v31, %v3148_v27  ;;  %7937 = vadd.xlane.f32.xlu1 %v7627_v24  ;;  %v11337_v18 = vmul.f32 %v17688_v32, %v11137_v13  ;;  %7146 = vadd.xlane.f32.xlu0 %v18035_v0 }
 0x436   : > { %v1861_v63 = vpop.f32.mrf.mxu0  ;;  %v3150_v33 = vpop.f32.mrf.mxu1  ;;  %v10055_v12 = vsub.f32 1.5, %v10054_v61  ;;  %v8786_v32 = vsub.f32 %v17571_v9, %v17986_v4 }
 0x437   : > { %v18054_v45 = vadd.f32 1e-05, %v8592_v6  ;;  %v6637_v57 = vadd.f32 %v6319_v56, %v4953_v28  ;;  %12419 = vmatmul.msk.bf16.gmra.mxu0 %vm1267_vm0, %v14105_v38  ;;  %v14582_v39 = vpop.eup %14581  ;;  %v11537_v2 = vadd.f32 %v17697_v1, %v11337_v18  ;;  %v3151_v54 = vadd.f32 %v3150_v33, %v1861_v63  ;;  %v18090_v38 = vld [vmem:[%s20452_s7] ss:$0 sm:$0xff] }
 0x438   : > { %12913 = vmatmul.msk.bf16.gmra.mxu1 %vm1267_vm0, %v14006_v30  ;;  %v10056_v11 = vmul.f32 %v14580_v50, %v10055_v12  ;;  %v7910_v35 = vpop.xlane.xlu2 %7909  ;;  %v10062_v5 = vmul.f32 %v14582_v39, %v18030_v48  ;;  %v7119_v46 = vpop.xlane.xlu1 %7118  ;;  %vm10068_vm11 = vweird.f32 %v14582_v39 }
 0x439   : > { %14583 = vrsqrt.f32 %v18054_v45  ;;  %13409 = vmatmul.msk.bf16.gmra.mxu2 %vm1267_vm0, %v14204_v7  ;;  %11733 = vst [vmem:[%s15334_s24 + $0x300] sm:$0xff] %v11537_v2  ;;  %v18068_v15 = vadd.f32 %v17872_v34, %v6637_v57  ;;  %v18071_v17 = vmul.f32 %v15231_v41, %v7119_v46  ;;  %v8201_v26 = vmul.f32 %v7910_v35, %v15231_v41  ;;  %vm10069_vm13 = vmor %vm10067_vm12, %vm10068_vm11  ;;  %v14106_v35 = vld [vmem:[%s14992_s13 + $0x218] sm:$0xff] }
 0x43a   : > { %13905 = vmatmul.msk.bf16.gmra.mxu3 %vm1267_vm0, %v14303_v51  ;;  %v10060_v1 = vsel %vm10059_vm10, %v14580_v50, %v10056_v11  ;;  %v10063_v4 = vmul.f32 %v14582_v39, %v10062_v5  ;;  %v18081_v50 = vld [vmem:[%s20451_s6] ss:$0 sm:$0xff]  ;;  %v8787_v51 = vsub.f32 %v17590_v21, %v18019_v62  ;;  %vm10077_vm15 = vweird.f32 %v18054_v45 }
 0x43b   : > { %v11138_v9 = vmul.f32 %v10060_v1, %v8786_v32  ;;  %v8397_v47 = vmul.f32 %v18071_v17, %v18071_v17  ;;  %v7628_v20 = vmul.f32 %v18068_v15, %v18068_v15  ;;  %v14007_v32 = vld [vmem:[%s14997_s19 + $0x218] sm:$0xff] }
 0x43c   : > { %v4638_v44 = vpop.f32.mrf.mxu2  ;;  %v10064_v3 = vmul.f32 0.5, %v10063_v4  ;;  %v14205_v4 = vld [vmem:[%s15004_s22 + $0x218] sm:$0xff] }
 0x43d   : > { %v6322_v16 = vpop.f32.mrf.mxu3  ;;  %v11338_v52 = vmul.f32 %v18081_v50, %v11138_v9  ;;  %v4954_v27 = vadd.f32 %v4638_v44, %v3151_v54  ;;  %7148 = vadd.xlane.f32.xlu1 %v18068_v15  ;;  %v8593_v49 = vsub.f32 %v8201_v26, %v8397_v47  ;;  %7939 = vadd.xlane.f32.xlu2 %v7628_v20  ;;  %v14304_v26 = vld [vmem:[%s15009_s25 + $0x218] sm:$0xff] }
 0x43e   : > { %v1863_v42 = vpop.f32.mrf.mxu0  ;;  %v3152_v37 = vpop.f32.mrf.mxu1  ;;  %v10065_v13 = vsub.f32 1.5, %v10064_v3 }
 0x43f   : > { %v18085_v24 = vpop.eup %14583  ;;  %v11538_v30 = vadd.f32 %v18090_v38, %v11338_v52  ;;  %v6638_v61 = vadd.f32 %v6322_v16, %v4954_v27  ;;  %v18095_v56 = vadd.f32 1e-05, %v8593_v49  ;;  %v3153_v12 = vadd.f32 %v3152_v37, %v1863_v42 }
 0x440   : > { %v10072_v31 = vmul.f32 %v18085_v24, %v18054_v45  ;;  %v7121_v6 = vpop.xlane.xlu2 %7120  ;;  %v10066_v28 = vmul.f32 %v14582_v39, %v10065_v13  ;;  %v7912_v7 = vpop.xlane.xlu0 %7911  ;;  %vm10078_vm14 = vweird.f32 %v18085_v24  ;;  %v8788_v37 = vsub.f32 %v17623_v58, %v18038_v22 }
 0x441   : > { %11734 = vst [vmem:[%s15334_s24 + $0x308] sm:$0xff] %v11538_v30  ;;  %v18100_v63 = vadd.f32 %v17872_v34, %v6638_v61  ;;  %v18103_v33 = vmul.f32 %v15231_v41, %v7121_v6  ;;  %14585 = vrsqrt.f32 %v18095_v56  ;;  %v8202_v2 = vmul.f32 %v7912_v7, %v15231_v41  ;;  %vm10079_vm1 = vmor %vm10077_vm15, %vm10078_vm14 }
 0x442   : > { %v10073_v18 = vmul.f32 %v18085_v24, %v10072_v31  ;;  %v10070_v57 = vsel %vm10069_vm13, %v14582_v39, %v10066_v28  ;;  %vm10087_vm3 = vweird.f32 %v18095_v56 }
 0x443   : > { %v8398_v48 = vmul.f32 %v18103_v33, %v18103_v33  ;;  %v7629_v11 = vmul.f32 %v18100_v63, %v18100_v63  ;;  %v11139_v21 = vmul.f32 %v10070_v57, %v8787_v51 }
 0x444   : > { %v10074_v62 = vmul.f32 0.5, %v10073_v18  ;;  %v4640_v5 = vpop.f32.mrf.mxu2 }
 0x445   : > { %v6324_v54 = vpop.f32.mrf.mxu3  ;;  %v8594_v46 = vsub.f32 %v8202_v2, %v8398_v48  ;;  %v4955_v1 = vadd.f32 %v4640_v5, %v3153_v12  ;;  %7941 = vadd.xlane.f32.xlu0 %v7629_v11  ;;  %v11339_v47 = vmul.f32 %v18081_v50, %v11139_v21  ;;  %7150 = vadd.xlane.f32.xlu2 %v18100_v63 }
 0x446   : > { %v1866_v9 = vpop.f32.mrf.mxu0  ;;  %v3155_v39 = vpop.f32.mrf.mxu1  ;;  %v10075_v44 = vsub.f32 1.5, %v10074_v62 }
 0x447   : > { %v18121_v16 = vadd.f32 1e-05, %v8594_v46  ;;  %v6639_v20 = vadd.f32 %v6324_v54, %v4955_v1  ;;  %12420 = vmatmul.msk.bf16.gmra.mxu0 %vm1267_vm0, %v14106_v35  ;;  %v14586_v52 = vpop.eup %14585  ;;  %v11539_v3 = vadd.f32 %v18090_v38, %v11339_v47  ;;  %v3156_v30 = vadd.f32 %v3155_v39, %v1866_v9 }
 0x448   : > { %12914 = vmatmul.msk.bf16.gmra.mxu1 %vm1267_vm0, %v14007_v32  ;;  %v10076_v27 = vmul.f32 %v18085_v24, %v10075_v44  ;;  %v7914_v42 = vpop.xlane.xlu1 %7913  ;;  %v10082_v49 = vmul.f32 %v14586_v52, %v18095_v56  ;;  %v7123_v13 = vpop.xlane.xlu0 %7122  ;;  %vm10088_vm2 = vweird.f32 %v14586_v52 }
 0x449   : > { %14587 = vrsqrt.f32 %v18121_v16  ;;  %13410 = vmatmul.msk.bf16.gmra.mxu2 %vm1267_vm0, %v14205_v4  ;;  %11735 = vst [vmem:[%s15334_s24 + $0x310] sm:$0xff] %v11539_v3  ;;  %v18137_v45 = vadd.f32 %v17872_v34, %v6639_v20  ;;  %v18140_v31 = vmul.f32 %v15231_v41, %v7123_v13  ;;  %v8203_v28 = vmul.f32 %v7914_v42, %v15231_v41  ;;  %vm10089_vm4 = vmor %vm10087_vm3, %vm10088_vm2  ;;  %v14107_v42 = vld [vmem:[%s14992_s13 + $0x220] sm:$0xff] }
 0x44a   : > { %13906 = vmatmul.msk.bf16.gmra.mxu3 %vm1267_vm0, %v14304_v26  ;;  %v10080_v61 = vsel %vm10079_vm1, %v18085_v24, %v10076_v27  ;;  %v10083_v22 = vmul.f32 %v14586_v52, %v10082_v49  ;;  %v8789_v26 = vsub.f32 %v17642_v59, %v18071_v17  ;;  %vm10097_vm6 = vweird.f32 %v18121_v16 }
 0x44b   : > { %v11140_v58 = vmul.f32 %v10080_v61, %v8788_v37  ;;  %v8399_v6 = vmul.f32 %v18140_v31, %v18140_v31  ;;  %v7630_v18 = vmul.f32 %v18137_v45, %v18137_v45  ;;  %v14008_v37 = vld [vmem:[%s14997_s19 + $0x220] sm:$0xff] }
 0x44c   : > { %v4643_v7 = vpop.f32.mrf.mxu2  ;;  %v10084_v12 = vmul.f32 0.5, %v10083_v22  ;;  %v14206_v22 = vld [vmem:[%s15004_s22 + $0x220] sm:$0xff] }
 0x44d   : > { %v6327_v51 = vpop.f32.mrf.mxu3  ;;  %v11340_v24 = vmul.f32 %v18081_v50, %v11140_v58  ;;  %v4956_v57 = vadd.f32 %v4643_v7, %v3156_v30  ;;  %7152 = vadd.xlane.f32.xlu0 %v18137_v45  ;;  %v8595_v11 = vsub.f32 %v8203_v28, %v8399_v6  ;;  %7943 = vadd.xlane.f32.xlu1 %v7630_v18  ;;  %v14305_v6 = vld [vmem:[%s15009_s25 + $0x220] sm:$0xff] }
 0x44e   : > { %v1868_v48 = vpop.f32.mrf.mxu0  ;;  %v3157_v2 = vpop.f32.mrf.mxu1  ;;  %v10085_v21 = vsub.f32 1.5, %v10084_v12 }
 0x44f   : > { %v14588_v35 = vpop.eup %14587  ;;  %v11540_v32 = vadd.f32 %v18090_v38, %v11340_v24  ;;  %v6640_v62 = vadd.f32 %v6327_v51, %v4956_v57  ;;  %v18151_v54 = vadd.f32 1e-05, %v8595_v11  ;;  %v3158_v44 = vadd.f32 %v3157_v2, %v1868_v48 }
 0x450   : > { %v10092_v5 = vmul.f32 %v14588_v35, %v18121_v16  ;;  %v7125_v46 = vpop.xlane.xlu1 %7124  ;;  %v10086_v1 = vmul.f32 %v14586_v52, %v10085_v21  ;;  %v7916_v39 = vpop.xlane.xlu2 %7915  ;;  %vm10098_vm5 = vweird.f32 %v14588_v35  ;;  %v8790_v2 = vsub.f32 %v17675_v14, %v18103_v33 }
 0x451   : > { %11736 = vst [vmem:[%s15334_s24 + $0x318] sm:$0xff] %v11540_v32  ;;  %v18156_v9 = vadd.f32 %v17872_v34, %v6640_v62  ;;  %v18159_v4 = vmul.f32 %v15231_v41, %v7125_v46  ;;  %14589 = vrsqrt.f32 %v18151_v54  ;;  %v8204_v56 = vmul.f32 %v7916_v39, %v15231_v41  ;;  %vm10099_vm7 = vmor %vm10097_vm6, %vm10098_vm5 }
 0x452   : > { %v10093_v47 = vmul.f32 %v14588_v35, %v10092_v5  ;;  %v10090_v20 = vsel %vm10089_vm4, %v14586_v52, %v10086_v1  ;;  %vm10107_vm9 = vweird.f32 %v18151_v54 }
 0x453   : > { %v8400_v3 = vmul.f32 %v18159_v4, %v18159_v4  ;;  %v7631_v27 = vmul.f32 %v18156_v9, %v18156_v9  ;;  %v11141_v49 = vmul.f32 %v10090_v20, %v8789_v26 }
 0x454   : > { %v10094_v59 = vmul.f32 0.5, %v10093_v47  ;;  %v4645_v17 = vpop.f32.mrf.mxu2 }
 0x455   : > { %v6329_v30 = vpop.f32.mrf.mxu3  ;;  %v8596_v13 = vsub.f32 %v8204_v56, %v8400_v3  ;;  %v4957_v61 = vadd.f32 %v4645_v17, %v3158_v44  ;;  %7945 = vadd.xlane.f32.xlu2 %v7631_v27  ;;  %v11341_v28 = vmul.f32 %v18081_v50, %v11141_v49  ;;  %7154 = vadd.xlane.f32.xlu1 %v18156_v9 }
 0x456   : > { %v1871_v58 = vpop.f32.mrf.mxu0  ;;  %v3160_v52 = vpop.f32.mrf.mxu1  ;;  %v10095_v7 = vsub.f32 1.5, %v10094_v59 }
 0x457   : > { %v18175_v51 = vadd.f32 1e-05, %v8596_v13  ;;  %v6641_v18 = vadd.f32 %v6329_v30, %v4957_v61  ;;  %12421 = vmatmul.msk.bf16.gmra.mxu0 %vm1267_vm0, %v14107_v42  ;;  %v14590_v24 = vpop.eup %14589  ;;  %v11541_v12 = vadd.f32 %v18090_v38, %v11341_v28  ;;  %v3161_v32 = vadd.f32 %v3160_v52, %v1871_v58 }
 0x458   : > { %12915 = vmatmul.msk.bf16.gmra.mxu1 %vm1267_vm0, %v14008_v37  ;;  %v10096_v57 = vmul.f32 %v14588_v35, %v10095_v7  ;;  %v7918_v48 = vpop.xlane.xlu0 %7917  ;;  %v10102_v11 = vmul.f32 %v14590_v24, %v18151_v54  ;;  %v7127_v21 = vpop.xlane.xlu2 %7126  ;;  %vm10108_vm8 = vweird.f32 %v14590_v24 }
 0x459   : > { %14591 = vrsqrt.f32 %v18175_v51  ;;  %13411 = vmatmul.msk.bf16.gmra.mxu2 %vm1267_vm0, %v14206_v22  ;;  %11737 = vst [vmem:[%s15334_s24 + $0x320] sm:$0xff] %v11541_v12  ;;  %v18189_v5 = vadd.f32 %v17872_v34, %v6641_v18  ;;  %v18192_v16 = vmul.f32 %v15231_v41, %v7127_v21  ;;  %v8205_v1 = vmul.f32 %v7918_v48, %v15231_v41  ;;  %vm10109_vm10 = vmor %vm10107_vm9, %vm10108_vm8  ;;  %v14108_v48 = vld [vmem:[%s14992_s13 + $0x228] sm:$0xff] }
 0x45a   : > { %13907 = vmatmul.msk.bf16.gmra.mxu3 %vm1267_vm0, %v14305_v6  ;;  %v10100_v62 = vsel %vm10099_vm7, %v14588_v35, %v10096_v57  ;;  %v10103_v33 = vmul.f32 %v14590_v24, %v10102_v11  ;;  %v8791_v6 = vsub.f32 %v17707_v23, %v18140_v31  ;;  %vm10117_vm12 = vweird.f32 %v18175_v51 }
 0x45b   : > { %v11142_v14 = vmul.f32 %v10100_v62, %v8790_v2  ;;  %v8401_v46 = vmul.f32 %v18192_v16, %v18192_v16  ;;  %v7632_v47 = vmul.f32 %v18189_v5, %v18189_v5  ;;  %v14009_v2 = vld [vmem:[%s14997_s19 + $0x228] sm:$0xff] }
 0x45c   : > { %v4648_v39 = vpop.f32.mrf.mxu2  ;;  %v10104_v44 = vmul.f32 0.5, %v10103_v33  ;;  %v14207_v33 = vld [vmem:[%s15004_s22 + $0x228] sm:$0xff] }
 0x45d   : > { %v6332_v26 = vpop.f32.mrf.mxu3  ;;  %v11342_v35 = vmul.f32 %v18081_v50, %v11142_v14  ;;  %v4958_v20 = vadd.f32 %v4648_v39, %v3161_v32  ;;  %7156 = vadd.xlane.f32.xlu2 %v18189_v5  ;;  %v8597_v27 = vsub.f32 %v8205_v1, %v8401_v46  ;;  %7947 = vadd.xlane.f32.xlu0 %v7632_v47  ;;  %v14306_v46 = vld [vmem:[%s15009_s25 + $0x228] sm:$0xff] }
 0x45e   : > { %v1873_v56 = vpop.f32.mrf.mxu0  ;;  %v3162_v3 = vpop.f32.mrf.mxu1  ;;  %v10105_v49 = vsub.f32 1.5, %v10104_v44 }
 0x45f   : > { %v14592_v42 = vpop.eup %14591  ;;  %v11542_v37 = vadd.f32 %v18090_v38, %v11342_v35  ;;  %v6642_v59 = vadd.f32 %v6332_v26, %v4958_v20  ;;  %v18203_v30 = vadd.f32 1e-05, %v8597_v27  ;;  %v3163_v7 = vadd.f32 %v3162_v3, %v1873_v56 }
 0x460   : > { %v10112_v17 = vmul.f32 %v14592_v42, %v18175_v51  ;;  %v7129_v13 = vpop.xlane.xlu0 %7128  ;;  %v10106_v61 = vmul.f32 %v14590_v24, %v10105_v49  ;;  %v7920_v22 = vpop.xlane.xlu1 %7919  ;;  %vm10118_vm11 = vweird.f32 %v14592_v42  ;;  %v8792_v3 = vsub.f32 %v17744_v43, %v18159_v4 }
 0x461   : > { %11738 = vst [vmem:[%s15334_s24 + $0x328] sm:$0xff] %v11542_v37  ;;  %v18208_v58 = vadd.f32 %v17872_v34, %v6642_v59  ;;  %v18211_v52 = vmul.f32 %v15231_v41, %v7129_v13  ;;  %14593 = vrsqrt.f32 %v18203_v30  ;;  %v8206_v12 = vmul.f32 %v7920_v22, %v15231_v41  ;;  %vm10119_vm13 = vmor %vm10117_vm12, %vm10118_vm11 }
 0x462   : > { %v10113_v28 = vmul.f32 %v14592_v42, %v10112_v17  ;;  %v10110_v18 = vsel %vm10109_vm10, %v14590_v24, %v10106_v61  ;;  %vm10127_vm15 = vweird.f32 %v18203_v30 }
 0x463   : > { %v8402_v54 = vmul.f32 %v18211_v52, %v18211_v52  ;;  %v7633_v57 = vmul.f32 %v18208_v58, %v18208_v58  ;;  %v11143_v11 = vmul.f32 %v10110_v18, %v8791_v6 }
 0x464   : > { %v10114_v23 = vmul.f32 0.5, %v10113_v28  ;;  %v4650_v31 = vpop.f32.mrf.mxu2 }
 0x465   : > { %v6334_v32 = vpop.f32.mrf.mxu3  ;;  %v8598_v21 = vsub.f32 %v8206_v12, %v8402_v54  ;;  %v4959_v62 = vadd.f32 %v4650_v31, %v3163_v7  ;;  %7949 = vadd.xlane.f32.xlu1 %v7633_v57  ;;  %v11343_v1 = vmul.f32 %v18081_v50, %v11143_v11  ;;  %7158 = vadd.xlane.f32.xlu0 %v18208_v58 }
 0x466   : > { %v1876_v14 = vpop.f32.mrf.mxu0  ;;  %v3165_v24 = vpop.f32.mrf.mxu1  ;;  %v10115_v39 = vsub.f32 1.5, %v10114_v23 }
 0x467   : > { %v18227_v26 = vadd.f32 1e-05, %v8598_v21  ;;  %v6643_v47 = vadd.f32 %v6334_v32, %v4959_v62  ;;  %12422 = vmatmul.msk.bf16.gmra.mxu0 %vm1267_vm0, %v14108_v48  ;;  %v14594_v35 = vpop.eup %14593  ;;  %v11543_v44 = vadd.f32 %v18090_v38, %v11343_v1  ;;  %v3166_v37 = vadd.f32 %v3165_v24, %v1876_v14  ;;  %v18265_v62 = vld [vmem:[%s20450_s5] ss:$0 sm:$0xff] }
 0x468   : > { %12916 = vmatmul.msk.bf16.gmra.mxu1 %vm1267_vm0, %v14009_v2  ;;  %v10116_v20 = vmul.f32 %v14592_v42, %v10115_v39  ;;  %v7922_v56 = vpop.xlane.xlu2 %7921  ;;  %v10122_v27 = vmul.f32 %v14594_v35, %v18203_v30  ;;  %v7131_v49 = vpop.xlane.xlu1 %7130  ;;  %vm10128_vm14 = vweird.f32 %v14594_v35 }
 0x469   : > { %14595 = vrsqrt.f32 %v18227_v26  ;;  %13412 = vmatmul.msk.bf16.gmra.mxu2 %vm1267_vm0, %v14207_v33  ;;  %11739 = vst [vmem:[%s15334_s24 + $0x330] sm:$0xff] %v11543_v44  ;;  %v18241_v17 = vadd.f32 %v17872_v34, %v6643_v47  ;;  %v18244_v51 = vmul.f32 %v15231_v41, %v7131_v49  ;;  %v8207_v13 = vmul.f32 %v7922_v56, %v15231_v41  ;;  %vm10129_vm1 = vmor %vm10127_vm15, %vm10128_vm14  ;;  %v14109_v56 = vld [vmem:[%s14992_s13 + $0x230] sm:$0xff] }
 0x46a   : > { %13908 = vmatmul.msk.bf16.gmra.mxu3 %vm1267_vm0, %v14306_v46  ;;  %v10120_v59 = vsel %vm10119_vm13, %v14592_v42, %v10116_v20  ;;  %v10123_v4 = vmul.f32 %v14594_v35, %v10122_v27  ;;  %v8793_v46 = vsub.f32 %v17763_v36, %v18192_v16  ;;  %vm10137_vm3 = vweird.f32 %v18227_v26 }
 0x46b   : > { %v11144_v43 = vmul.f32 %v10120_v59, %v8792_v3  ;;  %v8403_v61 = vmul.f32 %v18244_v51, %v18244_v51  ;;  %v7634_v28 = vmul.f32 %v18241_v17, %v18241_v17  ;;  %v14010_v3 = vld [vmem:[%s14997_s19 + $0x230] sm:$0xff] }
 0x46c   : > { %v4653_v22 = vpop.f32.mrf.mxu2  ;;  %v10124_v34 = vmul.f32 0.5, %v10123_v4  ;;  %v14208_v4 = vld [vmem:[%s15004_s22 + $0x230] sm:$0xff] }
 0x46d   : > { %v6337_v6 = vpop.f32.mrf.mxu3  ;;  %v11344_v42 = vmul.f32 %v18081_v50, %v11144_v43  ;;  %v4960_v7 = vadd.f32 %v4653_v22, %v3166_v37  ;;  %7160 = vadd.xlane.f32.xlu1 %v18241_v17  ;;  %v8599_v12 = vsub.f32 %v8207_v13, %v8403_v61  ;;  %7951 = vadd.xlane.f32.xlu2 %v7634_v28  ;;  %v14307_v13 = vld [vmem:[%s15009_s25 + $0x230] sm:$0xff] }
 0x46e   : > { %v1878_v18 = vpop.f32.mrf.mxu0  ;;  %v3167_v54 = vpop.f32.mrf.mxu1  ;;  %v10125_v2 = vsub.f32 1.5, %v10124_v34 }
 0x46f   : > { %v18253_v57 = vpop.eup %14595  ;;  %v11544_v48 = vadd.f32 %v18090_v38, %v11344_v42  ;;  %v6644_v11 = vadd.f32 %v6337_v6, %v4960_v7  ;;  %v18258_v31 = vadd.f32 1e-05, %v8599_v12  ;;  %v3168_v30 = vadd.f32 %v3167_v54, %v1878_v18 }
 0x470   : > { %v10132_v23 = vmul.f32 %v18253_v57, %v18227_v26  ;;  %v7133_v32 = vpop.xlane.xlu2 %7132  ;;  %v10126_v21 = vmul.f32 %v14594_v35, %v10125_v2  ;;  %v7924_v33 = vpop.xlane.xlu0 %7923  ;;  %vm10138_vm2 = vweird.f32 %v18253_v57  ;;  %v8794_v54 = vsub.f32 %v17796_v60, %v18211_v52 }
 0x471   : > { %11740 = vst [vmem:[%s15334_s24 + $0x338] sm:$0xff] %v11544_v48  ;;  %v18268_v14 = vadd.f32 %v18265_v62, %v6644_v11  ;;  %v18271_v24 = vmul.f32 %v15231_v41, %v7133_v32  ;;  %14597 = vrsqrt.f32 %v18258_v31  ;;  %v8208_v44 = vmul.f32 %v7924_v33, %v15231_v41  ;;  %vm10139_vm4 = vmor %vm10137_vm3, %vm10138_vm2 }
 0x472   : > { %v10133_v1 = vmul.f32 %v18253_v57, %v10132_v23  ;;  %v10130_v39 = vsel %vm10129_vm1, %v14594_v35, %v10126_v21  ;;  %vm10147_vm6 = vweird.f32 %v18258_v31 }
 0x473   : > { %v8404_v47 = vmul.f32 %v18271_v24, %v18271_v24  ;;  %v7635_v20 = vmul.f32 %v18268_v14, %v18268_v14  ;;  %v11145_v36 = vmul.f32 %v10130_v39, %v8793_v46 }
 0x474   : > { %v10134_v16 = vmul.f32 0.5, %v10133_v1  ;;  %v4655_v27 = vpop.f32.mrf.mxu2 }
 0x475   : > { %v6339_v37 = vpop.f32.mrf.mxu3  ;;  %v8600_v49 = vsub.f32 %v8208_v44, %v8404_v47  ;;  %v4961_v59 = vadd.f32 %v4655_v27, %v3168_v30  ;;  %7953 = vadd.xlane.f32.xlu0 %v7635_v20  ;;  %v11345_v61 = vmul.f32 %v18081_v50, %v11145_v36  ;;  %7162 = vadd.xlane.f32.xlu2 %v18268_v14 }
 0x476   : > { %v1881_v43 = vpop.f32.mrf.mxu0  ;;  %v3170_v35 = vpop.f32.mrf.mxu1  ;;  %v10135_v22 = vsub.f32 1.5, %v10134_v16 }
 0x477   : > { %v18289_v6 = vadd.f32 1e-05, %v8600_v49  ;;  %v6645_v28 = vadd.f32 %v6339_v37, %v4961_v59  ;;  %12423 = vmatmul.msk.bf16.gmra.mxu0 %vm1267_vm0, %v14109_v56  ;;  %v14598_v42 = vpop.eup %14597  ;;  %v11545_v34 = vadd.f32 %v18090_v38, %v11345_v61  ;;  %v3171_v48 = vadd.f32 %v3170_v35, %v1881_v43 }
 0x478   : > { %12917 = vmatmul.msk.bf16.gmra.mxu1 %vm1267_vm0, %v14010_v3  ;;  %v10136_v7 = vmul.f32 %v18253_v57, %v10135_v22  ;;  %v7926_v18 = vpop.xlane.xlu1 %7925  ;;  %v10142_v12 = vmul.f32 %v14598_v42, %v18258_v31  ;;  %v7135_v2 = vpop.xlane.xlu0 %7134  ;;  %vm10148_vm5 = vweird.f32 %v14598_v42 }
 0x479   : > { %14599 = vrsqrt.f32 %v18289_v6  ;;  %13413 = vmatmul.msk.bf16.gmra.mxu2 %vm1267_vm0, %v14208_v4  ;;  %11741 = vst [vmem:[%s15334_s24 + $0x340] sm:$0xff] %v11545_v34  ;;  %v18305_v26 = vadd.f32 %v18265_v62, %v6645_v28  ;;  %v18308_v23 = vmul.f32 %v15231_v41, %v7135_v2  ;;  %v8209_v21 = vmul.f32 %v7926_v18, %v15231_v41  ;;  %vm10149_vm7 = vmor %vm10147_vm6, %vm10148_vm5  ;;  %v14110_v18 = vld [vmem:[%s14992_s13 + $0x238] sm:$0xff] }
 0x47a   : > { %13909 = vmatmul.msk.bf16.gmra.mxu3 %vm1267_vm0, %v14307_v13  ;;  %v10140_v11 = vsel %vm10139_vm4, %v18253_v57, %v10136_v7  ;;  %v10143_v52 = vmul.f32 %v14598_v42, %v10142_v12  ;;  %v8795_v13 = vsub.f32 %v17815_v53, %v18244_v51  ;;  %vm10157_vm9 = vweird.f32 %v18289_v6 }
 0x47b   : > { %v11146_v60 = vmul.f32 %v10140_v11, %v8794_v54  ;;  %v8405_v32 = vmul.f32 %v18308_v23, %v18308_v23  ;;  %v7636_v1 = vmul.f32 %v18305_v26, %v18305_v26  ;;  %v14011_v54 = vld [vmem:[%s14997_s19 + $0x238] sm:$0xff] }
 0x47c   : > { %v4658_v33 = vpop.f32.mrf.mxu2  ;;  %v10144_v30 = vmul.f32 0.5, %v10143_v52  ;;  %v14209_v52 = vld [vmem:[%s15004_s22 + $0x238] sm:$0xff] }
 0x47d   : > { %v6342_v46 = vpop.f32.mrf.mxu3  ;;  %v11346_v57 = vmul.f32 %v18081_v50, %v11146_v60  ;;  %v4962_v39 = vadd.f32 %v4658_v33, %v3171_v48  ;;  %7164 = vadd.xlane.f32.xlu0 %v18305_v26  ;;  %v8601_v20 = vsub.f32 %v8209_v21, %v8405_v32  ;;  %7955 = vadd.xlane.f32.xlu1 %v7636_v1  ;;  %v14308_v32 = vld [vmem:[%s15009_s25 + $0x238] sm:$0xff] }
 0x47e   : > { %v1883_v47 = vpop.f32.mrf.mxu0  ;;  %v3172_v44 = vpop.f32.mrf.mxu1  ;;  %v10145_v36 = vsub.f32 1.5, %v10144_v30 }
 0x47f   : > { %v14600_v56 = vpop.eup %14599  ;;  %v11546_v3 = vadd.f32 %v18090_v38, %v11346_v57  ;;  %v6646_v16 = vadd.f32 %v6342_v46, %v4962_v39  ;;  %v18319_v37 = vadd.f32 1e-05, %v8601_v20  ;;  %v3173_v22 = vadd.f32 %v3172_v44, %v1883_v47 }
 0x480   : > { %v10152_v27 = vmul.f32 %v14600_v56, %v18289_v6  ;;  %v7137_v49 = vpop.xlane.xlu1 %7136  ;;  %v10146_v59 = vmul.f32 %v14598_v42, %v10145_v36  ;;  %v7928_v35 = vpop.xlane.xlu2 %7927  ;;  %vm10158_vm8 = vweird.f32 %v14600_v56  ;;  %v8796_v44 = vsub.f32 %v17848_v10, %v18271_v24 }
 0x481   : > { %11742 = vst [vmem:[%s15334_s24 + $0x348] sm:$0xff] %v11546_v3  ;;  %v18324_v43 = vadd.f32 %v18265_v62, %v6646_v16  ;;  %v18327_v4 = vmul.f32 %v15231_v41, %v7137_v49  ;;  %14601 = vrsqrt.f32 %v18319_v37  ;;  %v8210_v31 = vmul.f32 %v7928_v35, %v15231_v41  ;;  %vm10159_vm10 = vmor %vm10157_vm9, %vm10158_vm8 }
 0x482   : > { %v10153_v61 = vmul.f32 %v14600_v56, %v10152_v27  ;;  %v10150_v28 = vsel %vm10149_vm7, %v14598_v42, %v10146_v59  ;;  %vm10167_vm12 = vweird.f32 %v18319_v37 }
 0x483   : > { %v8406_v34 = vmul.f32 %v18327_v4, %v18327_v4  ;;  %v7637_v7 = vmul.f32 %v18324_v43, %v18324_v43  ;;  %v11147_v12 = vmul.f32 %v10150_v28, %v8795_v13 }
 0x484   : > { %v10154_v53 = vmul.f32 0.5, %v10153_v61  ;;  %v4660_v51 = vpop.f32.mrf.mxu2 }
 0x485   : > { %v6344_v48 = vpop.f32.mrf.mxu3  ;;  %v8602_v2 = vsub.f32 %v8210_v31, %v8406_v34  ;;  %v4963_v11 = vadd.f32 %v4660_v51, %v3173_v22  ;;  %7957 = vadd.xlane.f32.xlu2 %v7637_v7  ;;  %v11347_v21 = vmul.f32 %v18081_v50, %v11147_v12  ;;  %7166 = vadd.xlane.f32.xlu1 %v18324_v43 }
 0x486   : > { %v1886_v60 = vpop.f32.mrf.mxu0  ;;  %v3175_v42 = vpop.f32.mrf.mxu1  ;;  %v10155_v33 = vsub.f32 1.5, %v10154_v53 }
 0x487   : > { %v18343_v46 = vadd.f32 1e-05, %v8602_v2  ;;  %v6647_v1 = vadd.f32 %v6344_v48, %v4963_v11  ;;  %12424 = vmatmul.msk.bf16.gmra.mxu0 %vm1267_vm0, %v14110_v18  ;;  %v14602_v57 = vpop.eup %14601  ;;  %v11547_v30 = vadd.f32 %v18090_v38, %v11347_v21  ;;  %v3176_v3 = vadd.f32 %v3175_v42, %v1886_v60 }
 0x488   : > { %12918 = vmatmul.msk.bf16.gmra.mxu1 %vm1267_vm0, %v14011_v54  ;;  %v10156_v39 = vmul.f32 %v14600_v56, %v10155_v33  ;;  %v7930_v47 = vpop.xlane.xlu0 %7929  ;;  %v10162_v20 = vmul.f32 %v14602_v57, %v18319_v37  ;;  %v7139_v36 = vpop.xlane.xlu2 %7138  ;;  %vm10168_vm11 = vweird.f32 %v14602_v57 }
 0x489   : > { %14603 = vrsqrt.f32 %v18343_v46  ;;  %13414 = vmatmul.msk.bf16.gmra.mxu2 %vm1267_vm0, %v14209_v52  ;;  %11743 = vst [vmem:[%s15334_s24 + $0x350] sm:$0xff] %v11547_v30  ;;  %v18357_v27 = vadd.f32 %v18265_v62, %v6647_v1  ;;  %v18360_v6 = vmul.f32 %v15231_v41, %v7139_v36  ;;  %v8211_v59 = vmul.f32 %v7930_v47, %v15231_v41  ;;  %vm10169_vm13 = vmor %vm10167_vm12, %vm10168_vm11  ;;  %v14111_v47 = vld [vmem:[%s14992_s13 + $0x240] sm:$0xff] }
 0x48a   : > { %13910 = vmatmul.msk.bf16.gmra.mxu3 %vm1267_vm0, %v14308_v32  ;;  %v10160_v16 = vsel %vm10159_vm10, %v14600_v56, %v10156_v39  ;;  %v10163_v24 = vmul.f32 %v14602_v57, %v10162_v20  ;;  %v8797_v32 = vsub.f32 %v17875_v25, %v18308_v23  ;;  %vm10177_vm15 = vweird.f32 %v18343_v46 }
 0x48b   : > { %v11148_v10 = vmul.f32 %v10160_v16, %v8796_v44  ;;  %v8407_v49 = vmul.f32 %v18360_v6, %v18360_v6  ;;  %v7638_v61 = vmul.f32 %v18357_v27, %v18357_v27  ;;  %v14012_v44 = vld [vmem:[%s14997_s19 + $0x240] sm:$0xff] }
 0x48c   : > { %v4663_v35 = vpop.f32.mrf.mxu2  ;;  %v10164_v22 = vmul.f32 0.5, %v10163_v24  ;;  %v14210_v24 = vld [vmem:[%s15004_s22 + $0x240] sm:$0xff] }
 0x48d   : > { %v6347_v13 = vpop.f32.mrf.mxu3  ;;  %v11348_v56 = vmul.f32 %v18081_v50, %v11148_v10  ;;  %v4964_v28 = vadd.f32 %v4663_v35, %v3176_v3  ;;  %7168 = vadd.xlane.f32.xlu2 %v18357_v27  ;;  %v8603_v7 = vsub.f32 %v8211_v59, %v8407_v49  ;;  %7959 = vadd.xlane.f32.xlu0 %v7638_v61  ;;  %v14309_v49 = vld [vmem:[%s15009_s25 + $0x240] sm:$0xff] }
 0x48e   : > { %v1888_v31 = vpop.f32.mrf.mxu0  ;;  %v3177_v34 = vpop.f32.mrf.mxu1  ;;  %v10165_v12 = vsub.f32 1.5, %v10164_v22 }
 0x48f   : > { %v14604_v18 = vpop.eup %14603  ;;  %v11548_v54 = vadd.f32 %v18090_v38, %v11348_v56  ;;  %v6648_v53 = vadd.f32 %v6347_v13, %v4964_v28  ;;  %v18371_v48 = vadd.f32 1e-05, %v8603_v7  ;;  %v3178_v33 = vadd.f32 %v3177_v34, %v1888_v31 }
 0x490   : > { %v10172_v51 = vmul.f32 %v14604_v18, %v18343_v46  ;;  %v7141_v2 = vpop.xlane.xlu0 %7140  ;;  %v10166_v11 = vmul.f32 %v14602_v57, %v10165_v12  ;;  %v7932_v52 = vpop.xlane.xlu1 %7931  ;;  %vm10178_vm14 = vweird.f32 %v14604_v18  ;;  %v8798_v34 = vsub.f32 %v17912_v55, %v18327_v4 }
 0x491   : > { %11744 = vst [vmem:[%s15334_s24 + $0x358] sm:$0xff] %v11548_v54  ;;  %v18376_v60 = vadd.f32 %v18265_v62, %v6648_v53  ;;  %v18379_v42 = vmul.f32 %v15231_v41, %v7141_v2  ;;  %14605 = vrsqrt.f32 %v18371_v48  ;;  %v8212_v30 = vmul.f32 %v7932_v52, %v15231_v41  ;;  %vm10179_vm1 = vmor %vm10177_vm15, %vm10178_vm14 }
 0x492   : > { %v10173_v21 = vmul.f32 %v14604_v18, %v10172_v51  ;;  %v10170_v1 = vsel %vm10169_vm13, %v14602_v57, %v10166_v11  ;;  %vm10187_vm3 = vweird.f32 %v18371_v48 }
 0x493   : > { %v8408_v37 = vmul.f32 %v18379_v42, %v18379_v42  ;;  %v7639_v39 = vmul.f32 %v18376_v60, %v18376_v60  ;;  %v11149_v20 = vmul.f32 %v10170_v1, %v8797_v32 }
 0x494   : > { %v10174_v25 = vmul.f32 0.5, %v10173_v21  ;;  %v4665_v23 = vpop.f32.mrf.mxu2 }
 0x495   : > { %v6349_v3 = vpop.f32.mrf.mxu3  ;;  %v8604_v36 = vsub.f32 %v8212_v30, %v8408_v37  ;;  %v4965_v16 = vadd.f32 %v4665_v23, %v3178_v33  ;;  %7961 = vadd.xlane.f32.xlu1 %v7639_v39  ;;  %v11349_v59 = vmul.f32 %v18081_v50, %v11149_v20  ;;  %7170 = vadd.xlane.f32.xlu0 %v18376_v60 }
 0x496   : > { %v1891_v10 = vpop.f32.mrf.mxu0  ;;  %v3180_v57 = vpop.f32.mrf.mxu1  ;;  %v10175_v35 = vsub.f32 1.5, %v10174_v25 }
 0x497   : > { %v18395_v13 = vadd.f32 1e-05, %v8604_v36  ;;  %v6649_v61 = vadd.f32 %v6349_v3, %v4965_v16  ;;  %12425 = vmatmul.msk.bf16.gmra.mxu0 %vm1267_vm0, %v14111_v47  ;;  %v14606_v56 = vpop.eup %14605  ;;  %v11549_v22 = vadd.f32 %v18090_v38, %v11349_v59  ;;  %v3181_v54 = vadd.f32 %v3180_v57, %v1891_v10 }
 0x498   : > { %12919 = vmatmul.msk.bf16.gmra.mxu1 %vm1267_vm0, %v14012_v44  ;;  %v10176_v28 = vmul.f32 %v14604_v18, %v10175_v35  ;;  %v7934_v31 = vpop.xlane.xlu2 %7933  ;;  %v10182_v7 = vmul.f32 %v14606_v56, %v18371_v48  ;;  %v7143_v12 = vpop.xlane.xlu1 %7142  ;;  %vm10188_vm2 = vweird.f32 %v14606_v56 }
 0x499   : > { %14607 = vrsqrt.f32 %v18395_v13  ;;  %13415 = vmatmul.msk.bf16.gmra.mxu2 %vm1267_vm0, %v14210_v24  ;;  %11745 = vst [vmem:[%s15334_s24 + $0x360] sm:$0xff] %v11549_v22  ;;  %v18409_v51 = vadd.f32 %v18265_v62, %v6649_v61  ;;  %v18412_v46 = vmul.f32 %v15231_v41, %v7143_v12  ;;  %v8213_v2 = vmul.f32 %v7934_v31, %v15231_v41  ;;  %vm10189_vm4 = vmor %vm10187_vm3, %vm10188_vm2  ;;  %v14112_v31 = vld [vmem:[%s14992_s13 + $0x248] sm:$0xff] }
 0x49a   : > { %13911 = vmatmul.msk.bf16.gmra.mxu3 %vm1267_vm0, %v14309_v49  ;;  %v10180_v53 = vsel %vm10179_vm1, %v14604_v18, %v10176_v28  ;;  %v10183_v4 = vmul.f32 %v14606_v56, %v10182_v7  ;;  %v8799_v49 = vsub.f32 %v17931_v29, %v18360_v6  ;;  %vm10197_vm6 = vweird.f32 %v18395_v13 }
 0x49b   : > { %v11150_v55 = vmul.f32 %v10180_v53, %v8798_v34  ;;  %v8409_v11 = vmul.f32 %v18412_v46, %v18412_v46  ;;  %v7640_v21 = vmul.f32 %v18409_v51, %v18409_v51  ;;  %v14013_v34 = vld [vmem:[%s14997_s19 + $0x248] sm:$0xff] }
 0x49c   : > { %v4668_v52 = vpop.f32.mrf.mxu2  ;;  %v10184_v33 = vmul.f32 0.5, %v10183_v4  ;;  %v14211_v4 = vld [vmem:[%s15004_s22 + $0x248] sm:$0xff] }
 0x49d   : > { %v6352_v32 = vpop.f32.mrf.mxu3  ;;  %v11350_v18 = vmul.f32 %v18081_v50, %v11150_v55  ;;  %v4966_v1 = vadd.f32 %v4668_v52, %v3181_v54  ;;  %7172 = vadd.xlane.f32.xlu1 %v18409_v51  ;;  %v8605_v39 = vsub.f32 %v8213_v2, %v8409_v11  ;;  %7963 = vadd.xlane.f32.xlu2 %v7640_v21  ;;  %v14310_v2 = vld [vmem:[%s15009_s25 + $0x248] sm:$0xff] }
 0x49e   : > { %v1893_v37 = vpop.f32.mrf.mxu0  ;;  %v3182_v30 = vpop.f32.mrf.mxu1  ;;  %v10185_v20 = vsub.f32 1.5, %v10184_v33 }
 0x49f   : > { %v14608_v47 = vpop.eup %14607  ;;  %v11550_v44 = vadd.f32 %v18090_v38, %v11350_v18  ;;  %v6650_v25 = vadd.f32 %v6352_v32, %v4966_v1  ;;  %v18423_v3 = vadd.f32 1e-05, %v8605_v39  ;;  %v3183_v35 = vadd.f32 %v3182_v30, %v1893_v37 }
 0x4a0   : > { %v10192_v23 = vmul.f32 %v14608_v47, %v18395_v13  ;;  %v7145_v36 = vpop.xlane.xlu2 %7144  ;;  %v10186_v16 = vmul.f32 %v14606_v56, %v10185_v20  ;;  %v7936_v24 = vpop.xlane.xlu0 %7935  ;;  %vm10198_vm5 = vweird.f32 %v14608_v47 }
 0x4a1   : > { %11746 = vst [vmem:[%s15334_s24 + $0x368] sm:$0xff] %v11550_v44  ;;  %v18428_v10 = vadd.f32 %v18265_v62, %v6650_v25  ;;  %v18431_v57 = vmul.f32 %v15231_v41, %v7145_v36  ;;  %14609 = vrsqrt.f32 %v18423_v3  ;;  %v8214_v22 = vmul.f32 %v7936_v24, %v15231_v41  ;;  %vm10199_vm7 = vmor %vm10197_vm6, %vm10198_vm5 }
 0x4a2   : > { %v10193_v59 = vmul.f32 %v14608_v47, %v10192_v23  ;;  %v10190_v61 = vsel %vm10189_vm4, %v14606_v56, %v10186_v16  ;;  %vm10207_vm9 = vweird.f32 %v18423_v3 }
 0x4a3   : > { %v8410_v48 = vmul.f32 %v18431_v57, %v18431_v57  ;;  %v7641_v28 = vmul.f32 %v18428_v10, %v18428_v10  ;;  %v11151_v7 = vmul.f32 %v10190_v61, %v8799_v49 }
 0x4a4   : > { %v10194_v29 = vmul.f32 0.5, %v10193_v59  ;;  %v4670_v6 = vpop.f32.mrf.mxu2 }
 0x4a5   : > { %v6354_v54 = vpop.f32.mrf.mxu3  ;;  %v8606_v12 = vsub.f32 %v8214_v22, %v8410_v48  ;;  %v4967_v53 = vadd.f32 %v4670_v6, %v3183_v35  ;;  %7965 = vadd.xlane.f32.xlu0 %v7641_v28  ;;  %v11351_v11 = vmul.f32 %v18081_v50, %v11151_v7  ;;  %7174 = vadd.xlane.f32.xlu2 %v18428_v10 }
 0x4a6   : > { %v1896_v55 = vpop.f32.mrf.mxu0  ;;  %v3185_v56 = vpop.f32.mrf.mxu1  ;;  %v10195_v52 = vsub.f32 1.5, %v10194_v29  ;;  %v8800_v50 = vsub.f32 %v17964_v19, %v18379_v42 }
 0x4a7   : > { %v18447_v32 = vadd.f32 1e-05, %v8606_v12  ;;  %v6651_v21 = vadd.f32 %v6354_v54, %v4967_v53  ;;  %12426 = vmatmul.msk.bf16.gmra.mxu0 %vm1267_vm0, %v14112_v31  ;;  %v14610_v18 = vpop.eup %14609  ;;  %v11551_v33 = vadd.f32 %v18090_v38, %v11351_v11  ;;  %v3186_v39 = vadd.f32 %v3185_v56, %v1896_v55  ;;  %v18483_v31 = vld [vmem:[%s20452_s7] ss:$0 sm:$0xff] }
 0x4a8   : > { %12920 = vmatmul.msk.bf16.gmra.mxu1 %vm1267_vm0, %v14013_v34  ;;  %v10196_v1 = vmul.f32 %v14608_v47, %v10195_v52  ;;  %v7938_v37 = vpop.xlane.xlu1 %7937  ;;  %v10202_v30 = vmul.f32 %v14610_v18, %v18423_v3  ;;  %v7147_v44 = vpop.xlane.xlu0 %7146  ;;  %vm10208_vm8 = vweird.f32 %v14610_v18 }
 0x4a9   : > { %14611 = vrsqrt.f32 %v18447_v32  ;;  %13416 = vmatmul.msk.bf16.gmra.mxu2 %vm1267_vm0, %v14211_v4  ;;  %11747 = vst [vmem:[%s15334_s24 + $0x370] sm:$0xff] %v11551_v33  ;;  %v18461_v20 = vadd.f32 %v18265_v62, %v6651_v21  ;;  %v18464_v13 = vmul.f32 %v15231_v41, %v7147_v44  ;;  %v8215_v23 = vmul.f32 %v7938_v37, %v15231_v41  ;;  %vm10209_vm10 = vmor %vm10207_vm9, %vm10208_vm8  ;;  %v14113_v37 = vld [vmem:[%s14992_s13 + $0x250] sm:$0xff] }
 0x4aa   : > { %13912 = vmatmul.msk.bf16.gmra.mxu3 %vm1267_vm0, %v14310_v2  ;;  %v10200_v38 = vsel %vm10199_vm7, %v14608_v47, %v10196_v1  ;;  %v10203_v42 = vmul.f32 %v14610_v18, %v10202_v30  ;;  %v18474_v47 = vld [vmem:[%s20451_s6] ss:$0 sm:$0xff]  ;;  %v8801_v2 = vsub.f32 %v17983_v8, %v18412_v46  ;;  %vm10217_vm12 = vweird.f32 %v18447_v32 }
 0x4ab   : > { %v11152_v19 = vmul.f32 %v10200_v38, %v8800_v50  ;;  %v8411_v25 = vmul.f32 %v18464_v13, %v18464_v13  ;;  %v7642_v24 = vmul.f32 %v18461_v20, %v18461_v20  ;;  %v14014_v50 = vld [vmem:[%s14997_s19 + $0x250] sm:$0xff] }
 0x4ac   : > { %v4673_v36 = vpop.f32.mrf.mxu2  ;;  %v10204_v59 = vmul.f32 0.5, %v10203_v42  ;;  %v14212_v42 = vld [vmem:[%s15004_s22 + $0x250] sm:$0xff] }
 0x4ad   : > { %v6357_v16 = vpop.f32.mrf.mxu3  ;;  %v11352_v49 = vmul.f32 %v18474_v47, %v11152_v19  ;;  %v4968_v35 = vadd.f32 %v4673_v36, %v3186_v39  ;;  %7176 = vadd.xlane.f32.xlu0 %v18461_v20  ;;  %v8607_v22 = vsub.f32 %v8215_v23, %v8411_v25  ;;  %7967 = vadd.xlane.f32.xlu1 %v7642_v24  ;;  %v14311_v25 = vld [vmem:[%s15009_s25 + $0x250] sm:$0xff] }
 0x4ae   : > { %v1898_v61 = vpop.f32.mrf.mxu0  ;;  %v3187_v48 = vpop.f32.mrf.mxu1  ;;  %v10205_v7 = vsub.f32 1.5, %v10204_v59 }
 0x4af   : > { %v18478_v28 = vpop.eup %14611  ;;  %v11552_v34 = vadd.f32 %v18483_v31, %v11352_v49  ;;  %v6652_v29 = vadd.f32 %v6357_v16, %v4968_v35  ;;  %v18488_v54 = vadd.f32 1e-05, %v8607_v22  ;;  %v3188_v52 = vadd.f32 %v3187_v48, %v1898_v61 }
 0x4b0   : > { %v10212_v6 = vmul.f32 %v18478_v28, %v18447_v32  ;;  %v7149_v12 = vpop.xlane.xlu1 %7148  ;;  %v10206_v53 = vmul.f32 %v14610_v18, %v10205_v7  ;;  %v7940_v56 = vpop.xlane.xlu2 %7939  ;;  %vm10218_vm11 = vweird.f32 %v18478_v28  ;;  %v8802_v48 = vsub.f32 %v18016_v40, %v18431_v57 }
 0x4b1   : > { %11748 = vst [vmem:[%s15334_s24 + $0x378] sm:$0xff] %v11552_v34  ;;  %v18493_v55 = vadd.f32 %v18265_v62, %v6652_v29  ;;  %v18496_v4 = vmul.f32 %v15231_v41, %v7149_v12  ;;  %14613 = vrsqrt.f32 %v18488_v54  ;;  %v8216_v3 = vmul.f32 %v7940_v56, %v15231_v41  ;;  %vm10219_vm13 = vmor %vm10217_vm12, %vm10218_vm11 }
 0x4b2   : > { %v10213_v11 = vmul.f32 %v18478_v28, %v10212_v6  ;;  %v10210_v21 = vsel %vm10209_vm10, %v14610_v18, %v10206_v53  ;;  %vm10227_vm15 = vweird.f32 %v18488_v54 }
 0x4b3   : > { %v8412_v33 = vmul.f32 %v18496_v4, %v18496_v4  ;;  %v7643_v1 = vmul.f32 %v18493_v55, %v18493_v55  ;;  %v11153_v8 = vmul.f32 %v10210_v21, %v8801_v2 }
 0x4b4   : > { %v10214_v46 = vmul.f32 0.5, %v10213_v11  ;;  %v4675_v30 = vpop.f32.mrf.mxu2 }
 0x4b5   : > { %v6359_v39 = vpop.f32.mrf.mxu3  ;;  %v8608_v44 = vsub.f32 %v8216_v3, %v8412_v33  ;;  %v4969_v38 = vadd.f32 %v4675_v30, %v3188_v52  ;;  %7969 = vadd.xlane.f32.xlu2 %v7643_v1  ;;  %v11353_v23 = vmul.f32 %v18474_v47, %v11153_v8  ;;  %7178 = vadd.xlane.f32.xlu1 %v18493_v55 }
 0x4b6   : > { %v1901_v19 = vpop.f32.mrf.mxu0  ;;  %v3190_v18 = vpop.f32.mrf.mxu1  ;;  %v10215_v36 = vsub.f32 1.5, %v10214_v46 }
 0x4b7   : > { %v18514_v16 = vadd.f32 1e-05, %v8608_v44  ;;  %v6653_v24 = vadd.f32 %v6359_v39, %v4969_v38  ;;  %12427 = vmatmul.msk.bf16.gmra.mxu0 %vm1267_vm0, %v14113_v37  ;;  %v14614_v49 = vpop.eup %14613  ;;  %v11553_v59 = vadd.f32 %v18483_v31, %v11353_v23  ;;  %v3191_v34 = vadd.f32 %v3190_v18, %v1901_v19 }
 0x4b8   : > { %12921 = vmatmul.msk.bf16.gmra.mxu1 %vm1267_vm0, %v14014_v50  ;;  %v10216_v35 = vmul.f32 %v18478_v28, %v10215_v36  ;;  %v7942_v61 = vpop.xlane.xlu0 %7941  ;;  %v10222_v22 = vmul.f32 %v14614_v49, %v18488_v54  ;;  %v7151_v7 = vpop.xlane.xlu2 %7150  ;;  %vm10228_vm14 = vweird.f32 %v14614_v49 }
 0x4b9   : > { %14615 = vrsqrt.f32 %v18514_v16  ;;  %13417 = vmatmul.msk.bf16.gmra.mxu2 %vm1267_vm0, %v14212_v42  ;;  %11749 = vst [vmem:[%s15334_s24 + $0x380] sm:$0xff] %v11553_v59  ;;  %v18530_v32 = vadd.f32 %v18265_v62, %v6653_v24  ;;  %v18533_v6 = vmul.f32 %v15231_v41, %v7151_v7  ;;  %v8217_v53 = vmul.f32 %v7942_v61, %v15231_v41  ;;  %vm10229_vm1 = vmor %vm10227_vm15, %vm10228_vm14  ;;  %v14114_v61 = vld [vmem:[%s14992_s13 + $0x258] sm:$0xff] }
 0x4ba   : > { %13913 = vmatmul.msk.bf16.gmra.mxu3 %vm1267_vm0, %v14311_v25  ;;  %v10220_v29 = vsel %vm10219_vm13, %v18478_v28, %v10216_v35  ;;  %v10223_v57 = vmul.f32 %v14614_v49, %v10222_v22  ;;  %v8803_v25 = vsub.f32 %v18035_v0, %v18464_v13  ;;  %vm10237_vm3 = vweird.f32 %v18514_v16 }
 0x4bb   : > { %v11154_v40 = vmul.f32 %v10220_v29, %v8802_v48  ;;  %v8413_v12 = vmul.f32 %v18533_v6, %v18533_v6  ;;  %v7644_v11 = vmul.f32 %v18530_v32, %v18530_v32  ;;  %v14015_v48 = vld [vmem:[%s14997_s19 + $0x258] sm:$0xff] }
 0x4bc   : > { %v4678_v56 = vpop.f32.mrf.mxu2  ;;  %v10224_v52 = vmul.f32 0.5, %v10223_v57  ;;  %v14213_v57 = vld [vmem:[%s15004_s22 + $0x258] sm:$0xff] }
 0x4bd   : > { %v6362_v2 = vpop.f32.mrf.mxu3  ;;  %v11354_v28 = vmul.f32 %v18474_v47, %v11154_v40  ;;  %v4970_v21 = vadd.f32 %v4678_v56, %v3191_v34  ;;  %7180 = vadd.xlane.f32.xlu2 %v18530_v32  ;;  %v8609_v1 = vsub.f32 %v8217_v53, %v8413_v12  ;;  %7971 = vadd.xlane.f32.xlu0 %v7644_v11  ;;  %v14312_v12 = vld [vmem:[%s15009_s25 + $0x258] sm:$0xff] }
 0x4be   : > { %v1903_v3 = vpop.f32.mrf.mxu0  ;;  %v3192_v33 = vpop.f32.mrf.mxu1  ;;  %v10225_v8 = vsub.f32 1.5, %v10224_v52 }
 0x4bf   : > { %v14616_v37 = vpop.eup %14615  ;;  %v11554_v50 = vadd.f32 %v18483_v31, %v11354_v28  ;;  %v6654_v46 = vadd.f32 %v6362_v2, %v4970_v21  ;;  %v18544_v39 = vadd.f32 1e-05, %v8609_v1  ;;  %v3193_v36 = vadd.f32 %v3192_v33, %v1903_v3 }
 0x4c0   : > { %v10232_v30 = vmul.f32 %v14616_v37, %v18514_v16  ;;  %v7153_v44 = vpop.xlane.xlu0 %7152  ;;  %v10226_v38 = vmul.f32 %v14614_v49, %v10225_v8  ;;  %v7944_v42 = vpop.xlane.xlu1 %7943  ;;  %vm10238_vm2 = vweird.f32 %v14616_v37  ;;  %v8804_v33 = vsub.f32 %v18068_v15, %v18496_v4 }
 0x4c1   : > { %11750 = vst [vmem:[%s15334_s24 + $0x388] sm:$0xff] %v11554_v50  ;;  %v18549_v19 = vadd.f32 %v18265_v62, %v6654_v46  ;;  %v18552_v18 = vmul.f32 %v15231_v41, %v7153_v44  ;;  %14617 = vrsqrt.f32 %v18544_v39  ;;  %v8218_v59 = vmul.f32 %v7944_v42, %v15231_v41  ;;  %vm10239_vm4 = vmor %vm10237_vm3, %vm10238_vm2 }
 0x4c2   : > { %v10233_v23 = vmul.f32 %v14616_v37, %v10232_v30  ;;  %v10230_v24 = vsel %vm10229_vm1, %v14614_v49, %v10226_v38  ;;  %vm10247_vm6 = vweird.f32 %v18544_v39 }
 0x4c3   : > { %v8414_v54 = vmul.f32 %v18552_v18, %v18552_v18  ;;  %v7645_v35 = vmul.f32 %v18549_v19, %v18549_v19  ;;  %v11155_v22 = vmul.f32 %v10230_v24, %v8803_v25 }
 0x4c4   : > { %v10234_v0 = vmul.f32 0.5, %v10233_v23  ;;  %v4680_v13 = vpop.f32.mrf.mxu2 }
 0x4c5   : > { %v6364_v34 = vpop.f32.mrf.mxu3  ;;  %v8610_v7 = vsub.f32 %v8218_v59, %v8414_v54  ;;  %v4971_v29 = vadd.f32 %v4680_v13, %v3193_v36  ;;  %7973 = vadd.xlane.f32.xlu1 %v7645_v35  ;;  %v11355_v53 = vmul.f32 %v18474_v47, %v11155_v22  ;;  %7182 = vadd.xlane.f32.xlu0 %v18549_v19 }
 0x4c6   : > { %v1906_v40 = vpop.f32.mrf.mxu0  ;;  %v3195_v49 = vpop.f32.mrf.mxu1  ;;  %v10235_v56 = vsub.f32 1.5, %v10234_v0 }
 0x4c7   : > { %v18568_v2 = vadd.f32 1e-05, %v8610_v7  ;;  %v6655_v11 = vadd.f32 %v6364_v34, %v4971_v29  ;;  %12428 = vmatmul.msk.bf16.gmra.mxu0 %vm1267_vm0, %v14114_v61  ;;  %v14618_v28 = vpop.eup %14617  ;;  %v11555_v52 = vadd.f32 %v18483_v31, %v11355_v53  ;;  %v3196_v50 = vadd.f32 %v3195_v49, %v1906_v40 }
 0x4c8   : > { %12922 = vmatmul.msk.bf16.gmra.mxu1 %vm1267_vm0, %v14015_v48  ;;  %v10236_v21 = vmul.f32 %v14616_v37, %v10235_v56  ;;  %v7946_v3 = vpop.xlane.xlu2 %7945  ;;  %v10242_v1 = vmul.f32 %v14618_v28, %v18544_v39  ;;  %v7155_v8 = vpop.xlane.xlu1 %7154  ;;  %vm10248_vm5 = vweird.f32 %v14618_v28 }
 0x4c9   : > { %14619 = vrsqrt.f32 %v18568_v2  ;;  %13418 = vmatmul.msk.bf16.gmra.mxu2 %vm1267_vm0, %v14213_v57  ;;  %11751 = vst [vmem:[%s15334_s24 + $0x390] sm:$0xff] %v11555_v52  ;;  %v18582_v30 = vadd.f32 %v18265_v62, %v6655_v11  ;;  %v18585_v16 = vmul.f32 %v15231_v41, %v7155_v8  ;;  %v8219_v44 = vmul.f32 %v7946_v3, %v15231_v41  ;;  %vm10249_vm7 = vmor %vm10247_vm6, %vm10248_vm5  ;;  %v14115_v3 = vld [vmem:[%s14992_s13 + $0x260] sm:$0xff] }
 0x4ca   : > { %13914 = vmatmul.msk.bf16.gmra.mxu3 %vm1267_vm0, %v14312_v12  ;;  %v10240_v46 = vsel %vm10239_vm4, %v14616_v37, %v10236_v21  ;;  %v10243_v4 = vmul.f32 %v14618_v28, %v10242_v1  ;;  %v8805_v12 = vsub.f32 %v18100_v63, %v18533_v6  ;;  %vm10257_vm9 = vweird.f32 %v18568_v2 }
 0x4cb   : > { %v11156_v15 = vmul.f32 %v10240_v46, %v8804_v33  ;;  %v8415_v38 = vmul.f32 %v18585_v16, %v18585_v16  ;;  %v7646_v23 = vmul.f32 %v18582_v30, %v18582_v30  ;;  %v14016_v33 = vld [vmem:[%s14997_s19 + $0x260] sm:$0xff] }
 0x4cc   : > { %v4683_v42 = vpop.f32.mrf.mxu2  ;;  %v10244_v36 = vmul.f32 0.5, %v10243_v4  ;;  %v14214_v4 = vld [vmem:[%s15004_s22 + $0x260] sm:$0xff] }
 0x4cd   : > { %v6367_v25 = vpop.f32.mrf.mxu3  ;;  %v11356_v37 = vmul.f32 %v18474_v47, %v11156_v15  ;;  %v4972_v24 = vadd.f32 %v4683_v42, %v3196_v50  ;;  %7184 = vadd.xlane.f32.xlu1 %v18582_v30  ;;  %v8611_v35 = vsub.f32 %v8219_v44, %v8415_v38  ;;  %7975 = vadd.xlane.f32.xlu2 %v7646_v23  ;;  %v14313_v44 = vld [vmem:[%s15009_s25 + $0x260] sm:$0xff] }
 0x4ce   : > { %v1908_v54 = vpop.f32.mrf.mxu0  ;;  %v3197_v59 = vpop.f32.mrf.mxu1  ;;  %v10245_v22 = vsub.f32 1.5, %v10244_v36 }
 0x4cf   : > { %v14620_v61 = vpop.eup %14619  ;;  %v11556_v48 = vadd.f32 %v18483_v31, %v11356_v37  ;;  %v6656_v0 = vadd.f32 %v6367_v25, %v4972_v24  ;;  %v18596_v34 = vadd.f32 1e-05, %v8611_v35  ;;  %v3198_v56 = vadd.f32 %v3197_v59, %v1908_v54 }
 0x4d0   : > { %v10252_v13 = vmul.f32 %v14620_v61, %v18568_v2  ;;  %v7157_v7 = vpop.xlane.xlu2 %7156  ;;  %v10246_v29 = vmul.f32 %v14618_v28, %v10245_v22  ;;  %v7948_v57 = vpop.xlane.xlu0 %7947  ;;  %vm10258_vm8 = vweird.f32 %v14620_v61  ;;  %v8806_v59 = vsub.f32 %v18137_v45, %v18552_v18 }
 0x4d1   : > { %11752 = vst [vmem:[%s15334_s24 + $0x398] sm:$0xff] %v11556_v48  ;;  %v18601_v40 = vadd.f32 %v18265_v62, %v6656_v0  ;;  %v18604_v49 = vmul.f32 %v15231_v41, %v7157_v7  ;;  %14621 = vrsqrt.f32 %v18596_v34  ;;  %v8220_v52 = vmul.f32 %v7948_v57, %v15231_v41  ;;  %vm10259_vm10 = vmor %vm10257_vm9, %vm10258_vm8 }
 0x4d2   : > { %v10253_v53 = vmul.f32 %v14620_v61, %v10252_v13  ;;  %v10250_v11 = vsel %vm10249_vm7, %v14618_v28, %v10246_v29  ;;  %vm10267_vm12 = vweird.f32 %v18596_v34 }
 0x4d3   : > { %v8416_v39 = vmul.f32 %v18604_v49, %v18604_v49  ;;  %v7647_v21 = vmul.f32 %v18601_v40, %v18601_v40  ;;  %v11157_v1 = vmul.f32 %v10250_v11, %v8805_v12 }
 0x4d4   : > { %v10254_v63 = vmul.f32 0.5, %v10253_v53  ;;  %v4685_v6 = vpop.f32.mrf.mxu2 }
 0x4d5   : > { %v6369_v50 = vpop.f32.mrf.mxu3  ;;  %v8612_v8 = vsub.f32 %v8220_v52, %v8416_v39  ;;  %v4973_v46 = vadd.f32 %v4685_v6, %v3198_v56  ;;  %7977 = vadd.xlane.f32.xlu0 %v7647_v21  ;;  %v11357_v38 = vmul.f32 %v18474_v47, %v11157_v1  ;;  %7186 = vadd.xlane.f32.xlu2 %v18601_v40 }
 0x4d6   : > { %v1911_v15 = vpop.f32.mrf.mxu0  ;;  %v3200_v28 = vpop.f32.mrf.mxu1  ;;  %v10255_v42 = vsub.f32 1.5, %v10254_v63 }
 0x4d7   : > { %v18620_v25 = vadd.f32 1e-05, %v8612_v8  ;;  %v6657_v23 = vadd.f32 %v6369_v50, %v4973_v46  ;;  %12429 = vmatmul.msk.bf16.gmra.mxu0 %vm1267_vm0, %v14115_v3  ;;  %v14622_v37 = vpop.eup %14621  ;;  %v11557_v36 = vadd.f32 %v18483_v31, %v11357_v38  ;;  %v3201_v48 = vadd.f32 %v3200_v28, %v1911_v15  ;;  %v18658_v46 = vld [vmem:[%s20450_s5] ss:$0 sm:$0xff] }
 0x4d8   : > { %12923 = vmatmul.msk.bf16.gmra.mxu1 %vm1267_vm0, %v14016_v33  ;;  %v10256_v24 = vmul.f32 %v14620_v61, %v10255_v42  ;;  %v7950_v54 = vpop.xlane.xlu1 %7949  ;;  %v10262_v35 = vmul.f32 %v14622_v37, %v18596_v34  ;;  %v7159_v22 = vpop.xlane.xlu0 %7158  ;;  %vm10268_vm11 = vweird.f32 %v14622_v37 }
 0x4d9   : > { %14623 = vrsqrt.f32 %v18620_v25  ;;  %13419 = vmatmul.msk.bf16.gmra.mxu2 %vm1267_vm0, %v14214_v4  ;;  %11753 = vst [vmem:[%s15334_s24 + $0x3a0] sm:$0xff] %v11557_v36  ;;  %v18634_v13 = vadd.f32 %v18265_v62, %v6657_v23  ;;  %v18637_v2 = vmul.f32 %v15231_v41, %v7159_v22  ;;  %v8221_v29 = vmul.f32 %v7950_v54, %v15231_v41  ;;  %vm10269_vm13 = vmor %vm10267_vm12, %vm10268_vm11  ;;  %v14116_v54 = vld [vmem:[%s14992_s13 + $0x268] sm:$0xff] }
 0x4da   : > { %13915 = vmatmul.msk.bf16.gmra.mxu3 %vm1267_vm0, %v14313_v44  ;;  %v10260_v0 = vsel %vm10259_vm10, %v14620_v61, %v10256_v24  ;;  %v10263_v18 = vmul.f32 %v14622_v37, %v10262_v35  ;;  %v8807_v44 = vsub.f32 %v18156_v9, %v18585_v16  ;;  %vm10277_vm15 = vweird.f32 %v18620_v25 }
 0x4db   : > { %v11158_v45 = vmul.f32 %v10260_v0, %v8806_v59  ;;  %v8417_v7 = vmul.f32 %v18637_v2, %v18637_v2  ;;  %v7648_v53 = vmul.f32 %v18634_v13, %v18634_v13  ;;  %v14017_v59 = vld [vmem:[%s14997_s19 + $0x268] sm:$0xff] }
 0x4dc   : > { %v4688_v57 = vpop.f32.mrf.mxu2  ;;  %v10264_v62 = vmul.f32 0.5, %v10263_v18  ;;  %v14215_v18 = vld [vmem:[%s15004_s22 + $0x268] sm:$0xff] }
 0x4dd   : > { %v6372_v12 = vpop.f32.mrf.mxu3  ;;  %v11358_v61 = vmul.f32 %v18474_v47, %v11158_v45  ;;  %v4974_v56 = vadd.f32 %v4688_v57, %v3201_v48  ;;  %7188 = vadd.xlane.f32.xlu0 %v18634_v13  ;;  %v8613_v52 = vsub.f32 %v8221_v29, %v8417_v7  ;;  %7979 = vadd.xlane.f32.xlu1 %v7648_v53  ;;  %v14314_v7 = vld [vmem:[%s15009_s25 + $0x268] sm:$0xff] }
 0x4de   : > { %v1913_v11 = vpop.f32.mrf.mxu0  ;;  %v3202_v39 = vpop.f32.mrf.mxu1  ;;  %v10265_v33 = vsub.f32 1.5, %v10264_v62 }
 0x4df   : > { %v18646_v21 = vpop.eup %14623  ;;  %v11558_v3 = vadd.f32 %v18483_v31, %v11358_v61  ;;  %v6658_v1 = vadd.f32 %v6372_v12, %v4974_v56  ;;  %v18651_v6 = vadd.f32 1e-05, %v8613_v52  ;;  %v3203_v34 = vadd.f32 %v3202_v39, %v1913_v11 }
 0x4e0   : > { %v10272_v63 = vmul.f32 %v18646_v21, %v18620_v25  ;;  %v7161_v50 = vpop.xlane.xlu1 %7160  ;;  %v10266_v8 = vmul.f32 %v14622_v37, %v10265_v33  ;;  %v7952_v28 = vpop.xlane.xlu2 %7951  ;;  %vm10278_vm14 = vweird.f32 %v18646_v21  ;;  %v8808_v39 = vsub.f32 %v18189_v5, %v18604_v49 }
 0x4e1   : > { %11754 = vst [vmem:[%s15334_s24 + $0x3a8] sm:$0xff] %v11558_v3  ;;  %v18661_v15 = vadd.f32 %v18658_v46, %v6658_v1  ;;  %v18664_v4 = vmul.f32 %v15231_v41, %v7161_v50  ;;  %14625 = vrsqrt.f32 %v18651_v6  ;;  %v8222_v23 = vmul.f32 %v7952_v28, %v15231_v41  ;;  %vm10279_vm1 = vmor %vm10277_vm15, %vm10278_vm14 }
 0x4e2   : > { %v10273_v38 = vmul.f32 %v18646_v21, %v10272_v63  ;;  %v10270_v42 = vsel %vm10269_vm13, %v14622_v37, %v10266_v8  ;;  %vm10287_vm3 = vweird.f32 %v18651_v6 }
 0x4e3   : > { %v8418_v36 = vmul.f32 %v18664_v4, %v18664_v4  ;;  %v7649_v24 = vmul.f32 %v18661_v15, %v18661_v15  ;;  %v11159_v9 = vmul.f32 %v10270_v42, %v8807_v44 }
 0x4e4   : > { %v10274_v16 = vmul.f32 0.5, %v10273_v38  ;;  %v4690_v35 = vpop.f32.mrf.mxu2 }
 0x4e5   : > { %v6374_v48 = vpop.f32.mrf.mxu3  ;;  %v8614_v22 = vsub.f32 %v8222_v23, %v8418_v36  ;;  %v4975_v0 = vadd.f32 %v4690_v35, %v3203_v34  ;;  %7981 = vadd.xlane.f32.xlu2 %v7649_v24  ;;  %v11359_v29 = vmul.f32 %v18474_v47, %v11159_v9  ;;  %7190 = vadd.xlane.f32.xlu1 %v18661_v15 }
 0x4e6   : > { %v1916_v45 = vpop.f32.mrf.mxu0  ;;  %v3205_v37 = vpop.f32.mrf.mxu1  ;;  %v10275_v57 = vsub.f32 1.5, %v10274_v16 }
 0x4e7   : > { %v18682_v12 = vadd.f32 1e-05, %v8614_v22  ;;  %v6659_v53 = vadd.f32 %v6374_v48, %v4975_v0  ;;  %12430 = vmatmul.msk.bf16.gmra.mxu0 %vm1267_vm0, %v14116_v54  ;;  %v14626_v61 = vpop.eup %14625  ;;  %v11559_v62 = vadd.f32 %v18483_v31, %v11359_v29  ;;  %v3206_v3 = vadd.f32 %v3205_v37, %v1916_v45 }
 0x4e8   : > { %12924 = vmatmul.msk.bf16.gmra.mxu1 %vm1267_vm0, %v14017_v59  ;;  %v10276_v56 = vmul.f32 %v18646_v21, %v10275_v57  ;;  %v7954_v11 = vpop.xlane.xlu0 %7953  ;;  %v10282_v52 = vmul.f32 %v14626_v61, %v18651_v6  ;;  %v7163_v33 = vpop.xlane.xlu2 %7162  ;;  %vm10288_vm2 = vweird.f32 %v14626_v61 }
 0x4e9   : > { %14627 = vrsqrt.f32 %v18682_v12  ;;  %13420 = vmatmul.msk.bf16.gmra.mxu2 %vm1267_vm0, %v14215_v18  ;;  %11755 = vst [vmem:[%s15334_s24 + $0x3b0] sm:$0xff] %v11559_v62  ;;  %v18698_v25 = vadd.f32 %v18658_v46, %v6659_v53  ;;  %v18701_v63 = vmul.f32 %v15231_v41, %v7163_v33  ;;  %v8223_v8 = vmul.f32 %v7954_v11, %v15231_v41  ;;  %vm10289_vm4 = vmor %vm10287_vm3, %vm10288_vm2  ;;  %v14117_v11 = vld [vmem:[%s14992_s13 + $0x270] sm:$0xff] }
 0x4ea   : > { %13916 = vmatmul.msk.bf16.gmra.mxu3 %vm1267_vm0, %v14314_v7  ;;  %v10280_v1 = vsel %vm10279_vm1, %v18646_v21, %v10276_v56  ;;  %v10283_v49 = vmul.f32 %v14626_v61, %v10282_v52  ;;  %v8809_v7 = vsub.f32 %v18208_v58, %v18637_v2  ;;  %vm10297_vm6 = vweird.f32 %v18682_v12 }
 0x4eb   : > { %v11160_v5 = vmul.f32 %v10280_v1, %v8808_v39  ;;  %v8419_v50 = vmul.f32 %v18701_v63, %v18701_v63  ;;  %v7650_v38 = vmul.f32 %v18698_v25, %v18698_v25  ;;  %v14018_v39 = vld [vmem:[%s14997_s19 + $0x270] sm:$0xff] }
 0x4ec   : > { %v4693_v28 = vpop.f32.mrf.mxu2  ;;  %v10284_v34 = vmul.f32 0.5, %v10283_v49  ;;  %v14216_v49 = vld [vmem:[%s15004_s22 + $0x270] sm:$0xff] }
 0x4ed   : > { %v6377_v44 = vpop.f32.mrf.mxu3  ;;  %v11360_v21 = vmul.f32 %v18474_v47, %v11160_v5  ;;  %v4976_v42 = vadd.f32 %v4693_v28, %v3206_v3  ;;  %7192 = vadd.xlane.f32.xlu2 %v18698_v25  ;;  %v8615_v24 = vsub.f32 %v8223_v8, %v8419_v50  ;;  %7983 = vadd.xlane.f32.xlu0 %v7650_v38  ;;  %v14315_v50 = vld [vmem:[%s15009_s25 + $0x270] sm:$0xff] }
 0x4ee   : > { %v1918_v23 = vpop.f32.mrf.mxu0  ;;  %v3207_v36 = vpop.f32.mrf.mxu1  ;;  %v10285_v9 = vsub.f32 1.5, %v10284_v34 }
 0x4ef   : > { %v14628_v54 = vpop.eup %14627  ;;  %v11560_v59 = vadd.f32 %v18483_v31, %v11360_v21  ;;  %v6660_v16 = vadd.f32 %v6377_v44, %v4976_v42  ;;  %v18712_v48 = vadd.f32 1e-05, %v8615_v24  ;;  %v3208_v57 = vadd.f32 %v3207_v36, %v1918_v23 }
 0x4f0   : > { %v10292_v35 = vmul.f32 %v14628_v54, %v18682_v12  ;;  %v7165_v22 = vpop.xlane.xlu0 %7164  ;;  %v10286_v0 = vmul.f32 %v14626_v61, %v10285_v9  ;;  %v7956_v18 = vpop.xlane.xlu1 %7955  ;;  %vm10298_vm5 = vweird.f32 %v14628_v54  ;;  %v8810_v36 = vsub.f32 %v18241_v17, %v18664_v4 }
 0x4f1   : > { %11756 = vst [vmem:[%s15334_s24 + $0x3b8] sm:$0xff] %v11560_v59  ;;  %v18717_v45 = vadd.f32 %v18658_v46, %v6660_v16  ;;  %v18720_v37 = vmul.f32 %v15231_v41, %v7165_v22  ;;  %14629 = vrsqrt.f32 %v18712_v48  ;;  %v8224_v62 = vmul.f32 %v7956_v18, %v15231_v41  ;;  %vm10299_vm7 = vmor %vm10297_vm6, %vm10298_vm5 }
 0x4f2   : > { %v10293_v29 = vmul.f32 %v14628_v54, %v10292_v35  ;;  %v10290_v53 = vsel %vm10289_vm4, %v14626_v61, %v10286_v0  ;;  %vm10307_vm9 = vweird.f32 %v18712_v48 }
 0x4f3   : > { %v8420_v6 = vmul.f32 %v18720_v37, %v18720_v37  ;;  %v7651_v56 = vmul.f32 %v18717_v45, %v18717_v45  ;;  %v11161_v52 = vmul.f32 %v10290_v53, %v8809_v7 }
 0x4f4   : > { %v10294_v58 = vmul.f32 0.5, %v10293_v29  ;;  %v4695_v2 = vpop.f32.mrf.mxu2 }
 0x4f5   : > { %v6379_v3 = vpop.f32.mrf.mxu3  ;;  %v8616_v33 = vsub.f32 %v8224_v62, %v8420_v6  ;;  %v4977_v1 = vadd.f32 %v4695_v2, %v3208_v57  ;;  %7985 = vadd.xlane.f32.xlu1 %v7651_v56  ;;  %v11361_v8 = vmul.f32 %v18474_v47, %v11161_v52  ;;  %7194 = vadd.xlane.f32.xlu0 %v18717_v45 }
 0x4f6   : > { %v1921_v5 = vpop.f32.mrf.mxu0  ;;  %v3210_v61 = vpop.f32.mrf.mxu1  ;;  %v10295_v28 = vsub.f32 1.5, %v10294_v58 }
 0x4f7   : > { %v18736_v44 = vadd.f32 1e-05, %v8616_v33  ;;  %v6661_v38 = vadd.f32 %v6379_v3, %v4977_v1  ;;  %12431 = vmatmul.msk.bf16.gmra.mxu0 %vm1267_vm0, %v14117_v11  ;;  %v14630_v21 = vpop.eup %14629  ;;  %v11561_v34 = vadd.f32 %v18483_v31, %v11361_v8  ;;  %v3211_v59 = vadd.f32 %v3210_v61, %v1921_v5 }
 0x4f8   : > { %12925 = vmatmul.msk.bf16.gmra.mxu1 %vm1267_vm0, %v14018_v39  ;;  %v10296_v42 = vmul.f32 %v14628_v54, %v10295_v28  ;;  %v7958_v23 = vpop.xlane.xlu2 %7957  ;;  %v10302_v24 = vmul.f32 %v14630_v21, %v18712_v48  ;;  %v7167_v9 = vpop.xlane.xlu1 %7166  ;;  %vm10308_vm8 = vweird.f32 %v14630_v21 }
 0x4f9   : > { %14631 = vrsqrt.f32 %v18736_v44  ;;  %13421 = vmatmul.msk.bf16.gmra.mxu2 %vm1267_vm0, %v14216_v49  ;;  %11757 = vst [vmem:[%s15334_s24 + $0x3c0] sm:$0xff] %v11561_v34  ;;  %v18750_v35 = vadd.f32 %v18658_v46, %v6661_v38  ;;  %v18753_v12 = vmul.f32 %v15231_v41, %v7167_v9  ;;  %v8225_v22 = vmul.f32 %v7958_v23, %v15231_v41  ;;  %vm10309_vm10 = vmor %vm10307_vm9, %vm10308_vm8  ;;  %v14118_v23 = vld [vmem:[%s14992_s13 + $0x278] sm:$0xff] }
 0x4fa   : > { %13917 = vmatmul.msk.bf16.gmra.mxu3 %vm1267_vm0, %v14315_v50  ;;  %v10300_v16 = vsel %vm10299_vm7, %v14628_v54, %v10296_v42  ;;  %v10303_v4 = vmul.f32 %v14630_v21, %v10302_v24  ;;  %v8811_v50 = vsub.f32 %v18268_v14, %v18701_v63  ;;  %vm10317_vm12 = vweird.f32 %v18736_v44 }
 0x4fb   : > { %v11162_v17 = vmul.f32 %v10300_v16, %v8810_v36  ;;  %v8421_v0 = vmul.f32 %v18753_v12, %v18753_v12  ;;  %v7652_v29 = vmul.f32 %v18750_v35, %v18750_v35  ;;  %v14019_v36 = vld [vmem:[%s14997_s19 + $0x278] sm:$0xff] }
 0x4fc   : > { %v4698_v18 = vpop.f32.mrf.mxu2  ;;  %v10304_v57 = vmul.f32 0.5, %v10303_v4  ;;  %v14217_v4 = vld [vmem:[%s15004_s22 + $0x278] sm:$0xff] }
 0x4fd   : > { %v6382_v7 = vpop.f32.mrf.mxu3  ;;  %v11362_v54 = vmul.f32 %v18474_v47, %v11162_v17  ;;  %v4978_v53 = vadd.f32 %v4698_v18, %v3211_v59  ;;  %7196 = vadd.xlane.f32.xlu1 %v18750_v35  ;;  %v8617_v56 = vsub.f32 %v8225_v22, %v8421_v0  ;;  %7987 = vadd.xlane.f32.xlu2 %v7652_v29  ;;  %v14316_v22 = vld [vmem:[%s15009_s25 + $0x278] sm:$0xff] }
 0x4fe   : > { %v1923_v6 = vpop.f32.mrf.mxu0  ;;  %v3212_v62 = vpop.f32.mrf.mxu1  ;;  %v10305_v52 = vsub.f32 1.5, %v10304_v57 }
 0x4ff   : > { %v14632_v11 = vpop.eup %14631  ;;  %v11562_v39 = vadd.f32 %v18483_v31, %v11362_v54  ;;  %v6662_v58 = vadd.f32 %v6382_v7, %v4978_v53  ;;  %v18764_v3 = vadd.f32 1e-05, %v8617_v56  ;;  %v3213_v28 = vadd.f32 %v3212_v62, %v1923_v6 }
 0x500   : > { %v10312_v2 = vmul.f32 %v14632_v11, %v18736_v44  ;;  %v7169_v33 = vpop.xlane.xlu2 %7168  ;;  %v10306_v1 = vmul.f32 %v14630_v21, %v10305_v52  ;;  %v7960_v49 = vpop.xlane.xlu0 %7959  ;;  %vm10318_vm11 = vweird.f32 %v14632_v11  ;;  %v8812_v62 = vsub.f32 %v18305_v26, %v18720_v37 }
 0x501   : > { %11758 = vst [vmem:[%s15334_s24 + $0x3c8] sm:$0xff] %v11562_v39  ;;  %v18769_v5 = vadd.f32 %v18658_v46, %v6662_v58  ;;  %v18772_v61 = vmul.f32 %v15231_v41, %v7169_v33  ;;  %14633 = vrsqrt.f32 %v18764_v3  ;;  %v8226_v34 = vmul.f32 %v7960_v49, %v15231_v41  ;;  %vm10319_vm13 = vmor %vm10317_vm12, %vm10318_vm11 }
 0x502   : > { %v10313_v8 = vmul.f32 %v14632_v11, %v10312_v2  ;;  %v10310_v38 = vsel %vm10309_vm10, %v14630_v21, %v10306_v1  ;;  %vm10327_vm15 = vweird.f32 %v18764_v3 }
 0x503   : > { %v8422_v48 = vmul.f32 %v18772_v61, %v18772_v61  ;;  %v7653_v42 = vmul.f32 %v18769_v5, %v18769_v5  ;;  %v11163_v24 = vmul.f32 %v10310_v38, %v8811_v50 }
 0x504   : > { %v10314_v14 = vmul.f32 0.5, %v10313_v8  ;;  %v4700_v63 = vpop.f32.mrf.mxu2 }
 0x505   : > { %v6384_v59 = vpop.f32.mrf.mxu3  ;;  %v8618_v9 = vsub.f32 %v8226_v34, %v8422_v48  ;;  %v4979_v16 = vadd.f32 %v4700_v63, %v3213_v28  ;;  %7989 = vadd.xlane.f32.xlu0 %v7653_v42  ;;  %v11363_v0 = vmul.f32 %v18474_v47, %v11163_v24  ;;  %7198 = vadd.xlane.f32.xlu2 %v18769_v5 }
 0x506   : > { %v1926_v17 = vpop.f32.mrf.mxu0  ;;  %v3215_v21 = vpop.f32.mrf.mxu1  ;;  %v10315_v18 = vsub.f32 1.5, %v10314_v14 }
 0x507   : > { %v18788_v7 = vadd.f32 1e-05, %v8618_v9  ;;  %v6663_v29 = vadd.f32 %v6384_v59, %v4979_v16  ;;  %12432 = vmatmul.msk.bf16.gmra.mxu0 %vm1267_vm0, %v14118_v23  ;;  %v14634_v54 = vpop.eup %14633  ;;  %v11563_v57 = vadd.f32 %v18483_v31, %v11363_v0  ;;  %v3216_v39 = vadd.f32 %v3215_v21, %v1926_v17 }
 0x508   : > { %12926 = vmatmul.msk.bf16.gmra.mxu1 %vm1267_vm0, %v14019_v36  ;;  %v10316_v53 = vmul.f32 %v14632_v11, %v10315_v18  ;;  %v7962_v6 = vpop.xlane.xlu1 %7961  ;;  %v10322_v56 = vmul.f32 %v14634_v54, %v18764_v3  ;;  %v7171_v52 = vpop.xlane.xlu0 %7170  ;;  %vm10328_vm14 = vweird.f32 %v14634_v54 }
 0x509   : > { %14635 = vrsqrt.f32 %v18788_v7  ;;  %13422 = vmatmul.msk.bf16.gmra.mxu2 %vm1267_vm0, %v14217_v4  ;;  %11759 = vst [vmem:[%s15334_s24 + $0x3d0] sm:$0xff] %v11563_v57  ;;  %v18802_v2 = vadd.f32 %v18658_v46, %v6663_v29  ;;  %v18805_v44 = vmul.f32 %v15231_v41, %v7171_v52  ;;  %v8227_v1 = vmul.f32 %v7962_v6, %v15231_v41  ;;  %vm10329_vm1 = vmor %vm10327_vm15, %vm10328_vm14  ;;  %v14119_v6 = vld [vmem:[%s14992_s13 + $0x280] sm:$0xff] }
 0x50a   : > { %13918 = vmatmul.msk.bf16.gmra.mxu3 %vm1267_vm0, %v14316_v22  ;;  %v10320_v58 = vsel %vm10319_vm13, %v14632_v11, %v10316_v53  ;;  %v10323_v37 = vmul.f32 %v14634_v54, %v10322_v56  ;;  %v8813_v22 = vsub.f32 %v18324_v43, %v18753_v12  ;;  %vm10337_vm3 = vweird.f32 %v18788_v7 }
 0x50b   : > { %v11164_v26 = vmul.f32 %v10320_v58, %v8812_v62  ;;  %v8423_v33 = vmul.f32 %v18805_v44, %v18805_v44  ;;  %v7654_v8 = vmul.f32 %v18802_v2, %v18802_v2  ;;  %v14020_v62 = vld [vmem:[%s14997_s19 + $0x280] sm:$0xff] }
 0x50c   : > { %v4703_v49 = vpop.f32.mrf.mxu2  ;;  %v10324_v28 = vmul.f32 0.5, %v10323_v37  ;;  %v14218_v37 = vld [vmem:[%s15004_s22 + $0x280] sm:$0xff] }
 0x50d   : > { %v6387_v50 = vpop.f32.mrf.mxu3  ;;  %v11364_v11 = vmul.f32 %v18474_v47, %v11164_v26  ;;  %v4980_v38 = vadd.f32 %v4703_v49, %v3216_v39  ;;  %7200 = vadd.xlane.f32.xlu0 %v18802_v2  ;;  %v8619_v42 = vsub.f32 %v8227_v1, %v8423_v33  ;;  %7991 = vadd.xlane.f32.xlu1 %v7654_v8  ;;  %v14317_v33 = vld [vmem:[%s15009_s25 + $0x280] sm:$0xff] }
 0x50e   : > { %v1928_v48 = vpop.f32.mrf.mxu0  ;;  %v3217_v34 = vpop.f32.mrf.mxu1  ;;  %v10325_v24 = vsub.f32 1.5, %v10324_v28 }
 0x50f   : > { %v14636_v23 = vpop.eup %14635  ;;  %v11564_v36 = vadd.f32 %v18483_v31, %v11364_v11  ;;  %v6664_v14 = vadd.f32 %v6387_v50, %v4980_v38  ;;  %v18816_v59 = vadd.f32 1e-05, %v8619_v42  ;;  %v3218_v18 = vadd.f32 %v3217_v34, %v1928_v48 }
 0x510   : > { %v10332_v63 = vmul.f32 %v14636_v23, %v18788_v7  ;;  %v7173_v9 = vpop.xlane.xlu1 %7172  ;;  %v10326_v16 = vmul.f32 %v14634_v54, %v10325_v24  ;;  %v7964_v21 = vpop.xlane.xlu2 %7963  ;;  %vm10338_vm2 = vweird.f32 %v14636_v23 }
 0x511   : > { %11760 = vst [vmem:[%s15334_s24 + $0x3d8] sm:$0xff] %v11564_v36  ;;  %v18821_v17 = vadd.f32 %v18658_v46, %v6664_v14  ;;  %v18824_v4 = vmul.f32 %v15231_v41, %v7173_v9  ;;  %14637 = vrsqrt.f32 %v18816_v59  ;;  %v8228_v3 = vmul.f32 %v7964_v21, %v15231_v41  ;;  %vm10339_vm4 = vmor %vm10337_vm3, %vm10338_vm2 }
 0x512   : > { %v10333_v0 = vmul.f32 %v14636_v23, %v10332_v63  ;;  %v10330_v29 = vsel %vm10329_vm1, %v14634_v54, %v10326_v16  ;;  %vm10347_vm6 = vweird.f32 %v18816_v59 }
 0x513   : > { %v8424_v57 = vmul.f32 %v18824_v4, %v18824_v4  ;;  %v7655_v53 = vmul.f32 %v18821_v17, %v18821_v17  ;;  %v11165_v56 = vmul.f32 %v10330_v29, %v8813_v22 }
 0x514   : > { %v10334_v43 = vmul.f32 0.5, %v10333_v0  ;;  %v4705_v12 = vpop.f32.mrf.mxu2 }
 0x515   : > { %v6389_v39 = vpop.f32.mrf.mxu3  ;;  %v8620_v52 = vsub.f32 %v8228_v3, %v8424_v57  ;;  %v4981_v58 = vadd.f32 %v4705_v12, %v3218_v18  ;;  %7993 = vadd.xlane.f32.xlu2 %v7655_v53  ;;  %v11365_v1 = vmul.f32 %v18474_v47, %v11165_v56  ;;  %7202 = vadd.xlane.f32.xlu1 %v18821_v17 }
 0x516   : > { %v1931_v26 = vpop.f32.mrf.mxu0  ;;  %v3220_v54 = vpop.f32.mrf.mxu1  ;;  %v10335_v49 = vsub.f32 1.5, %v10334_v43  ;;  %v8814_v47 = vsub.f32 %v18357_v27, %v18772_v61 }
 0x517   : > { %v18840_v50 = vadd.f32 1e-05, %v8620_v52  ;;  %v6665_v8 = vadd.f32 %v6389_v39, %v4981_v58  ;;  %12433 = vmatmul.msk.bf16.gmra.mxu0 %vm1267_vm0, %v14119_v6  ;;  %v14638_v11 = vpop.eup %14637  ;;  %v11565_v28 = vadd.f32 %v18483_v31, %v11365_v1  ;;  %v3221_v42 = vadd.f32 %v3220_v54, %v1931_v26  ;;  %v18876_v6 = vld [vmem:[%s20452_s7] ss:$0 sm:$0xff] }
 0x518   : > { %12927 = vmatmul.msk.bf16.gmra.mxu1 %vm1267_vm0, %v14020_v62  ;;  %v10336_v38 = vmul.f32 %v14636_v23, %v10335_v49  ;;  %v7966_v48 = vpop.xlane.xlu0 %7965  ;;  %v10342_v34 = vmul.f32 %v14638_v11, %v18816_v59  ;;  %v7175_v36 = vpop.xlane.xlu2 %7174  ;;  %vm10348_vm5 = vweird.f32 %v14638_v11 }
 0x519   : > { %14639 = vrsqrt.f32 %v18840_v50  ;;  %13423 = vmatmul.msk.bf16.gmra.mxu2 %vm1267_vm0, %v14218_v37  ;;  %11761 = vst [vmem:[%s15334_s24 + $0x3e0] sm:$0xff] %v11565_v28  ;;  %v18854_v24 = vadd.f32 %v18658_v46, %v6665_v8  ;;  %v18857_v7 = vmul.f32 %v15231_v41, %v7175_v36  ;;  %v8229_v63 = vmul.f32 %v7966_v48, %v15231_v41  ;;  %vm10349_vm7 = vmor %vm10347_vm6, %vm10348_vm5  ;;  %v14120_v48 = vld [vmem:[%s14992_s13 + $0x288] sm:$0xff] }
 0x51a   : > { %13919 = vmatmul.msk.bf16.gmra.mxu3 %vm1267_vm0, %v14317_v33  ;;  %v10340_v31 = vsel %vm10339_vm4, %v14636_v23, %v10336_v38  ;;  %v10343_v61 = vmul.f32 %v14638_v11, %v10342_v34  ;;  %v18867_v23 = vld [vmem:[%s20451_s6] ss:$0 sm:$0xff]  ;;  %v8815_v33 = vsub.f32 %v18376_v60, %v18805_v44  ;;  %vm10357_vm9 = vweird.f32 %v18840_v50 }
 0x51b   : > { %v11166_v27 = vmul.f32 %v10340_v31, %v8814_v47  ;;  %v8425_v14 = vmul.f32 %v18857_v7, %v18857_v7  ;;  %v7656_v21 = vmul.f32 %v18854_v24, %v18854_v24  ;;  %v14021_v47 = vld [vmem:[%s14997_s19 + $0x288] sm:$0xff] }
 0x51c   : > { %v4708_v9 = vpop.f32.mrf.mxu2  ;;  %v10344_v0 = vmul.f32 0.5, %v10343_v61  ;;  %v14219_v61 = vld [vmem:[%s15004_s22 + $0x288] sm:$0xff] }
 0x51d   : > { %v6392_v16 = vpop.f32.mrf.mxu3  ;;  %v11366_v22 = vmul.f32 %v18867_v23, %v11166_v27  ;;  %v4982_v18 = vadd.f32 %v4708_v9, %v3221_v42  ;;  %7204 = vadd.xlane.f32.xlu2 %v18854_v24  ;;  %v8621_v57 = vsub.f32 %v8229_v63, %v8425_v14  ;;  %7995 = vadd.xlane.f32.xlu0 %v7656_v21  ;;  %v14318_v14 = vld [vmem:[%s15009_s25 + $0x288] sm:$0xff] }
 0x51e   : > { %v1933_v29 = vpop.f32.mrf.mxu0  ;;  %v3222_v3 = vpop.f32.mrf.mxu1  ;;  %v10345_v56 = vsub.f32 1.5, %v10344_v0 }
 0x51f   : > { %v18871_v53 = vpop.eup %14639  ;;  %v11566_v62 = vadd.f32 %v18876_v6, %v11366_v22  ;;  %v6666_v43 = vadd.f32 %v6392_v16, %v4982_v18  ;;  %v18881_v39 = vadd.f32 1e-05, %v8621_v57  ;;  %v3223_v49 = vadd.f32 %v3222_v3, %v1933_v29 }
 0x520   : > { %v10352_v12 = vmul.f32 %v18871_v53, %v18840_v50  ;;  %v7177_v52 = vpop.xlane.xlu0 %7176  ;;  %v10346_v58 = vmul.f32 %v14638_v11, %v10345_v56  ;;  %v7968_v37 = vpop.xlane.xlu1 %7967  ;;  %vm10358_vm8 = vweird.f32 %v18871_v53  ;;  %v8816_v3 = vsub.f32 %v18409_v51, %v18824_v4 }
 0x521   : > { %11762 = vst [vmem:[%s15334_s24 + $0x3e8] sm:$0xff] %v11566_v62  ;;  %v18886_v26 = vadd.f32 %v18658_v46, %v6666_v43  ;;  %v18889_v54 = vmul.f32 %v15231_v41, %v7177_v52  ;;  %14641 = vrsqrt.f32 %v18881_v39  ;;  %v8230_v28 = vmul.f32 %v7968_v37, %v15231_v41  ;;  %vm10359_vm10 = vmor %vm10357_vm9, %vm10358_vm8 }
 0x522   : > { %v10353_v1 = vmul.f32 %v18871_v53, %v10352_v12  ;;  %v10350_v8 = vsel %vm10349_vm7, %v14638_v11, %v10346_v58  ;;  %vm10367_vm12 = vweird.f32 %v18881_v39 }
 0x523   : > { %v8426_v59 = vmul.f32 %v18889_v54, %v18889_v54  ;;  %v7657_v38 = vmul.f32 %v18886_v26, %v18886_v26  ;;  %v11167_v60 = vmul.f32 %v10350_v8, %v8815_v33 }
 0x524   : > { %v10354_v44 = vmul.f32 0.5, %v10353_v1  ;;  %v4710_v34 = vpop.f32.mrf.mxu2 }
 0x525   : > { %v6394_v42 = vpop.f32.mrf.mxu3  ;;  %v8622_v36 = vsub.f32 %v8230_v28, %v8426_v59  ;;  %v4983_v31 = vadd.f32 %v4710_v34, %v3223_v49  ;;  %7997 = vadd.xlane.f32.xlu1 %v7657_v38  ;;  %v11367_v63 = vmul.f32 %v18867_v23, %v11167_v60  ;;  %7206 = vadd.xlane.f32.xlu0 %v18886_v26 }
 0x526   : > { %v1936_v27 = vpop.f32.mrf.mxu0  ;;  %v3225_v11 = vpop.f32.mrf.mxu1  ;;  %v10355_v9 = vsub.f32 1.5, %v10354_v44 }
 0x527   : > { %v18907_v16 = vadd.f32 1e-05, %v8622_v36  ;;  %v6667_v21 = vadd.f32 %v6394_v42, %v4983_v31  ;;  %12434 = vmatmul.msk.bf16.gmra.mxu0 %vm1267_vm0, %v14120_v48  ;;  %v14642_v22 = vpop.eup %14641  ;;  %v11567_v0 = vadd.f32 %v18876_v6, %v11367_v63  ;;  %v3226_v62 = vadd.f32 %v3225_v11, %v1936_v27 }
 0x528   : > { %12928 = vmatmul.msk.bf16.gmra.mxu1 %vm1267_vm0, %v14021_v47  ;;  %v10356_v18 = vmul.f32 %v18871_v53, %v10355_v9  ;;  %v7970_v29 = vpop.xlane.xlu2 %7969  ;;  %v10362_v57 = vmul.f32 %v14642_v22, %v18881_v39  ;;  %v7179_v56 = vpop.xlane.xlu1 %7178  ;;  %vm10368_vm11 = vweird.f32 %v14642_v22 }
 0x529   : > { %14643 = vrsqrt.f32 %v18907_v16  ;;  %13424 = vmatmul.msk.bf16.gmra.mxu2 %vm1267_vm0, %v14219_v61  ;;  %11763 = vst [vmem:[%s15334_s24 + $0x3f0] sm:$0xff] %v11567_v0  ;;  %v18923_v50 = vadd.f32 %v18658_v46, %v6667_v21  ;;  %v18926_v12 = vmul.f32 %v15231_v41, %v7179_v56  ;;  %v8231_v52 = vmul.f32 %v7970_v29, %v15231_v41  ;;  %vm10369_vm13 = vmor %vm10367_vm12, %vm10368_vm11  ;;  %v14121_v29 = vld [vmem:[%s14992_s13 + $0x290] sm:$0xff] }
 0x52a   : > { %13920 = vmatmul.msk.bf16.gmra.mxu3 %vm1267_vm0, %v14318_v14  ;;  %v10360_v43 = vsel %vm10359_vm10, %v18871_v53, %v10356_v18  ;;  %v10363_v4 = vmul.f32 %v14642_v22, %v10362_v57  ;;  %v8817_v14 = vsub.f32 %v18428_v10, %v18857_v7  ;;  %vm10377_vm15 = vweird.f32 %v18907_v16 }
 0x52b   : > { %v11168_v51 = vmul.f32 %v10360_v43, %v8816_v3  ;;  %v8427_v58 = vmul.f32 %v18926_v12, %v18926_v12  ;;  %v7658_v1 = vmul.f32 %v18923_v50, %v18923_v50  ;;  %v14022_v3 = vld [vmem:[%s14997_s19 + $0x290] sm:$0xff] }
 0x52c   : > { %v4713_v37 = vpop.f32.mrf.mxu2  ;;  %v10364_v49 = vmul.f32 0.5, %v10363_v4  ;;  %v14220_v4 = vld [vmem:[%s15004_s22 + $0x290] sm:$0xff] }
 0x52d   : > { %v6397_v33 = vpop.f32.mrf.mxu3  ;;  %v11368_v53 = vmul.f32 %v18867_v23, %v11168_v51  ;;  %v4984_v8 = vadd.f32 %v4713_v37, %v3226_v62  ;;  %7208 = vadd.xlane.f32.xlu1 %v18923_v50  ;;  %v8623_v38 = vsub.f32 %v8231_v52, %v8427_v58  ;;  %7999 = vadd.xlane.f32.xlu2 %v7658_v1  ;;  %v14319_v52 = vld [vmem:[%s15009_s25 + $0x290] sm:$0xff] }
 0x52e   : > { %v1938_v59 = vpop.f32.mrf.mxu0  ;;  %v3227_v28 = vpop.f32.mrf.mxu1  ;;  %v10365_v60 = vsub.f32 1.5, %v10364_v49 }
 0x52f   : > { %v14644_v48 = vpop.eup %14643  ;;  %v11568_v47 = vadd.f32 %v18876_v6, %v11368_v53  ;;  %v6668_v44 = vadd.f32 %v6397_v33, %v4984_v8  ;;  %v18937_v42 = vadd.f32 1e-05, %v8623_v38  ;;  %v3228_v9 = vadd.f32 %v3227_v28, %v1938_v59 }
 0x530   : > { %v10372_v34 = vmul.f32 %v14644_v48, %v18907_v16  ;;  %v7181_v36 = vpop.xlane.xlu2 %7180  ;;  %v10366_v31 = vmul.f32 %v14642_v22, %v10365_v60  ;;  %v7972_v61 = vpop.xlane.xlu0 %7971  ;;  %vm10378_vm14 = vweird.f32 %v14644_v48  ;;  %v8818_v28 = vsub.f32 %v18461_v20, %v18889_v54 }
 0x531   : > { %11764 = vst [vmem:[%s15334_s24 + $0x3f8] sm:$0xff] %v11568_v47  ;;  %v18942_v27 = vadd.f32 %v18658_v46, %v6668_v44  ;;  %v18945_v11 = vmul.f32 %v15231_v41, %v7181_v36  ;;  %14645 = vrsqrt.f32 %v18937_v42  ;;  %v8232_v0 = vmul.f32 %v7972_v61, %v15231_v41  ;;  %vm10379_vm1 = vmor %vm10377_vm15, %vm10378_vm14 }
 0x532   : > { %v10373_v63 = vmul.f32 %v14644_v48, %v10372_v34  ;;  %v10370_v21 = vsel %vm10369_vm13, %v14642_v22, %v10366_v31  ;;  %vm10387_vm3 = vweird.f32 %v18937_v42 }
 0x533   : > { %v8428_v39 = vmul.f32 %v18945_v11, %v18945_v11  ;;  %v7659_v18 = vmul.f32 %v18942_v27, %v18942_v27  ;;  %v11169_v57 = vmul.f32 %v10370_v21, %v8817_v14 }
 0x534   : > { %v10374_v10 = vmul.f32 0.5, %v10373_v63  ;;  %v4715_v7 = vpop.f32.mrf.mxu2 }
 0x535   : > { %v6399_v62 = vpop.f32.mrf.mxu3  ;;  %v8624_v56 = vsub.f32 %v8232_v0, %v8428_v39  ;;  %v4985_v43 = vadd.f32 %v4715_v7, %v3228_v9  ;;  %8001 = vadd.xlane.f32.xlu0 %v7659_v18  ;;  %v11369_v58 = vmul.f32 %v18867_v23, %v11169_v57  ;;  %7210 = vadd.xlane.f32.xlu2 %v18942_v27 }
 0x536   : > { %v1941_v51 = vpop.f32.mrf.mxu0  ;;  %v3230_v22 = vpop.f32.mrf.mxu1  ;;  %v10375_v37 = vsub.f32 1.5, %v10374_v10 }
 0x537   : > { %v18961_v33 = vadd.f32 1e-05, %v8624_v56  ;;  %v6669_v1 = vadd.f32 %v6399_v62, %v4985_v43  ;;  %12435 = vmatmul.msk.bf16.gmra.mxu0 %vm1267_vm0, %v14121_v29  ;;  %v14646_v53 = vpop.eup %14645  ;;  %v11569_v49 = vadd.f32 %v18876_v6, %v11369_v58  ;;  %v3231_v47 = vadd.f32 %v3230_v22, %v1941_v51 }
 0x538   : > { %12929 = vmatmul.msk.bf16.gmra.mxu1 %vm1267_vm0, %v14022_v3  ;;  %v10376_v8 = vmul.f32 %v14644_v48, %v10375_v37  ;;  %v7974_v59 = vpop.xlane.xlu1 %7973  ;;  %v10382_v38 = vmul.f32 %v14646_v53, %v18937_v42  ;;  %v7183_v60 = vpop.xlane.xlu0 %7182  ;;  %vm10388_vm2 = vweird.f32 %v14646_v53 }
 0x539   : > { %14647 = vrsqrt.f32 %v18961_v33  ;;  %13425 = vmatmul.msk.bf16.gmra.mxu2 %vm1267_vm0, %v14220_v4  ;;  %11765 = vst [vmem:[%s15334_s24 + $0x400] sm:$0xff] %v11569_v49  ;;  %v18975_v34 = vadd.f32 %v18658_v46, %v6669_v1  ;;  %v18978_v16 = vmul.f32 %v15231_v41, %v7183_v60  ;;  %v8233_v31 = vmul.f32 %v7974_v59, %v15231_v41  ;;  %vm10389_vm4 = vmor %vm10387_vm3, %vm10388_vm2  ;;  %v14122_v59 = vld [vmem:[%s14992_s13 + $0x298] sm:$0xff] }
 0x53a   : > { %13921 = vmatmul.msk.bf16.gmra.mxu3 %vm1267_vm0, %v14319_v52  ;;  %v10380_v44 = vsel %vm10379_vm1, %v14644_v48, %v10376_v8  ;;  %v10383_v54 = vmul.f32 %v14646_v53, %v10382_v38  ;;  %v8819_v52 = vsub.f32 %v18493_v55, %v18926_v12  ;;  %vm10397_vm6 = vweird.f32 %v18961_v33 }
 0x53b   : > { %v11170_v20 = vmul.f32 %v10380_v44, %v8818_v28  ;;  %v8429_v36 = vmul.f32 %v18978_v16, %v18978_v16  ;;  %v7660_v63 = vmul.f32 %v18975_v34, %v18975_v34  ;;  %v14023_v28 = vld [vmem:[%s14997_s19 + $0x298] sm:$0xff] }
 0x53c   : > { %v4718_v61 = vpop.f32.mrf.mxu2  ;;  %v10384_v9 = vmul.f32 0.5, %v10383_v54  ;;  %v14221_v54 = vld [vmem:[%s15004_s22 + $0x298] sm:$0xff] }
 0x53d   : > { %v6402_v14 = vpop.f32.mrf.mxu3  ;;  %v11370_v48 = vmul.f32 %v18867_v23, %v11170_v20  ;;  %v4986_v21 = vadd.f32 %v4718_v61, %v3231_v47  ;;  %7212 = vadd.xlane.f32.xlu0 %v18975_v34  ;;  %v8625_v18 = vsub.f32 %v8233_v31, %v8429_v36  ;;  %8003 = vadd.xlane.f32.xlu1 %v7660_v63  ;;  %v14320_v36 = vld [vmem:[%s15009_s25 + $0x298] sm:$0xff] }
 0x53e   : > { %v1943_v39 = vpop.f32.mrf.mxu0  ;;  %v3232_v0 = vpop.f32.mrf.mxu1  ;;  %v10385_v57 = vsub.f32 1.5, %v10384_v9 }
 0x53f   : > { %v14648_v29 = vpop.eup %14647  ;;  %v11570_v3 = vadd.f32 %v18876_v6, %v11370_v48  ;;  %v6670_v10 = vadd.f32 %v6402_v14, %v4986_v21  ;;  %v18989_v62 = vadd.f32 1e-05, %v8625_v18  ;;  %v3233_v37 = vadd.f32 %v3232_v0, %v1943_v39 }
 0x540   : > { %v10392_v7 = vmul.f32 %v14648_v29, %v18961_v33  ;;  %v7185_v56 = vpop.xlane.xlu1 %7184  ;;  %v10386_v43 = vmul.f32 %v14646_v53, %v10385_v57  ;;  %v7976_v22 = vpop.xlane.xlu2 %7975  ;;  %vm10398_vm5 = vweird.f32 %v14648_v29  ;;  %v8820_v0 = vsub.f32 %v18530_v32, %v18945_v11 }
 0x541   : > { %11766 = vst [vmem:[%s15334_s24 + $0x408] sm:$0xff] %v11570_v3  ;;  %v18994_v51 = vadd.f32 %v18658_v46, %v6670_v10  ;;  %v18997_v4 = vmul.f32 %v15231_v41, %v7185_v56  ;;  %14649 = vrsqrt.f32 %v18989_v62  ;;  %v8234_v42 = vmul.f32 %v7976_v22, %v15231_v41  ;;  %vm10399_vm7 = vmor %vm10397_vm6, %vm10398_vm5 }
 0x542   : > { %v10393_v58 = vmul.f32 %v14648_v29, %v10392_v7  ;;  %v10390_v1 = vsel %vm10389_vm4, %v14646_v53, %v10386_v43  ;;  %vm10407_vm9 = vweird.f32 %v18989_v62 }
 0x543   : > { %v8430_v49 = vmul.f32 %v18997_v4, %v18997_v4  ;;  %v7661_v8 = vmul.f32 %v18994_v51, %v18994_v51  ;;  %v11171_v38 = vmul.f32 %v10390_v1, %v8819_v52 }
 0x544   : > { %v10394_v55 = vmul.f32 0.5, %v10393_v58  ;;  %v4720_v12 = vpop.f32.mrf.mxu2 }
 0x545   : > { %v6404_v47 = vpop.f32.mrf.mxu3  ;;  %v8626_v60 = vsub.f32 %v8234_v42, %v8430_v49  ;;  %v4987_v44 = vadd.f32 %v4720_v12, %v3233_v37  ;;  %8005 = vadd.xlane.f32.xlu2 %v7661_v8  ;;  %v11371_v31 = vmul.f32 %v18867_v23, %v11171_v38  ;;  %7214 = vadd.xlane.f32.xlu1 %v18994_v51 }
 0x546   : > { %v1946_v20 = vpop.f32.mrf.mxu0  ;;  %v3235_v53 = vpop.f32.mrf.mxu1  ;;  %v10395_v61 = vsub.f32 1.5, %v10394_v55 }
 0x547   : > { %v19013_v14 = vadd.f32 1e-05, %v8626_v60  ;;  %v6671_v63 = vadd.f32 %v6404_v47, %v4987_v44  ;;  %12436 = vmatmul.msk.bf16.gmra.mxu0 %vm1267_vm0, %v14122_v59  ;;  %v14650_v48 = vpop.eup %14649  ;;  %v11571_v9 = vadd.f32 %v18876_v6, %v11371_v31  ;;  %v3236_v3 = vadd.f32 %v3235_v53, %v1946_v20  ;;  %v19051_v44 = vld [vmem:[%s20450_s5] ss:$0 sm:$0xff] }
 0x548   : > { %12930 = vmatmul.msk.bf16.gmra.mxu1 %vm1267_vm0, %v14023_v28  ;;  %v10396_v21 = vmul.f32 %v14648_v29, %v10395_v61  ;;  %v7978_v39 = vpop.xlane.xlu0 %7977  ;;  %v10402_v18 = vmul.f32 %v14650_v48, %v18989_v62  ;;  %v7187_v57 = vpop.xlane.xlu2 %7186  ;;  %vm10408_vm8 = vweird.f32 %v14650_v48 }
 0x549   : > { %14651 = vrsqrt.f32 %v19013_v14  ;;  %13426 = vmatmul.msk.bf16.gmra.mxu2 %vm1267_vm0, %v14221_v54  ;;  %11767 = vst [vmem:[%s15334_s24 + $0x410] sm:$0xff] %v11571_v9  ;;  %v19027_v7 = vadd.f32 %v18658_v46, %v6671_v63  ;;  %v19030_v33 = vmul.f32 %v15231_v41, %v7187_v57  ;;  %v8235_v43 = vmul.f32 %v7978_v39, %v15231_v41  ;;  %vm10409_vm10 = vmor %vm10407_vm9, %vm10408_vm8  ;;  %v14123_v39 = vld [vmem:[%s14992_s13 + $0x2a0] sm:$0xff] }
 0x54a   : > { %13922 = vmatmul.msk.bf16.gmra.mxu3 %vm1267_vm0, %v14320_v36  ;;  %v10400_v10 = vsel %vm10399_vm7, %v14648_v29, %v10396_v21  ;;  %v10403_v11 = vmul.f32 %v14650_v48, %v10402_v18  ;;  %v8821_v36 = vsub.f32 %v18549_v19, %v18978_v16  ;;  %vm10417_vm12 = vweird.f32 %v19013_v14 }
 0x54b   : > { %v11172_v32 = vmul.f32 %v10400_v10, %v8820_v0  ;;  %v8431_v56 = vmul.f32 %v19030_v33, %v19030_v33  ;;  %v7662_v58 = vmul.f32 %v19027_v7, %v19027_v7  ;;  %v14024_v0 = vld [vmem:[%s14997_s19 + $0x2a0] sm:$0xff] }
 0x54c   : > { %v4723_v22 = vpop.f32.mrf.mxu2  ;;  %v10404_v46 = vmul.f32 0.5, %v10403_v11  ;;  %v14222_v11 = vld [vmem:[%s15004_s22 + $0x2a0] sm:$0xff] }
 0x54d   : > { %v6407_v52 = vpop.f32.mrf.mxu3  ;;  %v11372_v29 = vmul.f32 %v18867_v23, %v11172_v32  ;;  %v4988_v37 = vadd.f32 %v4723_v22, %v3236_v3  ;;  %7216 = vadd.xlane.f32.xlu2 %v19027_v7  ;;  %v8627_v49 = vsub.f32 %v8235_v43, %v8431_v56  ;;  %8007 = vadd.xlane.f32.xlu0 %v7662_v58  ;;  %v14321_v56 = vld [vmem:[%s15009_s25 + $0x2a0] sm:$0xff] }
 0x54e   : > { %v1948_v1 = vpop.f32.mrf.mxu0  ;;  %v3237_v42 = vpop.f32.mrf.mxu1  ;;  %v10405_v28 = vsub.f32 1.5, %v10404_v46 }
 0x54f   : > { %v19039_v8 = vpop.eup %14651  ;;  %v11572_v59 = vadd.f32 %v18876_v6, %v11372_v29  ;;  %v6672_v38 = vadd.f32 %v6407_v52, %v4988_v37  ;;  %v19044_v12 = vadd.f32 1e-05, %v8627_v49  ;;  %v3238_v62 = vadd.f32 %v3237_v42, %v1948_v1 }
 0x550   : > { %v10412_v55 = vmul.f32 %v19039_v8, %v19013_v14  ;;  %v7189_v47 = vpop.xlane.xlu0 %7188  ;;  %v10406_v60 = vmul.f32 %v14650_v48, %v10405_v28  ;;  %v7980_v54 = vpop.xlane.xlu1 %7979  ;;  %vm10418_vm11 = vweird.f32 %v19039_v8  ;;  %v8822_v42 = vsub.f32 %v18582_v30, %v18997_v4 }
 0x551   : > { %11768 = vst [vmem:[%s15334_s24 + $0x418] sm:$0xff] %v11572_v59  ;;  %v19054_v20 = vadd.f32 %v19051_v44, %v6672_v38  ;;  %v19057_v53 = vmul.f32 %v15231_v41, %v7189_v47  ;;  %14653 = vrsqrt.f32 %v19044_v12  ;;  %v8236_v9 = vmul.f32 %v7980_v54, %v15231_v41  ;;  %vm10419_vm13 = vmor %vm10417_vm12, %vm10418_vm11 }
 0x552   : > { %v10413_v31 = vmul.f32 %v19039_v8, %v10412_v55  ;;  %v10410_v61 = vsel %vm10409_vm10, %v14650_v48, %v10406_v60  ;;  %vm10427_vm15 = vweird.f32 %v19044_v12 }
 0x553   : > { %v8432_v63 = vmul.f32 %v19057_v53, %v19057_v53  ;;  %v7663_v21 = vmul.f32 %v19054_v20, %v19054_v20  ;;  %v11173_v19 = vmul.f32 %v10410_v61, %v8821_v36 }
 0x554   : > { %v10414_v16 = vmul.f32 0.5, %v10413_v31  ;;  %v4725_v18 = vpop.f32.mrf.mxu2 }
 0x555   : > { %v6409_v3 = vpop.f32.mrf.mxu3  ;;  %v8628_v57 = vsub.f32 %v8236_v9, %v8432_v63  ;;  %v4989_v10 = vadd.f32 %v4725_v18, %v3238_v62  ;;  %8009 = vadd.xlane.f32.xlu1 %v7663_v21  ;;  %v11373_v43 = vmul.f32 %v18867_v23, %v11173_v19  ;;  %7218 = vadd.xlane.f32.xlu0 %v19054_v20 }
 0x556   : > { %v1951_v32 = vpop.f32.mrf.mxu0  ;;  %v3240_v48 = vpop.f32.mrf.mxu1  ;;  %v10415_v22 = vsub.f32 1.5, %v10414_v16 }
 0x557   : > { %v19075_v52 = vadd.f32 1e-05, %v8628_v57  ;;  %v6673_v58 = vadd.f32 %v6409_v3, %v4989_v10  ;;  %12437 = vmatmul.msk.bf16.gmra.mxu0 %vm1267_vm0, %v14123_v39  ;;  %v14654_v29 = vpop.eup %14653  ;;  %v11573_v46 = vadd.f32 %v18876_v6, %v11373_v43  ;;  %v3241_v59 = vadd.f32 %v3240_v48, %v1951_v32 }
 0x558   : > { %12931 = vmatmul.msk.bf16.gmra.mxu1 %vm1267_vm0, %v14024_v0  ;;  %v10416_v37 = vmul.f32 %v19039_v8, %v10415_v22  ;;  %v7982_v1 = vpop.xlane.xlu2 %7981  ;;  %v10422_v49 = vmul.f32 %v14654_v29, %v19044_v12  ;;  %v7191_v28 = vpop.xlane.xlu1 %7190  ;;  %vm10428_vm14 = vweird.f32 %v14654_v29 }
 0x559   : > { %14655 = vrsqrt.f32 %v19075_v52  ;;  %13427 = vmatmul.msk.bf16.gmra.mxu2 %vm1267_vm0, %v14222_v11  ;;  %11769 = vst [vmem:[%s15334_s24 + $0x420] sm:$0xff] %v11573_v46  ;;  %v19091_v14 = vadd.f32 %v19051_v44, %v6673_v58  ;;  %v19094_v55 = vmul.f32 %v15231_v41, %v7191_v28  ;;  %v8237_v47 = vmul.f32 %v7982_v1, %v15231_v41  ;;  %vm10429_vm1 = vmor %vm10427_vm15, %vm10428_vm14  ;;  %v14124_v1 = vld [vmem:[%s14992_s13 + $0x2a8] sm:$0xff] }
 0x55a   : > { %13923 = vmatmul.msk.bf16.gmra.mxu3 %vm1267_vm0, %v14321_v56  ;;  %v10420_v38 = vsel %vm10419_vm13, %v19039_v8, %v10416_v37  ;;  %v10423_v4 = vmul.f32 %v14654_v29, %v10422_v49  ;;  %v8823_v56 = vsub.f32 %v18601_v40, %v19030_v33  ;;  %vm10437_vm3 = vweird.f32 %v19075_v52 }
 0x55b   : > { %v11174_v30 = vmul.f32 %v10420_v38, %v8822_v42  ;;  %v8433_v60 = vmul.f32 %v19094_v55, %v19094_v55  ;;  %v7664_v31 = vmul.f32 %v19091_v14, %v19091_v14  ;;  %v14025_v42 = vld [vmem:[%s14997_s19 + $0x2a8] sm:$0xff] }
 0x55c   : > { %v4728_v54 = vpop.f32.mrf.mxu2  ;;  %v10424_v62 = vmul.f32 0.5, %v10423_v4  ;;  %v14223_v4 = vld [vmem:[%s15004_s22 + $0x2a8] sm:$0xff] }
 0x55d   : > { %v6412_v36 = vpop.f32.mrf.mxu3  ;;  %v11374_v8 = vmul.f32 %v18867_v23, %v11174_v30  ;;  %v4990_v61 = vadd.f32 %v4728_v54, %v3241_v59  ;;  %7220 = vadd.xlane.f32.xlu1 %v19091_v14  ;;  %v8629_v21 = vsub.f32 %v8237_v47, %v8433_v60  ;;  %8011 = vadd.xlane.f32.xlu2 %v7664_v31  ;;  %v14322_v47 = vld [vmem:[%s15009_s25 + $0x2a8] sm:$0xff] }
 0x55e   : > { %v1953_v63 = vpop.f32.mrf.mxu0  ;;  %v3242_v9 = vpop.f32.mrf.mxu1  ;;  %v10425_v19 = vsub.f32 1.5, %v10424_v62 }
 0x55f   : > { %v14656_v39 = vpop.eup %14655  ;;  %v11574_v0 = vadd.f32 %v18876_v6, %v11374_v8  ;;  %v6674_v16 = vadd.f32 %v6412_v36, %v4990_v61  ;;  %v19105_v3 = vadd.f32 1e-05, %v8629_v21  ;;  %v3243_v22 = vadd.f32 %v3242_v9, %v1953_v63 }
 0x560   : > { %v10432_v18 = vmul.f32 %v14656_v39, %v19075_v52  ;;  %v7193_v57 = vpop.xlane.xlu2 %7192  ;;  %v10426_v10 = vmul.f32 %v14654_v29, %v10425_v19  ;;  %v7984_v11 = vpop.xlane.xlu0 %7983  ;;  %vm10438_vm2 = vweird.f32 %v14656_v39  ;;  %v8824_v9 = vsub.f32 %v18634_v13, %v19057_v53 }
 0x561   : > { %11770 = vst [vmem:[%s15334_s24 + $0x428] sm:$0xff] %v11574_v0  ;;  %v19110_v32 = vadd.f32 %v19051_v44, %v6674_v16  ;;  %v19113_v48 = vmul.f32 %v15231_v41, %v7193_v57  ;;  %14657 = vrsqrt.f32 %v19105_v3  ;;  %v8238_v46 = vmul.f32 %v7984_v11, %v15231_v41  ;;  %vm10439_vm4 = vmor %vm10437_vm3, %vm10438_vm2 }
 0x562   : > { %v10433_v43 = vmul.f32 %v14656_v39, %v10432_v18  ;;  %v10430_v58 = vsel %vm10429_vm1, %v14654_v29, %v10426_v10  ;;  %vm10447_vm6 = vweird.f32 %v19105_v3 }
 0x563   : > { %v8434_v12 = vmul.f32 %v19113_v48, %v19113_v48  ;;  %v7665_v37 = vmul.f32 %v19110_v32, %v19110_v32  ;;  %v11175_v49 = vmul.f32 %v10430_v58, %v8823_v56 }
 0x564   : > { %v10434_v40 = vmul.f32 0.5, %v10433_v43  ;;  %v4730_v33 = vpop.f32.mrf.mxu2 }
 0x565   : > { %v6414_v59 = vpop.f32.mrf.mxu3  ;;  %v8630_v28 = vsub.f32 %v8238_v46, %v8434_v12  ;;  %v4991_v38 = vadd.f32 %v4730_v33, %v3243_v22  ;;  %8013 = vadd.xlane.f32.xlu0 %v7665_v37  ;;  %v11375_v60 = vmul.f32 %v18867_v23, %v11175_v49  ;;  %7222 = vadd.xlane.f32.xlu2 %v19110_v32 }
 0x566   : > { %v1956_v30 = vpop.f32.mrf.mxu0  ;;  %v3245_v29 = vpop.f32.mrf.mxu1  ;;  %v10435_v54 = vsub.f32 1.5, %v10434_v40 }
 0x567   : > { %v19129_v36 = vadd.f32 1e-05, %v8630_v28  ;;  %v6675_v31 = vadd.f32 %v6414_v59, %v4991_v38  ;;  %12438 = vmatmul.msk.bf16.gmra.mxu0 %vm1267_vm0, %v14124_v1  ;;  %v14658_v8 = vpop.eup %14657  ;;  %v11575_v62 = vadd.f32 %v18876_v6, %v11375_v60  ;;  %v3246_v0 = vadd.f32 %v3245_v29, %v1956_v30 }
 0x568   : > { %12932 = vmatmul.msk.bf16.gmra.mxu1 %vm1267_vm0, %v14025_v42  ;;  %v10436_v61 = vmul.f32 %v14656_v39, %v10435_v54  ;;  %v7986_v63 = vpop.xlane.xlu1 %7985  ;;  %v10442_v21 = vmul.f32 %v14658_v8, %v19105_v3  ;;  %v7195_v19 = vpop.xlane.xlu0 %7194  ;;  %vm10448_vm5 = vweird.f32 %v14658_v8 }
 0x569   : > { %14659 = vrsqrt.f32 %v19129_v36  ;;  %13428 = vmatmul.msk.bf16.gmra.mxu2 %vm1267_vm0, %v14223_v4  ;;  %11771 = vst [vmem:[%s15334_s24 + $0x430] sm:$0xff] %v11575_v62  ;;  %v19143_v18 = vadd.f32 %v19051_v44, %v6675_v31  ;;  %v19146_v52 = vmul.f32 %v15231_v41, %v7195_v19  ;;  %v8239_v10 = vmul.f32 %v7986_v63, %v15231_v41  ;;  %vm10449_vm7 = vmor %vm10447_vm6, %vm10448_vm5  ;;  %v14125_v63 = vld [vmem:[%s14992_s13 + $0x2b0] sm:$0xff] }
 0x56a   : > { %13924 = vmatmul.msk.bf16.gmra.mxu3 %vm1267_vm0, %v14322_v47  ;;  %v10440_v16 = vsel %vm10439_vm4, %v14656_v39, %v10436_v61  ;;  %v10443_v53 = vmul.f32 %v14658_v8, %v10442_v21  ;;  %v8825_v47 = vsub.f32 %v18661_v15, %v19094_v55  ;;  %vm10457_vm9 = vweird.f32 %v19129_v36 }
 0x56b   : > { %v11176_v13 = vmul.f32 %v10440_v16, %v8824_v9  ;;  %v8435_v57 = vmul.f32 %v19146_v52, %v19146_v52  ;;  %v7666_v43 = vmul.f32 %v19143_v18, %v19143_v18  ;;  %v14026_v9 = vld [vmem:[%s14997_s19 + $0x2b0] sm:$0xff] }
 0x56c   : > { %v4733_v11 = vpop.f32.mrf.mxu2  ;;  %v10444_v22 = vmul.f32 0.5, %v10443_v53  ;;  %v14224_v53 = vld [vmem:[%s15004_s22 + $0x2b0] sm:$0xff] }
 0x56d   : > { %v6417_v56 = vpop.f32.mrf.mxu3  ;;  %v11376_v39 = vmul.f32 %v18867_v23, %v11176_v13  ;;  %v4992_v58 = vadd.f32 %v4733_v11, %v3246_v0  ;;  %7224 = vadd.xlane.f32.xlu0 %v19143_v18  ;;  %v8631_v37 = vsub.f32 %v8239_v10, %v8435_v57  ;;  %8015 = vadd.xlane.f32.xlu1 %v7666_v43  ;;  %v14323_v57 = vld [vmem:[%s15009_s25 + $0x2b0] sm:$0xff] }
 0x56e   : > { %v1958_v12 = vpop.f32.mrf.mxu0  ;;  %v3247_v46 = vpop.f32.mrf.mxu1  ;;  %v10445_v49 = vsub.f32 1.5, %v10444_v22 }
 0x56f   : > { %v14660_v1 = vpop.eup %14659  ;;  %v11576_v42 = vadd.f32 %v18876_v6, %v11376_v39  ;;  %v6676_v40 = vadd.f32 %v6417_v56, %v4992_v58  ;;  %v19157_v59 = vadd.f32 1e-05, %v8631_v37  ;;  %v3248_v54 = vadd.f32 %v3247_v46, %v1958_v12 }
 0x570   : > { %v10452_v33 = vmul.f32 %v14660_v1, %v19129_v36  ;;  %v7197_v28 = vpop.xlane.xlu1 %7196  ;;  %v10446_v38 = vmul.f32 %v14658_v8, %v10445_v49  ;;  %v7988_v29 = vpop.xlane.xlu2 %7987  ;;  %vm10458_vm8 = vweird.f32 %v14660_v1  ;;  %v8826_v46 = vsub.f32 %v18698_v25, %v19113_v48 }
 0x571   : > { %11772 = vst [vmem:[%s15334_s24 + $0x438] sm:$0xff] %v11576_v42  ;;  %v19162_v30 = vadd.f32 %v19051_v44, %v6676_v40  ;;  %v19165_v4 = vmul.f32 %v15231_v41, %v7197_v28  ;;  %14661 = vrsqrt.f32 %v19157_v59  ;;  %v8240_v3 = vmul.f32 %v7988_v29, %v15231_v41  ;;  %vm10459_vm10 = vmor %vm10457_vm9, %vm10458_vm8 }
 0x572   : > { %v10453_v60 = vmul.f32 %v14660_v1, %v10452_v33  ;;  %v10450_v31 = vsel %vm10449_vm7, %v14658_v8, %v10446_v38  ;;  %vm10467_vm12 = vweird.f32 %v19157_v59 }
 0x573   : > { %v8436_v62 = vmul.f32 %v19165_v4, %v19165_v4  ;;  %v7667_v61 = vmul.f32 %v19162_v30, %v19162_v30  ;;  %v11177_v21 = vmul.f32 %v10450_v31, %v8825_v47 }
 0x574   : > { %v10454_v15 = vmul.f32 0.5, %v10453_v60  ;;  %v4735_v55 = vpop.f32.mrf.mxu2 }
 0x575   : > { %v6419_v0 = vpop.f32.mrf.mxu3  ;;  %v8632_v19 = vsub.f32 %v8240_v3, %v8436_v62  ;;  %v4993_v16 = vadd.f32 %v4735_v55, %v3248_v54  ;;  %8017 = vadd.xlane.f32.xlu2 %v7667_v61  ;;  %v11377_v10 = vmul.f32 %v18867_v23, %v11177_v21  ;;  %7226 = vadd.xlane.f32.xlu1 %v19162_v30 }
 0x576   : > { %v1961_v13 = vpop.f32.mrf.mxu0  ;;  %v3250_v8 = vpop.f32.mrf.mxu1  ;;  %v10455_v11 = vsub.f32 1.5, %v10454_v15 }
 0x577   : > { %v19181_v56 = vadd.f32 1e-05, %v8632_v19  ;;  %v6677_v43 = vadd.f32 %v6419_v0, %v4993_v16  ;;  %12439 = vmatmul.msk.bf16.gmra.mxu0 %vm1267_vm0, %v14125_v63  ;;  %v14662_v39 = vpop.eup %14661  ;;  %v11577_v22 = vadd.f32 %v18876_v6, %v11377_v10  ;;  %v3251_v42 = vadd.f32 %v3250_v8, %v1961_v13 }
 0x578   : > { %12933 = vmatmul.msk.bf16.gmra.mxu1 %vm1267_vm0, %v14026_v9  ;;  %v10456_v58 = vmul.f32 %v14660_v1, %v10455_v11  ;;  %v7990_v12 = vpop.xlane.xlu0 %7989  ;;  %v10462_v37 = vmul.f32 %v14662_v39, %v19157_v59  ;;  %v7199_v49 = vpop.xlane.xlu2 %7198  ;;  %vm10468_vm11 = vweird.f32 %v14662_v39 }
 0x579   : > { %14663 = vrsqrt.f32 %v19181_v56  ;;  %13429 = vmatmul.msk.bf16.gmra.mxu2 %vm1267_vm0, %v14224_v53  ;;  %11773 = vst [vmem:[%s15334_s24 + $0x440] sm:$0xff] %v11577_v22  ;;  %v19195_v33 = vadd.f32 %v19051_v44, %v6677_v43  ;;  %v19198_v36 = vmul.f32 %v15231_v41, %v7199_v49  ;;  %v8241_v38 = vmul.f32 %v7990_v12, %v15231_v41  ;;  %vm10469_vm13 = vmor %vm10467_vm12, %vm10468_vm11  ;;  %v14126_v12 = vld [vmem:[%s14992_s13 + $0x2b8] sm:$0xff] }
 0x57a   : > { %13925 = vmatmul.msk.bf16.gmra.mxu3 %vm1267_vm0, %v14323_v57  ;;  %v10460_v40 = vsel %vm10459_vm10, %v14660_v1, %v10456_v58  ;;  %v10463_v48 = vmul.f32 %v14662_v39, %v10462_v37  ;;  %v8827_v57 = vsub.f32 %v18717_v45, %v19146_v52  ;;  %vm10477_vm15 = vweird.f32 %v19181_v56 }
 0x57b   : > { %v11178_v25 = vmul.f32 %v10460_v40, %v8826_v46  ;;  %v8437_v28 = vmul.f32 %v19198_v36, %v19198_v36  ;;  %v7668_v60 = vmul.f32 %v19195_v33, %v19195_v33  ;;  %v14027_v46 = vld [vmem:[%s14997_s19 + $0x2b8] sm:$0xff] }
 0x57c   : > { %v4738_v29 = vpop.f32.mrf.mxu2  ;;  %v10464_v54 = vmul.f32 0.5, %v10463_v48  ;;  %v14225_v48 = vld [vmem:[%s15004_s22 + $0x2b8] sm:$0xff] }
 0x57d   : > { %v6422_v47 = vpop.f32.mrf.mxu3  ;;  %v11378_v1 = vmul.f32 %v18867_v23, %v11178_v25  ;;  %v4994_v31 = vadd.f32 %v4738_v29, %v3251_v42  ;;  %7228 = vadd.xlane.f32.xlu2 %v19195_v33  ;;  %v8633_v61 = vsub.f32 %v8241_v38, %v8437_v28  ;;  %8019 = vadd.xlane.f32.xlu0 %v7668_v60  ;;  %v14324_v28 = vld [vmem:[%s15009_s25 + $0x2b8] sm:$0xff] }
 0x57e   : > { %v1963_v3 = vpop.f32.mrf.mxu0  ;;  %v3252_v62 = vpop.f32.mrf.mxu1  ;;  %v10465_v21 = vsub.f32 1.5, %v10464_v54 }
 0x57f   : > { %v14664_v63 = vpop.eup %14663  ;;  %v11578_v9 = vadd.f32 %v18876_v6, %v11378_v1  ;;  %v6678_v15 = vadd.f32 %v6422_v47, %v4994_v31  ;;  %v19209_v0 = vadd.f32 1e-05, %v8633_v61  ;;  %v3253_v11 = vadd.f32 %v3252_v62, %v1963_v3 }
 0x580   : > { %v10472_v55 = vmul.f32 %v14664_v63, %v19181_v56  ;;  %v7201_v19 = vpop.xlane.xlu0 %7200  ;;  %v10466_v16 = vmul.f32 %v14662_v39, %v10465_v21  ;;  %v7992_v53 = vpop.xlane.xlu1 %7991  ;;  %vm10478_vm14 = vweird.f32 %v14664_v63 }
 0x581   : > { %11774 = vst [vmem:[%s15334_s24 + $0x448] sm:$0xff] %v11578_v9  ;;  %v19214_v13 = vadd.f32 %v19051_v44, %v6678_v15  ;;  %v19217_v8 = vmul.f32 %v15231_v41, %v7201_v19  ;;  %14665 = vrsqrt.f32 %v19209_v0  ;;  %v8242_v22 = vmul.f32 %v7992_v53, %v15231_v41  ;;  %vm10479_vm1 = vmor %vm10477_vm15, %vm10478_vm14 }
 0x582   : > { %v10473_v10 = vmul.f32 %v14664_v63, %v10472_v55  ;;  %v10470_v43 = vsel %vm10469_vm13, %v14662_v39, %v10466_v16  ;;  %vm10487_vm3 = vweird.f32 %v19209_v0 }
 0x583   : > { %v8438_v59 = vmul.f32 %v19217_v8, %v19217_v8  ;;  %v7669_v58 = vmul.f32 %v19214_v13, %v19214_v13  ;;  %v11179_v37 = vmul.f32 %v10470_v43, %v8827_v57 }
 0x584   : > { %v10474_v45 = vmul.f32 0.5, %v10473_v10  ;;  %v4740_v52 = vpop.f32.mrf.mxu2 }
 0x585   : > { %v6424_v42 = vpop.f32.mrf.mxu3  ;;  %v8634_v49 = vsub.f32 %v8242_v22, %v8438_v59  ;;  %v4995_v40 = vadd.f32 %v4740_v52, %v3253_v11  ;;  %8021 = vadd.xlane.f32.xlu1 %v7669_v58  ;;  %v11379_v38 = vmul.f32 %v18867_v23, %v11179_v37  ;;  %7230 = vadd.xlane.f32.xlu0 %v19214_v13 }
 0x586   : > { %v1966_v25 = vpop.f32.mrf.mxu0  ;;  %v3255_v39 = vpop.f32.mrf.mxu1  ;;  %v10475_v29 = vsub.f32 1.5, %v10474_v45  ;;  %v8828_v23 = vsub.f32 %v18750_v35, %v19165_v4 }
 0x587   : > { %v19233_v47 = vadd.f32 1e-05, %v8634_v49  ;;  %v6679_v60 = vadd.f32 %v6424_v42, %v4995_v40  ;;  %12440 = vmatmul.msk.bf16.gmra.mxu0 %vm1267_vm0, %v14126_v12  ;;  %v14666_v1 = vpop.eup %14665  ;;  %v11579_v54 = vadd.f32 %v18876_v6, %v11379_v38  ;;  %v3256_v61 = vadd.f32 %v3255_v39, %v1966_v25  ;;  %v19269_v12 = vld [vmem:[%s20452_s7] ss:$0 sm:$0xff] }
 0x588   : > { %12934 = vmatmul.msk.bf16.gmra.mxu1 %vm1267_vm0, %v14027_v46  ;;  %v10476_v31 = vmul.f32 %v14664_v63, %v10475_v29  ;;  %v7994_v3 = vpop.xlane.xlu2 %7993  ;;  %v10482_v62 = vmul.f32 %v14666_v1, %v19209_v0  ;;  %v7203_v9 = vpop.xlane.xlu1 %7202  ;;  %vm10488_vm2 = vweird.f32 %v14666_v1 }
 0x589   : > { %14667 = vrsqrt.f32 %v19233_v47  ;;  %13430 = vmatmul.msk.bf16.gmra.mxu2 %vm1267_vm0, %v14225_v48  ;;  %11775 = vst [vmem:[%s15334_s24 + $0x450] sm:$0xff] %v11579_v54  ;;  %v19247_v21 = vadd.f32 %v19051_v44, %v6679_v60  ;;  %v19250_v56 = vmul.f32 %v15231_v41, %v7203_v9  ;;  %v8243_v15 = vmul.f32 %v7994_v3, %v15231_v41  ;;  %vm10489_vm4 = vmor %vm10487_vm3, %vm10488_vm2  ;;  %v14127_v3 = vld [vmem:[%s14992_s13 + $0x2c0] sm:$0xff] }
 0x58a   : > { %13926 = vmatmul.msk.bf16.gmra.mxu3 %vm1267_vm0, %v14324_v28  ;;  %v10480_v6 = vsel %vm10479_vm1, %v14664_v63, %v10476_v31  ;;  %v10483_v4 = vmul.f32 %v14666_v1, %v10482_v62  ;;  %v19260_v63 = vld [vmem:[%s20451_s6] ss:$0 sm:$0xff]  ;;  %v8829_v28 = vsub.f32 %v18769_v5, %v19198_v36  ;;  %vm10497_vm6 = vweird.f32 %v19233_v47 }
 0x58b   : > { %v11180_v35 = vmul.f32 %v10480_v6, %v8828_v23  ;;  %v8439_v55 = vmul.f32 %v19250_v56, %v19250_v56  ;;  %v7670_v53 = vmul.f32 %v19247_v21, %v19247_v21  ;;  %v14028_v23 = vld [vmem:[%s14997_s19 + $0x2c0] sm:$0xff] }
 0x58c   : > { %v4743_v19 = vpop.f32.mrf.mxu2  ;;  %v10484_v10 = vmul.f32 0.5, %v10483_v4  ;;  %v14226_v4 = vld [vmem:[%s15004_s22 + $0x2c0] sm:$0xff] }
 0x58d   : > { %v6427_v16 = vpop.f32.mrf.mxu3  ;;  %v11380_v57 = vmul.f32 %v19260_v63, %v11180_v35  ;;  %v4996_v11 = vadd.f32 %v4743_v19, %v3256_v61  ;;  %7232 = vadd.xlane.f32.xlu1 %v19247_v21  ;;  %v8635_v22 = vsub.f32 %v8243_v15, %v8439_v55  ;;  %8023 = vadd.xlane.f32.xlu2 %v7670_v53  ;;  %v14325_v15 = vld [vmem:[%s15009_s25 + $0x2c0] sm:$0xff] }
 0x58e   : > { %v1968_v43 = vpop.f32.mrf.mxu0  ;;  %v3257_v59 = vpop.f32.mrf.mxu1  ;;  %v10485_v37 = vsub.f32 1.5, %v10484_v10 }
 0x58f   : > { %v19264_v58 = vpop.eup %14667  ;;  %v11580_v46 = vadd.f32 %v19269_v12, %v11380_v57  ;;  %v6680_v45 = vadd.f32 %v6427_v16, %v4996_v11  ;;  %v19274_v42 = vadd.f32 1e-05, %v8635_v22  ;;  %v3258_v29 = vadd.f32 %v3257_v59, %v1968_v43 }
 0x590   : > { %v10492_v52 = vmul.f32 %v19264_v58, %v19233_v47  ;;  %v7205_v49 = vpop.xlane.xlu2 %7204  ;;  %v10486_v40 = vmul.f32 %v14666_v1, %v10485_v37  ;;  %v7996_v48 = vpop.xlane.xlu0 %7995  ;;  %vm10498_vm5 = vweird.f32 %v19264_v58  ;;  %v8830_v59 = vsub.f32 %v18802_v2, %v19217_v8 }
 0x591   : > { %11776 = vst [vmem:[%s15334_s24 + $0x458] sm:$0xff] %v11580_v46  ;;  %v19279_v25 = vadd.f32 %v19051_v44, %v6680_v45  ;;  %v19282_v39 = vmul.f32 %v15231_v41, %v7205_v49  ;;  %14669 = vrsqrt.f32 %v19274_v42  ;;  %v8244_v54 = vmul.f32 %v7996_v48, %v15231_v41  ;;  %vm10499_vm7 = vmor %vm10497_vm6, %vm10498_vm5 }
 0x592   : > { %v10493_v38 = vmul.f32 %v19264_v58, %v10492_v52  ;;  %v10490_v60 = vsel %vm10489_vm4, %v14666_v1, %v10486_v40  ;;  %vm10507_vm9 = vweird.f32 %v19274_v42 }
 0x593   : > { %v8440_v0 = vmul.f32 %v19282_v39, %v19282_v39  ;;  %v7671_v31 = vmul.f32 %v19279_v25, %v19279_v25  ;;  %v11181_v5 = vmul.f32 %v10490_v60, %v8829_v28 }
 0x594   : > { %v10494_v36 = vmul.f32 0.5, %v10493_v38  ;;  %v4745_v62 = vpop.f32.mrf.mxu2 }
 0x595   : > { %v6429_v61 = vpop.f32.mrf.mxu3  ;;  %v8636_v9 = vsub.f32 %v8244_v54, %v8440_v0  ;;  %v4997_v6 = vadd.f32 %v4745_v62, %v3258_v29  ;;  %8025 = vadd.xlane.f32.xlu0 %v7671_v31  ;;  %v11381_v55 = vmul.f32 %v19260_v63, %v11181_v5  ;;  %7234 = vadd.xlane.f32.xlu2 %v19279_v25 }
 0x596   : > { %v1971_v35 = vpop.f32.mrf.mxu0  ;;  %v3260_v1 = vpop.f32.mrf.mxu1  ;;  %v10495_v19 = vsub.f32 1.5, %v10494_v36 }
 0x597   : > { %v19300_v16 = vadd.f32 1e-05, %v8636_v9  ;;  %v6681_v53 = vadd.f32 %v6429_v61, %v4997_v6  ;;  %12441 = vmatmul.msk.bf16.gmra.mxu0 %vm1267_vm0, %v14127_v3  ;;  %v14670_v57 = vpop.eup %14669  ;;  %v11581_v10 = vadd.f32 %v19269_v12, %v11381_v55  ;;  %v3261_v46 = vadd.f32 %v3260_v1, %v1971_v35 }
 0x598   : > { %12935 = vmatmul.msk.bf16.gmra.mxu1 %vm1267_vm0, %v14028_v23  ;;  %v10496_v11 = vmul.f32 %v19264_v58, %v10495_v19  ;;  %v7998_v43 = vpop.xlane.xlu1 %7997  ;;  %v10502_v22 = vmul.f32 %v14670_v57, %v19274_v42  ;;  %v7207_v37 = vpop.xlane.xlu0 %7206  ;;  %vm10508_vm8 = vweird.f32 %v14670_v57 }
 0x599   : > { %14671 = vrsqrt.f32 %v19300_v16  ;;  %13431 = vmatmul.msk.bf16.gmra.mxu2 %vm1267_vm0, %v14226_v4  ;;  %11777 = vst [vmem:[%s15334_s24 + $0x460] sm:$0xff] %v11581_v10  ;;  %v19316_v47 = vadd.f32 %v19051_v44, %v6681_v53  ;;  %v19319_v52 = vmul.f32 %v15231_v41, %v7207_v37  ;;  %v8245_v40 = vmul.f32 %v7998_v43, %v15231_v41  ;;  %vm10509_vm10 = vmor %vm10507_vm9, %vm10508_vm8  ;;  %v14128_v43 = vld [vmem:[%s14992_s13 + $0x2c8] sm:$0xff] }
 0x59a   : > { %13927 = vmatmul.msk.bf16.gmra.mxu3 %vm1267_vm0, %v14325_v15  ;;  %v10500_v45 = vsel %vm10499_vm7, %v19264_v58, %v10496_v11  ;;  %v10503_v8 = vmul.f32 %v14670_v57, %v10502_v22  ;;  %v8831_v15 = vsub.f32 %v18821_v17, %v19250_v56  ;;  %vm10517_vm12 = vweird.f32 %v19300_v16 }
 0x59b   : > { %v11182_v2 = vmul.f32 %v10500_v45, %v8830_v59  ;;  %v8441_v49 = vmul.f32 %v19319_v52, %v19319_v52  ;;  %v7672_v38 = vmul.f32 %v19316_v47, %v19316_v47  ;;  %v14029_v59 = vld [vmem:[%s14997_s19 + $0x2c8] sm:$0xff] }
 0x59c   : > { %v4748_v48 = vpop.f32.mrf.mxu2  ;;  %v10504_v29 = vmul.f32 0.5, %v10503_v8  ;;  %v14227_v8 = vld [vmem:[%s15004_s22 + $0x2c8] sm:$0xff] }
 0x59d   : > { %v6432_v28 = vpop.f32.mrf.mxu3  ;;  %v11382_v58 = vmul.f32 %v19260_v63, %v11182_v2  ;;  %v4998_v60 = vadd.f32 %v4748_v48, %v3261_v46  ;;  %7236 = vadd.xlane.f32.xlu0 %v19316_v47  ;;  %v8637_v31 = vsub.f32 %v8245_v40, %v8441_v49  ;;  %8027 = vadd.xlane.f32.xlu1 %v7672_v38  ;;  %v14326_v49 = vld [vmem:[%s15009_s25 + $0x2c8] sm:$0xff] }
 0x59e   : > { %v1973_v0 = vpop.f32.mrf.mxu0  ;;  %v3262_v54 = vpop.f32.mrf.mxu1  ;;  %v10505_v5 = vsub.f32 1.5, %v10504_v29 }
 0x59f   : > { %v14672_v3 = vpop.eup %14671  ;;  %v11582_v23 = vadd.f32 %v19269_v12, %v11382_v58  ;;  %v6682_v36 = vadd.f32 %v6432_v28, %v4998_v60  ;;  %v19330_v61 = vadd.f32 1e-05, %v8637_v31  ;;  %v3263_v19 = vadd.f32 %v3262_v54, %v1973_v0 }
 0x5a0   : > { %v10512_v62 = vmul.f32 %v14672_v3, %v19300_v16  ;;  %v7209_v9 = vpop.xlane.xlu1 %7208  ;;  %v10506_v6 = vmul.f32 %v14670_v57, %v10505_v5  ;;  %v8000_v1 = vpop.xlane.xlu2 %7999  ;;  %vm10518_vm11 = vweird.f32 %v14672_v3  ;;  %v8832_v54 = vsub.f32 %v18854_v24, %v19282_v39 }
 0x5a1   : > { %11778 = vst [vmem:[%s15334_s24 + $0x468] sm:$0xff] %v11582_v23  ;;  %v19335_v35 = vadd.f32 %v19051_v44, %v6682_v36  ;;  %v19338_v4 = vmul.f32 %v15231_v41, %v7209_v9  ;;  %14673 = vrsqrt.f32 %v19330_v61  ;;  %v8246_v42 = vmul.f32 %v8000_v1, %v15231_v41  ;;  %vm10519_vm13 = vmor %vm10517_vm12, %vm10518_vm11 }
 0x5a2   : > { %v10513_v55 = vmul.f32 %v14672_v3, %v10512_v62  ;;  %v10510_v53 = vsel %vm10509_vm10, %v14670_v57, %v10506_v6  ;;  %vm10527_vm15 = vweird.f32 %v19330_v61 }
 0x5a3   : > { %v8442_v10 = vmul.f32 %v19338_v4, %v19338_v4  ;;  %v7673_v11 = vmul.f32 %v19335_v35, %v19335_v35  ;;  %v11183_v22 = vmul.f32 %v10510_v53, %v8831_v15 }
 0x5a4   : > { %v10514_v17 = vmul.f32 0.5, %v10513_v55  ;;  %v4750_v56 = vpop.f32.mrf.mxu2 }
 0x5a5   : > { %v6434_v46 = vpop.f32.mrf.mxu3  ;;  %v8638_v37 = vsub.f32 %v8246_v42, %v8442_v10  ;;  %v4999_v45 = vadd.f32 %v4750_v56, %v3263_v19  ;;  %8029 = vadd.xlane.f32.xlu2 %v7673_v11  ;;  %v11383_v40 = vmul.f32 %v19260_v63, %v11183_v22  ;;  %7238 = vadd.xlane.f32.xlu1 %v19335_v35 }
 0x5a6   : > { %v1976_v2 = vpop.f32.mrf.mxu0  ;;  %v3265_v57 = vpop.f32.mrf.mxu1  ;;  %v10515_v48 = vsub.f32 1.5, %v10514_v17 }
 0x5a7   : > { %v19354_v28 = vadd.f32 1e-05, %v8638_v37  ;;  %v6683_v38 = vadd.f32 %v6434_v46, %v4999_v45  ;;  %12442 = vmatmul.msk.bf16.gmra.mxu0 %vm1267_vm0, %v14128_v43  ;;  %v14674_v58 = vpop.eup %14673  ;;  %v11583_v29 = vadd.f32 %v19269_v12, %v11383_v40  ;;  %v3266_v23 = vadd.f32 %v3265_v57, %v1976_v2 }
 0x5a8   : > { %12936 = vmatmul.msk.bf16.gmra.mxu1 %vm1267_vm0, %v14029_v59  ;;  %v10516_v60 = vmul.f32 %v14672_v3, %v10515_v48  ;;  %v8002_v0 = vpop.xlane.xlu0 %8001  ;;  %v10522_v31 = vmul.f32 %v14674_v58, %v19330_v61  ;;  %v7211_v5 = vpop.xlane.xlu2 %7210  ;;  %vm10528_vm14 = vweird.f32 %v14674_v58 }
 0x5a9   : > { %14675 = vrsqrt.f32 %v19354_v28  ;;  %13432 = vmatmul.msk.bf16.gmra.mxu2 %vm1267_vm0, %v14227_v8  ;;  %11779 = vst [vmem:[%s15334_s24 + $0x470] sm:$0xff] %v11583_v29  ;;  %v19368_v62 = vadd.f32 %v19051_v44, %v6683_v38  ;;  %v19371_v16 = vmul.f32 %v15231_v41, %v7211_v5  ;;  %v8247_v6 = vmul.f32 %v8002_v0, %v15231_v41  ;;  %vm10529_vm1 = vmor %vm10527_vm15, %vm10528_vm14  ;;  %v14129_v0 = vld [vmem:[%s14992_s13 + $0x2d0] sm:$0xff] }
 0x5aa   : > { %13928 = vmatmul.msk.bf16.gmra.mxu3 %vm1267_vm0, %v14326_v49  ;;  %v10520_v36 = vsel %vm10519_vm13, %v14672_v3, %v10516_v60  ;;  %v10523_v39 = vmul.f32 %v14674_v58, %v10522_v31  ;;  %v8833_v49 = vsub.f32 %v18886_v26, %v19319_v52  ;;  %vm10537_vm3 = vweird.f32 %v19354_v28 }
 0x5ab   : > { %v11184_v24 = vmul.f32 %v10520_v36, %v8832_v54  ;;  %v8443_v9 = vmul.f32 %v19371_v16, %v19371_v16  ;;  %v7674_v55 = vmul.f32 %v19368_v62, %v19368_v62  ;;  %v14030_v54 = vld [vmem:[%s14997_s19 + $0x2d0] sm:$0xff] }
 0x5ac   : > { %v4753_v1 = vpop.f32.mrf.mxu2  ;;  %v10524_v19 = vmul.f32 0.5, %v10523_v39  ;;  %v14228_v39 = vld [vmem:[%s15004_s22 + $0x2d0] sm:$0xff] }
 0x5ad   : > { %v6437_v15 = vpop.f32.mrf.mxu3  ;;  %v11384_v3 = vmul.f32 %v19260_v63, %v11184_v24  ;;  %v5000_v53 = vadd.f32 %v4753_v1, %v3266_v23  ;;  %7240 = vadd.xlane.f32.xlu2 %v19368_v62  ;;  %v8639_v11 = vsub.f32 %v8247_v6, %v8443_v9  ;;  %8031 = vadd.xlane.f32.xlu0 %v7674_v55  ;;  %v14327_v9 = vld [vmem:[%s15009_s25 + $0x2d0] sm:$0xff] }
 0x5ae   : > { %v1978_v42 = vpop.f32.mrf.mxu0  ;;  %v3267_v10 = vpop.f32.mrf.mxu1  ;;  %v10525_v22 = vsub.f32 1.5, %v10524_v19 }
 0x5af   : > { %v14676_v43 = vpop.eup %14675  ;;  %v11584_v59 = vadd.f32 %v19269_v12, %v11384_v3  ;;  %v6684_v17 = vadd.f32 %v6437_v15, %v5000_v53  ;;  %v19382_v46 = vadd.f32 1e-05, %v8639_v11  ;;  %v3268_v48 = vadd.f32 %v3267_v10, %v1978_v42 }
 0x5b0   : > { %v10532_v56 = vmul.f32 %v14676_v43, %v19354_v28  ;;  %v7213_v37 = vpop.xlane.xlu0 %7212  ;;  %v10526_v45 = vmul.f32 %v14674_v58, %v10525_v22  ;;  %v8004_v8 = vpop.xlane.xlu1 %8003  ;;  %vm10538_vm2 = vweird.f32 %v14676_v43  ;;  %v8834_v10 = vsub.f32 %v18923_v50, %v19338_v4 }
 0x5b1   : > { %11780 = vst [vmem:[%s15334_s24 + $0x478] sm:$0xff] %v11584_v59  ;;  %v19387_v2 = vadd.f32 %v19051_v44, %v6684_v17  ;;  %v19390_v57 = vmul.f32 %v15231_v41, %v7213_v37  ;;  %14677 = vrsqrt.f32 %v19382_v46  ;;  %v8248_v29 = vmul.f32 %v8004_v8, %v15231_v41  ;;  %vm10539_vm4 = vmor %vm10537_vm3, %vm10538_vm2 }
 0x5b2   : > { %v10533_v40 = vmul.f32 %v14676_v43, %v10532_v56  ;;  %v10530_v38 = vsel %vm10529_vm1, %v14674_v58, %v10526_v45  ;;  %vm10547_vm6 = vweird.f32 %v19382_v46 }
 0x5b3   : > { %v8444_v61 = vmul.f32 %v19390_v57, %v19390_v57  ;;  %v7675_v60 = vmul.f32 %v19387_v2, %v19387_v2  ;;  %v11185_v31 = vmul.f32 %v10530_v38, %v8833_v49 }
 0x5b4   : > { %v10534_v26 = vmul.f32 0.5, %v10533_v40  ;;  %v4755_v52 = vpop.f32.mrf.mxu2 }
 0x5b5   : > { %v6439_v23 = vpop.f32.mrf.mxu3  ;;  %v8640_v5 = vsub.f32 %v8248_v29, %v8444_v61  ;;  %v5001_v36 = vadd.f32 %v4755_v52, %v3268_v48  ;;  %8033 = vadd.xlane.f32.xlu1 %v7675_v60  ;;  %v11385_v6 = vmul.f32 %v19260_v63, %v11185_v31  ;;  %7242 = vadd.xlane.f32.xlu0 %v19387_v2 }
 0x5b6   : > { %v1981_v24 = vpop.f32.mrf.mxu0  ;;  %v3270_v58 = vpop.f32.mrf.mxu1  ;;  %v10535_v1 = vsub.f32 1.5, %v10534_v26 }
 0x5b7   : > { %v19406_v15 = vadd.f32 1e-05, %v8640_v5  ;;  %v6685_v55 = vadd.f32 %v6439_v23, %v5001_v36  ;;  %12443 = vmatmul.msk.bf16.gmra.mxu0 %vm1267_vm0, %v14129_v0  ;;  %v14678_v3 = vpop.eup %14677  ;;  %v11585_v19 = vadd.f32 %v19269_v12, %v11385_v6  ;;  %v3271_v59 = vadd.f32 %v3270_v58, %v1981_v24  ;;  %v19444_v36 = vld [vmem:[%s20450_s5] ss:$0 sm:$0xff] }
 0x5b8   : > { %12937 = vmatmul.msk.bf16.gmra.mxu1 %vm1267_vm0, %v14030_v54  ;;  %v10536_v53 = vmul.f32 %v14676_v43, %v10535_v1  ;;  %v8006_v42 = vpop.xlane.xlu2 %8005  ;;  %v10542_v11 = vmul.f32 %v14678_v3, %v19382_v46  ;;  %v7215_v22 = vpop.xlane.xlu1 %7214  ;;  %vm10548_vm5 = vweird.f32 %v14678_v3 }
 0x5b9   : > { %14679 = vrsqrt.f32 %v19406_v15  ;;  %13433 = vmatmul.msk.bf16.gmra.mxu2 %vm1267_vm0, %v14228_v39  ;;  %11781 = vst [vmem:[%s15334_s24 + $0x480] sm:$0xff] %v11585_v19  ;;  %v19420_v56 = vadd.f32 %v19051_v44, %v6685_v55  ;;  %v19423_v28 = vmul.f32 %v15231_v41, %v7215_v22  ;;  %v8249_v37 = vmul.f32 %v8006_v42, %v15231_v41  ;;  %vm10549_vm7 = vmor %vm10547_vm6, %vm10548_vm5  ;;  %v14130_v42 = vld [vmem:[%s14992_s13 + $0x2d8] sm:$0xff] }
 0x5ba   : > { %13929 = vmatmul.msk.bf16.gmra.mxu3 %vm1267_vm0, %v14327_v9  ;;  %v10540_v17 = vsel %vm10539_vm4, %v14676_v43, %v10536_v53  ;;  %v10543_v4 = vmul.f32 %v14678_v3, %v10542_v11  ;;  %v8835_v9 = vsub.f32 %v18942_v27, %v19371_v16  ;;  %vm10557_vm9 = vweird.f32 %v19406_v15 }
 0x5bb   : > { %v11186_v50 = vmul.f32 %v10540_v17, %v8834_v10  ;;  %v8445_v45 = vmul.f32 %v19423_v28, %v19423_v28  ;;  %v7676_v40 = vmul.f32 %v19420_v56, %v19420_v56  ;;  %v14031_v10 = vld [vmem:[%s14997_s19 + $0x2d8] sm:$0xff] }
 0x5bc   : > { %v4758_v8 = vpop.f32.mrf.mxu2  ;;  %v10544_v44 = vmul.f32 0.5, %v10543_v4  ;;  %v14229_v4 = vld [vmem:[%s15004_s22 + $0x2d8] sm:$0xff] }
 0x5bd   : > { %v6442_v49 = vpop.f32.mrf.mxu3  ;;  %v11386_v43 = vmul.f32 %v19260_v63, %v11186_v50  ;;  %v5002_v48 = vadd.f32 %v4758_v8, %v3271_v59  ;;  %7244 = vadd.xlane.f32.xlu1 %v19420_v56  ;;  %v8641_v29 = vsub.f32 %v8249_v37, %v8445_v45  ;;  %8035 = vadd.xlane.f32.xlu2 %v7676_v40  ;;  %v14328_v37 = vld [vmem:[%s15009_s25 + $0x2d8] sm:$0xff] }
 0x5be   : > { %v1983_v38 = vpop.f32.mrf.mxu0  ;;  %v3272_v61 = vpop.f32.mrf.mxu1  ;;  %v10545_v54 = vsub.f32 1.5, %v10544_v44 }
 0x5bf   : > { %v19432_v60 = vpop.eup %14679  ;;  %v11586_v0 = vadd.f32 %v19269_v12, %v11386_v43  ;;  %v6686_v31 = vadd.f32 %v6442_v49, %v5002_v48  ;;  %v19437_v52 = vadd.f32 1e-05, %v8641_v29  ;;  %v3273_v46 = vadd.f32 %v3272_v61, %v1983_v38 }
 0x5c0   : > { %v10552_v26 = vmul.f32 %v19432_v60, %v19406_v15  ;;  %v7217_v23 = vpop.xlane.xlu2 %7216  ;;  %v10546_v5 = vmul.f32 %v14678_v3, %v10545_v54  ;;  %v8008_v39 = vpop.xlane.xlu0 %8007  ;;  %vm10558_vm8 = vweird.f32 %v19432_v60  ;;  %v8836_v61 = vsub.f32 %v18975_v34, %v19390_v57 }
 0x5c1   : > { %11782 = vst [vmem:[%s15334_s24 + $0x488] sm:$0xff] %v11586_v0  ;;  %v19447_v24 = vadd.f32 %v19444_v36, %v6686_v31  ;;  %v19450_v58 = vmul.f32 %v15231_v41, %v7217_v23  ;;  %14681 = vrsqrt.f32 %v19437_v52  ;;  %v8250_v19 = vmul.f32 %v8008_v39, %v15231_v41  ;;  %vm10559_vm10 = vmor %vm10557_vm9, %vm10558_vm8 }
 0x5c2   : > { %v10553_v6 = vmul.f32 %v19432_v60, %v10552_v26  ;;  %v10550_v1 = vsel %vm10549_vm7, %v14678_v3, %v10546_v5  ;;  %vm10567_vm12 = vweird.f32 %v19437_v52 }
 0x5c3   : > { %v8446_v55 = vmul.f32 %v19450_v58, %v19450_v58  ;;  %v7677_v53 = vmul.f32 %v19447_v24, %v19447_v24  ;;  %v11187_v27 = vmul.f32 %v10550_v1, %v8835_v9 }
 0x5c4   : > { %v10554_v16 = vmul.f32 0.5, %v10553_v6  ;;  %v4760_v11 = vpop.f32.mrf.mxu2 }
 0x5c5   : > { %v6444_v59 = vpop.f32.mrf.mxu3  ;;  %v8642_v22 = vsub.f32 %v8250_v19, %v8446_v55  ;;  %v5003_v17 = vadd.f32 %v4760_v11, %v3273_v46  ;;  %8037 = vadd.xlane.f32.xlu0 %v7677_v53  ;;  %v11387_v45 = vmul.f32 %v19260_v63, %v11187_v27  ;;  %7246 = vadd.xlane.f32.xlu2 %v19447_v24 }
 0x5c6   : > { %v1986_v50 = vpop.f32.mrf.mxu0  ;;  %v3275_v3 = vpop.f32.mrf.mxu1  ;;  %v10555_v8 = vsub.f32 1.5, %v10554_v16 }
 0x5c7   : > { %v19468_v49 = vadd.f32 1e-05, %v8642_v22  ;;  %v6687_v40 = vadd.f32 %v6444_v59, %v5003_v17  ;;  %12444 = vmatmul.msk.bf16.gmra.mxu0 %vm1267_vm0, %v14130_v42  ;;  %v14682_v43 = vpop.eup %14681  ;;  %v11587_v44 = vadd.f32 %v19269_v12, %v11387_v45  ;;  %v3276_v0 = vadd.f32 %v3275_v3, %v1986_v50 }
 0x5c8   : > { %12938 = vmatmul.msk.bf16.gmra.mxu1 %vm1267_vm0, %v14031_v10  ;;  %v10556_v48 = vmul.f32 %v19432_v60, %v10555_v8  ;;  %v8010_v38 = vpop.xlane.xlu1 %8009  ;;  %v10562_v29 = vmul.f32 %v14682_v43, %v19437_v52  ;;  %v7219_v54 = vpop.xlane.xlu0 %7218  ;;  %vm10568_vm11 = vweird.f32 %v14682_v43 }
 0x5c9   : > { %14683 = vrsqrt.f32 %v19468_v49  ;;  %13434 = vmatmul.msk.bf16.gmra.mxu2 %vm1267_vm0, %v14229_v4  ;;  %11783 = vst [vmem:[%s15334_s24 + $0x490] sm:$0xff] %v11587_v44  ;;  %v19484_v15 = vadd.f32 %v19444_v36, %v6687_v40  ;;  %v19487_v26 = vmul.f32 %v15231_v41, %v7219_v54  ;;  %v8251_v5 = vmul.f32 %v8010_v38, %v15231_v41  ;;  %vm10569_vm13 = vmor %vm10567_vm12, %vm10568_vm11  ;;  %v14131_v38 = vld [vmem:[%s14992_s13 + $0x2e0] sm:$0xff] }
 0x5ca   : > { %13930 = vmatmul.msk.bf16.gmra.mxu3 %vm1267_vm0, %v14328_v37  ;;  %v10560_v31 = vsel %vm10559_vm10, %v19432_v60, %v10556_v48  ;;  %v10563_v57 = vmul.f32 %v14682_v43, %v10562_v29  ;;  %v8837_v37 = vsub.f32 %v18994_v51, %v19423_v28  ;;  %vm10577_vm15 = vweird.f32 %v19468_v49 }
 0x5cb   : > { %v11188_v34 = vmul.f32 %v10560_v31, %v8836_v61  ;;  %v8447_v23 = vmul.f32 %v19487_v26, %v19487_v26  ;;  %v7678_v6 = vmul.f32 %v19484_v15, %v19484_v15  ;;  %v14032_v61 = vld [vmem:[%s14997_s19 + $0x2e0] sm:$0xff] }
 0x5cc   : > { %v4763_v39 = vpop.f32.mrf.mxu2  ;;  %v10564_v46 = vmul.f32 0.5, %v10563_v57  ;;  %v14230_v57 = vld [vmem:[%s15004_s22 + $0x2e0] sm:$0xff] }
 0x5cd   : > { %v6447_v9 = vpop.f32.mrf.mxu3  ;;  %v11388_v60 = vmul.f32 %v19260_v63, %v11188_v34  ;;  %v5004_v1 = vadd.f32 %v4763_v39, %v3276_v0  ;;  %7248 = vadd.xlane.f32.xlu0 %v19484_v15  ;;  %v8643_v53 = vsub.f32 %v8251_v5, %v8447_v23  ;;  %8039 = vadd.xlane.f32.xlu1 %v7678_v6  ;;  %v14329_v23 = vld [vmem:[%s15009_s25 + $0x2e0] sm:$0xff] }
 0x5ce   : > { %v1988_v55 = vpop.f32.mrf.mxu0  ;;  %v3277_v19 = vpop.f32.mrf.mxu1  ;;  %v10565_v27 = vsub.f32 1.5, %v10564_v46 }
 0x5cf   : > { %v14684_v42 = vpop.eup %14683  ;;  %v11588_v10 = vadd.f32 %v19269_v12, %v11388_v60  ;;  %v6688_v16 = vadd.f32 %v6447_v9, %v5004_v1  ;;  %v19498_v59 = vadd.f32 1e-05, %v8643_v53  ;;  %v3278_v8 = vadd.f32 %v3277_v19, %v1988_v55 }
 0x5d0   : > { %v10572_v11 = vmul.f32 %v14684_v42, %v19468_v49  ;;  %v7221_v22 = vpop.xlane.xlu1 %7220  ;;  %v10566_v17 = vmul.f32 %v14682_v43, %v10565_v27  ;;  %v8012_v3 = vpop.xlane.xlu2 %8011  ;;  %vm10578_vm14 = vweird.f32 %v14684_v42  ;;  %v8838_v19 = vsub.f32 %v19027_v7, %v19450_v58 }
 0x5d1   : > { %11784 = vst [vmem:[%s15334_s24 + $0x498] sm:$0xff] %v11588_v10  ;;  %v19503_v50 = vadd.f32 %v19444_v36, %v6688_v16  ;;  %v19506_v4 = vmul.f32 %v15231_v41, %v7221_v22  ;;  %14685 = vrsqrt.f32 %v19498_v59  ;;  %v8252_v52 = vmul.f32 %v8012_v3, %v15231_v41  ;;  %vm10579_vm1 = vmor %vm10577_vm15, %vm10578_vm14 }
 0x5d2   : > { %v10573_v45 = vmul.f32 %v14684_v42, %v10572_v11  ;;  %v10570_v40 = vsel %vm10569_vm13, %v14682_v43, %v10566_v17  ;;  %vm10587_vm3 = vweird.f32 %v19498_v59 }
 0x5d3   : > { %v8448_v44 = vmul.f32 %v19506_v4, %v19506_v4  ;;  %v7679_v48 = vmul.f32 %v19503_v50, %v19503_v50  ;;  %v11189_v29 = vmul.f32 %v10570_v40, %v8837_v37 }
 0x5d4   : > { %v10574_v51 = vmul.f32 0.5, %v10573_v45  ;;  %v4765_v28 = vpop.f32.mrf.mxu2 }
 0x5d5   : > { %v6449_v0 = vpop.f32.mrf.mxu3  ;;  %v8644_v54 = vsub.f32 %v8252_v52, %v8448_v44  ;;  %v5005_v31 = vadd.f32 %v4765_v28, %v3278_v8  ;;  %8041 = vadd.xlane.f32.xlu2 %v7679_v48  ;;  %v11389_v5 = vmul.f32 %v19260_v63, %v11189_v29  ;;  %7250 = vadd.xlane.f32.xlu1 %v19503_v50 }
 0x5d6   : > { %v1991_v34 = vpop.f32.mrf.mxu0  ;;  %v3280_v43 = vpop.f32.mrf.mxu1  ;;  %v10575_v39 = vsub.f32 1.5, %v10574_v51 }
 0x5d7   : > { %v19522_v9 = vadd.f32 1e-05, %v8644_v54  ;;  %v6689_v6 = vadd.f32 %v6449_v0, %v5005_v31  ;;  %12445 = vmatmul.msk.bf16.gmra.mxu0 %vm1267_vm0, %v14131_v38  ;;  %v14686_v60 = vpop.eup %14685  ;;  %v11589_v46 = vadd.f32 %v19269_v12, %v11389_v5  ;;  %v3281_v10 = vadd.f32 %v3280_v43, %v1991_v34 }
 0x5d8   : > { %12939 = vmatmul.msk.bf16.gmra.mxu1 %vm1267_vm0, %v14032_v61  ;;  %v10576_v1 = vmul.f32 %v14684_v42, %v10575_v39  ;;  %v8014_v55 = vpop.xlane.xlu0 %8013  ;;  %v10582_v53 = vmul.f32 %v14686_v60, %v19498_v59  ;;  %v7223_v27 = vpop.xlane.xlu2 %7222  ;;  %vm10588_vm2 = vweird.f32 %v14686_v60 }
 0x5d9   : > { %14687 = vrsqrt.f32 %v19522_v9  ;;  %13435 = vmatmul.msk.bf16.gmra.mxu2 %vm1267_vm0, %v14230_v57  ;;  %11785 = vst [vmem:[%s15334_s24 + $0x4a0] sm:$0xff] %v11589_v46  ;;  %v19536_v11 = vadd.f32 %v19444_v36, %v6689_v6  ;;  %v19539_v49 = vmul.f32 %v15231_v41, %v7223_v27  ;;  %v8253_v17 = vmul.f32 %v8014_v55, %v15231_v41  ;;  %vm10589_vm4 = vmor %vm10587_vm3, %vm10588_vm2  ;;  %v14132_v55 = vld [vmem:[%s14992_s13 + $0x2e8] sm:$0xff] }
 0x5da   : > { %13931 = vmatmul.msk.bf16.gmra.mxu3 %vm1267_vm0, %v14329_v23  ;;  %v10580_v16 = vsel %vm10579_vm1, %v14684_v42, %v10576_v1  ;;  %v10583_v58 = vmul.f32 %v14686_v60, %v10582_v53  ;;  %v8839_v23 = vsub.f32 %v19054_v20, %v19487_v26  ;;  %vm10597_vm6 = vweird.f32 %v19522_v9 }
 0x5db   : > { %v11190_v7 = vmul.f32 %v10580_v16, %v8838_v19  ;;  %v8449_v22 = vmul.f32 %v19539_v49, %v19539_v49  ;;  %v7680_v45 = vmul.f32 %v19536_v11, %v19536_v11  ;;  %v14033_v19 = vld [vmem:[%s14997_s19 + $0x2e8] sm:$0xff] }
 0x5dc   : > { %v4768_v3 = vpop.f32.mrf.mxu2  ;;  %v10584_v8 = vmul.f32 0.5, %v10583_v58  ;;  %v14231_v58 = vld [vmem:[%s15004_s22 + $0x2e8] sm:$0xff] }
 0x5dd   : > { %v6452_v37 = vpop.f32.mrf.mxu3  ;;  %v11390_v42 = vmul.f32 %v19260_v63, %v11190_v7  ;;  %v5006_v40 = vadd.f32 %v4768_v3, %v3281_v10  ;;  %7252 = vadd.xlane.f32.xlu2 %v19536_v11  ;;  %v8645_v48 = vsub.f32 %v8253_v17, %v8449_v22  ;;  %8043 = vadd.xlane.f32.xlu0 %v7680_v45  ;;  %v14330_v22 = vld [vmem:[%s15009_s25 + $0x2e8] sm:$0xff] }
 0x5de   : > { %v1993_v52 = vpop.f32.mrf.mxu0  ;;  %v3282_v44 = vpop.f32.mrf.mxu1  ;;  %v10585_v29 = vsub.f32 1.5, %v10584_v8 }
 0x5df   : > { %v14688_v38 = vpop.eup %14687  ;;  %v11590_v61 = vadd.f32 %v19269_v12, %v11390_v42  ;;  %v6690_v51 = vadd.f32 %v6452_v37, %v5006_v40  ;;  %v19550_v0 = vadd.f32 1e-05, %v8645_v48  ;;  %v3283_v39 = vadd.f32 %v3282_v44, %v1993_v52 }
 0x5e0   : > { %v10592_v28 = vmul.f32 %v14688_v38, %v19522_v9  ;;  %v7225_v54 = vpop.xlane.xlu0 %7224  ;;  %v10586_v31 = vmul.f32 %v14686_v60, %v10585_v29  ;;  %v8016_v57 = vpop.xlane.xlu1 %8015  ;;  %vm10598_vm5 = vweird.f32 %v14688_v38  ;;  %v8840_v44 = vsub.f32 %v19091_v14, %v19506_v4 }
 0x5e1   : > { %11786 = vst [vmem:[%s15334_s24 + $0x4a8] sm:$0xff] %v11590_v61  ;;  %v19555_v34 = vadd.f32 %v19444_v36, %v6690_v51  ;;  %v19558_v43 = vmul.f32 %v15231_v41, %v7225_v54  ;;  %14689 = vrsqrt.f32 %v19550_v0  ;;  %v8254_v46 = vmul.f32 %v8016_v57, %v15231_v41  ;;  %vm10599_vm7 = vmor %vm10597_vm6, %vm10598_vm5 }
 0x5e2   : > { %v10593_v5 = vmul.f32 %v14688_v38, %v10592_v28  ;;  %v10590_v6 = vsel %vm10589_vm4, %v14686_v60, %v10586_v31  ;;  %vm10607_vm9 = vweird.f32 %v19550_v0 }
 0x5e3   : > { %v8450_v59 = vmul.f32 %v19558_v43, %v19558_v43  ;;  %v7681_v1 = vmul.f32 %v19555_v34, %v19555_v34  ;;  %v11191_v53 = vmul.f32 %v10590_v6, %v8839_v23 }
 0x5e4   : > { %v10594_v20 = vmul.f32 0.5, %v10593_v5  ;;  %v4770_v26 = vpop.f32.mrf.mxu2 }
 0x5e5   : > { %v6454_v10 = vpop.f32.mrf.mxu3  ;;  %v8646_v27 = vsub.f32 %v8254_v46, %v8450_v59  ;;  %v5007_v16 = vadd.f32 %v4770_v26, %v3283_v39  ;;  %8045 = vadd.xlane.f32.xlu1 %v7681_v1  ;;  %v11391_v17 = vmul.f32 %v19260_v63, %v11191_v53  ;;  %7254 = vadd.xlane.f32.xlu0 %v19555_v34 }
 0x5e6   : > { %v1996_v7 = vpop.f32.mrf.mxu0  ;;  %v3285_v60 = vpop.f32.mrf.mxu1  ;;  %v10595_v3 = vsub.f32 1.5, %v10594_v20 }
 0x5e7   : > { %v19574_v37 = vadd.f32 1e-05, %v8646_v27  ;;  %v6691_v45 = vadd.f32 %v6454_v10, %v5007_v16  ;;  %12446 = vmatmul.msk.bf16.gmra.mxu0 %vm1267_vm0, %v14132_v55  ;;  %v14690_v42 = vpop.eup %14689  ;;  %v11591_v8 = vadd.f32 %v19269_v12, %v11391_v17  ;;  %v3286_v61 = vadd.f32 %v3285_v60, %v1996_v7 }
 0x5e8   : > { %12940 = vmatmul.msk.bf16.gmra.mxu1 %vm1267_vm0, %v14033_v19  ;;  %v10596_v40 = vmul.f32 %v14688_v38, %v10595_v3  ;;  %v8018_v52 = vpop.xlane.xlu2 %8017  ;;  %v10602_v48 = vmul.f32 %v14690_v42, %v19550_v0  ;;  %v7227_v29 = vpop.xlane.xlu1 %7226  ;;  %vm10608_vm8 = vweird.f32 %v14690_v42 }
 0x5e9   : > { %14691 = vrsqrt.f32 %v19574_v37  ;;  %13436 = vmatmul.msk.bf16.gmra.mxu2 %vm1267_vm0, %v14231_v58  ;;  %11787 = vst [vmem:[%s15334_s24 + $0x4b0] sm:$0xff] %v11591_v8  ;;  %v19588_v28 = vadd.f32 %v19444_v36, %v6691_v45  ;;  %v19591_v9 = vmul.f32 %v15231_v41, %v7227_v29  ;;  %v8255_v54 = vmul.f32 %v8018_v52, %v15231_v41  ;;  %vm10609_vm10 = vmor %vm10607_vm9, %vm10608_vm8  ;;  %v14133_v52 = vld [vmem:[%s14992_s13 + $0x2f0] sm:$0xff] }
 0x5ea   : > { %13932 = vmatmul.msk.bf16.gmra.mxu3 %vm1267_vm0, %v14330_v22  ;;  %v10600_v51 = vsel %vm10599_vm7, %v14688_v38, %v10596_v40  ;;  %v10603_v4 = vmul.f32 %v14690_v42, %v10602_v48  ;;  %v8841_v22 = vsub.f32 %v19110_v32, %v19539_v49  ;;  %vm10617_vm12 = vweird.f32 %v19574_v37 }
 0x5eb   : > { %v11192_v14 = vmul.f32 %v10600_v51, %v8840_v44  ;;  %v8451_v31 = vmul.f32 %v19591_v9, %v19591_v9  ;;  %v7682_v5 = vmul.f32 %v19588_v28, %v19588_v28  ;;  %v14034_v44 = vld [vmem:[%s14997_s19 + $0x2f0] sm:$0xff] }
 0x5ec   : > { %v4773_v57 = vpop.f32.mrf.mxu2  ;;  %v10604_v39 = vmul.f32 0.5, %v10603_v4  ;;  %v14232_v4 = vld [vmem:[%s15004_s22 + $0x2f0] sm:$0xff] }
 0x5ed   : > { %v6457_v23 = vpop.f32.mrf.mxu3  ;;  %v11392_v38 = vmul.f32 %v19260_v63, %v11192_v14  ;;  %v5008_v6 = vadd.f32 %v4773_v57, %v3286_v61  ;;  %7256 = vadd.xlane.f32.xlu1 %v19588_v28  ;;  %v8647_v1 = vsub.f32 %v8255_v54, %v8451_v31  ;;  %8047 = vadd.xlane.f32.xlu2 %v7682_v5  ;;  %v14331_v54 = vld [vmem:[%s15009_s25 + $0x2f0] sm:$0xff] }
 0x5ee   : > { %v1998_v59 = vpop.f32.mrf.mxu0  ;;  %v3287_v46 = vpop.f32.mrf.mxu1  ;;  %v10605_v53 = vsub.f32 1.5, %v10604_v39 }
 0x5ef   : > { %v14692_v55 = vpop.eup %14691  ;;  %v11592_v19 = vadd.f32 %v19269_v12, %v11392_v38  ;;  %v6692_v20 = vadd.f32 %v6457_v23, %v5008_v6  ;;  %v19602_v10 = vadd.f32 1e-05, %v8647_v1  ;;  %v3288_v3 = vadd.f32 %v3287_v46, %v1998_v59 }
 0x5f0   : > { %v10612_v26 = vmul.f32 %v14692_v55, %v19574_v37  ;;  %v7229_v27 = vpop.xlane.xlu2 %7228  ;;  %v10606_v16 = vmul.f32 %v14690_v42, %v10605_v53  ;;  %v8020_v58 = vpop.xlane.xlu0 %8019  ;;  %vm10618_vm11 = vweird.f32 %v14692_v55 }
 0x5f1   : > { %11788 = vst [vmem:[%s15334_s24 + $0x4b8] sm:$0xff] %v11592_v19  ;;  %v19607_v7 = vadd.f32 %v19444_v36, %v6692_v20  ;;  %v19610_v60 = vmul.f32 %v15231_v41, %v7229_v27  ;;  %14693 = vrsqrt.f32 %v19602_v10  ;;  %v8256_v8 = vmul.f32 %v8020_v58, %v15231_v41  ;;  %vm10619_vm13 = vmor %vm10617_vm12, %vm10618_vm11 }
 0x5f2   : > { %v10613_v17 = vmul.f32 %v14692_v55, %v10612_v26  ;;  %v10610_v45 = vsel %vm10609_vm10, %v14690_v42, %v10606_v16  ;;  %vm10627_vm15 = vweird.f32 %v19602_v10 }
 0x5f3   : > { %v8452_v0 = vmul.f32 %v19610_v60, %v19610_v60  ;;  %v7683_v40 = vmul.f32 %v19607_v7, %v19607_v7  ;;  %v11193_v48 = vmul.f32 %v10610_v45, %v8841_v22 }
 0x5f4   : > { %v10614_v32 = vmul.f32 0.5, %v10613_v17  ;;  %v4775_v49 = vpop.f32.mrf.mxu2 }
 0x5f5   : > { %v6459_v61 = vpop.f32.mrf.mxu3  ;;  %v8648_v29 = vsub.f32 %v8256_v8, %v8452_v0  ;;  %v5009_v51 = vadd.f32 %v4775_v49, %v3288_v3  ;;  %8049 = vadd.xlane.f32.xlu0 %v7683_v40  ;;  %v11393_v31 = vmul.f32 %v19260_v63, %v11193_v48  ;;  %7258 = vadd.xlane.f32.xlu2 %v19607_v7 }
 0x5f6   : > { %v2001_v14 = vpop.f32.mrf.mxu0  ;;  %v3290_v42 = vpop.f32.mrf.mxu1  ;;  %v10615_v57 = vsub.f32 1.5, %v10614_v32  ;;  %v8842_v63 = vsub.f32 %v19143_v18, %v19558_v43 }
 0x5f7   : > { %v19626_v23 = vadd.f32 1e-05, %v8648_v29  ;;  %v6693_v5 = vadd.f32 %v6459_v61, %v5009_v51  ;;  %12447 = vmatmul.msk.bf16.gmra.mxu0 %vm1267_vm0, %v14133_v52  ;;  %v14694_v38 = vpop.eup %14693  ;;  %v11593_v39 = vadd.f32 %v19269_v12, %v11393_v31  ;;  %v3291_v1 = vadd.f32 %v3290_v42, %v2001_v14  ;;  %v19662_v52 = vld [vmem:[%s20452_s7] ss:$0 sm:$0xff] }
 0x5f8   : > { %12941 = vmatmul.msk.bf16.gmra.mxu1 %vm1267_vm0, %v14034_v44  ;;  %v10616_v6 = vmul.f32 %v14692_v55, %v10615_v57  ;;  %v8022_v59 = vpop.xlane.xlu1 %8021  ;;  %v10622_v46 = vmul.f32 %v14694_v38, %v19602_v10  ;;  %v7231_v19 = vpop.xlane.xlu0 %7230  ;;  %vm10628_vm14 = vweird.f32 %v14694_v38 }
 0x5f9   : > { %14695 = vrsqrt.f32 %v19626_v23  ;;  %13437 = vmatmul.msk.bf16.gmra.mxu2 %vm1267_vm0, %v14232_v4  ;;  %11789 = vst [vmem:[%s15334_s24 + $0x4c0] sm:$0xff] %v11593_v39  ;;  %v19640_v53 = vadd.f32 %v19444_v36, %v6693_v5  ;;  %v19643_v37 = vmul.f32 %v15231_v41, %v7231_v19  ;;  %v8257_v26 = vmul.f32 %v8022_v59, %v15231_v41  ;;  %vm10629_vm1 = vmor %vm10627_vm15, %vm10628_vm14  ;;  %v14134_v59 = vld [vmem:[%s14992_s13 + $0x2f8] sm:$0xff] }
 0x5fa   : > { %13933 = vmatmul.msk.bf16.gmra.mxu3 %vm1267_vm0, %v14331_v54  ;;  %v10620_v12 = vsel %vm10619_vm13, %v14692_v55, %v10616_v6  ;;  %v10623_v43 = vmul.f32 %v14694_v38, %v10622_v46  ;;  %v19653_v55 = vld [vmem:[%s20451_s6] ss:$0 sm:$0xff]  ;;  %v8843_v54 = vsub.f32 %v19162_v30, %v19591_v9  ;;  %vm10637_vm3 = vweird.f32 %v19626_v23 }
 0x5fb   : > { %v11194_v18 = vmul.f32 %v10620_v12, %v8842_v63  ;;  %v8453_v20 = vmul.f32 %v19643_v37, %v19643_v37  ;;  %v7684_v58 = vmul.f32 %v19640_v53, %v19640_v53  ;;  %v14035_v63 = vld [vmem:[%s14997_s19 + $0x2f8] sm:$0xff] }
 0x5fc   : > { %v4778_v27 = vpop.f32.mrf.mxu2  ;;  %v10624_v17 = vmul.f32 0.5, %v10623_v43  ;;  %v14233_v43 = vld [vmem:[%s15004_s22 + $0x2f8] sm:$0xff] }
 0x5fd   : > { %v6462_v16 = vpop.f32.mrf.mxu3  ;;  %v11394_v22 = vmul.f32 %v19653_v55, %v11194_v18  ;;  %v5010_v3 = vadd.f32 %v4778_v27, %v3291_v1  ;;  %7260 = vadd.xlane.f32.xlu0 %v19640_v53  ;;  %v8649_v8 = vsub.f32 %v8257_v26, %v8453_v20  ;;  %8051 = vadd.xlane.f32.xlu1 %v7684_v58  ;;  %v14332_v20 = vld [vmem:[%s15009_s25 + $0x2f8] sm:$0xff] }
 0x5fe   : > { %v2003_v45 = vpop.f32.mrf.mxu0  ;;  %v3292_v0 = vpop.f32.mrf.mxu1  ;;  %v10625_v48 = vsub.f32 1.5, %v10624_v17 }
 0x5ff   : > { %v19657_v40 = vpop.eup %14695  ;;  %v11594_v44 = vadd.f32 %v19662_v52, %v11394_v22  ;;  %v6694_v32 = vadd.f32 %v6462_v16, %v5010_v3  ;;  %v19667_v61 = vadd.f32 1e-05, %v8649_v8  ;;  %v3293_v57 = vadd.f32 %v3292_v0, %v2003_v45 }
 0x600   : > { %v10632_v49 = vmul.f32 %v19657_v40, %v19626_v23  ;;  %v7233_v29 = vpop.xlane.xlu1 %7232  ;;  %v10626_v51 = vmul.f32 %v14694_v38, %v10625_v48  ;;  %v8024_v42 = vpop.xlane.xlu2 %8023  ;;  %vm10638_vm2 = vweird.f32 %v19657_v40  ;;  %v8844_v0 = vsub.f32 %v19195_v33, %v19610_v60 }
 0x601   : > { %11790 = vst [vmem:[%s15334_s24 + $0x4c8] sm:$0xff] %v11594_v44  ;;  %v19672_v14 = vadd.f32 %v19444_v36, %v6694_v32  ;;  %v19675_v4 = vmul.f32 %v15231_v41, %v7233_v29  ;;  %14697 = vrsqrt.f32 %v19667_v61  ;;  %v8258_v10 = vmul.f32 %v8024_v42, %v15231_v41  ;;  %vm10639_vm4 = vmor %vm10637_vm3, %vm10638_vm2 }
 0x602   : > { %v10633_v31 = vmul.f32 %v19657_v40, %v10632_v49  ;;  %v10630_v5 = vsel %vm10629_vm1, %v14694_v38, %v10626_v51  ;;  %vm10647_vm6 = vweird.f32 %v19667_v61 }
 0x603   : > { %v8454_v39 = vmul.f32 %v19675_v4, %v19675_v4  ;;  %v7685_v6 = vmul.f32 %v19672_v14, %v19672_v14  ;;  %v11195_v30 = vmul.f32 %v10630_v5, %v8843_v54 }
 0x604   : > { %v10634_v9 = vmul.f32 0.5, %v10633_v31  ;;  %v4780_v46 = vpop.f32.mrf.mxu2 }
 0x605   : > { %v6464_v1 = vpop.f32.mrf.mxu3  ;;  %v8650_v19 = vsub.f32 %v8258_v10, %v8454_v39  ;;  %v5011_v12 = vadd.f32 %v4780_v46, %v3293_v57  ;;  %8053 = vadd.xlane.f32.xlu2 %v7685_v6  ;;  %v11395_v26 = vmul.f32 %v19653_v55, %v11195_v30  ;;  %7262 = vadd.xlane.f32.xlu1 %v19672_v14 }
 0x606   : > { %v2006_v18 = vpop.f32.mrf.mxu0  ;;  %v3295_v38 = vpop.f32.mrf.mxu1  ;;  %v10635_v27 = vsub.f32 1.5, %v10634_v9 }
 0x607   : > { %v19693_v16 = vadd.f32 1e-05, %v8650_v19  ;;  %v6695_v58 = vadd.f32 %v6464_v1, %v5011_v12  ;;  %12448 = vmatmul.msk.bf16.gmra.mxu0 %vm1267_vm0, %v14134_v59  ;;  %v14698_v22 = vpop.eup %14697  ;;  %v11595_v17 = vadd.f32 %v19662_v52, %v11395_v26  ;;  %v3296_v44 = vadd.f32 %v3295_v38, %v2006_v18 }
 0x608   : > { %12942 = vmatmul.msk.bf16.gmra.mxu1 %vm1267_vm0, %v14035_v63  ;;  %v10636_v3 = vmul.f32 %v19657_v40, %v10635_v27  ;;  %v8026_v45 = vpop.xlane.xlu0 %8025  ;;  %v10642_v8 = vmul.f32 %v14698_v22, %v19667_v61  ;;  %v7235_v48 = vpop.xlane.xlu2 %7234  ;;  %vm10648_vm5 = vweird.f32 %v14698_v22 }
 0x609   : > { %14699 = vrsqrt.f32 %v19693_v16  ;;  %13438 = vmatmul.msk.bf16.gmra.mxu2 %vm1267_vm0, %v14233_v43  ;;  %11791 = vst [vmem:[%s15334_s24 + $0x4d0] sm:$0xff] %v11595_v17  ;;  %v19709_v23 = vadd.f32 %v19444_v36, %v6695_v58  ;;  %v19712_v49 = vmul.f32 %v15231_v41, %v7235_v48  ;;  %v8259_v51 = vmul.f32 %v8026_v45, %v15231_v41  ;;  %vm10649_vm7 = vmor %vm10647_vm6, %vm10648_vm5  ;;  %v14135_v45 = vld [vmem:[%s14992_s13 + $0x300] sm:$0xff] }
 0x60a   : > { %13934 = vmatmul.msk.bf16.gmra.mxu3 %vm1267_vm0, %v14332_v20  ;;  %v10640_v32 = vsel %vm10639_vm4, %v19657_v40, %v10636_v3  ;;  %v10643_v60 = vmul.f32 %v14698_v22, %v10642_v8  ;;  %v8845_v20 = vsub.f32 %v19214_v13, %v19643_v37  ;;  %vm10657_vm9 = vweird.f32 %v19693_v16 }
 0x60b   : > { %v11196_v33 = vmul.f32 %v10640_v32, %v8844_v0  ;;  %v8455_v29 = vmul.f32 %v19712_v49, %v19712_v49  ;;  %v7686_v31 = vmul.f32 %v19709_v23, %v19709_v23  ;;  %v14036_v0 = vld [vmem:[%s14997_s19 + $0x300] sm:$0xff] }
 0x60c   : > { %v4783_v42 = vpop.f32.mrf.mxu2  ;;  %v10644_v57 = vmul.f32 0.5, %v10643_v60  ;;  %v14234_v60 = vld [vmem:[%s15004_s22 + $0x300] sm:$0xff] }
 0x60d   : > { %v6467_v54 = vpop.f32.mrf.mxu3  ;;  %v11396_v40 = vmul.f32 %v19653_v55, %v11196_v33  ;;  %v5012_v5 = vadd.f32 %v4783_v42, %v3296_v44  ;;  %7264 = vadd.xlane.f32.xlu2 %v19709_v23  ;;  %v8651_v6 = vsub.f32 %v8259_v51, %v8455_v29  ;;  %8055 = vadd.xlane.f32.xlu0 %v7686_v31  ;;  %v14333_v29 = vld [vmem:[%s15009_s25 + $0x300] sm:$0xff] }
 0x60e   : > { %v2008_v10 = vpop.f32.mrf.mxu0  ;;  %v3297_v39 = vpop.f32.mrf.mxu1  ;;  %v10645_v30 = vsub.f32 1.5, %v10644_v57 }
 0x60f   : > { %v14700_v59 = vpop.eup %14699  ;;  %v11596_v63 = vadd.f32 %v19662_v52, %v11396_v40  ;;  %v6696_v9 = vadd.f32 %v6467_v54, %v5012_v5  ;;  %v19723_v1 = vadd.f32 1e-05, %v8651_v6  ;;  %v3298_v27 = vadd.f32 %v3297_v39, %v2008_v10 }
 0x610   : > { %v10652_v46 = vmul.f32 %v14700_v59, %v19693_v16  ;;  %v7237_v19 = vpop.xlane.xlu0 %7236  ;;  %v10646_v12 = vmul.f32 %v14698_v22, %v10645_v30  ;;  %v8028_v43 = vpop.xlane.xlu1 %8027  ;;  %vm10658_vm8 = vweird.f32 %v14700_v59  ;;  %v8846_v39 = vsub.f32 %v19247_v21, %v19675_v4 }
 0x611   : > { %11792 = vst [vmem:[%s15334_s24 + $0x4d8] sm:$0xff] %v11596_v63  ;;  %v19728_v18 = vadd.f32 %v19444_v36, %v6696_v9  ;;  %v19731_v38 = vmul.f32 %v15231_v41, %v7237_v19  ;;  %14701 = vrsqrt.f32 %v19723_v1  ;;  %v8260_v17 = vmul.f32 %v8028_v43, %v15231_v41  ;;  %vm10659_vm10 = vmor %vm10657_vm9, %vm10658_vm8 }
 0x612   : > { %v10653_v26 = vmul.f32 %v14700_v59, %v10652_v46  ;;  %v10650_v58 = vsel %vm10649_vm7, %v14698_v22, %v10646_v12  ;;  %vm10667_vm12 = vweird.f32 %v19723_v1 }
 0x613   : > { %v8456_v61 = vmul.f32 %v19731_v38, %v19731_v38  ;;  %v7687_v3 = vmul.f32 %v19728_v18, %v19728_v18  ;;  %v11197_v8 = vmul.f32 %v10650_v58, %v8845_v20 }
 0x614   : > { %v10654_v13 = vmul.f32 0.5, %v10653_v26  ;;  %v4785_v37 = vpop.f32.mrf.mxu2 }
 0x615   : > { %v6469_v44 = vpop.f32.mrf.mxu3  ;;  %v8652_v48 = vsub.f32 %v8260_v17, %v8456_v61  ;;  %v5013_v32 = vadd.f32 %v4785_v37, %v3298_v27  ;;  %8057 = vadd.xlane.f32.xlu1 %v7687_v3  ;;  %v11397_v51 = vmul.f32 %v19653_v55, %v11197_v8  ;;  %7266 = vadd.xlane.f32.xlu0 %v19728_v18 }
 0x616   : > { %v2011_v33 = vpop.f32.mrf.mxu0  ;;  %v3300_v22 = vpop.f32.mrf.mxu1  ;;  %v10655_v42 = vsub.f32 1.5, %v10654_v13 }
 0x617   : > { %v19747_v54 = vadd.f32 1e-05, %v8652_v48  ;;  %v6697_v31 = vadd.f32 %v6469_v44, %v5013_v32  ;;  %12449 = vmatmul.msk.bf16.gmra.mxu0 %vm1267_vm0, %v14135_v45  ;;  %v14702_v40 = vpop.eup %14701  ;;  %v11597_v57 = vadd.f32 %v19662_v52, %v11397_v51  ;;  %v3301_v63 = vadd.f32 %v3300_v22, %v2011_v33 }
 0x618   : > { %12943 = vmatmul.msk.bf16.gmra.mxu1 %vm1267_vm0, %v14036_v0  ;;  %v10656_v5 = vmul.f32 %v14700_v59, %v10655_v42  ;;  %v8030_v10 = vpop.xlane.xlu2 %8029  ;;  %v10662_v6 = vmul.f32 %v14702_v40, %v19723_v1  ;;  %v7239_v30 = vpop.xlane.xlu1 %7238  ;;  %vm10668_vm11 = vweird.f32 %v14702_v40 }
 0x619   : > { %14703 = vrsqrt.f32 %v19747_v54  ;;  %13439 = vmatmul.msk.bf16.gmra.mxu2 %vm1267_vm0, %v14234_v60  ;;  %11793 = vst [vmem:[%s15334_s24 + $0x4e0] sm:$0xff] %v11597_v57  ;;  %v19761_v46 = vadd.f32 %v19444_v36, %v6697_v31  ;;  %v19764_v16 = vmul.f32 %v15231_v41, %v7239_v30  ;;  %v8261_v19 = vmul.f32 %v8030_v10, %v15231_v41  ;;  %vm10669_vm13 = vmor %vm10667_vm12, %vm10668_vm11  ;;  %v14136_v10 = vld [vmem:[%s14992_s13 + $0x308] sm:$0xff]  ;;  %s14836_s13 = scalar_lea.hbm %s20453_s8, 6272 }
 0x61a   : > { %13935 = vmatmul.msk.bf16.gmra.mxu3 %vm1267_vm0, %v14333_v29  ;;  %v10660_v9 = vsel %vm10659_vm10, %v14700_v59, %v10656_v5  ;;  %v10663_v4 = vmul.f32 %v14702_v40, %v10662_v6  ;;  %v8847_v29 = vsub.f32 %v19279_v25, %v19712_v49  ;;  %vm10677_vm15 = vweird.f32 %v19747_v54 }
 0x61b   : > { %v11198_v21 = vmul.f32 %v10660_v9, %v8846_v39  ;;  %v8457_v12 = vmul.f32 %v19764_v16, %v19764_v16  ;;  %v7688_v26 = vmul.f32 %v19761_v46, %v19761_v46  ;;  %v14037_v39 = vld [vmem:[%s14997_s19 + $0x308] sm:$0xff]  ;;  %s14336_s19 = smul.u32 1568, %s14949_s9  ;;  %s11846_s9 = sshll.u32 %s15334_s24, 4  ;;  %s11847_s9 = int_to_ptr.vmem [resolvable:$true] %s11846_s9 }
 0x61c   : > { %v4788_v43 = vpop.f32.mrf.mxu2  ;;  %v10664_v27 = vmul.f32 0.5, %v10663_v4  ;;  %v14235_v4 = vld [vmem:[%s15004_s22 + $0x308] sm:$0xff] }
 0x61d   : > { %v6472_v20 = vpop.f32.mrf.mxu3  ;;  %v11398_v59 = vmul.f32 %v19653_v55, %v11198_v21  ;;  %v5014_v58 = vadd.f32 %v4788_v43, %v3301_v63  ;;  %7268 = vadd.xlane.f32.xlu1 %v19761_v46  ;;  %v8653_v3 = vsub.f32 %v8261_v19, %v8457_v12  ;;  %8059 = vadd.xlane.f32.xlu2 %v7688_v26  ;;  %v14334_v19 = vld [vmem:[%s15009_s25 + $0x308] sm:$0xff]  ;;  %s11845_s18 = scalar_lea.hbm %s20453_s8, %s14336_s19 }
 0x61e   : > { %v2013_v61 = vpop.f32.mrf.mxu0  ;;  %v3302_v17 = vpop.f32.mrf.mxu1  ;;  %v10665_v8 = vsub.f32 1.5, %v10664_v27  ;;  %s11848_s20 = sshll.u32 %s11845_s18, 4  ;;  %s11849_s20 = int_to_ptr.hbm [resolvable:$true] %s11848_s20 }
 0x61f   : > { %v14704_v45 = vpop.eup %14703  ;;  %v11598_v0 = vadd.f32 %v19662_v52, %v11398_v59  ;;  %v6698_v13 = vadd.f32 %v6472_v20, %v5014_v58  ;;  %v19775_v44 = vadd.f32 1e-05, %v8653_v3  ;;  %v3303_v42 = vadd.f32 %v3302_v17, %v2013_v61  ;;  %s14830_s23 = sshra.s32 %s11849_s20, 4  ;;  %s14831_s23 = int_to_ptr.hbm [resolvable:$true] %s14830_s23 }
 0x620   : > { %v10672_v37 = vmul.f32 %v14704_v45, %v19747_v54  ;;  %v7241_v48 = vpop.xlane.xlu2 %7240  ;;  %v10666_v32 = vmul.f32 %v14702_v40, %v10665_v8  ;;  %v8032_v60 = vpop.xlane.xlu0 %8031  ;;  %vm10678_vm14 = vweird.f32 %v14704_v45  ;;  %v8848_v17 = vsub.f32 %v19316_v47, %v19731_v38  ;;  %s14832_s26 = scalar_lea.hbm %s14831_s23, 1568  ;;  %p14837_p0 = scmp.lt.s32.totalorder %s14831_s23, %s20453_s8 }
 0x621   : > { %11794 = vst [vmem:[%s15334_s24 + $0x4e8] sm:$0xff] %v11598_v0  ;;  %v19780_v33 = vadd.f32 %v19444_v36, %v6698_v13  ;;  %v19783_v22 = vmul.f32 %v15231_v41, %v7241_v48  ;;  %14705 = vrsqrt.f32 %v19775_v44  ;;  %v8262_v57 = vmul.f32 %v8032_v60, %v15231_v41  ;;  %vm10679_vm1 = vmor %vm10677_vm15, %vm10678_vm14  ;;  %p14833_p11 = scmp.ne.s32.totalorder %s14831_s23, %s14832_s26  ;;  %p14838_p1 = scmp.lt.s32.totalorder %s14836_s13, %s14832_s26 }
 0x622   : > { %v10673_v51 = vmul.f32 %v14704_v45, %v10672_v37  ;;  %v10670_v31 = vsel %vm10669_vm13, %v14702_v40, %v10666_v32  ;;  %vm10687_vm2 = vweird.f32 %v19775_v44 }
 0x623   : > { %v8458_v1 = vmul.f32 %v19783_v22, %v19783_v22  ;;  %v7689_v5 = vmul.f32 %v19780_v33, %v19780_v33  ;;  %v11199_v6 = vmul.f32 %v10670_v31, %v8847_v29  ;;  %p14834_p12 = pnand %p14833_p11, %p14966_p5  ;;  %p14839_p2 = por %p14838_p1, %p14837_p0 }
 0x624   : > { %v10674_v25 = vmul.f32 0.5, %v10673_v51  ;;  %v4790_v49 = vpop.f32.mrf.mxu2 }
 0x625   : > { %v6474_v63 = vpop.f32.mrf.mxu3  ;;  %v8654_v30 = vsub.f32 %v8262_v57, %v8458_v1  ;;  %v5015_v9 = vadd.f32 %v4790_v49, %v3303_v42  ;;  %8061 = vadd.xlane.f32.xlu0 %v7689_v5  ;;  %v11399_v12 = vmul.f32 %v19653_v55, %v11199_v6  ;;  %7270 = vadd.xlane.f32.xlu2 %v19780_v33  ;;  %p14835_p13 = pneg %p14834_p12 }
 0x626   : > { %v2016_v21 = vpop.f32.mrf.mxu0  ;;  %v3305_v40 = vpop.f32.mrf.mxu1  ;;  %v10675_v43 = vsub.f32 1.5, %v10674_v25 }
 0x627   : > { %v19799_v20 = vadd.f32 1e-05, %v8654_v30  ;;  %v6699_v26 = vadd.f32 %v6474_v63, %v5015_v9  ;;  %12450 = vmatmul.msk.bf16.gmra.mxu0 %vm1267_vm0, %v14136_v10  ;;  %v14706_v59 = vpop.eup %14705  ;;  %v11599_v27 = vadd.f32 %v19662_v52, %v11399_v12  ;;  %v3306_v0 = vadd.f32 %v3305_v40, %v2016_v21  ;;  %v19834_v9 = vld [vmem:[%s20450_s5] ss:$0 sm:$0xff]  ;;  %p14840_p3 = pnand %p14839_p2, %p14835_p13 }
 0x628   : > { %12944 = vmatmul.msk.bf16.gmra.mxu1 %vm1267_vm0, %v14037_v39  ;;  %v10676_v58 = vmul.f32 %v14704_v45, %v10675_v43  ;;  %v8034_v61 = vpop.xlane.xlu1 %8033  ;;  %v10682_v3 = vmul.f32 %v14706_v59, %v19775_v44  ;;  %v7243_v8 = vpop.xlane.xlu0 %7242 }
 0x629   : > { %14707 = vrsqrt.f32 %v19799_v20  ;;  %13440 = vmatmul.msk.bf16.gmra.mxu2 %vm1267_vm0, %v14235_v4  ;;  %11795 = vst [vmem:[%s15334_s24 + $0x4f0] sm:$0xff] %v11599_v27  ;;  %v19813_v37 = vadd.f32 %v19444_v36, %v6699_v26  ;;  %v19816_v54 = vmul.f32 %v15231_v41, %v7243_v8  ;;  %v8263_v32 = vmul.f32 %v8034_v61, %v15231_v41 }
 0x62a   : > { %13936 = vmatmul.msk.bf16.gmra.mxu3 %vm1267_vm0, %v14334_v19  ;;  %v10680_v13 = vsel %vm10679_vm1, %v14704_v45, %v10676_v58  ;;  %v10683_v38 = vmul.f32 %v14706_v59, %v10682_v3  ;;  %vm10688_vm0 = vweird.f32 %v14706_v59  ;;  %v8849_v19 = vsub.f32 %v19335_v35, %v19764_v16 }
 0x62b   : > { %v11200_v47 = vmul.f32 %v10680_v13, %v8848_v17  ;;  %v8459_v48 = vmul.f32 %v19816_v54, %v19816_v54  ;;  %v7690_v51 = vmul.f32 %v19813_v37, %v19813_v37  ;;  %vm10689_vm3 = vmor %vm10687_vm2, %vm10688_vm0  ;;  %vm10697_vm5 = vweird.f32 %v19799_v20 }
 0x62c   : > { %v4793_v60 = vpop.f32.mrf.mxu2  ;;  %v10684_v36 = vmul.f32 0.5, %v10683_v38 }
 0x62d   : > { %v6477_v29 = vpop.f32.mrf.mxu3  ;;  %v11400_v45 = vmul.f32 %v19653_v55, %v11200_v47  ;;  %v5016_v42 = vadd.f32 %v4793_v60, %v3306_v0  ;;  %7272 = vadd.xlane.f32.xlu0 %v19813_v37  ;;  %v8655_v57 = vsub.f32 %v8263_v32, %v8459_v48  ;;  %8063 = vadd.xlane.f32.xlu1 %v7690_v51 }
 0x62e   : > { %v2018_v31 = vpop.f32.mrf.mxu0  ;;  %v3307_v1 = vpop.f32.mrf.mxu1  ;;  %v10685_v39 = vsub.f32 1.5, %v10684_v36 }
 0x62f   : > { %v14708_v5 = vpop.eup %14707  ;;  %v11600_v10 = vadd.f32 %v19662_v52, %v11400_v45  ;;  %v6700_v6 = vadd.f32 %v6477_v29, %v5016_v42  ;;  %v19827_v49 = vadd.f32 1e-05, %v8655_v57  ;;  %v3308_v44 = vadd.f32 %v3307_v1, %v2018_v31 }
 0x630   : > { %v10692_v25 = vmul.f32 %v14708_v5, %v19799_v20  ;;  %v7245_v63 = vpop.xlane.xlu1 %7244  ;;  %v10686_v30 = vmul.f32 %v14706_v59, %v10685_v39  ;;  %v8036_v40 = vpop.xlane.xlu2 %8035  ;;  %vm10698_vm4 = vweird.f32 %v14708_v5  ;;  %v8850_v45 = vsub.f32 %v19368_v62, %v19783_v22 }
 0x631   : > { %11796 = vst [vmem:[%s15334_s24 + $0x4f8] sm:$0xff] %v11600_v10  ;;  %v19837_v21 = vadd.f32 %v19834_v9, %v6700_v6  ;;  %v19840_v4 = vmul.f32 %v15231_v41, %v7245_v63  ;;  %14709 = vrsqrt.f32 %v19827_v49  ;;  %v8264_v26 = vmul.f32 %v8036_v40, %v15231_v41  ;;  %vm10699_vm6 = vmor %vm10697_vm5, %vm10698_vm4 }
 0x632   : > { %v10693_v12 = vmul.f32 %v14708_v5, %v10692_v25  ;;  %v10690_v43 = vsel %vm10689_vm3, %v14706_v59, %v10686_v30  ;;  %vm10707_vm8 = vweird.f32 %v19827_v49 }
 0x633   : > { %v8460_v27 = vmul.f32 %v19840_v4, %v19840_v4  ;;  %v7691_v58 = vmul.f32 %v19837_v21, %v19837_v21  ;;  %v11201_v61 = vmul.f32 %v10690_v43, %v8849_v19 }
 0x634   : > { %v10694_v17 = vmul.f32 0.5, %v10693_v12  ;;  %v4795_v3 = vpop.f32.mrf.mxu2 }
 0x635   : > { %v6479_v0 = vpop.f32.mrf.mxu3  ;;  %v8656_v8 = vsub.f32 %v8264_v26, %v8460_v27  ;;  %v5017_v35 = vadd.f32 %v4795_v3, %v3308_v44  ;;  %8065 = vadd.xlane.f32.xlu2 %v7691_v58  ;;  %v11401_v47 = vmul.f32 %v19653_v55, %v11201_v61  ;;  %7274 = vadd.xlane.f32.xlu1 %v19837_v21 }
 0x636   : > { %v2021_v16 = vpop.f32.mrf.mxu0  ;;  %v3310_v13 = vpop.f32.mrf.mxu1  ;;  %v10695_v59 = vsub.f32 1.5, %v10694_v17 }
 0x637   : > { %v19852_v38 = vadd.f32 1e-05, %v8656_v8  ;;  %v6701_v48 = vadd.f32 %v6479_v0, %v5017_v35  ;;  %v14710_v32 = vpop.eup %14709  ;;  %v11601_v60 = vadd.f32 %v19662_v52, %v11401_v47  ;;  %v3311_v42 = vadd.f32 %v3310_v13, %v2021_v16 }
 0x638   : > { %v10696_v29 = vmul.f32 %v14708_v5, %v10695_v59  ;;  %v8038_v51 = vpop.xlane.xlu0 %8037  ;;  %v10702_v36 = vmul.f32 %v14710_v32, %v19827_v49  ;;  %v7247_v31 = vpop.xlane.xlu2 %7246  ;;  %vm10708_vm7 = vweird.f32 %v14710_v32  ;;  %v8851_v13 = vsub.f32 %v19387_v2, %v19816_v54 }
 0x639   : > { %14711 = vrsqrt.f32 %v19852_v38  ;;  %11797 = vst [vmem:[%s15334_s24 + $0x500] sm:$0xff] %v11601_v60  ;;  %v19862_v57 = vadd.f32 %v19834_v9, %v6701_v48  ;;  %v19865_v10 = vmul.f32 %v15231_v41, %v7247_v31  ;;  %v8265_v22 = vmul.f32 %v8038_v51, %v15231_v41  ;;  %vm10709_vm9 = vmor %vm10707_vm8, %vm10708_vm7 }
 0x63a   : > { %v10700_v1 = vsel %vm10699_vm6, %v14708_v5, %v10696_v29  ;;  %v10703_v39 = vmul.f32 %v14710_v32, %v10702_v36  ;;  %vm10717_vm11 = vweird.f32 %v19852_v38 }
 0x63b   : > { %v11202_v20 = vmul.f32 %v10700_v1, %v8850_v45  ;;  %v8461_v62 = vmul.f32 %v19865_v10, %v19865_v10  ;;  %v7692_v63 = vmul.f32 %v19862_v57, %v19862_v57 }
 0x63c   : > { %v4798_v6 = vpop.f32.mrf.mxu2  ;;  %v10704_v30 = vmul.f32 0.5, %v10703_v39 }
 0x63d   : > { %v6482_v25 = vpop.f32.mrf.mxu3  ;;  %v11402_v5 = vmul.f32 %v19653_v55, %v11202_v20  ;;  %v5018_v40 = vadd.f32 %v4798_v6, %v3311_v42  ;;  %7276 = vadd.xlane.f32.xlu2 %v19862_v57  ;;  %v8657_v44 = vsub.f32 %v8265_v22, %v8461_v62  ;;  %8067 = vadd.xlane.f32.xlu0 %v7692_v63 }
 0x63e   : > { %v2023_v19 = vpop.f32.mrf.mxu0  ;;  %v3312_v12 = vpop.f32.mrf.mxu1  ;;  %v10705_v27 = vsub.f32 1.5, %v10704_v30 }
 0x63f   : > { %v14712_v43 = vpop.eup %14711  ;;  %v11602_v26 = vadd.f32 %v19662_v52, %v11402_v5  ;;  %v6702_v58 = vadd.f32 %v6482_v25, %v5018_v40  ;;  %v19876_v17 = vadd.f32 1e-05, %v8657_v44  ;;  %v3313_v59 = vadd.f32 %v3312_v12, %v2023_v19 }
 0x640   : > { %v10712_v61 = vmul.f32 %v14712_v43, %v19852_v38  ;;  %v7249_v3 = vpop.xlane.xlu0 %7248  ;;  %v10706_v0 = vmul.f32 %v14710_v32, %v10705_v27  ;;  %v8040_v16 = vpop.xlane.xlu1 %8039  ;;  %vm10718_vm10 = vweird.f32 %v14712_v43  ;;  %v8852_v5 = vsub.f32 %v19420_v56, %v19840_v4 }
 0x641   : > { %11798 = vst [vmem:[%s15334_s24 + $0x508] sm:$0xff] %v11602_v26  ;;  %v19881_v8 = vadd.f32 %v19834_v9, %v6702_v58  ;;  %v19884_v35 = vmul.f32 %v15231_v41, %v7249_v3  ;;  %14713 = vrsqrt.f32 %v19876_v17  ;;  %v8266_v49 = vmul.f32 %v8040_v16, %v15231_v41  ;;  %vm10719_vm12 = vmor %vm10717_vm11, %vm10718_vm10 }
 0x642   : > { %v10713_v47 = vmul.f32 %v14712_v43, %v10712_v61  ;;  %v10710_v48 = vsel %vm10709_vm9, %v14710_v32, %v10706_v0  ;;  %vm10727_vm14 = vweird.f32 %v19876_v17 }
 0x643   : > { %v8462_v60 = vmul.f32 %v19884_v35, %v19884_v35  ;;  %v7693_v29 = vmul.f32 %v19881_v8, %v19881_v8  ;;  %v11203_v51 = vmul.f32 %v10710_v48, %v8851_v13 }
 0x644   : > { %v10714_v45 = vmul.f32 0.5, %v10713_v47  ;;  %v4800_v36 = vpop.f32.mrf.mxu2 }
 0x645   : > { %v6484_v42 = vpop.f32.mrf.mxu3  ;;  %v8658_v31 = vsub.f32 %v8266_v49, %v8462_v60  ;;  %v5019_v2 = vadd.f32 %v4800_v36, %v3313_v59  ;;  %8069 = vadd.xlane.f32.xlu1 %v7693_v29  ;;  %v11403_v20 = vmul.f32 %v19653_v55, %v11203_v51  ;;  %7278 = vadd.xlane.f32.xlu0 %v19881_v8 }
 0x646   : > { %v2026_v54 = vpop.f32.mrf.mxu0  ;;  %v3315_v1 = vpop.f32.mrf.mxu1  ;;  %v10715_v32 = vsub.f32 1.5, %v10714_v45 }
 0x647   : > { %v19896_v39 = vadd.f32 1e-05, %v8658_v31  ;;  %v6703_v62 = vadd.f32 %v6484_v42, %v5019_v2  ;;  %v14714_v22 = vpop.eup %14713  ;;  %v11603_v6 = vadd.f32 %v19662_v52, %v11403_v20  ;;  %v3316_v40 = vadd.f32 %v3315_v1, %v2026_v54 }
 0x648   : > { %v10716_v25 = vmul.f32 %v14712_v43, %v10715_v32  ;;  %v8042_v63 = vpop.xlane.xlu2 %8041  ;;  %v10722_v30 = vmul.f32 %v14714_v22, %v19876_v17  ;;  %v7251_v19 = vpop.xlane.xlu1 %7250  ;;  %vm10728_vm13 = vweird.f32 %v14714_v22  ;;  %v8853_v1 = vsub.f32 %v19447_v24, %v19865_v10 }
 0x649   : > { %14715 = vrsqrt.f32 %v19896_v39  ;;  %11799 = vst [vmem:[%s15334_s24 + $0x510] sm:$0xff] %v11603_v6  ;;  %v19906_v44 = vadd.f32 %v19834_v9, %v6703_v62  ;;  %v19909_v26 = vmul.f32 %v15231_v41, %v7251_v19  ;;  %v8267_v58 = vmul.f32 %v8042_v63, %v15231_v41  ;;  %vm10729_vm15 = vmor %vm10727_vm14, %vm10728_vm13 }
 0x64a   : > { %v10720_v12 = vsel %vm10719_vm12, %v14712_v43, %v10716_v25  ;;  %v10723_v27 = vmul.f32 %v14714_v22, %v10722_v30  ;;  %vm10737_vm0 = vweird.f32 %v19896_v39 }
 0x64b   : > { %v11204_v38 = vmul.f32 %v10720_v12, %v8852_v5  ;;  %v8463_v56 = vmul.f32 %v19909_v26, %v19909_v26  ;;  %v7694_v3 = vmul.f32 %v19906_v44, %v19906_v44 }
 0x64c   : > { %v4803_v4 = vpop.f32.mrf.mxu2  ;;  %v10724_v0 = vmul.f32 0.5, %v10723_v27 }
 0x64d   : > { %v6487_v61 = vpop.f32.mrf.mxu3  ;;  %v11404_v43 = vmul.f32 %v19653_v55, %v11204_v38  ;;  %v5020_v16 = vadd.f32 %v4803_v4, %v3316_v40  ;;  %7280 = vadd.xlane.f32.xlu1 %v19906_v44  ;;  %v8659_v59 = vsub.f32 %v8267_v58, %v8463_v56  ;;  %8071 = vadd.xlane.f32.xlu2 %v7694_v3 }
 0x64e   : > { %v2028_v13 = vpop.f32.mrf.mxu0  ;;  %v3317_v47 = vpop.f32.mrf.mxu1  ;;  %v10725_v49 = vsub.f32 1.5, %v10724_v0 }
 0x64f   : > { %v14716_v48 = vpop.eup %14715  ;;  %v11604_v60 = vadd.f32 %v19662_v52, %v11404_v43  ;;  %v6704_v29 = vadd.f32 %v6487_v61, %v5020_v16  ;;  %v19920_v45 = vadd.f32 1e-05, %v8659_v59  ;;  %v3318_v32 = vadd.f32 %v3317_v47, %v2028_v13 }
 0x650   : > { %v10732_v51 = vmul.f32 %v14716_v48, %v19896_v39  ;;  %v7253_v36 = vpop.xlane.xlu2 %7252  ;;  %v10726_v42 = vmul.f32 %v14714_v22, %v10725_v49  ;;  %v8044_v54 = vpop.xlane.xlu0 %8043  ;;  %vm10738_vm1 = vweird.f32 %v14716_v48  ;;  %v8854_v43 = vsub.f32 %v19484_v15, %v19884_v35 }
 0x651   : > { %11800 = vst [vmem:[%s15334_s24 + $0x518] sm:$0xff] %v11604_v60  ;;  %v19925_v31 = vadd.f32 %v19834_v9, %v6704_v29  ;;  %v19928_v2 = vmul.f32 %v15231_v41, %v7253_v36  ;;  %14717 = vrsqrt.f32 %v19920_v45  ;;  %v8268_v17 = vmul.f32 %v8044_v54, %v15231_v41  ;;  %vm10739_vm2 = vmor %vm10737_vm0, %vm10738_vm1 }
 0x652   : > { %v10733_v20 = vmul.f32 %v14716_v48, %v10732_v51  ;;  %v10730_v62 = vsel %vm10729_vm15, %v14714_v22, %v10726_v42  ;;  %vm10747_vm4 = vweird.f32 %v19920_v45 }
 0x653   : > { %v8464_v6 = vmul.f32 %v19928_v2, %v19928_v2  ;;  %v7695_v25 = vmul.f32 %v19925_v31, %v19925_v31  ;;  %v11205_v63 = vmul.f32 %v10730_v62, %v8853_v1 }
 0x654   : > { %v10734_v5 = vmul.f32 0.5, %v10733_v20  ;;  %v4805_v30 = vpop.f32.mrf.mxu2 }
 0x655   : > { %v6489_v40 = vpop.f32.mrf.mxu3  ;;  %v8660_v19 = vsub.f32 %v8268_v17, %v8464_v6  ;;  %v5021_v24 = vadd.f32 %v4805_v30, %v3318_v32  ;;  %8073 = vadd.xlane.f32.xlu0 %v7695_v25  ;;  %v11405_v38 = vmul.f32 %v19653_v55, %v11205_v63  ;;  %7282 = vadd.xlane.f32.xlu2 %v19925_v31 }
 0x656   : > { %v2031_v10 = vpop.f32.mrf.mxu0  ;;  %v3320_v12 = vpop.f32.mrf.mxu1  ;;  %v10735_v22 = vsub.f32 1.5, %v10734_v5 }
 0x657   : > { %v19940_v27 = vadd.f32 1e-05, %v8660_v19  ;;  %v6705_v58 = vadd.f32 %v6489_v40, %v5021_v24  ;;  %v14718_v56 = vpop.eup %14717  ;;  %v11605_v4 = vadd.f32 %v19662_v52, %v11405_v38  ;;  %v3321_v16 = vadd.f32 %v3320_v12, %v2031_v10 }
 0x658   : > { %v10736_v61 = vmul.f32 %v14716_v48, %v10735_v22  ;;  %v8046_v3 = vpop.xlane.xlu1 %8045  ;;  %v10742_v0 = vmul.f32 %v14718_v56, %v19920_v45  ;;  %v7255_v13 = vpop.xlane.xlu0 %7254  ;;  %vm10748_vm3 = vweird.f32 %v14718_v56  ;;  %v8855_v12 = vsub.f32 %v19503_v50, %v19909_v26 }
 0x659   : > { %14719 = vrsqrt.f32 %v19940_v27  ;;  %11801 = vst [vmem:[%s15334_s24 + $0x520] sm:$0xff] %v11605_v4  ;;  %v19950_v59 = vadd.f32 %v19834_v9, %v6705_v58  ;;  %v19953_v60 = vmul.f32 %v15231_v41, %v7255_v13  ;;  %v8269_v35 = vmul.f32 %v8046_v3, %v15231_v41  ;;  %vm10749_vm5 = vmor %vm10747_vm4, %vm10748_vm3 }
 0x65a   : > { %v10740_v47 = vsel %vm10739_vm2, %v14716_v48, %v10736_v61  ;;  %v10743_v49 = vmul.f32 %v14718_v56, %v10742_v0  ;;  %vm10757_vm7 = vweird.f32 %v19940_v27 }
 0x65b   : > { %v11206_v39 = vmul.f32 %v10740_v47, %v8854_v43  ;;  %v8465_v15 = vmul.f32 %v19953_v60, %v19953_v60  ;;  %v7696_v36 = vmul.f32 %v19950_v59, %v19950_v59 }
 0x65c   : > { %v4808_v29 = vpop.f32.mrf.mxu2  ;;  %v10744_v42 = vmul.f32 0.5, %v10743_v49 }
 0x65d   : > { %v6492_v51 = vpop.f32.mrf.mxu3  ;;  %v11406_v48 = vmul.f32 %v19653_v55, %v11206_v39  ;;  %v5022_v54 = vadd.f32 %v4808_v29, %v3321_v16  ;;  %7284 = vadd.xlane.f32.xlu0 %v19950_v59  ;;  %v8661_v32 = vsub.f32 %v8269_v35, %v8465_v15  ;;  %8075 = vadd.xlane.f32.xlu1 %v7696_v36 }
 0x65e   : > { %v2033_v1 = vpop.f32.mrf.mxu0  ;;  %v3322_v20 = vpop.f32.mrf.mxu1  ;;  %v10745_v17 = vsub.f32 1.5, %v10744_v42 }
 0x65f   : > { %v14720_v62 = vpop.eup %14719  ;;  %v11606_v6 = vadd.f32 %v19662_v52, %v11406_v48  ;;  %v6706_v25 = vadd.f32 %v6492_v51, %v5022_v54  ;;  %v19964_v5 = vadd.f32 1e-05, %v8661_v32  ;;  %v3323_v22 = vadd.f32 %v3322_v20, %v2033_v1 }
 0x660   : > { %v10752_v63 = vmul.f32 %v14720_v62, %v19940_v27  ;;  %v7257_v30 = vpop.xlane.xlu1 %7256  ;;  %v10746_v40 = vmul.f32 %v14718_v56, %v10745_v17  ;;  %v8048_v24 = vpop.xlane.xlu2 %8047  ;;  %vm10758_vm6 = vweird.f32 %v14720_v62  ;;  %v8856_v48 = vsub.f32 %v19536_v11, %v19928_v2 }
 0x661   : > { %11802 = vst [vmem:[%s15334_s24 + $0x528] sm:$0xff] %v11606_v6  ;;  %v19969_v19 = vadd.f32 %v19834_v9, %v6706_v25  ;;  %v19972_v10 = vmul.f32 %v15231_v41, %v7257_v30  ;;  %14721 = vrsqrt.f32 %v19964_v5  ;;  %v8270_v4 = vmul.f32 %v8048_v24, %v15231_v41  ;;  %vm10759_vm8 = vmor %vm10757_vm7, %vm10758_vm6 }
 0x662   : > { %v10753_v38 = vmul.f32 %v14720_v62, %v10752_v63  ;;  %v10750_v58 = vsel %vm10749_vm5, %v14718_v56, %v10746_v40  ;;  %vm10767_vm10 = vweird.f32 %v19964_v5 }
 0x663   : > { %v8466_v45 = vmul.f32 %v19972_v10, %v19972_v10  ;;  %v7697_v61 = vmul.f32 %v19969_v19, %v19969_v19  ;;  %v11207_v3 = vmul.f32 %v10750_v58, %v8855_v12 }
 0x664   : > { %v10754_v43 = vmul.f32 0.5, %v10753_v38  ;;  %v4810_v0 = vpop.f32.mrf.mxu2 }
 0x665   : > { %v6494_v16 = vpop.f32.mrf.mxu3  ;;  %v8662_v13 = vsub.f32 %v8270_v4, %v8466_v45  ;;  %v5023_v50 = vadd.f32 %v4810_v0, %v3323_v22  ;;  %8077 = vadd.xlane.f32.xlu2 %v7697_v61  ;;  %v11407_v39 = vmul.f32 %v19653_v55, %v11207_v3  ;;  %7286 = vadd.xlane.f32.xlu1 %v19969_v19 }
 0x666   : > { %v2036_v26 = vpop.f32.mrf.mxu0  ;;  %v3325_v47 = vpop.f32.mrf.mxu1  ;;  %v10755_v56 = vsub.f32 1.5, %v10754_v43 }
 0x667   : > { %v19984_v49 = vadd.f32 1e-05, %v8662_v13  ;;  %v6707_v15 = vadd.f32 %v6494_v16, %v5023_v50  ;;  %v14722_v35 = vpop.eup %14721  ;;  %v11607_v29 = vadd.f32 %v19662_v52, %v11407_v39  ;;  %v3326_v54 = vadd.f32 %v3325_v47, %v2036_v26 }
 0x668   : > { %v10756_v51 = vmul.f32 %v14720_v62, %v10755_v56  ;;  %v8050_v36 = vpop.xlane.xlu0 %8049  ;;  %v10762_v42 = vmul.f32 %v14722_v35, %v19964_v5  ;;  %v7259_v1 = vpop.xlane.xlu2 %7258  ;;  %vm10768_vm9 = vweird.f32 %v14722_v35 }
 0x669   : > { %14723 = vrsqrt.f32 %v19984_v49  ;;  %11803 = vst [vmem:[%s15334_s24 + $0x530] sm:$0xff] %v11607_v29  ;;  %v19994_v32 = vadd.f32 %v19834_v9, %v6707_v15  ;;  %v19997_v6 = vmul.f32 %v15231_v41, %v7259_v1  ;;  %v8271_v2 = vmul.f32 %v8050_v36, %v15231_v41  ;;  %vm10769_vm11 = vmor %vm10767_vm10, %vm10768_vm9 }
 0x66a   : > { %v10760_v20 = vsel %vm10759_vm8, %v14720_v62, %v10756_v51  ;;  %v10763_v17 = vmul.f32 %v14722_v35, %v10762_v42  ;;  %vm10777_vm13 = vweird.f32 %v19984_v49 }
 0x66b   : > { %v11208_v27 = vmul.f32 %v10760_v20, %v8856_v48  ;;  %v8467_v11 = vmul.f32 %v19997_v6, %v19997_v6  ;;  %v7698_v30 = vmul.f32 %v19994_v32, %v19994_v32 }
 0x66c   : > { %v4813_v25 = vpop.f32.mrf.mxu2  ;;  %v10764_v40 = vmul.f32 0.5, %v10763_v17 }
 0x66d   : > { %v6497_v63 = vpop.f32.mrf.mxu3  ;;  %v11408_v62 = vmul.f32 %v19653_v55, %v11208_v27  ;;  %v5024_v24 = vadd.f32 %v4813_v25, %v3326_v54  ;;  %7288 = vadd.xlane.f32.xlu2 %v19994_v32  ;;  %v8663_v22 = vsub.f32 %v8271_v2, %v8467_v11  ;;  %8079 = vadd.xlane.f32.xlu0 %v7698_v30  ;;  %v20038_v2 = vld [vmem:[%s20452_s7] ss:$0 sm:$0xff] }
 0x66e   : > { %v2038_v12 = vpop.f32.mrf.mxu0  ;;  %v3327_v38 = vpop.f32.mrf.mxu1  ;;  %v10765_v45 = vsub.f32 1.5, %v10764_v40 }
 0x66f   : > { %v14724_v58 = vpop.eup %14723  ;;  %v11608_v4 = vadd.f32 %v19662_v52, %v11408_v62  ;;  %v6708_v61 = vadd.f32 %v6497_v63, %v5024_v24  ;;  %v20008_v43 = vadd.f32 1e-05, %v8663_v22  ;;  %v8857_v52 = vsub.f32 %v19555_v34, %v19953_v60 }
 0x670   : > { %v10772_v3 = vmul.f32 %v14724_v58, %v19984_v49  ;;  %v7261_v55 = vpop.xlane.xlu0 %7260  ;;  %v10766_v0 = vmul.f32 %v14722_v35, %v10765_v45  ;;  %v8052_v50 = vpop.xlane.xlu1 %8051  ;;  %v3328_v47 = vadd.f32 %v3327_v38, %v2038_v12  ;;  %vm10778_vm12 = vweird.f32 %v14724_v58 }
 0x671   : > { %11804 = vst [vmem:[%s15334_s24 + $0x538] sm:$0xff] %v11608_v4  ;;  %v20013_v16 = vadd.f32 %v19834_v9, %v6708_v61  ;;  %v20016_v13 = vmul.f32 %v15231_v41, %v7261_v55  ;;  %14725 = vrsqrt.f32 %v20008_v43  ;;  %v8272_v5 = vmul.f32 %v8052_v50, %v15231_v41  ;;  %vm10779_vm14 = vmor %vm10777_vm13, %vm10778_vm12 }
 0x672   : > { %v10773_v26 = vmul.f32 %v14724_v58, %v10772_v3  ;;  %v10770_v39 = vsel %vm10769_vm11, %v14722_v35, %v10766_v0  ;;  %v20029_v35 = vld [vmem:[%s20451_s6] ss:$0 sm:$0xff]  ;;  %v8858_v62 = vsub.f32 %v19588_v28, %v19972_v10  ;;  %vm10787_vm1 = vweird.f32 %v20008_v43 }
 0x673   : > { %v8468_v56 = vmul.f32 %v20016_v13, %v20016_v13  ;;  %v7699_v15 = vmul.f32 %v20013_v16, %v20013_v16  ;;  %v11209_v29 = vmul.f32 %v10770_v39, %v8857_v52 }
 0x674   : > { %v10774_v51 = vmul.f32 0.5, %v10773_v26  ;;  %v4815_v36 = vpop.f32.mrf.mxu2 }
 0x675   : > { %v6499_v48 = vpop.f32.mrf.mxu3  ;;  %v8664_v42 = vsub.f32 %v8272_v5, %v8468_v56  ;;  %v5025_v34 = vadd.f32 %v4815_v36, %v3328_v47  ;;  %8081 = vadd.xlane.f32.xlu1 %v7699_v15  ;;  %v11409_v1 = vmul.f32 %v20029_v35, %v11209_v29  ;;  %7290 = vadd.xlane.f32.xlu0 %v20013_v16 }
 0x676   : > { %v2041_v60 = vpop.f32.mrf.mxu0  ;;  %v3330_v54 = vpop.f32.mrf.mxu1  ;;  %v10775_v20 = vsub.f32 1.5, %v10774_v51 }
 0x677   : > { %v20033_v27 = vadd.f32 1e-05, %v8664_v42  ;;  %v6709_v17 = vadd.f32 %v6499_v48, %v5025_v34  ;;  %v14726_v11 = vpop.eup %14725  ;;  %v11609_v25 = vadd.f32 %v20038_v2, %v11409_v1  ;;  %v3331_v24 = vadd.f32 %v3330_v54, %v2041_v60 }
 0x678   : > { %v10776_v63 = vmul.f32 %v14724_v58, %v10775_v20  ;;  %v8054_v30 = vpop.xlane.xlu2 %8053  ;;  %v10782_v40 = vmul.f32 %v14726_v11, %v20008_v43  ;;  %v7263_v12 = vpop.xlane.xlu1 %7262  ;;  %vm10788_vm15 = vweird.f32 %v14726_v11  ;;  %v8859_v54 = vsub.f32 %v19607_v7, %v19997_v6 }
 0x679   : > { %14727 = vrsqrt.f32 %v20033_v27  ;;  %11805 = vst [vmem:[%s15334_s24 + $0x540] sm:$0xff] %v11609_v25  ;;  %v20048_v22 = vadd.f32 %v19834_v9, %v6709_v17  ;;  %v20051_v4 = vmul.f32 %v15231_v41, %v7263_v12  ;;  %v8273_v61 = vmul.f32 %v8054_v30, %v15231_v41  ;;  %vm10789_vm0 = vmor %vm10787_vm1, %vm10788_vm15 }
 0x67a   : > { %v10780_v38 = vsel %vm10779_vm14, %v14724_v58, %v10776_v63  ;;  %v10783_v45 = vmul.f32 %v14726_v11, %v10782_v40  ;;  %vm10797_vm3 = vweird.f32 %v20033_v27 }
 0x67b   : > { %v11210_v49 = vmul.f32 %v10780_v38, %v8858_v62  ;;  %v8469_v28 = vmul.f32 %v20051_v4, %v20051_v4  ;;  %v7700_v55 = vmul.f32 %v20048_v22, %v20048_v22 }
 0x67c   : > { %v4818_v10 = vpop.f32.mrf.mxu2  ;;  %v10784_v0 = vmul.f32 0.5, %v10783_v45 }
 0x67d   : > { %v6502_v3 = vpop.f32.mrf.mxu3  ;;  %v11410_v58 = vmul.f32 %v20029_v35, %v11210_v49  ;;  %v5026_v50 = vadd.f32 %v4818_v10, %v3331_v24  ;;  %7292 = vadd.xlane.f32.xlu1 %v20048_v22  ;;  %v8665_v47 = vsub.f32 %v8273_v61, %v8469_v28  ;;  %8083 = vadd.xlane.f32.xlu2 %v7700_v55 }
 0x67e   : > { %v2043_v52 = vpop.f32.mrf.mxu0  ;;  %v3332_v26 = vpop.f32.mrf.mxu1  ;;  %v10785_v5 = vsub.f32 1.5, %v10784_v0 }
 0x67f   : > { %v14728_v39 = vpop.eup %14727  ;;  %v11610_v56 = vadd.f32 %v20038_v2, %v11410_v58  ;;  %v6710_v15 = vadd.f32 %v6502_v3, %v5026_v50  ;;  %v20062_v51 = vadd.f32 1e-05, %v8665_v47  ;;  %v3333_v20 = vadd.f32 %v3332_v26, %v2043_v52 }
 0x680   : > { %v10792_v29 = vmul.f32 %v14728_v39, %v20033_v27  ;;  %v7265_v36 = vpop.xlane.xlu2 %7264  ;;  %v10786_v48 = vmul.f32 %v14726_v11, %v10785_v5  ;;  %v8056_v60 = vpop.xlane.xlu0 %8055  ;;  %vm10798_vm2 = vweird.f32 %v14728_v39  ;;  %v8860_v58 = vsub.f32 %v19640_v53, %v20016_v13 }
 0x681   : > { %11806 = vst [vmem:[%s15334_s24 + $0x548] sm:$0xff] %v11610_v56  ;;  %v20067_v42 = vadd.f32 %v19834_v9, %v6710_v15  ;;  %v20070_v34 = vmul.f32 %v15231_v41, %v7265_v36  ;;  %14729 = vrsqrt.f32 %v20062_v51  ;;  %v8274_v43 = vmul.f32 %v8056_v60, %v15231_v41  ;;  %vm10799_vm4 = vmor %vm10797_vm3, %vm10798_vm2 }
 0x682   : > { %v10793_v1 = vmul.f32 %v14728_v39, %v10792_v29  ;;  %v10790_v17 = vsel %vm10789_vm0, %v14726_v11, %v10786_v48  ;;  %vm10807_vm6 = vweird.f32 %v20062_v51 }
 0x683   : > { %v8470_v25 = vmul.f32 %v20070_v34, %v20070_v34  ;;  %v7701_v63 = vmul.f32 %v20067_v42, %v20067_v42  ;;  %v11211_v30 = vmul.f32 %v10790_v17, %v8859_v54 }
 0x684   : > { %v10794_v62 = vmul.f32 0.5, %v10793_v1  ;;  %v4820_v40 = vpop.f32.mrf.mxu2 }
 0x685   : > { %v6504_v24 = vpop.f32.mrf.mxu3  ;;  %v8666_v12 = vsub.f32 %v8274_v43, %v8470_v25  ;;  %v5027_v7 = vadd.f32 %v4820_v40, %v3333_v20  ;;  %8085 = vadd.xlane.f32.xlu0 %v7701_v63  ;;  %v11411_v49 = vmul.f32 %v20029_v35, %v11211_v30  ;;  %7294 = vadd.xlane.f32.xlu2 %v20067_v42 }
 0x686   : > { %v2046_v6 = vpop.f32.mrf.mxu0  ;;  %v3335_v38 = vpop.f32.mrf.mxu1  ;;  %v10795_v11 = vsub.f32 1.5, %v10794_v62 }
 0x687   : > { %v20082_v45 = vadd.f32 1e-05, %v8666_v12  ;;  %v6711_v61 = vadd.f32 %v6504_v24, %v5027_v7  ;;  %v14730_v28 = vpop.eup %14729  ;;  %v11611_v10 = vadd.f32 %v20038_v2, %v11411_v49  ;;  %v3336_v50 = vadd.f32 %v3335_v38, %v2046_v6 }
 0x688   : > { %v10796_v3 = vmul.f32 %v14728_v39, %v10795_v11  ;;  %v8058_v55 = vpop.xlane.xlu1 %8057  ;;  %v10802_v0 = vmul.f32 %v14730_v28, %v20062_v51  ;;  %v7267_v52 = vpop.xlane.xlu0 %7266  ;;  %vm10808_vm5 = vweird.f32 %v14730_v28  ;;  %v8861_v38 = vsub.f32 %v19672_v14, %v20051_v4 }
 0x689   : > { %14731 = vrsqrt.f32 %v20082_v45  ;;  %11807 = vst [vmem:[%s15334_s24 + $0x550] sm:$0xff] %v11611_v10  ;;  %v20092_v47 = vadd.f32 %v19834_v9, %v6711_v61  ;;  %v20095_v56 = vmul.f32 %v15231_v41, %v7267_v52  ;;  %v8275_v13 = vmul.f32 %v8058_v55, %v15231_v41  ;;  %vm10809_vm7 = vmor %vm10807_vm6, %vm10808_vm5 }
 0x68a   : > { %v10800_v26 = vsel %vm10799_vm4, %v14728_v39, %v10796_v3  ;;  %v10803_v5 = vmul.f32 %v14730_v28, %v10802_v0  ;;  %vm10817_vm9 = vweird.f32 %v20082_v45 }
 0x68b   : > { %v11212_v27 = vmul.f32 %v10800_v26, %v8860_v58  ;;  %v8471_v53 = vmul.f32 %v20095_v56, %v20095_v56  ;;  %v7702_v36 = vmul.f32 %v20092_v47, %v20092_v47 }
 0x68c   : > { %v4823_v15 = vpop.f32.mrf.mxu2  ;;  %v10804_v48 = vmul.f32 0.5, %v10803_v5 }
 0x68d   : > { %v6507_v29 = vpop.f32.mrf.mxu3  ;;  %v11412_v39 = vmul.f32 %v20029_v35, %v11212_v27  ;;  %v5028_v60 = vadd.f32 %v4823_v15, %v3336_v50  ;;  %7296 = vadd.xlane.f32.xlu0 %v20092_v47  ;;  %v8667_v20 = vsub.f32 %v8275_v13, %v8471_v53  ;;  %8087 = vadd.xlane.f32.xlu1 %v7702_v36 }
 0x68e   : > { %v2048_v54 = vpop.f32.mrf.mxu0  ;;  %v3337_v1 = vpop.f32.mrf.mxu1  ;;  %v10805_v43 = vsub.f32 1.5, %v10804_v48 }
 0x68f   : > { %v14732_v17 = vpop.eup %14731  ;;  %v11612_v25 = vadd.f32 %v20038_v2, %v11412_v39  ;;  %v6712_v63 = vadd.f32 %v6507_v29, %v5028_v60  ;;  %v20106_v62 = vadd.f32 1e-05, %v8667_v20  ;;  %v3338_v11 = vadd.f32 %v3337_v1, %v2048_v54 }
 0x690   : > { %v10812_v30 = vmul.f32 %v14732_v17, %v20082_v45  ;;  %v7269_v40 = vpop.xlane.xlu1 %7268  ;;  %v10806_v24 = vmul.f32 %v14730_v28, %v10805_v43  ;;  %v8060_v7 = vpop.xlane.xlu2 %8059  ;;  %vm10818_vm8 = vweird.f32 %v14732_v17  ;;  %v8862_v39 = vsub.f32 %v19709_v23, %v20070_v34 }
 0x691   : > { %11808 = vst [vmem:[%s15334_s24 + $0x558] sm:$0xff] %v11612_v25  ;;  %v20111_v12 = vadd.f32 %v19834_v9, %v6712_v63  ;;  %v20114_v6 = vmul.f32 %v15231_v41, %v7269_v40  ;;  %14733 = vrsqrt.f32 %v20106_v62  ;;  %v8276_v10 = vmul.f32 %v8060_v7, %v15231_v41  ;;  %vm10819_vm10 = vmor %vm10817_vm9, %vm10818_vm8 }
 0x692   : > { %v10813_v49 = vmul.f32 %v14732_v17, %v10812_v30  ;;  %v10810_v61 = vsel %vm10809_vm7, %v14730_v28, %v10806_v24  ;;  %vm10827_vm12 = vweird.f32 %v20106_v62 }
 0x693   : > { %v8472_v51 = vmul.f32 %v20114_v6, %v20114_v6  ;;  %v7703_v3 = vmul.f32 %v20111_v12, %v20111_v12  ;;  %v11213_v55 = vmul.f32 %v10810_v61, %v8861_v38 }
 0x694   : > { %v10814_v58 = vmul.f32 0.5, %v10813_v49  ;;  %v4825_v0 = vpop.f32.mrf.mxu2 }
 0x695   : > { %v6509_v50 = vpop.f32.mrf.mxu3  ;;  %v8668_v52 = vsub.f32 %v8276_v10, %v8472_v51  ;;  %v5029_v14 = vadd.f32 %v4825_v0, %v3338_v11  ;;  %8089 = vadd.xlane.f32.xlu2 %v7703_v3  ;;  %v11413_v27 = vmul.f32 %v20029_v35, %v11213_v55  ;;  %7298 = vadd.xlane.f32.xlu1 %v20111_v12 }
 0x696   : > { %v2051_v4 = vpop.f32.mrf.mxu0  ;;  %v3340_v26 = vpop.f32.mrf.mxu1  ;;  %v10815_v28 = vsub.f32 1.5, %v10814_v58 }
 0x697   : > { %v20126_v5 = vadd.f32 1e-05, %v8668_v52  ;;  %v6713_v53 = vadd.f32 %v6509_v50, %v5029_v14  ;;  %v14734_v13 = vpop.eup %14733  ;;  %v11613_v15 = vadd.f32 %v20038_v2, %v11413_v27  ;;  %v3341_v60 = vadd.f32 %v3340_v26, %v2051_v4 }
 0x698   : > { %v10816_v29 = vmul.f32 %v14732_v17, %v10815_v28  ;;  %v8062_v36 = vpop.xlane.xlu0 %8061  ;;  %v10822_v48 = vmul.f32 %v14734_v13, %v20106_v62  ;;  %v7271_v54 = vpop.xlane.xlu2 %7270  ;;  %vm10828_vm11 = vweird.f32 %v14734_v13  ;;  %v8863_v26 = vsub.f32 %v19728_v18, %v20095_v56 }
 0x699   : > { %14735 = vrsqrt.f32 %v20126_v5  ;;  %11809 = vst [vmem:[%s15334_s24 + $0x560] sm:$0xff] %v11613_v15  ;;  %v20136_v20 = vadd.f32 %v19834_v9, %v6713_v53  ;;  %v20139_v25 = vmul.f32 %v15231_v41, %v7271_v54  ;;  %v8277_v34 = vmul.f32 %v8062_v36, %v15231_v41  ;;  %vm10829_vm13 = vmor %vm10827_vm12, %vm10828_vm11 }
 0x69a   : > { %v10820_v1 = vsel %vm10819_vm10, %v14732_v17, %v10816_v29  ;;  %v10823_v43 = vmul.f32 %v14734_v13, %v10822_v48  ;;  %vm10837_vm15 = vweird.f32 %v20126_v5 }
 0x69b   : > { %v11214_v45 = vmul.f32 %v10820_v1, %v8862_v39  ;;  %v8473_v23 = vmul.f32 %v20139_v25, %v20139_v25  ;;  %v7704_v40 = vmul.f32 %v20136_v20, %v20136_v20 }
 0x69c   : > { %v4828_v63 = vpop.f32.mrf.mxu2  ;;  %v10824_v24 = vmul.f32 0.5, %v10823_v43 }
 0x69d   : > { %v6512_v30 = vpop.f32.mrf.mxu3  ;;  %v11414_v17 = vmul.f32 %v20029_v35, %v11214_v45  ;;  %v5030_v7 = vadd.f32 %v4828_v63, %v3341_v60  ;;  %7300 = vadd.xlane.f32.xlu2 %v20136_v20  ;;  %v8669_v11 = vsub.f32 %v8277_v34, %v8473_v23  ;;  %8091 = vadd.xlane.f32.xlu0 %v7704_v40 }
 0x69e   : > { %v2053_v38 = vpop.f32.mrf.mxu0  ;;  %v3342_v49 = vpop.f32.mrf.mxu1  ;;  %v10825_v51 = vsub.f32 1.5, %v10824_v24  ;;  %v8864_v40 = vsub.f32 %v19761_v46, %v20114_v6 }
 0x69f   : > { %v14736_v61 = vpop.eup %14735  ;;  %v11614_v10 = vadd.f32 %v20038_v2, %v11414_v17  ;;  %v6714_v3 = vadd.f32 %v6512_v30, %v5030_v7  ;;  %v20150_v58 = vadd.f32 1e-05, %v8669_v11  ;;  %v3343_v28 = vadd.f32 %v3342_v49, %v2053_v38 }
 0x6a0   : > { %v10832_v55 = vmul.f32 %v14736_v61, %v20126_v5  ;;  %v7273_v0 = vpop.xlane.xlu0 %7272  ;;  %v10826_v50 = vmul.f32 %v14734_v13, %v10825_v51  ;;  %v8064_v4 = vpop.xlane.xlu1 %8063  ;;  %vm10838_vm14 = vweird.f32 %v14736_v61  ;;  %v14813_v5 = vld [vmem:[%s20450_s5] ss:$0 sm:$0xff] }
 0x6a1   : > { %11810 = vst [vmem:[%s15334_s24 + $0x568] sm:$0xff] %v11614_v10  ;;  %v20155_v52 = vadd.f32 %v19834_v9, %v6714_v3  ;;  %v20158_v14 = vmul.f32 %v15231_v41, %v7273_v0  ;;  %14737 = vrsqrt.f32 %v20150_v58  ;;  %v8278_v62 = vmul.f32 %v8064_v4, %v15231_v41  ;;  %vm10839_vm1 = vmor %vm10837_vm15, %vm10838_vm14 }
 0x6a2   : > { %v10833_v27 = vmul.f32 %v14736_v61, %v10832_v55  ;;  %v10830_v53 = vsel %vm10829_vm13, %v14734_v13, %v10826_v50  ;;  %vm10847_vm2 = vweird.f32 %v20150_v58 }
 0x6a3   : > { %v8474_v15 = vmul.f32 %v20158_v14, %v20158_v14  ;;  %v7705_v9 = vmul.f32 %v20155_v52, %v20155_v52  ;;  %v11215_v29 = vmul.f32 %v10830_v53, %v8863_v26 }
 0x6a4   : > { %v10834_v36 = vmul.f32 0.5, %v10833_v27  ;;  %v4830_v39 = vpop.f32.mrf.mxu2 }
 0x6a5   : > { %v6514_v48 = vpop.f32.mrf.mxu3  ;;  %v8670_v60 = vsub.f32 %v8278_v62, %v8474_v15  ;;  %v5031_v18 = vadd.f32 %v4830_v39, %v3343_v28  ;;  %8093 = vadd.xlane.f32.xlu1 %v7705_v9  ;;  %v11415_v54 = vmul.f32 %v20029_v35, %v11215_v29  ;;  %7302 = vadd.xlane.f32.xlu0 %v20155_v52 }
 0x6a6   : > { %v2056_v56 = vpop.f32.mrf.mxu0  ;;  %v10835_v1 = vsub.f32 1.5, %v10834_v36  ;;  %v3345_v13 = vpop.f32.mrf.mxu1 }
 0x6a7   : > { %v20170_v45 = vadd.f32 1e-05, %v8670_v60  ;;  %v6715_v43 = vadd.f32 %v6514_v48, %v5031_v18  ;;  %v14738_v23 = vpop.eup %14737  ;;  %v11615_v34 = vadd.f32 %v20038_v2, %v11415_v54  ;;  %v3346_v24 = vadd.f32 %v3345_v13, %v2056_v56 }
 0x6a8   : > { %v10836_v63 = vmul.f32 %v14736_v61, %v10835_v1  ;;  %v8066_v30 = vpop.xlane.xlu2 %8065  ;;  %v10842_v17 = vmul.f32 %v14738_v23, %v20150_v58  ;;  %v7275_v7 = vpop.xlane.xlu1 %7274  ;;  %vm10848_vm0 = vweird.f32 %v14738_v23  ;;  %v8865_v56 = vsub.f32 %v19780_v33, %v20139_v25 }
 0x6a9   : > { %14739 = vrsqrt.f32 %v20170_v45  ;;  %11811 = vst [vmem:[%s15334_s24 + $0x570] sm:$0xff] %v11615_v34  ;;  %v20180_v49 = vmul.f32 %v15231_v41, %v7275_v7  ;;  %v20185_v51 = vadd.f32 %v14813_v5, %v6715_v43  ;;  %v8279_v46 = vmul.f32 %v8066_v30, %v15231_v41  ;;  %vm10849_vm3 = vmor %vm10847_vm2, %vm10848_vm0 }
 0x6aa   : > { %v10840_v38 = vsel %vm10839_vm1, %v14736_v61, %v10836_v63  ;;  %v10843_v10 = vmul.f32 %v14738_v23, %v10842_v17  ;;  %vm10857_vm5 = vweird.f32 %v20170_v45 }
 0x6ab   : > { %v11216_v11 = vmul.f32 %v10840_v38, %v8864_v40  ;;  %v8475_v6 = vmul.f32 %v20180_v49, %v20180_v49 }
 0x6ac   : > { %v4833_v3 = vpop.f32.mrf.mxu2  ;;  %v10844_v0 = vmul.f32 0.5, %v10843_v10 }
 0x6ad   : > { %v6517_v55 = vpop.f32.mrf.mxu3  ;;  %v11416_v61 = vmul.f32 %v20029_v35, %v11216_v11  ;;  %v5032_v50 = vadd.f32 %v4833_v3, %v3346_v24  ;;  %7304 = vadd.xlane.f32.xlu1 %v20185_v51  ;;  %v8671_v4 = vsub.f32 %v8279_v46, %v8475_v6  ;;  %v8866_v6 = vsub.f32 %v19813_v37, %v20158_v14 }
 0x6ae   : > { %v10845_v28 = vsub.f32 1.5, %v10844_v0  ;;  %v2058_v15 = vpop.f32.mrf.mxu0  ;;  %v3347_v29 = vpop.f32.mrf.mxu1 }
 0x6af   : > { %v14740_v26 = vpop.eup %14739  ;;  %v11616_v27 = vadd.f32 %v20038_v2, %v11416_v61  ;;  %v6716_v53 = vadd.f32 %v6517_v55, %v5032_v50  ;;  %v20194_v9 = vadd.f32 1e-05, %v8671_v4  ;;  %v3348_v13 = vadd.f32 %v3347_v29, %v2058_v15 }
 0x6b0   : > { %v10852_v62 = vmul.f32 %v14740_v26, %v20170_v45  ;;  %v7277_v36 = vpop.xlane.xlu2 %7276  ;;  %v10846_v39 = vmul.f32 %v14738_v23, %v10845_v28  ;;  %v8068_v18 = vpop.xlane.xlu0 %8067  ;;  %vm10858_vm4 = vweird.f32 %v14740_v26  ;;  %v7706_v61 = vmul.f32 %v20185_v51, %v20185_v51 }
 0x6b1   : > { %11812 = vst [vmem:[%s15334_s24 + $0x578] sm:$0xff] %v11616_v27  ;;  %v20198_v48 = vadd.f32 %v14813_v5, %v6716_v53  ;;  %v20201_v60 = vmul.f32 %v15231_v41, %v7277_v36  ;;  %14741 = vrsqrt.f32 %v20194_v9  ;;  %v8280_v58 = vmul.f32 %v8068_v18, %v15231_v41  ;;  %vm10859_vm6 = vmor %vm10857_vm5, %vm10858_vm4 }
 0x6b2   : > { %v10853_v54 = vmul.f32 %v14740_v26, %v10852_v62  ;;  %v10850_v1 = vsel %vm10849_vm3, %v14738_v23, %v10846_v39  ;;  %vm10867_vm8 = vweird.f32 %v20194_v9 }
 0x6b3   : > { %v8476_v43 = vmul.f32 %v20201_v60, %v20201_v60  ;;  %7306 = vadd.xlane.f32.xlu2 %v20198_v48  ;;  %v11217_v34 = vmul.f32 %v10850_v1, %v8865_v56 }
 0x6b4   : > { %v10854_v63 = vmul.f32 0.5, %v10853_v54  ;;  %v4835_v30 = vpop.f32.mrf.mxu2 }
 0x6b5   : > { %v8672_v40 = vsub.f32 %v8280_v58, %v8476_v43  ;;  %v5033_v17 = vadd.f32 %v4835_v30, %v3348_v13  ;;  %v11417_v33 = vmul.f32 %v20029_v35, %v11217_v34  ;;  %v6519_v24 = vpop.f32.mrf.mxu3  ;;  %v8867_v13 = vsub.f32 %v19837_v21, %v20180_v49 }
 0x6b6   : > { %v10855_v25 = vsub.f32 1.5, %v10854_v63  ;;  %v7707_v58 = vmul.f32 %v20198_v48, %v20198_v48 }
 0x6b7   : > { %v9064_v23 = vadd.f32 1e-05, %v8672_v40  ;;  %v6717_v7 = vadd.f32 %v6519_v24, %v5033_v17  ;;  %v14742_v38 = vpop.eup %14741  ;;  %v11617_v11 = vadd.f32 %v20038_v2, %v11417_v33 }
 0x6b8   : > { %v10856_v10 = vmul.f32 %v14740_v26, %v10855_v25  ;;  %v8070_v46 = vpop.xlane.xlu1 %8069  ;;  %v10862_v3 = vmul.f32 %v14742_v38, %v20194_v9  ;;  %v7279_v55 = vpop.xlane.xlu0 %7278  ;;  %vm10868_vm7 = vweird.f32 %v14742_v38 }
 0x6b9   : > { %14743 = vrsqrt.f32 %v9064_v23  ;;  %11813 = vst [vmem:[%s15334_s24 + $0x580] sm:$0xff] %v11617_v11  ;;  %v20219_v50 = vadd.f32 %v14813_v5, %v6717_v7  ;;  %v20222_v4 = vmul.f32 %v15231_v41, %v7279_v55  ;;  %v8281_v14 = vmul.f32 %v8070_v46, %v15231_v41  ;;  %vm10869_vm9 = vmor %vm10867_vm8, %vm10868_vm7 }
 0x6ba   : > { %v10860_v0 = vsel %vm10859_vm6, %v14740_v26, %v10856_v10  ;;  %v10863_v27 = vmul.f32 %v14742_v38, %v10862_v3  ;;  %vm10877_vm11 = vweird.f32 %v9064_v23  ;;  %v8868_v11 = vsub.f32 %v19862_v57, %v20201_v60 }
 0x6bb   : > { %v11218_v45 = vmul.f32 %v10860_v0, %v8866_v6  ;;  %8095 = vadd.xlane.f32.xlu2 %v7706_v61  ;;  %v8477_v37 = vmul.f32 %v20222_v4, %v20222_v4  ;;  %7308 = vadd.xlane.f32.xlu0 %v20219_v50  ;;  %v7708_v28 = vmul.f32 %v20219_v50, %v20219_v50 }
 0x6bc   : > { %v10864_v26 = vmul.f32 0.5, %v10863_v27 }
 0x6bd   : > { %v11418_v5 = vmul.f32 %v20029_v35, %v11218_v45  ;;  %v8673_v53 = vsub.f32 %v8281_v14, %v8477_v37  ;;  %8099 = vadd.xlane.f32.xlu1 %v7708_v28 }
 0x6be   : > { %v10865_v29 = vsub.f32 1.5, %v10864_v26 }
 0x6bf   : > { %v14744_v15 = vpop.eup %14743  ;;  %v11618_v62 = vadd.f32 %v20038_v2, %v11418_v5  ;;  %v9065_v39 = vadd.f32 1e-05, %v8673_v53 }
 0x6c0   : > { %v10872_v36 = vmul.f32 %v14744_v15, %v9064_v23  ;;  %v7281_v18 = vpop.xlane.xlu1 %7280  ;;  %v10866_v56 = vmul.f32 %v14742_v38, %v10865_v29  ;;  %v8072_v54 = vpop.xlane.xlu2 %8071  ;;  %vm10878_vm10 = vweird.f32 %v14744_v15  ;;  %v8869_v29 = vsub.f32 %v19881_v8, %v20222_v4 }
 0x6c1   : > { %11814 = vst [vmem:[%s15334_s24 + $0x588] sm:$0xff] %v11618_v62  ;;  %v20235_v1 = vmul.f32 %v15231_v41, %v7281_v18  ;;  %14745 = vrsqrt.f32 %v9065_v39  ;;  %v8282_v63 = vmul.f32 %v8072_v54, %v15231_v41  ;;  %vm10879_vm12 = vmor %vm10877_vm11, %vm10878_vm10  ;;  %vm10887_vm14 = vweird.f32 %v9065_v39 }
 0x6c2   : > { %v10873_v43 = vmul.f32 %v14744_v15, %v10872_v36  ;;  %v10870_v34 = vsel %vm10869_vm9, %v14742_v38, %v10866_v56 }
 0x6c3   : > { %v8478_v30 = vmul.f32 %v20235_v1, %v20235_v1  ;;  %v11219_v9 = vmul.f32 %v10870_v34, %v8867_v13  ;;  %8097 = vadd.xlane.f32.xlu0 %v7707_v58 }
 0x6c4   : > { %v10874_v40 = vmul.f32 0.5, %v10873_v43 }
 0x6c5   : > { %v8674_v17 = vsub.f32 %v8282_v63, %v8478_v30  ;;  %v11419_v33 = vmul.f32 %v20029_v35, %v11219_v9 }
 0x6c6   : > { %v10875_v21 = vsub.f32 1.5, %v10874_v40  ;;  %v8870_v40 = vsub.f32 %v19906_v44, %v20235_v1 }
 0x6c7   : > { %v9066_v49 = vadd.f32 1e-05, %v8674_v17  ;;  %v14746_v25 = vpop.eup %14745  ;;  %v11619_v24 = vadd.f32 %v20038_v2, %v11419_v33 }
 0x6c8   : > { %v10876_v7 = vmul.f32 %v14744_v15, %v10875_v21  ;;  %v8074_v38 = vpop.xlane.xlu0 %8073  ;;  %v10882_v10 = vmul.f32 %v14746_v25, %v9065_v39  ;;  %v7283_v46 = vpop.xlane.xlu2 %7282  ;;  %vm10888_vm13 = vweird.f32 %v14746_v25 }
 0x6c9   : > { %14747 = vrsqrt.f32 %v9066_v49  ;;  %11815 = vst [vmem:[%s15334_s24 + $0x590] sm:$0xff] %v11619_v24  ;;  %v20250_v3 = vmul.f32 %v15231_v41, %v7283_v46  ;;  %v8283_v23 = vmul.f32 %v8074_v38, %v15231_v41  ;;  %vm10889_vm15 = vmor %vm10887_vm14, %vm10888_vm13  ;;  %vm10897_vm0 = vweird.f32 %v9066_v49 }
 0x6ca   : > { %v10880_v6 = vsel %vm10879_vm12, %v14744_v15, %v10876_v7  ;;  %v10883_v61 = vmul.f32 %v14746_v25, %v10882_v10 }
 0x6cb   : > { %v11220_v55 = vmul.f32 %v10880_v6, %v8868_v11  ;;  %v8479_v0 = vmul.f32 %v20250_v3, %v20250_v3 }
 0x6cc   : > { %v10884_v57 = vmul.f32 0.5, %v10883_v61 }
 0x6cd   : > { %v11420_v45 = vmul.f32 %v20029_v35, %v11220_v55  ;;  %v8675_v60 = vsub.f32 %v8283_v23, %v8479_v0 }
 0x6ce   : > { %v10885_v14 = vsub.f32 1.5, %v10884_v57 }
 0x6cf   : > { %v14748_v27 = vpop.eup %14747  ;;  %v11620_v37 = vadd.f32 %v20038_v2, %v11420_v45  ;;  %v9067_v5 = vadd.f32 1e-05, %v8675_v60  ;;  %v8871_v60 = vsub.f32 %v19925_v31, %v20250_v3 }
 0x6d0   : > { %v10892_v28 = vmul.f32 %v14748_v27, %v9066_v49  ;;  %v7285_v26 = vpop.xlane.xlu0 %7284  ;;  %v10886_v53 = vmul.f32 %v14746_v25, %v10885_v14  ;;  %v8076_v62 = vpop.xlane.xlu1 %8075  ;;  %vm10898_vm1 = vweird.f32 %v14748_v27 }
 0x6d1   : > { %11816 = vst [vmem:[%s15334_s24 + $0x598] sm:$0xff] %v11620_v37  ;;  %v20259_v15 = vmul.f32 %v15231_v41, %v7285_v26  ;;  %14749 = vrsqrt.f32 %v9067_v5  ;;  %v8284_v54 = vmul.f32 %v8076_v62, %v15231_v41  ;;  %vm10899_vm2 = vmor %vm10897_vm0, %vm10898_vm1  ;;  %vm10907_vm4 = vweird.f32 %v9067_v5 }
 0x6d2   : > { %v10893_v36 = vmul.f32 %v14748_v27, %v10892_v28  ;;  %v10890_v18 = vsel %vm10889_vm15, %v14746_v25, %v10886_v53 }
 0x6d3   : > { %v8480_v56 = vmul.f32 %v20259_v15, %v20259_v15  ;;  %v11221_v13 = vmul.f32 %v10890_v18, %v8869_v29 }
 0x6d4   : > { %v10894_v43 = vmul.f32 0.5, %v10893_v36 }
 0x6d5   : > { %v8676_v39 = vsub.f32 %v8284_v54, %v8480_v56  ;;  %v11421_v58 = vmul.f32 %v20029_v35, %v11221_v13  ;;  %v8872_v54 = vsub.f32 %v19950_v59, %v20259_v15 }
 0x6d6   : > { %v10895_v34 = vsub.f32 1.5, %v10894_v43 }
 0x6d7   : > { %v9068_v63 = vadd.f32 1e-05, %v8676_v39  ;;  %v14750_v30 = vpop.eup %14749  ;;  %v11621_v8 = vadd.f32 %v20038_v2, %v11421_v58 }
 0x6d8   : > { %v10896_v4 = vmul.f32 %v14748_v27, %v10895_v34  ;;  %v8078_v9 = vpop.xlane.xlu2 %8077  ;;  %v10902_v17 = vmul.f32 %v14750_v30, %v9067_v5  ;;  %v7287_v33 = vpop.xlane.xlu1 %7286  ;;  %vm10908_vm3 = vweird.f32 %v14750_v30 }
 0x6d9   : > { %14751 = vrsqrt.f32 %v9068_v63  ;;  %11817 = vst [vmem:[%s15334_s24 + $0x5a0] sm:$0xff] %v11621_v8  ;;  %v20272_v25 = vmul.f32 %v15231_v41, %v7287_v33  ;;  %v8285_v38 = vmul.f32 %v8078_v9, %v15231_v41  ;;  %vm10909_vm5 = vmor %vm10907_vm4, %vm10908_vm3  ;;  %vm10917_vm7 = vweird.f32 %v9068_v63 }
 0x6da   : > { %v10900_v21 = vsel %vm10899_vm2, %v14748_v27, %v10896_v4  ;;  %v10903_v7 = vmul.f32 %v14750_v30, %v10902_v17 }
 0x6db   : > { %v11222_v24 = vmul.f32 %v10900_v21, %v8870_v40  ;;  %v8481_v49 = vmul.f32 %v20272_v25, %v20272_v25 }
 0x6dc   : > { %v10904_v44 = vmul.f32 0.5, %v10903_v7 }
 0x6dd   : > { %v11422_v11 = vmul.f32 %v20029_v35, %v11222_v24  ;;  %v8677_v1 = vsub.f32 %v8285_v38, %v8481_v49 }
 0x6de   : > { %v10905_v6 = vsub.f32 1.5, %v10904_v44 }
 0x6df   : > { %v14752_v10 = vpop.eup %14751  ;;  %v11622_v46 = vadd.f32 %v20038_v2, %v11422_v11  ;;  %v9069_v61 = vadd.f32 1e-05, %v8677_v1  ;;  %v8873_v11 = vsub.f32 %v19969_v19, %v20272_v25 }
 0x6e0   : > { %v10912_v55 = vmul.f32 %v14752_v10, %v9068_v63  ;;  %v7289_v0 = vpop.xlane.xlu2 %7288  ;;  %v10906_v23 = vmul.f32 %v14750_v30, %v10905_v6  ;;  %v8080_v57 = vpop.xlane.xlu0 %8079  ;;  %vm10918_vm6 = vweird.f32 %v14752_v10 }
 0x6e1   : > { %11818 = vst [vmem:[%s15334_s24 + $0x5a8] sm:$0xff] %v11622_v46  ;;  %v20281_v45 = vmul.f32 %v15231_v41, %v7289_v0  ;;  %14753 = vrsqrt.f32 %v9069_v61  ;;  %v8286_v28 = vmul.f32 %v8080_v57, %v15231_v41  ;;  %vm10919_vm8 = vmor %vm10917_vm7, %vm10918_vm6  ;;  %vm10927_vm10 = vweird.f32 %v9069_v61 }
 0x6e2   : > { %v10913_v27 = vmul.f32 %v14752_v10, %v10912_v55  ;;  %v10910_v37 = vsel %vm10909_vm5, %v14750_v30, %v10906_v23 }
 0x6e3   : > { %v8482_v14 = vmul.f32 %v20281_v45, %v20281_v45  ;;  %v11223_v26 = vmul.f32 %v10910_v37, %v8871_v60  ;;  %v8874_v37 = vsub.f32 %v19994_v32, %v20281_v45 }
 0x6e4   : > { %v10914_v53 = vmul.f32 0.5, %v10913_v27 }
 0x6e5   : > { %v8678_v5 = vsub.f32 %v8286_v28, %v8482_v14  ;;  %v11423_v62 = vmul.f32 %v20029_v35, %v11223_v26 }
 0x6e6   : > { %v10915_v29 = vsub.f32 1.5, %v10914_v53 }
 0x6e7   : > { %v9070_v36 = vadd.f32 1e-05, %v8678_v5  ;;  %v14754_v18 = vpop.eup %14753  ;;  %v11623_v31 = vadd.f32 %v20038_v2, %v11423_v62 }
 0x6e8   : > { %v10916_v3 = vmul.f32 %v14752_v10, %v10915_v29  ;;  %v8082_v56 = vpop.xlane.xlu1 %8081  ;;  %v10922_v13 = vmul.f32 %v14754_v18, %v9069_v61  ;;  %v7291_v43 = vpop.xlane.xlu0 %7290  ;;  %vm10928_vm9 = vweird.f32 %v14754_v18 }
 0x6e9   : > { %14755 = vrsqrt.f32 %v9070_v36  ;;  %11819 = vst [vmem:[%s15334_s24 + $0x5b0] sm:$0xff] %v11623_v31  ;;  %v20294_v58 = vmul.f32 %v15231_v41, %v7291_v43  ;;  %v8287_v63 = vmul.f32 %v8082_v56, %v15231_v41  ;;  %vm10929_vm11 = vmor %vm10927_vm10, %vm10928_vm9  ;;  %vm10937_vm13 = vweird.f32 %v9070_v36 }
 0x6ea   : > { %v10920_v39 = vsel %vm10919_vm8, %v14752_v10, %v10916_v3  ;;  %v10923_v30 = vmul.f32 %v14754_v18, %v10922_v13 }
 0x6eb   : > { %v11224_v34 = vmul.f32 %v10920_v39, %v8872_v54  ;;  %v8483_v8 = vmul.f32 %v20294_v58, %v20294_v58 }
 0x6ec   : > { %v10924_v59 = vmul.f32 0.5, %v10923_v30 }
 0x6ed   : > { %v11424_v4 = vmul.f32 %v20029_v35, %v11224_v34  ;;  %v8679_v15 = vsub.f32 %v8287_v63, %v8483_v8  ;;  %v8875_v8 = vsub.f32 %v20013_v16, %v20294_v58 }
 0x6ee   : > { %v10925_v17 = vsub.f32 1.5, %v10924_v59 }
 0x6ef   : > { %v14756_v9 = vpop.eup %14755  ;;  %v11624_v40 = vadd.f32 %v20038_v2, %v11424_v4  ;;  %v9071_v21 = vadd.f32 1e-05, %v8679_v15 }
 0x6f0   : > { %v10932_v33 = vmul.f32 %v14756_v9, %v9070_v36  ;;  %v7293_v24 = vpop.xlane.xlu1 %7292  ;;  %v10926_v7 = vmul.f32 %v14754_v18, %v10925_v17  ;;  %v8084_v38 = vpop.xlane.xlu2 %8083  ;;  %vm10938_vm12 = vweird.f32 %v14756_v9 }
 0x6f1   : > { %11820 = vst [vmem:[%s15334_s24 + $0x5b8] sm:$0xff] %v11624_v40  ;;  %v20303_v49 = vmul.f32 %v15231_v41, %v7293_v24  ;;  %14757 = vrsqrt.f32 %v9071_v21  ;;  %v8288_v10 = vmul.f32 %v8084_v38, %v15231_v41  ;;  %vm10939_vm14 = vmor %vm10937_vm13, %vm10938_vm12  ;;  %vm10947_vm1 = vweird.f32 %v9071_v21 }
 0x6f2   : > { %v10933_v44 = vmul.f32 %v14756_v9, %v10932_v33  ;;  %v10930_v1 = vsel %vm10929_vm11, %v14754_v18, %v10926_v7 }
 0x6f3   : > { %v8484_v46 = vmul.f32 %v20303_v49, %v20303_v49  ;;  %v11225_v6 = vmul.f32 %v10930_v1, %v8873_v11  ;;  %v8876_v11 = vsub.f32 %v20048_v22, %v20303_v49  ;;  %v20346_v22 = vld [vmem:[%s20451_s6] ss:$0 sm:$0xff] }
 0x6f4   : > { %v10934_v55 = vmul.f32 0.5, %v10933_v44 }
 0x6f5   : > { %v8680_v61 = vsub.f32 %v8288_v10, %v8484_v46  ;;  %v11425_v0 = vmul.f32 %v20029_v35, %v11225_v6 }
 0x6f6   : > { %v10935_v23 = vsub.f32 1.5, %v10934_v55 }
 0x6f7   : > { %v9072_v57 = vadd.f32 1e-05, %v8680_v61  ;;  %v14758_v60 = vpop.eup %14757  ;;  %v11625_v19 = vadd.f32 %v20038_v2, %v11425_v0 }
 0x6f8   : > { %v10936_v25 = vmul.f32 %v14756_v9, %v10935_v23  ;;  %v8086_v27 = vpop.xlane.xlu0 %8085  ;;  %v10942_v14 = vmul.f32 %v14758_v60, %v9071_v21  ;;  %v7295_v28 = vpop.xlane.xlu2 %7294  ;;  %vm10948_vm15 = vweird.f32 %v14758_v60 }
 0x6f9   : > { %14759 = vrsqrt.f32 %v9072_v57  ;;  %11821 = vst [vmem:[%s15334_s24 + $0x5c0] sm:$0xff] %v11625_v19  ;;  %v20316_v53 = vmul.f32 %v15231_v41, %v7295_v28  ;;  %v8289_v36 = vmul.f32 %v8086_v27, %v15231_v41  ;;  %vm10949_vm0 = vmor %vm10947_vm1, %vm10948_vm15  ;;  %vm10957_vm3 = vweird.f32 %v9072_v57 }
 0x6fa   : > { %v10940_v26 = vsel %vm10939_vm14, %v14756_v9, %v10936_v25  ;;  %v10943_v62 = vmul.f32 %v14758_v60, %v10942_v14 }
 0x6fb   : > { %v11226_v5 = vmul.f32 %v10940_v26, %v8874_v37  ;;  %v8485_v29 = vmul.f32 %v20316_v53, %v20316_v53 }
 0x6fc   : > { %v10944_v32 = vmul.f32 0.5, %v10943_v62 }
 0x6fd   : > { %v11426_v18 = vmul.f32 %v20029_v35, %v11226_v5  ;;  %v8681_v45 = vsub.f32 %v8289_v36, %v8485_v29  ;;  %v8877_v5 = vsub.f32 %v20067_v42, %v20316_v53 }
 0x6fe   : > { %v10945_v56 = vsub.f32 1.5, %v10944_v32 }
 0x6ff   : > { %v14760_v31 = vpop.eup %14759  ;;  %v11626_v3 = vadd.f32 %v20038_v2, %v11426_v18  ;;  %v9073_v13 = vadd.f32 1e-05, %v8681_v45 }
 0x700   : > { %v10952_v54 = vmul.f32 %v14760_v31, %v9072_v57  ;;  %v7297_v43 = vpop.xlane.xlu0 %7296  ;;  %v10946_v39 = vmul.f32 %v14758_v60, %v10945_v56  ;;  %v8088_v30 = vpop.xlane.xlu1 %8087  ;;  %vm10958_vm2 = vweird.f32 %v14760_v31  ;;  %v20352_v57 = vld [vmem:[%s20452_s7] ss:$0 sm:$0xff] }
 0x701   : > { %11822 = vst [vmem:[%s15334_s24 + $0x5c8] sm:$0xff] %v11626_v3  ;;  %v20325_v34 = vmul.f32 %v15231_v41, %v7297_v43  ;;  %14761 = vrsqrt.f32 %v9073_v13  ;;  %v8290_v15 = vmul.f32 %v8088_v30, %v15231_v41  ;;  %vm10959_vm4 = vmor %vm10957_vm3, %vm10958_vm2  ;;  %vm10967_vm6 = vweird.f32 %v9073_v13 }
 0x702   : > { %v10953_v63 = vmul.f32 %v14760_v31, %v10952_v54  ;;  %v10950_v4 = vsel %vm10949_vm0, %v14758_v60, %v10946_v39 }
 0x703   : > { %v8486_v59 = vmul.f32 %v20325_v34, %v20325_v34  ;;  %v11227_v9 = vmul.f32 %v10950_v4, %v8875_v8  ;;  %v8878_v43 = vsub.f32 %v20092_v47, %v20325_v34 }
 0x704   : > { %v10954_v40 = vmul.f32 0.5, %v10953_v63 }
 0x705   : > { %v8682_v17 = vsub.f32 %v8290_v15, %v8486_v59  ;;  %v11427_v33 = vmul.f32 %v20029_v35, %v11227_v9 }
 0x706   : > { %v10955_v21 = vsub.f32 1.5, %v10954_v40 }
 0x707   : > { %v9074_v24 = vadd.f32 1e-05, %v8682_v17  ;;  %v14762_v7 = vpop.eup %14761  ;;  %v11627_v16 = vadd.f32 %v20038_v2, %v11427_v33 }
 0x708   : > { %v10956_v58 = vmul.f32 %v14760_v31, %v10955_v21  ;;  %v8090_v38 = vpop.xlane.xlu2 %8089  ;;  %v10962_v44 = vmul.f32 %v14762_v7, %v9073_v13  ;;  %v7299_v1 = vpop.xlane.xlu1 %7298  ;;  %vm10968_vm5 = vweird.f32 %v14762_v7 }
 0x709   : > { %14763 = vrsqrt.f32 %v9074_v24  ;;  %11823 = vst [vmem:[%s15334_s24 + $0x5d0] sm:$0xff] %v11627_v16  ;;  %v20338_v35 = vmul.f32 %v15231_v41, %v7299_v1  ;;  %v8291_v2 = vmul.f32 %v8090_v38, %v15231_v41  ;;  %vm10969_vm7 = vmor %vm10967_vm6, %vm10968_vm5  ;;  %vm10977_vm9 = vweird.f32 %v9074_v24 }
 0x70a   : > { %v10960_v10 = vsel %vm10959_vm4, %v14760_v31, %v10956_v58  ;;  %v10963_v6 = vmul.f32 %v14762_v7, %v10962_v44 }
 0x70b   : > { %v11228_v46 = vmul.f32 %v10960_v10, %v8876_v11  ;;  %v8487_v55 = vmul.f32 %v20338_v35, %v20338_v35  ;;  %v8879_v38 = vsub.f32 %v20111_v12, %v20338_v35 }
 0x70c   : > { %v10964_v61 = vmul.f32 0.5, %v10963_v6 }
 0x70d   : > { %v11428_v49 = vmul.f32 %v20346_v22, %v11228_v46  ;;  %v8683_v0 = vsub.f32 %v8291_v2, %v8487_v55 }
 0x70e   : > { %v10965_v19 = vsub.f32 1.5, %v10964_v61 }
 0x70f   : > { %v14764_v23 = vpop.eup %14763  ;;  %v11628_v60 = vadd.f32 %v20352_v57, %v11428_v49  ;;  %v9075_v27 = vadd.f32 1e-05, %v8683_v0 }
 0x710   : > { %v10972_v25 = vmul.f32 %v14764_v23, %v9074_v24  ;;  %v7301_v37 = vpop.xlane.xlu2 %7300  ;;  %v10966_v14 = vmul.f32 %v14762_v7, %v10965_v19  ;;  %v8092_v26 = vpop.xlane.xlu0 %8091  ;;  %vm10978_vm8 = vweird.f32 %v14764_v23 }
 0x711   : > { %11824 = vst [vmem:[%s15334_s24 + $0x5d8] sm:$0xff] %v11628_v60  ;;  %v20357_v28 = vmul.f32 %v15231_v41, %v7301_v37  ;;  %14765 = vrsqrt.f32 %v9075_v27  ;;  %v8292_v18 = vmul.f32 %v8092_v26, %v15231_v41  ;;  %vm10979_vm10 = vmor %vm10977_vm9, %vm10978_vm8  ;;  %vm10987_vm12 = vweird.f32 %v9075_v27 }
 0x712   : > { %v10973_v62 = vmul.f32 %v14764_v23, %v10972_v25  ;;  %v10970_v29 = vsel %vm10969_vm7, %v14762_v7, %v10966_v14 }
 0x713   : > { %v8488_v36 = vmul.f32 %v20357_v28, %v20357_v28  ;;  %v11229_v32 = vmul.f32 %v10970_v29, %v8877_v5  ;;  %v8880_v12 = vsub.f32 %v20136_v20, %v20357_v28 }
 0x714   : > { %v10974_v45 = vmul.f32 0.5, %v10973_v62 }
 0x715   : > { %v8684_v31 = vsub.f32 %v8292_v18, %v8488_v36  ;;  %v11429_v3 = vmul.f32 %v20346_v22, %v11229_v32 }
 0x716   : > { %v10975_v56 = vsub.f32 1.5, %v10974_v45 }
 0x717   : > { %v9076_v54 = vadd.f32 1e-05, %v8684_v31  ;;  %v14766_v13 = vpop.eup %14765  ;;  %v11629_v42 = vadd.f32 %v20352_v57, %v11429_v3 }
 0x718   : > { %v10976_v53 = vmul.f32 %v14764_v23, %v10975_v56  ;;  %v10982_v39 = vmul.f32 %v14766_v13, %v9075_v27  ;;  %v7303_v30 = vpop.xlane.xlu0 %7302  ;;  %v8094_v8 = vpop.xlane.xlu1 %8093  ;;  %vm10988_vm11 = vweird.f32 %v14766_v13 }
 0x719   : > { %14767 = vrsqrt.f32 %v9076_v54  ;;  %11825 = vst [vmem:[%s15334_s24 + $0x5e0] sm:$0xff] %v11629_v42  ;;  %v20370_v4 = vmul.f32 %v15231_v41, %v7303_v30  ;;  %v8293_v40 = vmul.f32 %v8094_v8, %v15231_v41  ;;  %vm10989_vm13 = vmor %vm10987_vm12, %vm10988_vm11  ;;  %vm10997_vm15 = vweird.f32 %v9076_v54 }
 0x71a   : > { %v10980_v63 = vsel %vm10979_vm10, %v14764_v23, %v10976_v53  ;;  %v10983_v15 = vmul.f32 %v14766_v13, %v10982_v39 }
 0x71b   : > { %v11230_v59 = vmul.f32 %v10980_v63, %v8878_v43  ;;  %v8489_v9 = vmul.f32 %v20370_v4, %v20370_v4  ;;  %v8881_v45 = vsub.f32 %v20155_v52, %v20370_v4 }
 0x71c   : > { %v10984_v34 = vmul.f32 0.5, %v10983_v15 }
 0x71d   : > { %v11430_v47 = vmul.f32 %v20346_v22, %v11230_v59  ;;  %v8685_v17 = vsub.f32 %v8293_v40, %v8489_v9 }
 0x71e   : > { %v10985_v24 = vsub.f32 1.5, %v10984_v34 }
 0x71f   : > { %v14768_v33 = vpop.eup %14767  ;;  %v11630_v21 = vadd.f32 %v20352_v57, %v11430_v47  ;;  %v9077_v16 = vadd.f32 1e-05, %v8685_v17 }
 0x720   : > { %v10992_v7 = vmul.f32 %v14768_v33, %v9076_v54  ;;  %v10986_v58 = vmul.f32 %v14766_v13, %v10985_v24  ;;  %vm10998_vm14 = vweird.f32 %v14768_v33  ;;  %v7305_v55 = vpop.xlane.xlu1 %7304 }
 0x721   : > { %11826 = vst [vmem:[%s15334_s24 + $0x5e8] sm:$0xff] %v11630_v21  ;;  %14769 = vrsqrt.f32 %v9077_v16  ;;  %vm10999_vm1 = vmor %vm10997_vm15, %vm10998_vm14  ;;  %v7510_v60 = vmul.f32 %v15231_v41, %v7305_v55  ;;  %vm11007_vm2 = vweird.f32 %v9077_v16 }
 0x722   : > { %v10993_v11 = vmul.f32 %v14768_v33, %v10992_v7  ;;  %v10990_v44 = vsel %vm10989_vm13, %v14766_v13, %v10986_v58 }
 0x723   : > { %v11231_v1 = vmul.f32 %v10990_v44, %v8879_v38  ;;  %v8490_v14 = vmul.f32 %v7510_v60, %v7510_v60 }
 0x724   : > { %v10994_v10 = vmul.f32 0.5, %v10993_v11 }
 0x725   : > { %v11431_v46 = vmul.f32 %v20346_v22, %v11231_v1 }
 0x726   : > { %v10995_v6 = vsub.f32 1.5, %v10994_v10  ;;  %v7307_v2 = vpop.xlane.xlu2 %7306 }
 0x727   : > { %v14770_v49 = vpop.eup %14769  ;;  %v11631_v61 = vadd.f32 %v20352_v57, %v11431_v46  ;;  %v7511_v42 = vmul.f32 %v15231_v41, %v7307_v2 }
 0x728   : > { %v10996_v0 = vmul.f32 %v14768_v33, %v10995_v6  ;;  %v11002_v35 = vmul.f32 %v14770_v49, %v9077_v16  ;;  %vm11008_vm0 = vweird.f32 %v14770_v49 }
 0x729   : > { %11827 = vst [vmem:[%s15334_s24 + $0x5f0] sm:$0xff] %v11631_v61  ;;  %vm11009_vm3 = vmor %vm11007_vm2, %vm11008_vm0  ;;  %v8491_v63 = vmul.f32 %v7511_v42, %v7511_v42 }
 0x72a   : > { %v11000_v23 = vsel %vm10999_vm1, %v14768_v33, %v10996_v0  ;;  %v11003_v25 = vmul.f32 %v14770_v49, %v11002_v35 }
 0x72b   : > { %v11232_v19 = vmul.f32 %v11000_v23, %v8880_v12 }
 0x72c   : > { %v11004_v37 = vmul.f32 0.5, %v11003_v25 }
 0x72d   : > { %v11432_v27 = vmul.f32 %v20346_v22, %v11232_v19 }
 0x72e   : > { %v8096_v26 = vpop.xlane.xlu2 %8095  ;;  %v11005_v62 = vsub.f32 1.5, %v11004_v37  ;;  %v7309_v28 = vpop.xlane.xlu0 %7308 }
 0x72f   : > { %v11632_v5 = vadd.f32 %v20352_v57, %v11432_v27  ;;  %v8294_v20 = vmul.f32 %v8096_v26, %v15231_v41  ;;  %v7512_v29 = vmul.f32 %v15231_v41, %v7309_v28 }
 0x730   : > { %v11006_v36 = vmul.f32 %v14770_v49, %v11005_v62  ;;  %v8100_v32 = vpop.xlane.xlu1 %8099 }
 0x731   : > { %11828 = vst [vmem:[%s15334_s24 + $0x5f8] sm:$0xff] %v11632_v5  ;;  %v8686_v18 = vsub.f32 %v8294_v20, %v8490_v14  ;;  %v8492_v31 = vmul.f32 %v7512_v29, %v7512_v29  ;;  %v8296_v3 = vmul.f32 %v8100_v32, %v15231_v41  ;;  %v8884_v46 = vsub.f32 %v20219_v50, %v7512_v29 }
 0x732   : > { %v11010_v56 = vsel %vm11009_vm3, %v14770_v49, %v11006_v36  ;;  %v8883_v50 = vsub.f32 %v20198_v48, %v7511_v42 }
 0x733   : > { %v9078_v54 = vadd.f32 1e-05, %v8686_v18  ;;  %v11233_v13 = vmul.f32 %v11010_v56, %v8881_v45  ;;  %v8688_v53 = vsub.f32 %v8296_v3, %v8492_v31 }
 0x735   : > { %14771 = vrsqrt.f32 %v9078_v54  ;;  %v11433_v43 = vmul.f32 %v20346_v22, %v11233_v13  ;;  %v9080_v39 = vadd.f32 1e-05, %v8688_v53  ;;  %vm11017_vm5 = vweird.f32 %v9078_v54 }
 0x736   : > { %v8098_v30 = vpop.xlane.xlu0 %8097 }
 0x737   : > { %v11633_v8 = vadd.f32 %v20352_v57, %v11433_v43  ;;  %14773 = vrsqrt.f32 %v9080_v39  ;;  %v8295_v52 = vmul.f32 %v8098_v30, %v15231_v41  ;;  %v8882_v41 = vsub.f32 %v20185_v51, %v7510_v60 }
 0x738   : > { %vm11037_vm8 = vweird.f32 %v9080_v39 }
 0x739   : > { %11829 = vst [vmem:[%s15334_s24 + $0x600] sm:$0xff] %v11633_v8  ;;  %v8687_v4 = vsub.f32 %v8295_v52, %v8491_v63 }
 0x73b   : > { %v14772_v59 = vpop.eup %14771  ;;  %v9079_v9 = vadd.f32 1e-05, %v8687_v4 }
 0x73c   : > { %v11012_v15 = vmul.f32 %v14772_v59, %v9078_v54  ;;  %vm11018_vm4 = vweird.f32 %v14772_v59 }
 0x73d   : > { %v14774_v40 = vpop.eup %14773  ;;  %14775 = vrsqrt.f32 %v9079_v9  ;;  %vm11019_vm6 = vmor %vm11017_vm5, %vm11018_vm4  ;;  %vm11027_vm11 = vweird.f32 %v9079_v9 }
 0x73e   : > { %v11013_v47 = vmul.f32 %v14772_v59, %v11012_v15  ;;  %v11032_v34 = vmul.f32 %v14774_v40, %v9080_v39  ;;  %vm11038_vm7 = vweird.f32 %v14774_v40 }
 0x73f   : > { %vm11039_vm9 = vmor %vm11037_vm8, %vm11038_vm7 }
 0x740   : > { %v11014_v17 = vmul.f32 0.5, %v11013_v47  ;;  %v11033_v33 = vmul.f32 %v14774_v40, %v11032_v34 }
 0x742   : > { %v11015_v21 = vsub.f32 1.5, %v11014_v17  ;;  %v11034_v24 = vmul.f32 0.5, %v11033_v33 }
 0x743   : > { %v14776_v7 = vpop.eup %14775 }
 0x744   : > { %v11016_v16 = vmul.f32 %v14772_v59, %v11015_v21  ;;  %v11035_v58 = vsub.f32 1.5, %v11034_v24  ;;  %v11022_v38 = vmul.f32 %v14776_v7, %v9079_v9  ;;  %vm11028_vm10 = vweird.f32 %v14776_v7 }
 0x745   : > { %vm11029_vm12 = vmor %vm11027_vm11, %vm11028_vm10 }
 0x746   : > { %v11020_v11 = vsel %vm11019_vm6, %v14772_v59, %v11016_v16  ;;  %v11036_v1 = vmul.f32 %v14774_v40, %v11035_v58  ;;  %v11023_v10 = vmul.f32 %v14776_v7, %v11022_v38 }
 0x747   : > { %v11234_v44 = vmul.f32 %v11020_v11, %v8882_v41 }
 0x748   : > { %v11040_v2 = vsel %vm11039_vm9, %v14774_v40, %v11036_v1  ;;  %v11024_v55 = vmul.f32 0.5, %v11023_v10 }
 0x749   : > { %v11434_v6 = vmul.f32 %v20346_v22, %v11234_v44  ;;  %v11236_v51 = vmul.f32 %v11040_v2, %v8884_v46 }
 0x74a   : > { %v11025_v61 = vsub.f32 1.5, %v11024_v55 }
 0x74b   : > { %v11634_v49 = vadd.f32 %v20352_v57, %v11434_v6  ;;  %v11436_v0 = vmul.f32 %v20346_v22, %v11236_v51 }
 0x74c   : > { %v11026_v12 = vmul.f32 %v14776_v7, %v11025_v61 }
 0x74d   : > { %11830 = vst [vmem:[%s15334_s24 + $0x608] sm:$0xff] %v11634_v49  ;;  %v11636_v35 = vadd.f32 %v20352_v57, %v11436_v0 }
 0x74e   : > { %v11030_v23 = vsel %vm11029_vm12, %v14776_v7, %v11026_v12 }
 0x74f   : > { %11832 = vst [vmem:[%s15334_s24 + $0x618] sm:$0xff] %v11636_v35  ;;  %v11235_v60 = vmul.f32 %v11030_v23, %v8883_v50 }
 0x751   : > { %v11435_v19 = vmul.f32 %v20346_v22, %v11235_v60 }
 0x753   : > { %v11635_v25 = vadd.f32 %v20352_v57, %v11435_v19 }
 0x755   : > { %11831 = vst [vmem:[%s15334_s24 + $0x610] sm:$0xff] %v11635_v25 }
 0x756   : > { %14843 = shalt.err (!%p14840_p3)
}
 0x757   : > { %s14881_s12 = smov 128   ;;  %s14882_s24 = smov 8  }
 0x758   : > { %14338 = dma.vmem_to_hbm [thread:$0]  (%p14966_p5), %s11847_s9, 25088, %s11849_s20, %s11834_s21, %s14881_s12, %s14881_s12, %s14882_s24  }
 0x759 PF: > { %p14344_p4 = scmp.ge.s32.totalorder %s14878_s30, 2  ;;  %s11863_s25 = sand.u32 1, %s14866_s27  }
 0x75a   : > { %s11864_s18 = scalar_lea.sflag [#allocation3], %s11863_s25 }
 0x75b   : > { %p14341_p7 = pnand %p14344_p4, %p14970_p6 }
 0x75d   : > { %p14342_p8 = pneg %p14341_p7 }
 0x75f   : > { %14861 = dma.done.wait (%p14342_p8), %s11864_s18, 25088  }
 0x760   : > { %14863 = vsyncadd (%p14342_p8), %s11864_s18, 4294942208  ;;  %p18_p9 = scmp.ge.s32.totalorder %s14953_s11, 6   ;;  %s20456_s27 = smov %s14870_s28 }
 0x761   : > { %s20457_s28 = smov %s14874_s29  ;;  %s20458_s29 = smov %s14964_s14 }
 0x762   : > { %s20459_s30 = smov %s14953_s11  ;;  %20 = sbr.rel (!%p18_p9) target bundleno = 3 (0x3), region = 99 }
 0x767   :  { %11870 = vsyncpa [#allocation3], 1 }
 0x768   :  { %11872 = vsyncpa [#allocation3 + $0x1], 1 }

</bundles_post_ra>
